<compile_context>
chip_gen: v7x
topology: tpu7x:2x2x1
jax: 0.10.0
libtpu: 0.0.40
codegen_flags: <defaults>
</compile_context>

<pallas_src>
import functools
import math

import jax
import jax.numpy as jnp
from jax.experimental import pallas as pl
from jax.experimental.pallas import tpu as pltpu


# --------------------------------------------------------------------------
# helpers
# --------------------------------------------------------------------------

VMEM_LIMIT = 56 * 1024 * 1024     # portable budget (v7x has 64 MiB physical VMEM)
MAX_TILE = 1024                   # N / F tile width (multiple of 128)
FFN_SPLIT = 2                     # leading parallel F-split axis in the FFN


def _round_up(n, m):
    return ((n + m - 1) // m) * m


def _pick_tile(n, max_tile=MAX_TILE):
    """Largest multiple of 128 that divides n and is <= max_tile, else full n."""
    best = None
    t = 128
    while t <= min(n, max_tile):
        if n % t == 0:
            best = t
        t += 128
    return best if best is not None else n


def _pick_hp(H, dk, max_hp=8):
    """Heads per attention grid step: largest divisor of H <= max_hp whose
    lane width hp*dk is a multiple of 128."""
    for hp in range(min(H, max_hp), 0, -1):
        if H % hp == 0 and (hp * dk) % 128 == 0:
            return hp
    return H


def _mosaic(dims):
    return pltpu.CompilerParams(dimension_semantics=dims,
                                vmem_limit_bytes=VMEM_LIMIT)


# --------------------------------------------------------------------------
# kernel 1: fused (RMS|Layer)Norm + matmul (+ optional output bias)
#   x comes in as [P, M, D] partial slabs (summed in-kernel); normalized bf16
#   activations are cached in VMEM scratch at j == 0 and reused for every
#   N-tile of the weight.
# --------------------------------------------------------------------------

def _norm_matmul_kernel(*refs, rms, eps, has_beta, has_bias):
    x_ref, g_ref = refs[0], refs[1]
    i = 2
    beta_ref = refs[i] if has_beta else None
    i += int(has_beta)
    w_ref = refs[i]
    i += 1
    b_ref = refs[i] if has_bias else None
    i += int(has_bias)
    o_ref = refs[i]
    h_ref = refs[i + 1]

    @pl.when(pl.program_id(0) == 0)
    def _():
        x = jnp.sum(x_ref[...], axis=0)                  # combine residual slabs
        if not rms:                                      # LayerNorm: subtract mean
            x = x - jnp.mean(x, axis=-1, keepdims=True)
        var = jnp.mean(x * x, axis=-1, keepdims=True)
        h = x * jax.lax.rsqrt(var + eps) * g_ref[...]
        if has_beta:
            h = h + beta_ref[...]
        h_ref[...] = h.astype(jnp.bfloat16)

    acc = jnp.dot(h_ref[...], w_ref[...], preferred_element_type=jnp.float32)
    if has_bias:
        acc = acc + b_ref[...]
    o_ref[...] = acc.astype(o_ref.dtype)


def pallas_norm_matmul(xs, g, w, *, beta=None, bias=None, rms, eps):
    P, M, D = xs.shape
    N = w.shape[1]
    tn = _pick_tile(N)
    has_beta = beta is not None
    has_bias = bias is not None
    kernel = functools.partial(_norm_matmul_kernel, rms=rms, eps=eps,
                               has_beta=has_beta, has_bias=has_bias)
    in_specs = [pl.BlockSpec((P, M, D), lambda j: (0, 0, 0)),
                pl.BlockSpec((1, D), lambda j: (0, 0))]
    args = [xs, g.reshape(1, D)]
    if has_beta:
        in_specs.append(pl.BlockSpec((1, D), lambda j: (0, 0)))
        args.append(beta.reshape(1, D))
    in_specs.append(pl.BlockSpec((D, tn), lambda j: (0, j)))
    args.append(w)
    if has_bias:
        in_specs.append(pl.BlockSpec((1, tn), lambda j: (0, j)))
        args.append(bias.reshape(1, N))
    return pl.pallas_call(
        kernel,
        out_shape=jax.ShapeDtypeStruct((M, N), jnp.bfloat16),
        grid=(N // tn,),
        in_specs=in_specs,
        out_specs=pl.BlockSpec((M, tn), lambda j: (0, j)),
        scratch_shapes=[pltpu.VMEM((M, D), jnp.bfloat16)],
        # scratch carries across N-tiles -> must stay sequential
        compiler_params=_mosaic(("arbitrary",)),
    )(*args)


# --------------------------------------------------------------------------
# kernel 2: attention, up to 8 heads (hp*dk lanes) per grid step
#   q/k/v are three BlockSpec views over the SAME [B, S, 3*H*dk] array.
#   bf16 QK^T / PV with f32 accumulation. CLIP causal mask is built in-kernel;
#   T5 gets rel-bias [H,S,S] (per head-group) + additive pad mask [B,1,S].
# --------------------------------------------------------------------------

def _attn_kernel(*refs, hp, dk, scale, causal, has_bias, has_mask):
    q_ref, k_ref, v_ref = refs[0], refs[1], refs[2]
    i = 3
    bias_ref = refs[i] if has_bias else None
    i += int(has_bias)
    mask_ref = refs[i] if has_mask else None
    i += int(has_mask)
    o_ref = refs[i]

    S = q_ref.shape[1]
    if causal:
        row = jax.lax.broadcasted_iota(jnp.int32, (S, S), 0)
        col = jax.lax.broadcasted_iota(jnp.int32, (S, S), 1)
        causal_bias = jnp.where(col > row, jnp.float32(-1e9), jnp.float32(0.0))
    if has_mask:
        mask_b = mask_ref[0]                               # (1, S) additive

    outs = []
    for h in range(hp):
        lo, hi = h * dk, (h + 1) * dk
        q = q_ref[0, :, lo:hi]                             # (S, dk) bf16
        k = k_ref[0, :, lo:hi]                             # (S, dk) bf16
        v = v_ref[0, :, lo:hi]                             # (S, dk) bf16
        # bf16 operands straight into the MXU, f32 accumulation, no k.T relayout
        s = jax.lax.dot_general(q, k, (((1,), (1,)), ((), ())),
                                preferred_element_type=jnp.float32)
        if scale != 1.0:                                   # T5: no scaling
            s = s * scale
        if has_bias:
            s = s + bias_ref[h]
        if causal:
            s = s + causal_bias
        if has_mask:
            s = s + mask_b
        m = jnp.max(s, axis=-1, keepdims=True)
        p = jnp.exp(s - m)
        denom = jnp.sum(p, axis=-1, keepdims=True)
        o = jnp.dot(p.astype(v.dtype), v, preferred_element_type=jnp.float32)
        outs.append(o * pl.reciprocal(denom, approx=True))  # divide on the EUP
    # single lane-dense (S, hp*dk) store
    o_ref[0] = jnp.concatenate(outs, axis=-1).astype(o_ref.dtype)


def pallas_attention(qkv, H, dk, *, scale=1.0, causal=False,
                     rel_bias=None, mask_bias=None):
    """qkv: [B, S, 3*H*dk] bf16 (Q|K|V concatenated, head-major)."""
    B, S, _ = qkv.shape
    hp = _pick_hp(H, dk)
    n_hp = H // hp
    has_bias = rel_bias is not None
    has_mask = mask_bias is not None
    kernel = functools.partial(_attn_kernel, hp=hp, dk=dk, scale=scale,
                               causal=causal, has_bias=has_bias, has_mask=has_mask)
    in_specs = [pl.BlockSpec((1, S, hp * dk), lambda b, j: (b, 0, j)),              # Q
                pl.BlockSpec((1, S, hp * dk), lambda b, j: (b, 0, n_hp + j)),       # K
                pl.BlockSpec((1, S, hp * dk), lambda b, j: (b, 0, 2 * n_hp + j))]   # V
    args = [qkv, qkv, qkv]
    if has_bias:
        in_specs.append(pl.BlockSpec((hp, S, S), lambda b, j: (j, 0, 0)))
        args.append(rel_bias)
    if has_mask:
        in_specs.append(pl.BlockSpec((1, 1, S), lambda b, j: (b, 0, 0)))
        args.append(mask_bias)
    return pl.pallas_call(
        kernel,
        out_shape=jax.ShapeDtypeStruct((B, S, H * dk), jnp.bfloat16),
        grid=(B, n_hp),
        in_specs=in_specs,
        out_specs=pl.BlockSpec((1, S, hp * dk), lambda b, j: (b, 0, j)),
        compiler_params=_mosaic(("parallel", "parallel")),
    )(*args)


# --------------------------------------------------------------------------
# kernel 3: output projection (+ optional bias) + residual, grid over N tiles
#   residual comes in as [P, M, D] partial slabs and is summed in-kernel.
# --------------------------------------------------------------------------

def _proj_residual_kernel(*refs, has_bias):
    a_ref, w_ref = refs[0], refs[1]
    i = 2
    b_ref = refs[i] if has_bias else None
    i += int(has_bias)
    r_ref = refs[i]
    o_ref = refs[i + 1]
    acc = jnp.dot(a_ref[...], w_ref[...], preferred_element_type=jnp.float32)
    acc = acc + jnp.sum(r_ref[...], axis=0)
    if has_bias:
        acc = acc + b_ref[...]
    o_ref[...] = acc


def pallas_proj_residual(a2d, w, resid, *, bias=None):
    M, K = a2d.shape
    N = w.shape[1]
    P = resid.shape[0]
    tn = _pick_tile(N)
    has_bias = bias is not None
    kernel = functools.partial(_proj_residual_kernel, has_bias=has_bias)
    in_specs = [pl.BlockSpec((M, K), lambda j: (0, 0)),
                pl.BlockSpec((K, tn), lambda j: (0, j))]
    args = [a2d, w]
    if has_bias:
        in_specs.append(pl.BlockSpec((1, tn), lambda j: (0, j)))
        args.append(bias.reshape(1, N))
    in_specs.append(pl.BlockSpec((P, M, tn), lambda j: (0, 0, j)))
    args.append(resid)
    return pl.pallas_call(
        kernel,
        out_shape=jax.ShapeDtypeStruct((M, N), jnp.float32),
        grid=(N // tn,),
        in_specs=in_specs,
        out_specs=pl.BlockSpec((M, tn), lambda j: (0, j)),
        compiler_params=_mosaic(("parallel",)),
    )(*args)


# --------------------------------------------------------------------------
# kernel 4a: T5 gated-GELU FFN, grid = (F-split [parallel], F-tiles [arbitrary])
#   each F-split slab p accumulates a partial sum in its own output slab;
#   slab 0 carries the residual. Consumers sum the slabs.
# --------------------------------------------------------------------------

def _t5_ffn_kernel(x_ref, g_ref, wi0_ref, wi1_ref, wo_ref, o_ref, h_ref, *, eps):
    p = pl.program_id(0)

    @pl.when(pl.program_id(1) == 0)
    def _init():
        x = x_ref[...]
        var = jnp.mean(x * x, axis=-1, keepdims=True)
        h_ref[...] = (x * jax.lax.rsqrt(var + eps) * g_ref[...]).astype(jnp.bfloat16)
        o_ref[0] = x * (p == 0).astype(x.dtype)          # residual only in slab 0

    h = h_ref[...]
    a = jnp.dot(h, wi0_ref[...], preferred_element_type=jnp.float32)
    b = jnp.dot(h, wi1_ref[...], preferred_element_type=jnp.float32)
    gated = (jax.nn.gelu(a, approximate=True) * b).astype(jnp.bfloat16)   # gelu_new
    o_ref[0] += jnp.dot(gated, wo_ref[...], preferred_element_type=jnp.float32)


def _ffn_grid(F):
    nsplit = FFN_SPLIT if (F % FFN_SPLIT == 0 and (F // FFN_SPLIT) % 128 == 0) else 1
    per_split = F // nsplit
    tf = _pick_tile(per_split)
    return nsplit, tf, per_split // tf


def pallas_t5_ffn(x2d, g, wi0, wi1, wo, *, eps=1e-6):
    M, D = x2d.shape
    F = wi0.shape[1]
    nsplit, tf, nf = _ffn_grid(F)
    col_map = lambda p_, f_: (0, p_ * nf + f_)
    row_map = lambda p_, f_: (p_ * nf + f_, 0)
    kernel = functools.partial(_t5_ffn_kernel, eps=eps)
    return pl.pallas_call(
        kernel,
        out_shape=jax.ShapeDtypeStruct((nsplit, M, D), jnp.float32),
        grid=(nsplit, nf),
        in_specs=[pl.BlockSpec((M, D), lambda p_, f_: (0, 0)),
                  pl.BlockSpec((1, D), lambda p_, f_: (0, 0)),
                  pl.BlockSpec((D, tf), col_map),
                  pl.BlockSpec((D, tf), col_map),
                  pl.BlockSpec((tf, D), row_map)],
        out_specs=pl.BlockSpec((1, M, D), lambda p_, f_: (p_, 0, 0)),
        scratch_shapes=[pltpu.VMEM((M, D), jnp.bfloat16)],
        compiler_params=_mosaic(("parallel", "arbitrary")),
    )(x2d, g.reshape(1, D), wi0, wi1, wo)


# --------------------------------------------------------------------------
# kernel 4b: CLIP MLP (quick-GELU), same F-split structure as the T5 FFN
# --------------------------------------------------------------------------

def _clip_ffn_kernel(x_ref, g_ref, bta_ref, w1_ref, b1_ref, w2_ref, b2_ref,
                     o_ref, h_ref, *, eps):
    p = pl.program_id(0)

    @pl.when(pl.program_id(1) == 0)
    def _init():
        x = x_ref[...]
        xc = x - jnp.mean(x, axis=-1, keepdims=True)
        var = jnp.mean(xc * xc, axis=-1, keepdims=True)
        h_ref[...] = (xc * jax.lax.rsqrt(var + eps) * g_ref[...]
                      + bta_ref[...]).astype(jnp.bfloat16)
        # residual + fc2 bias only in slab 0
        o_ref[0] = (x + b2_ref[...]) * (p == 0).astype(x.dtype)

    h = h_ref[...]
    a = jnp.dot(h, w1_ref[...], preferred_element_type=jnp.float32) + b1_ref[...]
    act = (a * jax.nn.sigmoid(1.702 * a)).astype(jnp.bfloat16)   # quick_gelu
    o_ref[0] += jnp.dot(act, w2_ref[...], preferred_element_type=jnp.float32)


def pallas_clip_ffn(x2d, g, beta, w1, b1, w2, b2, *, eps=1e-5):
    M, D = x2d.shape
    F = w1.shape[1]
    nsplit, tf, nf = _ffn_grid(F)
    col_map = lambda p_, f_: (0, p_ * nf + f_)
    row_map = lambda p_, f_: (p_ * nf + f_, 0)
    kernel = functools.partial(_clip_ffn_kernel, eps=eps)
    return pl.pallas_call(
        kernel,
        out_shape=jax.ShapeDtypeStruct((nsplit, M, D), jnp.float32),
        grid=(nsplit, nf),
        in_specs=[pl.BlockSpec((M, D), lambda p_, f_: (0, 0)),
                  pl.BlockSpec((1, D), lambda p_, f_: (0, 0)),
                  pl.BlockSpec((1, D), lambda p_, f_: (0, 0)),
                  pl.BlockSpec((D, tf), col_map),
                  pl.BlockSpec((1, tf), col_map),
                  pl.BlockSpec((tf, D), row_map),
                  pl.BlockSpec((1, D), lambda p_, f_: (0, 0))],
        out_specs=pl.BlockSpec((1, M, D), lambda p_, f_: (p_, 0, 0)),
        scratch_shapes=[pltpu.VMEM((M, D), jnp.bfloat16)],
        compiler_params=_mosaic(("parallel", "arbitrary")),
    )(x2d, g.reshape(1, D), beta.reshape(1, D), w1, b1.reshape(1, F),
      w2, b2.reshape(1, D))


# --------------------------------------------------------------------------
# kernel 5: final (RMS|Layer)Norm over summed slabs
# --------------------------------------------------------------------------

def _norm_kernel(x_ref, g_ref, b_ref, o_ref, *, rms, eps):
    x = jnp.sum(x_ref[...], axis=0)
    if not rms:
        x = x - jnp.mean(x, axis=-1, keepdims=True)
    var = jnp.mean(x * x, axis=-1, keepdims=True)
    o_ref[...] = x * jax.lax.rsqrt(var + eps) * g_ref[...] + b_ref[...]


def pallas_norm(xs, g, b, *, rms, eps):
    P, M, D = xs.shape
    kernel = functools.partial(_norm_kernel, rms=rms, eps=eps)
    return pl.pallas_call(
        kernel,
        out_shape=jax.ShapeDtypeStruct((M, D), jnp.float32),
        grid=(1,),
        in_specs=[pl.BlockSpec((P, M, D), lambda i: (0, 0, 0)),
                  pl.BlockSpec((1, D), lambda i: (0, 0)),
                  pl.BlockSpec((1, D), lambda i: (0, 0))],
        out_specs=pl.BlockSpec((M, D), lambda i: (0, 0)),
        compiler_params=_mosaic(None),
    )(xs, g.reshape(1, D), b.reshape(1, D))


# --------------------------------------------------------------------------
# glue: T5 relative-position bias / padding mask (tiny, computed once per call)
# --------------------------------------------------------------------------

def _relative_position_bucket(relative_position, num_buckets=32, max_distance=128):
    num_buckets = num_buckets // 2                      # bidirectional (encoder)
    relative_buckets = (relative_position > 0).astype(jnp.int32) * num_buckets
    n = jnp.abs(relative_position)
    max_exact = num_buckets // 2
    is_small = n < max_exact
    val_if_large = max_exact + (
        jnp.log(jnp.maximum(n, 1).astype(jnp.float32) / max_exact)
        / math.log(max_distance / max_exact) * (num_buckets - max_exact)
    ).astype(jnp.int32)
    val_if_large = jnp.minimum(val_if_large, num_buckets - 1)
    return relative_buckets + jnp.where(is_small, n, val_if_large)


def t5_rel_bias(rel_emb, S):
    """rel_emb [num_buckets, H] -> [H, S, S] f32 (no batch/head duplication)."""
    ctx = jnp.arange(S)[:, None]
    mem = jnp.arange(S)[None, :]
    buckets = _relative_position_bucket(mem - ctx)            # (S, S)
    return jnp.transpose(rel_emb[buckets], (2, 0, 1)).astype(jnp.float32)


def t5_mask_bias(attn_mask):
    """attn_mask [B, S] (1 real, 0 pad) -> additive [B, 1, S] f32."""
    return ((1.0 - attn_mask.astype(jnp.float32)) * jnp.float32(-1e9))[:, None, :]


# --------------------------------------------------------------------------
# encoders
# --------------------------------------------------------------------------

def t5_encoder(tokens, attn_mask, p, H, dk):
    """T5EncoderModel.last_hidden_state (FrozenT5Embedder path), [B, S, D] f32."""
    B, S0 = tokens.shape
    S = _round_up(S0, 8)                       # keep sublane dims (8,.)-aligned
    if S != S0:
        tokens = jnp.pad(tokens, ((0, 0), (0, S - S0)))
        attn_mask = jnp.pad(attn_mask, ((0, 0), (0, S - S0)))
    D = p["embed"].shape[1]
    inner = H * dk
    M = B * S

    x2 = p["embed"][tokens].astype(jnp.float32).reshape(M, D)   # embedding gather
    rel = t5_rel_bias(p["rel_emb"], S)                          # (H, S, S)
    maskb = t5_mask_bias(attn_mask)                             # (B, 1, S)
    zd = jnp.zeros((D,), jnp.float32)

    xs = x2[None]                                               # (1, M, D)
    for lyr in p["layers"]:
        # self-attn sublayer: RMSNorm + fused QKV -> attn -> out-proj + residual
        qkv = pallas_norm_matmul(xs, lyr["ln1"], lyr["wqkv"], rms=True, eps=1e-6)
        attn = pallas_attention(qkv.reshape(B, S, 3 * inner), H, dk,
                                scale=1.0, rel_bias=rel, mask_bias=maskb)
        x = pallas_proj_residual(attn.reshape(M, inner), lyr["wo"], xs)
        # gated-GELU FFN sublayer (residual fused, F-split + F-tiled)
        xs = pallas_t5_ffn(x, lyr["ln2"], lyr["wi0"], lyr["wi1"], lyr["wo_ff"])

    z = pallas_norm(xs, p["ln_f"], zd, rms=True, eps=1e-6)      # dropout: eval no-op
    return z.reshape(B, S, D)[:, :S0]


def clip_text_encoder(tokens, p, H, dk):
    """CLIPTextModel.last_hidden_state (FrozenCLIPEmbedder, layer='last'), f32."""
    # NOTE: matches FrozenCLIPEmbedder, which passes only input_ids (causal mask,
    # no padding attention mask). 'pooled'/'hidden' layer options not needed here.
    B, S0 = tokens.shape
    S = _round_up(S0, 8)
    if S != S0:
        tokens = jnp.pad(tokens, ((0, 0), (0, S - S0)))
    D = p["token_emb"].shape[1]
    inner = H * dk                     # == D for CLIP
    M = B * S

    npos = p["pos_emb"].shape[0]
    pos = p["pos_emb"][:min(S, npos)]
    if pos.shape[0] < S:               # pad pos table when S was rounded up
        pos = jnp.pad(pos, ((0, S - pos.shape[0]), (0, 0)))
    x = p["token_emb"][tokens] + pos[None]
    xs = x.astype(jnp.float32).reshape(1, M, D)
    scale = 1.0 / math.sqrt(dk)

    for lyr in p["layers"]:
        qkv = pallas_norm_matmul(xs, lyr["ln1_g"], lyr["wqkv"],
                                 beta=lyr["ln1_b"], bias=lyr["bqkv"],
                                 rms=False, eps=1e-5)
        attn = pallas_attention(qkv.reshape(B, S, 3 * inner), H, dk,
                                scale=scale, causal=True)
        x2 = pallas_proj_residual(attn.reshape(M, inner), lyr["wo"], xs,
                                  bias=lyr["bo"])
        xs = pallas_clip_ffn(x2, lyr["ln2_g"], lyr["ln2_b"],
                             lyr["w1"], lyr["b1"], lyr["w2"], lyr["b2"])

    z = pallas_norm(xs, p["ln_f_g"], p["ln_f_b"], rms=False, eps=1e-5)
    return z.reshape(B, S, D)[:, :S0]


def frozen_clip_t5_forward(params, clip_tokens, t5_tokens, t5_mask,
                           clip_hd, t5_hd):
    """FrozenCLIPT5Encoder.forward -> [clip_z, t5_z]."""
    clip_z = clip_text_encoder(clip_tokens, params["clip"], *clip_hd)
    t5_z = t5_encoder(t5_tokens, t5_mask, params["t5"], *t5_hd)
    return [clip_z, t5_z]


forward = jax.jit(frozen_clip_t5_forward, static_argnums=(4, 5))


# --------------------------------------------------------------------------
# parameter init (frozen / eval; random stand-ins for HF checkpoints)
# --------------------------------------------------------------------------

def init_t5_params(key, vocab, D, H, dk, F, L, num_buckets=32):
    inner = H * dk
    ks = jax.random.split(key, 2 + L)

    def w(k, shape, scale=0.02):
        return (scale * jax.random.normal(k, shape, jnp.float32)).astype(jnp.bfloat16)

    p = {
        "embed": jax.random.normal(ks[0], (vocab, D), jnp.float32),
        "rel_emb": 0.5 * jax.random.normal(ks[1], (num_buckets, H), jnp.float32),
        "ln_f": jnp.ones((D,), jnp.float32),
        "layers": [],
    }
    for l in range(L):
        lk = jax.random.split(ks[2 + l], 5)
        p["layers"].append({
            "ln1": jnp.ones((D,), jnp.float32),
            "wqkv": w(lk[0], (D, 3 * inner)),       # concat(Wq|Wk|Wv), head-major
            "wo": w(lk[1], (inner, D)),
            "ln2": jnp.ones((D,), jnp.float32),
            "wi0": w(lk[2], (D, F)),
            "wi1": w(lk[3], (D, F)),
            "wo_ff": w(lk[4], (F, D)),
        })
    return p


def init_clip_params(key, vocab, D, H, dk, F, L, max_pos):
    inner = H * dk
    assert inner == D, "CLIP text model requires D == H * dk"
    ks = jax.random.split(key, 2 + L)

    def w(k, shape, scale=0.02):
        return (scale * jax.random.normal(k, shape, jnp.float32)).astype(jnp.bfloat16)

    def b(k, shape, scale=0.01):
        return scale * jax.random.normal(k, shape, jnp.float32)

    p = {
        "token_emb": 0.02 * jax.random.normal(ks[0], (vocab, D), jnp.float32),
        "pos_emb": 0.01 * jax.random.normal(ks[1], (max_pos, D), jnp.float32),
        "ln_f_g": jnp.ones((D,), jnp.float32),
        "ln_f_b": jnp.zeros((D,), jnp.float32),
        "layers": [],
    }
    for l in range(L):
        lk = jax.random.split(ks[2 + l], 8)
        p["layers"].append({
            "ln1_g": jnp.ones((D,), jnp.float32),
            "ln1_b": jnp.zeros((D,), jnp.float32),
            "wqkv": w(lk[0], (D, 3 * inner)),
            "bqkv": b(lk[1], (3 * inner,)),
            "wo": w(lk[2], (inner, D)),
            "bo": b(lk[3], (D,)),
            "ln2_g": jnp.ones((D,), jnp.float32),
            "ln2_b": jnp.zeros((D,), jnp.float32),
            "w1": w(lk[4], (D, F)),
            "b1": b(lk[5], (F,)),
            "w2": w(lk[6], (F, D)),
            "b2": b(lk[7], (D,)),
        })
    return p


# --------------------------------------------------------------------------
# main
# --------------------------------------------------------------------------

if __name__ == "__main__":
    # Small synthetic configs (real: CLIP-L/14 D=768,H=12,L=12,F=3072;
    # t5-v1_1-xl D=2048,H=32,dk=64,L=24,F=5120; max_length=77). dk=64 keeps
    # per-head slices sublane/lane friendly and hp*dk a multiple of 128.
    B, S = 2, 16
    D, H, dk, F, L = 256, 4, 64, 1024, 2
    vocab = 1000

    key = jax.random.PRNGKey(0)
    kc, kt, k1, k2 = jax.random.split(key, 4)
    params = {
        "clip": init_clip_params(kc, vocab, D, H, dk, F, L, max_pos=S),
        "t5": init_t5_params(kt, vocab, D, H, dk, F, L),
    }

    # Pre-tokenized, max_length-padded token ids (tokenizers out of scope).
    clip_tokens = jax.random.randint(k1, (B, S), 0, vocab, dtype=jnp.int32)
    t5_tokens = jax.random.randint(k2, (B, S), 0, vocab, dtype=jnp.int32)
    # T5 attention mask: second sequence has only 11 real tokens (rest padding).
    lens = jnp.array([S, 11], dtype=jnp.int32)
    t5_mask = (jnp.arange(S)[None, :] < lens[:, None]).astype(jnp.int32)

    clip_z, t5_z = forward(params, clip_tokens, t5_tokens, t5_mask, (H, dk), (H, dk))
    clip_z = jax.block_until_ready(clip_z)
    t5_z = jax.block_until_ready(t5_z)

    assert clip_z.shape == (B, S, D) and clip_z.dtype == jnp.float32
    assert t5_z.shape == (B, S, D) and t5_z.dtype == jnp.float32
    assert bool(jnp.all(jnp.isfinite(clip_z))) and bool(jnp.all(jnp.isfinite(t5_z)))
    print("KERNEL_OK")
</pallas_src>

<mosaic_0001>
module attributes {stable_mosaic.version = 11 : i64} {
  func.func @_norm_matmul_kernel(%arg0: i32, %arg1: memref<1x32x256xf32, #tpu.memory_space<vmem>>, %arg2: memref<1x256xf32, #tpu.memory_space<vmem>>, %arg3: memref<256x768xbf16, #tpu.memory_space<vmem>>, %arg4: memref<32x768xbf16, #tpu.memory_space<vmem>>, %arg5: memref<32x256xbf16, #tpu.memory_space<vmem>>) attributes {dimension_semantics = [#tpu.dimension_semantics<arbitrary>], iteration_bounds = array<i64: 1>, scalar_prefetch = 0 : i64, scratch_operands = 1 : i64, tpu.core_type = #tpu.core_type<tc>, window_params = [{pipeline_mode = #tpu.pipeline_mode<synchronous>, transform_indices = @transform_0, window_bounds = array<i64: 1, 32, 256>}, {pipeline_mode = #tpu.pipeline_mode<synchronous>, transform_indices = @transform_1, window_bounds = array<i64: 1, 256>}, {transform_indices = @transform_2, window_bounds = array<i64: 256, 768>}, {transform_indices = @transform_3, window_bounds = array<i64: 32, 768>}]} {
    %c0_i32 = arith.constant 0 : i32
    %0 = arith.cmpi eq, %arg0, %c0_i32 : i32
    %1 = arith.extui %0 : i1 to i32
    %c0_i32_0 = arith.constant 0 : i32
    %2 = arith.cmpi ne, %1, %c0_i32_0 : i32
    scf.if %2 {
      %c0_6 = arith.constant 0 : index
      %c0_7 = arith.constant 0 : index
      %c0_8 = arith.constant 0 : index
      %8 = vector.load %arg1[%c0_6, %c0_7, %c0_8] : memref<1x32x256xf32, #tpu.memory_space<vmem>>, vector<1x32x256xf32>
      %cst_9 = arith.constant dense<0.000000e+00> : vector<32x256xf32>
      %9 = vector.multi_reduction <add>, %8, %cst_9 [0] : vector<1x32x256xf32> to vector<32x256xf32>
      %10 = arith.mulf %9, %9 : vector<32x256xf32>
      %cst_10 = arith.constant dense<0.000000e+00> : vector<32xf32>
      %11 = vector.multi_reduction <add>, %10, %cst_10 [1] : vector<32x256xf32> to vector<32xf32>
      %12 = vector.shape_cast %11 : vector<32xf32> to vector<32x1xf32>
      %cst_11 = arith.constant 2.560000e+02 : f32
      %13 = vector.broadcast %cst_11 : f32 to vector<32x1xf32>
      %14 = arith.divf %12, %13 : vector<32x1xf32>
      %cst_12 = arith.constant 9.99999997E-7 : f32
      %15 = vector.broadcast %cst_12 : f32 to vector<32x1xf32>
      %16 = arith.addf %14, %15 : vector<32x1xf32>
      %17 = math.rsqrt %16 : vector<32x1xf32>
      %18 = vector.broadcast %17 : vector<32x1xf32> to vector<32x256xf32>
      %19 = arith.mulf %9, %18 : vector<32x256xf32>
      %c0_13 = arith.constant 0 : index
      %c0_14 = arith.constant 0 : index
      %20 = vector.load %arg2[%c0_13, %c0_14] : memref<1x256xf32, #tpu.memory_space<vmem>>, vector<1x256xf32>
      %21 = vector.broadcast %20 : vector<1x256xf32> to vector<32x256xf32>
      %22 = arith.mulf %19, %21 : vector<32x256xf32>
      %23 = arith.truncf %22 : vector<32x256xf32> to vector<32x256xbf16>
      %c0_15 = arith.constant 0 : index
      %c0_16 = arith.constant 0 : index
      %24 = vector.load %arg5[%c0_15, %c0_16] : memref<32x256xbf16, #tpu.memory_space<vmem>>, vector<32x256xbf16>
      tpu.vector_store %arg5[%c0_15, %c0_16], %23 {strides = array<i32>} : memref<32x256xbf16, #tpu.memory_space<vmem>>, vector<32x256xbf16>,
    } else {
    }
    %c0 = arith.constant 0 : index
    %c0_1 = arith.constant 0 : index
    %3 = vector.load %arg5[%c0, %c0_1] : memref<32x256xbf16, #tpu.memory_space<vmem>>, vector<32x256xbf16>
    %c0_2 = arith.constant 0 : index
    %c0_3 = arith.constant 0 : index
    %4 = vector.load %arg3[%c0_2, %c0_3] : memref<256x768xbf16, #tpu.memory_space<vmem>>, vector<256x768xbf16>
    %cst = arith.constant dense<0.000000e+00> : vector<32x768xf32>
    %5 = tpu.matmul %3, %4, %cst {dimension_numbers = #tpu.dot_dimension_numbers<[1], [0], [0], [1], [0, 0, 1, 1], [], []>} : vector<32x256xbf16>, vector<256x768xbf16>, vector<32x768xf32> -> vector<32x768xf32>
    %6 = arith.truncf %5 : vector<32x768xf32> to vector<32x768xbf16>
    %c0_4 = arith.constant 0 : index
    %c0_5 = arith.constant 0 : index
    %7 = vector.load %arg4[%c0_4, %c0_5] : memref<32x768xbf16, #tpu.memory_space<vmem>>, vector<32x768xbf16>
    tpu.vector_store %arg4[%c0_4, %c0_5], %6 {strides = array<i32>} : memref<32x768xbf16, #tpu.memory_space<vmem>>, vector<32x768xbf16>,
    return
  }
  func.func @transform_0(%arg0: i32) -> (i32, i32, i32) {
    %c0_i32 = arith.constant 0 : i32
    %c0_i32_0 = arith.constant 0 : i32
    %c0_i32_1 = arith.constant 0 : i32
    %c0_i32_2 = arith.constant 0 : i32
    return %c0_i32, %c0_i32_0, %c0_i32_1 : i32, i32, i32
  }
  func.func @transform_1(%arg0: i32) -> (i32, i32) {
    %c0_i32 = arith.constant 0 : i32
    %c0_i32_0 = arith.constant 0 : i32
    %c0_i32_1 = arith.constant 0 : i32
    return %c0_i32, %c0_i32_0 : i32, i32
  }
  func.func @transform_2(%arg0: i32) -> (i32, i32) {
    %c0_i32 = arith.constant 0 : i32
    %c0_i32_0 = arith.constant 0 : i32
    return %c0_i32, %arg0 : i32, i32
  }
  func.func @transform_3(%arg0: i32) -> (i32, i32) {
    %c0_i32 = arith.constant 0 : i32
    %c0_i32_0 = arith.constant 0 : i32
    return %c0_i32, %arg0 : i32, i32
  }
}

module attributes {stable_mosaic.version = 11 : i64} {
  func.func @_attn_kernel(%arg0: i32, %arg1: i32, %arg2: memref<1x16x256xbf16, #tpu.memory_space<vmem>>, %arg3: memref<1x16x256xbf16, #tpu.memory_space<vmem>>, %arg4: memref<1x16x256xbf16, #tpu.memory_space<vmem>>, %arg5: memref<4x16x16xf32, #tpu.memory_space<vmem>>, %arg6: memref<1x1x16xf32, #tpu.memory_space<vmem>>, %arg7: memref<1x16x256xbf16, #tpu.memory_space<vmem>>) attributes {dimension_semantics = [#tpu.dimension_semantics<parallel>, #tpu.dimension_semantics<parallel>], iteration_bounds = array<i64: 2, 1>, scalar_prefetch = 0 : i64, scratch_operands = 0 : i64, tpu.core_type = #tpu.core_type<tc>, window_params = [{transform_indices = @transform_0, window_bounds = array<i64: 1, 16, 256>}, {transform_indices = @transform_1, window_bounds = array<i64: 1, 16, 256>}, {transform_indices = @transform_2, window_bounds = array<i64: 1, 16, 256>}, {transform_indices = @transform_3, window_bounds = array<i64: 4, 16, 16>}, {transform_indices = @transform_4, window_bounds = array<i64: 1, 1, 16>}, {transform_indices = @transform_5, window_bounds = array<i64: 1, 16, 256>}]} {
    %c0 = arith.constant 0 : index
    %c0_0 = arith.constant 0 : index
    %c0_1 = arith.constant 0 : index
    %0 = vector.load %arg6[%c0, %c0_0, %c0_1] : memref<1x1x16xf32, #tpu.memory_space<vmem>>, vector<1x1x16xf32>
    %1 = vector.shape_cast %0 : vector<1x1x16xf32> to vector<1x16xf32>
    %c0_2 = arith.constant 0 : index
    %c0_3 = arith.constant 0 : index
    %c0_4 = arith.constant 0 : index
    %2 = vector.load %arg2[%c0_2, %c0_3, %c0_4] : memref<1x16x256xbf16, #tpu.memory_space<vmem>>, vector<1x16x64xbf16>
    %3 = vector.shape_cast %2 : vector<1x16x64xbf16> to vector<16x64xbf16>
    %c0_5 = arith.constant 0 : index
    %c0_6 = arith.constant 0 : index
    %c0_7 = arith.constant 0 : index
    %4 = vector.load %arg3[%c0_5, %c0_6, %c0_7] : memref<1x16x256xbf16, #tpu.memory_space<vmem>>, vector<1x16x64xbf16>
    %5 = vector.shape_cast %4 : vector<1x16x64xbf16> to vector<16x64xbf16>
    %c0_8 = arith.constant 0 : index
    %c0_9 = arith.constant 0 : index
    %c0_10 = arith.constant 0 : index
    %6 = vector.load %arg4[%c0_8, %c0_9, %c0_10] : memref<1x16x256xbf16, #tpu.memory_space<vmem>>, vector<1x16x64xbf16>
    %7 = vector.shape_cast %6 : vector<1x16x64xbf16> to vector<16x64xbf16>
    %cst = arith.constant dense<0.000000e+00> : vector<16x16xf32>
    %8 = tpu.matmul %3, %5, %cst {dimension_numbers = #tpu.dot_dimension_numbers<[1], [1], [0], [0], [0, 0, 1, 0], [], []>} : vector<16x64xbf16>, vector<16x64xbf16>, vector<16x16xf32> -> vector<16x16xf32>
    %c0_11 = arith.constant 0 : index
    %c0_12 = arith.constant 0 : index
    %c0_13 = arith.constant 0 : index
    %9 = vector.load %arg5[%c0_11, %c0_12, %c0_13] : memref<4x16x16xf32, #tpu.memory_space<vmem>>, vector<1x16x16xf32>
    %10 = vector.shape_cast %9 : vector<1x16x16xf32> to vector<16x16xf32>
    %11 = arith.addf %8, %10 : vector<16x16xf32>
    %12 = vector.broadcast %1 : vector<1x16xf32> to vector<16x16xf32>
    %13 = arith.addf %11, %12 : vector<16x16xf32>
    %cst_14 = arith.constant dense<0xFF800000> : vector<16xf32>
    %14 = vector.multi_reduction <maximumf>, %13, %cst_14 [1] : vector<16x16xf32> to vector<16xf32>
    %15 = vector.shape_cast %14 : vector<16xf32> to vector<16x1xf32>
    %16 = vector.broadcast %15 : vector<16x1xf32> to vector<16x16xf32>
    %17 = arith.subf %13, %16 : vector<16x16xf32>
    %18 = math.exp %17 : vector<16x16xf32>
    %cst_15 = arith.constant dense<0.000000e+00> : vector<16xf32>
    %19 = vector.multi_reduction <add>, %18, %cst_15 [1] : vector<16x16xf32> to vector<16xf32>
    %20 = vector.shape_cast %19 : vector<16xf32> to vector<16x1xf32>
    %21 = arith.truncf %18 : vector<16x16xf32> to vector<16x16xbf16>
    %cst_16 = arith.constant dense<0.000000e+00> : vector<16x64xf32>
    %22 = tpu.matmul %21, %7, %cst_16 {dimension_numbers = #tpu.dot_dimension_numbers<[1], [0], [0], [1], [0, 0, 1, 1], [], []>} : vector<16x16xbf16>, vector<16x64xbf16>, vector<16x64xf32> -> vector<16x64xf32>
    %23 = tpu.reciprocal %20 {approx = true} : vector<16x1xf32> -> vector<16x1xf32>
    %24 = vector.broadcast %23 : vector<16x1xf32> to vector<16x64xf32>
    %25 = arith.mulf %22, %24 : vector<16x64xf32>
    %c0_17 = arith.constant 0 : index
    %c0_18 = arith.constant 0 : index
    %c64 = arith.constant 64 : index
    %26 = vector.load %arg2[%c0_17, %c0_18, %c64] : memref<1x16x256xbf16, #tpu.memory_space<vmem>>, vector<1x16x64xbf16>
    %27 = vector.shape_cast %26 : vector<1x16x64xbf16> to vector<16x64xbf16>
    %c0_19 = arith.constant 0 : index
    %c0_20 = arith.constant 0 : index
    %c64_21 = arith.constant 64 : index
    %28 = vector.load %arg3[%c0_19, %c0_20, %c64_21] : memref<1x16x256xbf16, #tpu.memory_space<vmem>>, vector<1x16x64xbf16>
    %29 = vector.shape_cast %28 : vector<1x16x64xbf16> to vector<16x64xbf16>
    %c0_22 = arith.constant 0 : index
    %c0_23 = arith.constant 0 : index
    %c64_24 = arith.constant 64 : index
    %30 = vector.load %arg4[%c0_22, %c0_23, %c64_24] : memref<1x16x256xbf16, #tpu.memory_space<vmem>>, vector<1x16x64xbf16>
    %31 = vector.shape_cast %30 : vector<1x16x64xbf16> to vector<16x64xbf16>
    %cst_25 = arith.constant dense<0.000000e+00> : vector<16x16xf32>
    %32 = tpu.matmul %27, %29, %cst_25 {dimension_numbers = #tpu.dot_dimension_numbers<[1], [1], [0], [0], [0, 0, 1, 0], [], []>} : vector<16x64xbf16>, vector<16x64xbf16>, vector<16x16xf32> -> vector<16x16xf32>
    %c1 = arith.constant 1 : index
    %c0_26 = arith.constant 0 : index
    %c0_27 = arith.constant 0 : index
    %33 = vector.load %arg5[%c1, %c0_26, %c0_27] : memref<4x16x16xf32, #tpu.memory_space<vmem>>, vector<1x16x16xf32>
    %34 = vector.shape_cast %33 : vector<1x16x16xf32> to vector<16x16xf32>
    %35 = arith.addf %32, %34 : vector<16x16xf32>
    %36 = vector.broadcast %1 : vector<1x16xf32> to vector<16x16xf32>
    %37 = arith.addf %35, %36 : vector<16x16xf32>
    %cst_28 = arith.constant dense<0xFF800000> : vector<16xf32>
    %38 = vector.multi_reduction <maximumf>, %37, %cst_28 [1] : vector<16x16xf32> to vector<16xf32>
    %39 = vector.shape_cast %38 : vector<16xf32> to vector<16x1xf32>
    %40 = vector.broadcast %39 : vector<16x1xf32> to vector<16x16xf32>
    %41 = arith.subf %37, %40 : vector<16x16xf32>
    %42 = math.exp %41 : vector<16x16xf32>
    %cst_29 = arith.constant dense<0.000000e+00> : vector<16xf32>
    %43 = vector.multi_reduction <add>, %42, %cst_29 [1] : vector<16x16xf32> to vector<16xf32>
    %44 = vector.shape_cast %43 : vector<16xf32> to vector<16x1xf32>
    %45 = arith.truncf %42 : vector<16x16xf32> to vector<16x16xbf16>
    %cst_30 = arith.constant dense<0.000000e+00> : vector<16x64xf32>
    %46 = tpu.matmul %45, %31, %cst_30 {dimension_numbers = #tpu.dot_dimension_numbers<[1], [0], [0], [1], [0, 0, 1, 1], [], []>} : vector<16x16xbf16>, vector<16x64xbf16>, vector<16x64xf32> -> vector<16x64xf32>
    %47 = tpu.reciprocal %44 {approx = true} : vector<16x1xf32> -> vector<16x1xf32>
    %48 = vector.broadcast %47 : vector<16x1xf32> to vector<16x64xf32>
    %49 = arith.mulf %46, %48 : vector<16x64xf32>
    %c0_31 = arith.constant 0 : index
    %c0_32 = arith.constant 0 : index
    %c128 = arith.constant 128 : index
    %50 = vector.load %arg2[%c0_31, %c0_32, %c128] : memref<1x16x256xbf16, #tpu.memory_space<vmem>>, vector<1x16x64xbf16>
    %51 = vector.shape_cast %50 : vector<1x16x64xbf16> to vector<16x64xbf16>
    %c0_33 = arith.constant 0 : index
    %c0_34 = arith.constant 0 : index
    %c128_35 = arith.constant 128 : index
    %52 = vector.load %arg3[%c0_33, %c0_34, %c128_35] : memref<1x16x256xbf16, #tpu.memory_space<vmem>>, vector<1x16x64xbf16>
    %53 = vector.shape_cast %52 : vector<1x16x64xbf16> to vector<16x64xbf16>
    %c0_36 = arith.constant 0 : index
    %c0_37 = arith.constant 0 : index
    %c128_38 = arith.constant 128 : index
    %54 = vector.load %arg4[%c0_36, %c0_37, %c128_38] : memref<1x16x256xbf16, #tpu.memory_space<vmem>>, vector<1x16x64xbf16>
    %55 = vector.shape_cast %54 : vector<1x16x64xbf16> to vector<16x64xbf16>
    %cst_39 = arith.constant dense<0.000000e+00> : vector<16x16xf32>
    %56 = tpu.matmul %51, %53, %cst_39 {dimension_numbers = #tpu.dot_dimension_numbers<[1], [1], [0], [0], [0, 0, 1, 0], [], []>} : vector<16x64xbf16>, vector<16x64xbf16>, vector<16x16xf32> -> vector<16x16xf32>
    %c2 = arith.constant 2 : index
    %c0_40 = arith.constant 0 : index
    %c0_41 = arith.constant 0 : index
    %57 = vector.load %arg5[%c2, %c0_40, %c0_41] : memref<4x16x16xf32, #tpu.memory_space<vmem>>, vector<1x16x16xf32>
    %58 = vector.shape_cast %57 : vector<1x16x16xf32> to vector<16x16xf32>
    %59 = arith.addf %56, %58 : vector<16x16xf32>
    %60 = vector.broadcast %1 : vector<1x16xf32> to vector<16x16xf32>
    %61 = arith.addf %59, %60 : vector<16x16xf32>
    %cst_42 = arith.constant dense<0xFF800000> : vector<16xf32>
    %62 = vector.multi_reduction <maximumf>, %61, %cst_42 [1] : vector<16x16xf32> to vector<16xf32>
    %63 = vector.shape_cast %62 : vector<16xf32> to vector<16x1xf32>
    %64 = vector.broadcast %63 : vector<16x1xf32> to vector<16x16xf32>
    %65 = arith.subf %61, %64 : vector<16x16xf32>
    %66 = math.exp %65 : vector<16x16xf32>
    %cst_43 = arith.constant dense<0.000000e+00> : vector<16xf32>
    %67 = vector.multi_reduction <add>, %66, %cst_43 [1] : vector<16x16xf32> to vector<16xf32>
    %68 = vector.shape_cast %67 : vector<16xf32> to vector<16x1xf32>
    %69 = arith.truncf %66 : vector<16x16xf32> to vector<16x16xbf16>
    %cst_44 = arith.constant dense<0.000000e+00> : vector<16x64xf32>
    %70 = tpu.matmul %69, %55, %cst_44 {dimension_numbers = #tpu.dot_dimension_numbers<[1], [0], [0], [1], [0, 0, 1, 1], [], []>} : vector<16x16xbf16>, vector<16x64xbf16>, vector<16x64xf32> -> vector<16x64xf32>
    %71 = tpu.reciprocal %68 {approx = true} : vector<16x1xf32> -> vector<16x1xf32>
    %72 = vector.broadcast %71 : vector<16x1xf32> to vector<16x64xf32>
    %73 = arith.mulf %70, %72 : vector<16x64xf32>
    %c0_45 = arith.constant 0 : index
    %c0_46 = arith.constant 0 : index
    %c192 = arith.constant 192 : index
    %74 = vector.load %arg2[%c0_45, %c0_46, %c192] : memref<1x16x256xbf16, #tpu.memory_space<vmem>>, vector<1x16x64xbf16>
    %75 = vector.shape_cast %74 : vector<1x16x64xbf16> to vector<16x64xbf16>
    %c0_47 = arith.constant 0 : index
    %c0_48 = arith.constant 0 : index
    %c192_49 = arith.constant 192 : index
    %76 = vector.load %arg3[%c0_47, %c0_48, %c192_49] : memref<1x16x256xbf16, #tpu.memory_space<vmem>>, vector<1x16x64xbf16>
    %77 = vector.shape_cast %76 : vector<1x16x64xbf16> to vector<16x64xbf16>
    %c0_50 = arith.constant 0 : index
    %c0_51 = arith.constant 0 : index
    %c192_52 = arith.constant 192 : index
    %78 = vector.load %arg4[%c0_50, %c0_51, %c192_52] : memref<1x16x256xbf16, #tpu.memory_space<vmem>>, vector<1x16x64xbf16>
    %79 = vector.shape_cast %78 : vector<1x16x64xbf16> to vector<16x64xbf16>
    %cst_53 = arith.constant dense<0.000000e+00> : vector<16x16xf32>
    %80 = tpu.matmul %75, %77, %cst_53 {dimension_numbers = #tpu.dot_dimension_numbers<[1], [1], [0], [0], [0, 0, 1, 0], [], []>} : vector<16x64xbf16>, vector<16x64xbf16>, vector<16x16xf32> -> vector<16x16xf32>
    %c3 = arith.constant 3 : index
    %c0_54 = arith.constant 0 : index
    %c0_55 = arith.constant 0 : index
    %81 = vector.load %arg5[%c3, %c0_54, %c0_55] : memref<4x16x16xf32, #tpu.memory_space<vmem>>, vector<1x16x16xf32>
    %82 = vector.shape_cast %81 : vector<1x16x16xf32> to vector<16x16xf32>
    %83 = arith.addf %80, %82 : vector<16x16xf32>
    %84 = vector.broadcast %1 : vector<1x16xf32> to vector<16x16xf32>
    %85 = arith.addf %83, %84 : vector<16x16xf32>
    %cst_56 = arith.constant dense<0xFF800000> : vector<16xf32>
    %86 = vector.multi_reduction <maximumf>, %85, %cst_56 [1] : vector<16x16xf32> to vector<16xf32>
    %87 = vector.shape_cast %86 : vector<16xf32> to vector<16x1xf32>
    %88 = vector.broadcast %87 : vector<16x1xf32> to vector<16x16xf32>
    %89 = arith.subf %85, %88 : vector<16x16xf32>
    %90 = math.exp %89 : vector<16x16xf32>
    %cst_57 = arith.constant dense<0.000000e+00> : vector<16xf32>
    %91 = vector.multi_reduction <add>, %90, %cst_57 [1] : vector<16x16xf32> to vector<16xf32>
    %92 = vector.shape_cast %91 : vector<16xf32> to vector<16x1xf32>
    %93 = arith.truncf %90 : vector<16x16xf32> to vector<16x16xbf16>
    %cst_58 = arith.constant dense<0.000000e+00> : vector<16x64xf32>
    %94 = tpu.matmul %93, %79, %cst_58 {dimension_numbers = #tpu.dot_dimension_numbers<[1], [0], [0], [1], [0, 0, 1, 1], [], []>} : vector<16x16xbf16>, vector<16x64xbf16>, vector<16x64xf32> -> vector<16x64xf32>
    %95 = tpu.reciprocal %92 {approx = true} : vector<16x1xf32> -> vector<16x1xf32>
    %96 = vector.broadcast %95 : vector<16x1xf32> to vector<16x64xf32>
    %97 = arith.mulf %94, %96 : vector<16x64xf32>
    %98 = tpu.concatenate %25, %49, %73, %97 in 1 : vector<16x64xf32>, vector<16x64xf32>, vector<16x64xf32>, vector<16x64xf32> -> vector<16x256xf32>
    %99 = arith.truncf %98 : vector<16x256xf32> to vector<16x256xbf16>
    %c0_59 = arith.constant 0 : index
    %c0_60 = arith.constant 0 : index
    %c0_61 = arith.constant 0 : index
    %100 = vector.load %arg7[%c0_59, %c0_60, %c0_61] : memref<1x16x256xbf16, #tpu.memory_space<vmem>>, vector<1x16x256xbf16>
    %101 = vector.shape_cast %100 : vector<1x16x256xbf16> to vector<16x256xbf16>
    %102 = vector.shape_cast %99 : vector<16x256xbf16> to vector<1x16x256xbf16>
    tpu.vector_store %arg7[%c0_59, %c0_60, %c0_61], %102 {strides = array<i32>} : memref<1x16x256xbf16, #tpu.memory_space<vmem>>, vector<1x16x256xbf16>,
    return
  }
  func.func @transform_0(%arg0: i32, %arg1: i32) -> (i32, i32, i32) {
    %c0_i32 = arith.constant 0 : i32
    %c0_i32_0 = arith.constant 0 : i32
    return %arg0, %c0_i32, %arg1 : i32, i32, i32
  }
  func.func @transform_1(%arg0: i32, %arg1: i32) -> (i32, i32, i32) {
    %c1_i32 = arith.constant 1 : i32
    %0 = arith.addi %c1_i32, %arg1 : i32
    %c0_i32 = arith.constant 0 : i32
    %c0_i32_0 = arith.constant 0 : i32
    return %arg0, %c0_i32, %0 : i32, i32, i32
  }
  func.func @transform_2(%arg0: i32, %arg1: i32) -> (i32, i32, i32) {
    %c2_i32 = arith.constant 2 : i32
    %0 = arith.addi %c2_i32, %arg1 : i32
    %c0_i32 = arith.constant 0 : i32
    %c0_i32_0 = arith.constant 0 : i32
    return %arg0, %c0_i32, %0 : i32, i32, i32
  }
  func.func @transform_3(%arg0: i32, %arg1: i32) -> (i32, i32, i32) {
    %c0_i32 = arith.constant 0 : i32
    %c0_i32_0 = arith.constant 0 : i32
    %c0_i32_1 = arith.constant 0 : i32
    return %arg1, %c0_i32, %c0_i32_0 : i32, i32, i32
  }
  func.func @transform_4(%arg0: i32, %arg1: i32) -> (i32, i32, i32) {
    %c0_i32 = arith.constant 0 : i32
    %c0_i32_0 = arith.constant 0 : i32
    %c0_i32_1 = arith.constant 0 : i32
    return %arg0, %c0_i32, %c0_i32_0 : i32, i32, i32
  }
  func.func @transform_5(%arg0: i32, %arg1: i32) -> (i32, i32, i32) {
    %c0_i32 = arith.constant 0 : i32
    %c0_i32_0 = arith.constant 0 : i32
    return %arg0, %c0_i32, %arg1 : i32, i32, i32
  }
}

module attributes {stable_mosaic.version = 11 : i64} {
  func.func @_proj_residual_kernel(%arg0: i32, %arg1: memref<32x256xbf16, #tpu.memory_space<vmem>>, %arg2: memref<256x256xbf16, #tpu.memory_space<vmem>>, %arg3: memref<1x32x256xf32, #tpu.memory_space<vmem>>, %arg4: memref<32x256xf32, #tpu.memory_space<vmem>>) attributes {dimension_semantics = [#tpu.dimension_semantics<parallel>], iteration_bounds = array<i64: 1>, scalar_prefetch = 0 : i64, scratch_operands = 0 : i64, tpu.core_type = #tpu.core_type<tc>, window_params = [{pipeline_mode = #tpu.pipeline_mode<synchronous>, transform_indices = @transform_0, window_bounds = array<i64: 32, 256>}, {transform_indices = @transform_1, window_bounds = array<i64: 256, 256>}, {transform_indices = @transform_2, window_bounds = array<i64: 1, 32, 256>}, {transform_indices = @transform_3, window_bounds = array<i64: 32, 256>}]} {
    %c0 = arith.constant 0 : index
    %c0_0 = arith.constant 0 : index
    %0 = vector.load %arg1[%c0, %c0_0] : memref<32x256xbf16, #tpu.memory_space<vmem>>, vector<32x256xbf16>
    %c0_1 = arith.constant 0 : index
    %c0_2 = arith.constant 0 : index
    %1 = vector.load %arg2[%c0_1, %c0_2] : memref<256x256xbf16, #tpu.memory_space<vmem>>, vector<256x256xbf16>
    %cst = arith.constant dense<0.000000e+00> : vector<32x256xf32>
    %2 = tpu.matmul %0, %1, %cst {dimension_numbers = #tpu.dot_dimension_numbers<[1], [0], [0], [1], [0, 0, 1, 1], [], []>} : vector<32x256xbf16>, vector<256x256xbf16>, vector<32x256xf32> -> vector<32x256xf32>
    %c0_3 = arith.constant 0 : index
    %c0_4 = arith.constant 0 : index
    %c0_5 = arith.constant 0 : index
    %3 = vector.load %arg3[%c0_3, %c0_4, %c0_5] : memref<1x32x256xf32, #tpu.memory_space<vmem>>, vector<1x32x256xf32>
    %cst_6 = arith.constant dense<0.000000e+00> : vector<32x256xf32>
    %4 = vector.multi_reduction <add>, %3, %cst_6 [0] : vector<1x32x256xf32> to vector<32x256xf32>
    %5 = arith.addf %2, %4 : vector<32x256xf32>
    %c0_7 = arith.constant 0 : index
    %c0_8 = arith.constant 0 : index
    %6 = vector.load %arg4[%c0_7, %c0_8] : memref<32x256xf32, #tpu.memory_space<vmem>>, vector<32x256xf32>
    tpu.vector_store %arg4[%c0_7, %c0_8], %5 {strides = array<i32>} : memref<32x256xf32, #tpu.memory_space<vmem>>, vector<32x256xf32>,
    return
  }
  func.func @transform_0(%arg0: i32) -> (i32, i32) {
    %c0_i32 = arith.constant 0 : i32
    %c0_i32_0 = arith.constant 0 : i32
    %c0_i32_1 = arith.constant 0 : i32
    return %c0_i32, %c0_i32_0 : i32, i32
  }
  func.func @transform_1(%arg0: i32) -> (i32, i32) {
    %c0_i32 = arith.constant 0 : i32
    %c0_i32_0 = arith.constant 0 : i32
    return %c0_i32, %arg0 : i32, i32
  }
  func.func @transform_2(%arg0: i32) -> (i32, i32, i32) {
    %c0_i32 = arith.constant 0 : i32
    %c0_i32_0 = arith.constant 0 : i32
    %c0_i32_1 = arith.constant 0 : i32
    return %c0_i32, %c0_i32_0, %arg0 : i32, i32, i32
  }
  func.func @transform_3(%arg0: i32) -> (i32, i32) {
    %c0_i32 = arith.constant 0 : i32
    %c0_i32_0 = arith.constant 0 : i32
    return %c0_i32, %arg0 : i32, i32
  }
}

module attributes {stable_mosaic.version = 11 : i64} {
  func.func @_t5_ffn_kernel(%arg0: i32, %arg1: i32, %arg2: memref<32x256xf32, #tpu.memory_space<vmem>>, %arg3: memref<1x256xf32, #tpu.memory_space<vmem>>, %arg4: memref<256x512xbf16, #tpu.memory_space<vmem>>, %arg5: memref<256x512xbf16, #tpu.memory_space<vmem>>, %arg6: memref<512x256xbf16, #tpu.memory_space<vmem>>, %arg7: memref<1x32x256xf32, #tpu.memory_space<vmem>>, %arg8: memref<32x256xbf16, #tpu.memory_space<vmem>>) attributes {dimension_semantics = [#tpu.dimension_semantics<parallel>, #tpu.dimension_semantics<arbitrary>], iteration_bounds = array<i64: 2, 1>, scalar_prefetch = 0 : i64, scratch_operands = 1 : i64, tpu.core_type = #tpu.core_type<tc>, window_params = [{pipeline_mode = #tpu.pipeline_mode<synchronous>, transform_indices = @transform_0, window_bounds = array<i64: 32, 256>}, {pipeline_mode = #tpu.pipeline_mode<synchronous>, transform_indices = @transform_1, window_bounds = array<i64: 1, 256>}, {transform_indices = @transform_2, window_bounds = array<i64: 256, 512>}, {transform_indices = @transform_3, window_bounds = array<i64: 256, 512>}, {transform_indices = @transform_4, window_bounds = array<i64: 512, 256>}, {transform_indices = @transform_5, window_bounds = array<i64: 1, 32, 256>}]} {
    %c0_i32 = arith.constant 0 : i32
    %0 = arith.cmpi eq, %arg1, %c0_i32 : i32
    %1 = arith.extui %0 : i1 to i32
    %c0_i32_0 = arith.constant 0 : i32
    %2 = arith.cmpi ne, %1, %c0_i32_0 : i32
    scf.if %2 {
      %c0_20 = arith.constant 0 : index
      %c0_21 = arith.constant 0 : index
      %31 = vector.load %arg2[%c0_20, %c0_21] : memref<32x256xf32, #tpu.memory_space<vmem>>, vector<32x256xf32>
      %32 = arith.mulf %31, %31 : vector<32x256xf32>
      %cst_22 = arith.constant dense<0.000000e+00> : vector<32xf32>
      %33 = vector.multi_reduction <add>, %32, %cst_22 [1] : vector<32x256xf32> to vector<32xf32>
      %34 = vector.shape_cast %33 : vector<32xf32> to vector<32x1xf32>
      %cst_23 = arith.constant 2.560000e+02 : f32
      %35 = vector.broadcast %cst_23 : f32 to vector<32x1xf32>
      %36 = arith.divf %34, %35 : vector<32x1xf32>
      %cst_24 = arith.constant 9.99999997E-7 : f32
      %37 = vector.broadcast %cst_24 : f32 to vector<32x1xf32>
      %38 = arith.addf %36, %37 : vector<32x1xf32>
      %39 = math.rsqrt %38 : vector<32x1xf32>
      %40 = vector.broadcast %39 : vector<32x1xf32> to vector<32x256xf32>
      %41 = arith.mulf %31, %40 : vector<32x256xf32>
      %c0_25 = arith.constant 0 : index
      %c0_26 = arith.constant 0 : index
      %42 = vector.load %arg3[%c0_25, %c0_26] : memref<1x256xf32, #tpu.memory_space<vmem>>, vector<1x256xf32>
      %43 = vector.broadcast %42 : vector<1x256xf32> to vector<32x256xf32>
      %44 = arith.mulf %41, %43 : vector<32x256xf32>
      %45 = arith.truncf %44 : vector<32x256xf32> to vector<32x256xbf16>
      %c0_27 = arith.constant 0 : index
      %c0_28 = arith.constant 0 : index
      %46 = vector.load %arg8[%c0_27, %c0_28] : memref<32x256xbf16, #tpu.memory_space<vmem>>, vector<32x256xbf16>
      tpu.vector_store %arg8[%c0_27, %c0_28], %45 {strides = array<i32>} : memref<32x256xbf16, #tpu.memory_space<vmem>>, vector<32x256xbf16>,
      %c0_i32_29 = arith.constant 0 : i32
      %47 = arith.cmpi eq, %arg0, %c0_i32_29 : i32
      %48 = arith.extui %47 : i1 to i32
      %49 = arith.sitofp %48 : i32 to f32
      %50 = vector.broadcast %49 : f32 to vector<32x256xf32>
      %51 = arith.mulf %31, %50 : vector<32x256xf32>
      %c0_30 = arith.constant 0 : index
      %c0_31 = arith.constant 0 : index
      %c0_32 = arith.constant 0 : index
      %52 = vector.load %arg7[%c0_30, %c0_31, %c0_32] : memref<1x32x256xf32, #tpu.memory_space<vmem>>, vector<1x32x256xf32>
      %53 = vector.shape_cast %52 : vector<1x32x256xf32> to vector<32x256xf32>
      %54 = vector.shape_cast %51 : vector<32x256xf32> to vector<1x32x256xf32>
      tpu.vector_store %arg7[%c0_30, %c0_31, %c0_32], %54 {strides = array<i32>} : memref<1x32x256xf32, #tpu.memory_space<vmem>>, vector<1x32x256xf32>,
    } else {
    }
    %c0 = arith.constant 0 : index
    %c0_1 = arith.constant 0 : index
    %3 = vector.load %arg8[%c0, %c0_1] : memref<32x256xbf16, #tpu.memory_space<vmem>>, vector<32x256xbf16>
    %c0_2 = arith.constant 0 : index
    %c0_3 = arith.constant 0 : index
    %4 = vector.load %arg4[%c0_2, %c0_3] : memref<256x512xbf16, #tpu.memory_space<vmem>>, vector<256x512xbf16>
    %cst = arith.constant dense<0.000000e+00> : vector<32x512xf32>
    %5 = tpu.matmul %3, %4, %cst {dimension_numbers = #tpu.dot_dimension_numbers<[1], [0], [0], [1], [0, 0, 1, 1], [], []>} : vector<32x256xbf16>, vector<256x512xbf16>, vector<32x512xf32> -> vector<32x512xf32>
    %c0_4 = arith.constant 0 : index
    %c0_5 = arith.constant 0 : index
    %6 = vector.load %arg5[%c0_4, %c0_5] : memref<256x512xbf16, #tpu.memory_space<vmem>>, vector<256x512xbf16>
    %cst_6 = arith.constant dense<0.000000e+00> : vector<32x512xf32>
    %7 = tpu.matmul %3, %6, %cst_6 {dimension_numbers = #tpu.dot_dimension_numbers<[1], [0], [0], [1], [0, 0, 1, 1], [], []>} : vector<32x256xbf16>, vector<256x512xbf16>, vector<32x512xf32> -> vector<32x512xf32>
    %8 = arith.mulf %5, %5 : vector<32x512xf32>
    %9 = arith.mulf %5, %8 : vector<32x512xf32>
    %cst_7 = arith.constant 4.471500e-02 : f32
    %10 = vector.broadcast %cst_7 : f32 to vector<32x512xf32>
    %11 = arith.mulf %10, %9 : vector<32x512xf32>
    %12 = arith.addf %5, %11 : vector<32x512xf32>
    %cst_8 = arith.constant 0.797884583 : f32
    %13 = vector.broadcast %cst_8 : f32 to vector<32x512xf32>
    %14 = arith.mulf %13, %12 : vector<32x512xf32>
    %15 = math.tanh %14 : vector<32x512xf32>
    %cst_9 = arith.constant 1.000000e+00 : f32
    %16 = vector.broadcast %cst_9 : f32 to vector<32x512xf32>
    %17 = arith.addf %16, %15 : vector<32x512xf32>
    %cst_10 = arith.constant 5.000000e-01 : f32
    %18 = vector.broadcast %cst_10 : f32 to vector<32x512xf32>
    %19 = arith.mulf %18, %17 : vector<32x512xf32>
    %20 = arith.mulf %5, %19 : vector<32x512xf32>
    %21 = arith.mulf %20, %7 : vector<32x512xf32>
    %22 = arith.truncf %21 : vector<32x512xf32> to vector<32x512xbf16>
    %c0_11 = arith.constant 0 : index
    %c0_12 = arith.constant 0 : index
    %c0_13 = arith.constant 0 : index
    %23 = vector.load %arg7[%c0_11, %c0_12, %c0_13] : memref<1x32x256xf32, #tpu.memory_space<vmem>>, vector<1x32x256xf32>
    %24 = vector.shape_cast %23 : vector<1x32x256xf32> to vector<32x256xf32>
    %c0_14 = arith.constant 0 : index
    %c0_15 = arith.constant 0 : index
    %25 = vector.load %arg6[%c0_14, %c0_15] : memref<512x256xbf16, #tpu.memory_space<vmem>>, vector<512x256xbf16>
    %cst_16 = arith.constant dense<0.000000e+00> : vector<32x256xf32>
    %26 = tpu.matmul %22, %25, %cst_16 {dimension_numbers = #tpu.dot_dimension_numbers<[1], [0], [0], [1], [0, 0, 1, 1], [], []>} : vector<32x512xbf16>, vector<512x256xbf16>, vector<32x256xf32> -> vector<32x256xf32>
    %27 = arith.addf %24, %26 : vector<32x256xf32>
    %c0_17 = arith.constant 0 : index
    %c0_18 = arith.constant 0 : index
    %c0_19 = arith.constant 0 : index
    %28 = vector.load %arg7[%c0_17, %c0_18, %c0_19] : memref<1x32x256xf32, #tpu.memory_space<vmem>>, vector<1x32x256xf32>
    %29 = vector.shape_cast %28 : vector<1x32x256xf32> to vector<32x256xf32>
    %30 = vector.shape_cast %27 : vector<32x256xf32> to vector<1x32x256xf32>
    tpu.vector_store %arg7[%c0_17, %c0_18, %c0_19], %30 {strides = array<i32>} : memref<1x32x256xf32, #tpu.memory_space<vmem>>, vector<1x32x256xf32>,
    return
  }
  func.func @transform_0(%arg0: i32, %arg1: i32) -> (i32, i32) {
    %c0_i32 = arith.constant 0 : i32
    %c0_i32_0 = arith.constant 0 : i32
    %c0_i32_1 = arith.constant 0 : i32
    return %c0_i32, %c0_i32_0 : i32, i32
  }
  func.func @transform_1(%arg0: i32, %arg1: i32) -> (i32, i32) {
    %c0_i32 = arith.constant 0 : i32
    %c0_i32_0 = arith.constant 0 : i32
    %c0_i32_1 = arith.constant 0 : i32
    return %c0_i32, %c0_i32_0 : i32, i32
  }
  func.func @transform_2(%arg0: i32, %arg1: i32) -> (i32, i32) {
    %c1_i32 = arith.constant 1 : i32
    %0 = arith.muli %arg0, %c1_i32 : i32
    %1 = arith.addi %0, %arg1 : i32
    %c0_i32 = arith.constant 0 : i32
    %c0_i32_0 = arith.constant 0 : i32
    return %c0_i32, %1 : i32, i32
  }
  func.func @transform_3(%arg0: i32, %arg1: i32) -> (i32, i32) {
    %c1_i32 = arith.constant 1 : i32
    %0 = arith.muli %arg0, %c1_i32 : i32
    %1 = arith.addi %0, %arg1 : i32
    %c0_i32 = arith.constant 0 : i32
    %c0_i32_0 = arith.constant 0 : i32
    return %c0_i32, %1 : i32, i32
  }
  func.func @transform_4(%arg0: i32, %arg1: i32) -> (i32, i32) {
    %c1_i32 = arith.constant 1 : i32
    %0 = arith.muli %arg0, %c1_i32 : i32
    %1 = arith.addi %0, %arg1 : i32
    %c0_i32 = arith.constant 0 : i32
    %c0_i32_0 = arith.constant 0 : i32
    return %1, %c0_i32 : i32, i32
  }
  func.func @transform_5(%arg0: i32, %arg1: i32) -> (i32, i32, i32) {
    %c0_i32 = arith.constant 0 : i32
    %c0_i32_0 = arith.constant 0 : i32
    %c0_i32_1 = arith.constant 0 : i32
    return %arg0, %c0_i32, %c0_i32_0 : i32, i32, i32
  }
}

module attributes {stable_mosaic.version = 11 : i64} {
  func.func @_norm_matmul_kernel(%arg0: i32, %arg1: memref<2x32x256xf32, #tpu.memory_space<vmem>>, %arg2: memref<1x256xf32, #tpu.memory_space<vmem>>, %arg3: memref<256x768xbf16, #tpu.memory_space<vmem>>, %arg4: memref<32x768xbf16, #tpu.memory_space<vmem>>, %arg5: memref<32x256xbf16, #tpu.memory_space<vmem>>) attributes {dimension_semantics = [#tpu.dimension_semantics<arbitrary>], iteration_bounds = array<i64: 1>, scalar_prefetch = 0 : i64, scratch_operands = 1 : i64, tpu.core_type = #tpu.core_type<tc>, window_params = [{pipeline_mode = #tpu.pipeline_mode<synchronous>, transform_indices = @transform_0, window_bounds = array<i64: 2, 32, 256>}, {pipeline_mode = #tpu.pipeline_mode<synchronous>, transform_indices = @transform_1, window_bounds = array<i64: 1, 256>}, {transform_indices = @transform_2, window_bounds = array<i64: 256, 768>}, {transform_indices = @transform_3, window_bounds = array<i64: 32, 768>}]} {
    %c0_i32 = arith.constant 0 : i32
    %0 = arith.cmpi eq, %arg0, %c0_i32 : i32
    %1 = arith.extui %0 : i1 to i32
    %c0_i32_0 = arith.constant 0 : i32
    %2 = arith.cmpi ne, %1, %c0_i32_0 : i32
    scf.if %2 {
      %c0_6 = arith.constant 0 : index
      %c0_7 = arith.constant 0 : index
      %c0_8 = arith.constant 0 : index
      %8 = vector.load %arg1[%c0_6, %c0_7, %c0_8] : memref<2x32x256xf32, #tpu.memory_space<vmem>>, vector<2x32x256xf32>
      %cst_9 = arith.constant dense<0.000000e+00> : vector<32x256xf32>
      %9 = vector.multi_reduction <add>, %8, %cst_9 [0] : vector<2x32x256xf32> to vector<32x256xf32>
      %10 = arith.mulf %9, %9 : vector<32x256xf32>
      %cst_10 = arith.constant dense<0.000000e+00> : vector<32xf32>
      %11 = vector.multi_reduction <add>, %10, %cst_10 [1] : vector<32x256xf32> to vector<32xf32>
      %12 = vector.shape_cast %11 : vector<32xf32> to vector<32x1xf32>
      %cst_11 = arith.constant 2.560000e+02 : f32
      %13 = vector.broadcast %cst_11 : f32 to vector<32x1xf32>
      %14 = arith.divf %12, %13 : vector<32x1xf32>
      %cst_12 = arith.constant 9.99999997E-7 : f32
      %15 = vector.broadcast %cst_12 : f32 to vector<32x1xf32>
      %16 = arith.addf %14, %15 : vector<32x1xf32>
      %17 = math.rsqrt %16 : vector<32x1xf32>
      %18 = vector.broadcast %17 : vector<32x1xf32> to vector<32x256xf32>
      %19 = arith.mulf %9, %18 : vector<32x256xf32>
      %c0_13 = arith.constant 0 : index
      %c0_14 = arith.constant 0 : index
      %20 = vector.load %arg2[%c0_13, %c0_14] : memref<1x256xf32, #tpu.memory_space<vmem>>, vector<1x256xf32>
      %21 = vector.broadcast %20 : vector<1x256xf32> to vector<32x256xf32>
      %22 = arith.mulf %19, %21 : vector<32x256xf32>
      %23 = arith.truncf %22 : vector<32x256xf32> to vector<32x256xbf16>
      %c0_15 = arith.constant 0 : index
      %c0_16 = arith.constant 0 : index
      %24 = vector.load %arg5[%c0_15, %c0_16] : memref<32x256xbf16, #tpu.memory_space<vmem>>, vector<32x256xbf16>
      tpu.vector_store %arg5[%c0_15, %c0_16], %23 {strides = array<i32>} : memref<32x256xbf16, #tpu.memory_space<vmem>>, vector<32x256xbf16>,
    } else {
    }
    %c0 = arith.constant 0 : index
    %c0_1 = arith.constant 0 : index
    %3 = vector.load %arg5[%c0, %c0_1] : memref<32x256xbf16, #tpu.memory_space<vmem>>, vector<32x256xbf16>
    %c0_2 = arith.constant 0 : index
    %c0_3 = arith.constant 0 : index
    %4 = vector.load %arg3[%c0_2, %c0_3] : memref<256x768xbf16, #tpu.memory_space<vmem>>, vector<256x768xbf16>
    %cst = arith.constant dense<0.000000e+00> : vector<32x768xf32>
    %5 = tpu.matmul %3, %4, %cst {dimension_numbers = #tpu.dot_dimension_numbers<[1], [0], [0], [1], [0, 0, 1, 1], [], []>} : vector<32x256xbf16>, vector<256x768xbf16>, vector<32x768xf32> -> vector<32x768xf32>
    %6 = arith.truncf %5 : vector<32x768xf32> to vector<32x768xbf16>
    %c0_4 = arith.constant 0 : index
    %c0_5 = arith.constant 0 : index
    %7 = vector.load %arg4[%c0_4, %c0_5] : memref<32x768xbf16, #tpu.memory_space<vmem>>, vector<32x768xbf16>
    tpu.vector_store %arg4[%c0_4, %c0_5], %6 {strides = array<i32>} : memref<32x768xbf16, #tpu.memory_space<vmem>>, vector<32x768xbf16>,
    return
  }
  func.func @transform_0(%arg0: i32) -> (i32, i32, i32) {
    %c0_i32 = arith.constant 0 : i32
    %c0_i32_0 = arith.constant 0 : i32
    %c0_i32_1 = arith.constant 0 : i32
    %c0_i32_2 = arith.constant 0 : i32
    return %c0_i32, %c0_i32_0, %c0_i32_1 : i32, i32, i32
  }
  func.func @transform_1(%arg0: i32) -> (i32, i32) {
    %c0_i32 = arith.constant 0 : i32
    %c0_i32_0 = arith.constant 0 : i32
    %c0_i32_1 = arith.constant 0 : i32
    return %c0_i32, %c0_i32_0 : i32, i32
  }
  func.func @transform_2(%arg0: i32) -> (i32, i32) {
    %c0_i32 = arith.constant 0 : i32
    %c0_i32_0 = arith.constant 0 : i32
    return %c0_i32, %arg0 : i32, i32
  }
  func.func @transform_3(%arg0: i32) -> (i32, i32) {
    %c0_i32 = arith.constant 0 : i32
    %c0_i32_0 = arith.constant 0 : i32
    return %c0_i32, %arg0 : i32, i32
  }
}

module attributes {stable_mosaic.version = 11 : i64} {
  func.func @_proj_residual_kernel(%arg0: i32, %arg1: memref<32x256xbf16, #tpu.memory_space<vmem>>, %arg2: memref<256x256xbf16, #tpu.memory_space<vmem>>, %arg3: memref<2x32x256xf32, #tpu.memory_space<vmem>>, %arg4: memref<32x256xf32, #tpu.memory_space<vmem>>) attributes {dimension_semantics = [#tpu.dimension_semantics<parallel>], iteration_bounds = array<i64: 1>, scalar_prefetch = 0 : i64, scratch_operands = 0 : i64, tpu.core_type = #tpu.core_type<tc>, window_params = [{pipeline_mode = #tpu.pipeline_mode<synchronous>, transform_indices = @transform_0, window_bounds = array<i64: 32, 256>}, {transform_indices = @transform_1, window_bounds = array<i64: 256, 256>}, {transform_indices = @transform_2, window_bounds = array<i64: 2, 32, 256>}, {transform_indices = @transform_3, window_bounds = array<i64: 32, 256>}]} {
    %c0 = arith.constant 0 : index
    %c0_0 = arith.constant 0 : index
    %0 = vector.load %arg1[%c0, %c0_0] : memref<32x256xbf16, #tpu.memory_space<vmem>>, vector<32x256xbf16>
    %c0_1 = arith.constant 0 : index
    %c0_2 = arith.constant 0 : index
    %1 = vector.load %arg2[%c0_1, %c0_2] : memref<256x256xbf16, #tpu.memory_space<vmem>>, vector<256x256xbf16>
    %cst = arith.constant dense<0.000000e+00> : vector<32x256xf32>
    %2 = tpu.matmul %0, %1, %cst {dimension_numbers = #tpu.dot_dimension_numbers<[1], [0], [0], [1], [0, 0, 1, 1], [], []>} : vector<32x256xbf16>, vector<256x256xbf16>, vector<32x256xf32> -> vector<32x256xf32>
    %c0_3 = arith.constant 0 : index
    %c0_4 = arith.constant 0 : index
    %c0_5 = arith.constant 0 : index
    %3 = vector.load %arg3[%c0_3, %c0_4, %c0_5] : memref<2x32x256xf32, #tpu.memory_space<vmem>>, vector<2x32x256xf32>
    %cst_6 = arith.constant dense<0.000000e+00> : vector<32x256xf32>
    %4 = vector.multi_reduction <add>, %3, %cst_6 [0] : vector<2x32x256xf32> to vector<32x256xf32>
    %5 = arith.addf %2, %4 : vector<32x256xf32>
    %c0_7 = arith.constant 0 : index
    %c0_8 = arith.constant 0 : index
    %6 = vector.load %arg4[%c0_7, %c0_8] : memref<32x256xf32, #tpu.memory_space<vmem>>, vector<32x256xf32>
    tpu.vector_store %arg4[%c0_7, %c0_8], %5 {strides = array<i32>} : memref<32x256xf32, #tpu.memory_space<vmem>>, vector<32x256xf32>,
    return
  }
  func.func @transform_0(%arg0: i32) -> (i32, i32) {
    %c0_i32 = arith.constant 0 : i32
    %c0_i32_0 = arith.constant 0 : i32
    %c0_i32_1 = arith.constant 0 : i32
    return %c0_i32, %c0_i32_0 : i32, i32
  }
  func.func @transform_1(%arg0: i32) -> (i32, i32) {
    %c0_i32 = arith.constant 0 : i32
    %c0_i32_0 = arith.constant 0 : i32
    return %c0_i32, %arg0 : i32, i32
  }
  func.func @transform_2(%arg0: i32) -> (i32, i32, i32) {
    %c0_i32 = arith.constant 0 : i32
    %c0_i32_0 = arith.constant 0 : i32
    %c0_i32_1 = arith.constant 0 : i32
    return %c0_i32, %c0_i32_0, %arg0 : i32, i32, i32
  }
  func.func @transform_3(%arg0: i32) -> (i32, i32) {
    %c0_i32 = arith.constant 0 : i32
    %c0_i32_0 = arith.constant 0 : i32
    return %c0_i32, %arg0 : i32, i32
  }
}

module attributes {stable_mosaic.version = 11 : i64} {
  func.func @_norm_kernel(%arg0: i32, %arg1: memref<2x32x256xf32, #tpu.memory_space<vmem>>, %arg2: memref<1x256xf32, #tpu.memory_space<vmem>>, %arg3: memref<1x256xf32, #tpu.memory_space<vmem>>, %arg4: memref<32x256xf32, #tpu.memory_space<vmem>>) attributes {dimension_semantics = [#tpu.dimension_semantics<arbitrary>], iteration_bounds = array<i64: 1>, scalar_prefetch = 0 : i64, scratch_operands = 0 : i64, tpu.core_type = #tpu.core_type<tc>, window_params = [{pipeline_mode = #tpu.pipeline_mode<synchronous>, transform_indices = @transform_0, window_bounds = array<i64: 2, 32, 256>}, {pipeline_mode = #tpu.pipeline_mode<synchronous>, transform_indices = @transform_1, window_bounds = array<i64: 1, 256>}, {pipeline_mode = #tpu.pipeline_mode<synchronous>, transform_indices = @transform_2, window_bounds = array<i64: 1, 256>}, {pipeline_mode = #tpu.pipeline_mode<synchronous>, transform_indices = @transform_3, window_bounds = array<i64: 32, 256>}]} {
    %c0 = arith.constant 0 : index
    %c0_0 = arith.constant 0 : index
    %c0_1 = arith.constant 0 : index
    %0 = vector.load %arg1[%c0, %c0_0, %c0_1] : memref<2x32x256xf32, #tpu.memory_space<vmem>>, vector<2x32x256xf32>
    %cst = arith.constant dense<0.000000e+00> : vector<32x256xf32>
    %1 = vector.multi_reduction <add>, %0, %cst [0] : vector<2x32x256xf32> to vector<32x256xf32>
    %2 = arith.mulf %1, %1 : vector<32x256xf32>
    %cst_2 = arith.constant dense<0.000000e+00> : vector<32xf32>
    %3 = vector.multi_reduction <add>, %2, %cst_2 [1] : vector<32x256xf32> to vector<32xf32>
    %4 = vector.shape_cast %3 : vector<32xf32> to vector<32x1xf32>
    %cst_3 = arith.constant 2.560000e+02 : f32
    %5 = vector.broadcast %cst_3 : f32 to vector<32x1xf32>
    %6 = arith.divf %4, %5 : vector<32x1xf32>
    %cst_4 = arith.constant 9.99999997E-7 : f32
    %7 = vector.broadcast %cst_4 : f32 to vector<32x1xf32>
    %8 = arith.addf %6, %7 : vector<32x1xf32>
    %9 = math.rsqrt %8 : vector<32x1xf32>
    %10 = vector.broadcast %9 : vector<32x1xf32> to vector<32x256xf32>
    %11 = arith.mulf %1, %10 : vector<32x256xf32>
    %c0_5 = arith.constant 0 : index
    %c0_6 = arith.constant 0 : index
    %12 = vector.load %arg2[%c0_5, %c0_6] : memref<1x256xf32, #tpu.memory_space<vmem>>, vector<1x256xf32>
    %13 = vector.broadcast %12 : vector<1x256xf32> to vector<32x256xf32>
    %14 = arith.mulf %11, %13 : vector<32x256xf32>
    %c0_7 = arith.constant 0 : index
    %c0_8 = arith.constant 0 : index
    %15 = vector.load %arg3[%c0_7, %c0_8] : memref<1x256xf32, #tpu.memory_space<vmem>>, vector<1x256xf32>
    %16 = vector.broadcast %15 : vector<1x256xf32> to vector<32x256xf32>
    %17 = arith.addf %14, %16 : vector<32x256xf32>
    %c0_9 = arith.constant 0 : index
    %c0_10 = arith.constant 0 : index
    %18 = vector.load %arg4[%c0_9, %c0_10] : memref<32x256xf32, #tpu.memory_space<vmem>>, vector<32x256xf32>
    tpu.vector_store %arg4[%c0_9, %c0_10], %17 {strides = array<i32>} : memref<32x256xf32, #tpu.memory_space<vmem>>, vector<32x256xf32>,
    return
  }
  func.func @transform_0(%arg0: i32) -> (i32, i32, i32) {
    %c0_i32 = arith.constant 0 : i32
    %c0_i32_0 = arith.constant 0 : i32
    %c0_i32_1 = arith.constant 0 : i32
    %c0_i32_2 = arith.constant 0 : i32
    return %c0_i32, %c0_i32_0, %c0_i32_1 : i32, i32, i32
  }
  func.func @transform_1(%arg0: i32) -> (i32, i32) {
    %c0_i32 = arith.constant 0 : i32
    %c0_i32_0 = arith.constant 0 : i32
    %c0_i32_1 = arith.constant 0 : i32
    return %c0_i32, %c0_i32_0 : i32, i32
  }
  func.func @transform_2(%arg0: i32) -> (i32, i32) {
    %c0_i32 = arith.constant 0 : i32
    %c0_i32_0 = arith.constant 0 : i32
    %c0_i32_1 = arith.constant 0 : i32
    return %c0_i32, %c0_i32_0 : i32, i32
  }
  func.func @transform_3(%arg0: i32) -> (i32, i32) {
    %c0_i32 = arith.constant 0 : i32
    %c0_i32_0 = arith.constant 0 : i32
    %c0_i32_1 = arith.constant 0 : i32
    return %c0_i32, %c0_i32_0 : i32, i32
  }
}

module attributes {stable_mosaic.version = 11 : i64} {
  func.func @_attn_kernel(%arg0: i32, %arg1: i32, %arg2: memref<1x16x256xbf16, #tpu.memory_space<vmem>>, %arg3: memref<1x16x256xbf16, #tpu.memory_space<vmem>>, %arg4: memref<1x16x256xbf16, #tpu.memory_space<vmem>>, %arg5: memref<1x16x256xbf16, #tpu.memory_space<vmem>>) attributes {dimension_semantics = [#tpu.dimension_semantics<parallel>, #tpu.dimension_semantics<parallel>], iteration_bounds = array<i64: 2, 1>, scalar_prefetch = 0 : i64, scratch_operands = 0 : i64, tpu.core_type = #tpu.core_type<tc>, window_params = [{transform_indices = @transform_0, window_bounds = array<i64: 1, 16, 256>}, {transform_indices = @transform_1, window_bounds = array<i64: 1, 16, 256>}, {transform_indices = @transform_2, window_bounds = array<i64: 1, 16, 256>}, {transform_indices = @transform_3, window_bounds = array<i64: 1, 16, 256>}]} {
    %0 = tpu.iota {dimensions = array<i32: 0>} : vector<16x16xi32>
    %1 = tpu.iota {dimensions = array<i32: 1>} : vector<16x16xi32>
    %2 = arith.cmpi sgt, %1, %0 : vector<16x16xi32>
    %cst = arith.constant -1.000000e+09 : f32
    %cst_0 = arith.constant 0.000000e+00 : f32
    %3 = vector.broadcast %cst : f32 to vector<16x16xf32>
    %4 = vector.broadcast %cst_0 : f32 to vector<16x16xf32>
    %5 = arith.select %2, %3, %4 : vector<16x16xi1>, vector<16x16xf32>
    %c0 = arith.constant 0 : index
    %c0_1 = arith.constant 0 : index
    %c0_2 = arith.constant 0 : index
    %6 = vector.load %arg2[%c0, %c0_1, %c0_2] : memref<1x16x256xbf16, #tpu.memory_space<vmem>>, vector<1x16x64xbf16>
    %7 = vector.shape_cast %6 : vector<1x16x64xbf16> to vector<16x64xbf16>
    %c0_3 = arith.constant 0 : index
    %c0_4 = arith.constant 0 : index
    %c0_5 = arith.constant 0 : index
    %8 = vector.load %arg3[%c0_3, %c0_4, %c0_5] : memref<1x16x256xbf16, #tpu.memory_space<vmem>>, vector<1x16x64xbf16>
    %9 = vector.shape_cast %8 : vector<1x16x64xbf16> to vector<16x64xbf16>
    %c0_6 = arith.constant 0 : index
    %c0_7 = arith.constant 0 : index
    %c0_8 = arith.constant 0 : index
    %10 = vector.load %arg4[%c0_6, %c0_7, %c0_8] : memref<1x16x256xbf16, #tpu.memory_space<vmem>>, vector<1x16x64xbf16>
    %11 = vector.shape_cast %10 : vector<1x16x64xbf16> to vector<16x64xbf16>
    %cst_9 = arith.constant dense<0.000000e+00> : vector<16x16xf32>
    %12 = tpu.matmul %7, %9, %cst_9 {dimension_numbers = #tpu.dot_dimension_numbers<[1], [1], [0], [0], [0, 0, 1, 0], [], []>} : vector<16x64xbf16>, vector<16x64xbf16>, vector<16x16xf32> -> vector<16x16xf32>
    %cst_10 = arith.constant 1.250000e-01 : f32
    %13 = vector.broadcast %cst_10 : f32 to vector<16x16xf32>
    %14 = arith.mulf %12, %13 : vector<16x16xf32>
    %15 = arith.addf %14, %5 : vector<16x16xf32>
    %cst_11 = arith.constant dense<0xFF800000> : vector<16xf32>
    %16 = vector.multi_reduction <maximumf>, %15, %cst_11 [1] : vector<16x16xf32> to vector<16xf32>
    %17 = vector.shape_cast %16 : vector<16xf32> to vector<16x1xf32>
    %18 = vector.broadcast %17 : vector<16x1xf32> to vector<16x16xf32>
    %19 = arith.subf %15, %18 : vector<16x16xf32>
    %20 = math.exp %19 : vector<16x16xf32>
    %cst_12 = arith.constant dense<0.000000e+00> : vector<16xf32>
    %21 = vector.multi_reduction <add>, %20, %cst_12 [1] : vector<16x16xf32> to vector<16xf32>
    %22 = vector.shape_cast %21 : vector<16xf32> to vector<16x1xf32>
    %23 = arith.truncf %20 : vector<16x16xf32> to vector<16x16xbf16>
    %cst_13 = arith.constant dense<0.000000e+00> : vector<16x64xf32>
    %24 = tpu.matmul %23, %11, %cst_13 {dimension_numbers = #tpu.dot_dimension_numbers<[1], [0], [0], [1], [0, 0, 1, 1], [], []>} : vector<16x16xbf16>, vector<16x64xbf16>, vector<16x64xf32> -> vector<16x64xf32>
    %25 = tpu.reciprocal %22 {approx = true} : vector<16x1xf32> -> vector<16x1xf32>
    %26 = vector.broadcast %25 : vector<16x1xf32> to vector<16x64xf32>
    %27 = arith.mulf %24, %26 : vector<16x64xf32>
    %c0_14 = arith.constant 0 : index
    %c0_15 = arith.constant 0 : index
    %c64 = arith.constant 64 : index
    %28 = vector.load %arg2[%c0_14, %c0_15, %c64] : memref<1x16x256xbf16, #tpu.memory_space<vmem>>, vector<1x16x64xbf16>
    %29 = vector.shape_cast %28 : vector<1x16x64xbf16> to vector<16x64xbf16>
    %c0_16 = arith.constant 0 : index
    %c0_17 = arith.constant 0 : index
    %c64_18 = arith.constant 64 : index
    %30 = vector.load %arg3[%c0_16, %c0_17, %c64_18] : memref<1x16x256xbf16, #tpu.memory_space<vmem>>, vector<1x16x64xbf16>
    %31 = vector.shape_cast %30 : vector<1x16x64xbf16> to vector<16x64xbf16>
    %c0_19 = arith.constant 0 : index
    %c0_20 = arith.constant 0 : index
    %c64_21 = arith.constant 64 : index
    %32 = vector.load %arg4[%c0_19, %c0_20, %c64_21] : memref<1x16x256xbf16, #tpu.memory_space<vmem>>, vector<1x16x64xbf16>
    %33 = vector.shape_cast %32 : vector<1x16x64xbf16> to vector<16x64xbf16>
    %cst_22 = arith.constant dense<0.000000e+00> : vector<16x16xf32>
    %34 = tpu.matmul %29, %31, %cst_22 {dimension_numbers = #tpu.dot_dimension_numbers<[1], [1], [0], [0], [0, 0, 1, 0], [], []>} : vector<16x64xbf16>, vector<16x64xbf16>, vector<16x16xf32> -> vector<16x16xf32>
    %cst_23 = arith.constant 1.250000e-01 : f32
    %35 = vector.broadcast %cst_23 : f32 to vector<16x16xf32>
    %36 = arith.mulf %34, %35 : vector<16x16xf32>
    %37 = arith.addf %36, %5 : vector<16x16xf32>
    %cst_24 = arith.constant dense<0xFF800000> : vector<16xf32>
    %38 = vector.multi_reduction <maximumf>, %37, %cst_24 [1] : vector<16x16xf32> to vector<16xf32>
    %39 = vector.shape_cast %38 : vector<16xf32> to vector<16x1xf32>
    %40 = vector.broadcast %39 : vector<16x1xf32> to vector<16x16xf32>
    %41 = arith.subf %37, %40 : vector<16x16xf32>
    %42 = math.exp %41 : vector<16x16xf32>
    %cst_25 = arith.constant dense<0.000000e+00> : vector<16xf32>
    %43 = vector.multi_reduction <add>, %42, %cst_25 [1] : vector<16x16xf32> to vector<16xf32>
    %44 = vector.shape_cast %43 : vector<16xf32> to vector<16x1xf32>
    %45 = arith.truncf %42 : vector<16x16xf32> to vector<16x16xbf16>
    %cst_26 = arith.constant dense<0.000000e+00> : vector<16x64xf32>
    %46 = tpu.matmul %45, %33, %cst_26 {dimension_numbers = #tpu.dot_dimension_numbers<[1], [0], [0], [1], [0, 0, 1, 1], [], []>} : vector<16x16xbf16>, vector<16x64xbf16>, vector<16x64xf32> -> vector<16x64xf32>
    %47 = tpu.reciprocal %44 {approx = true} : vector<16x1xf32> -> vector<16x1xf32>
    %48 = vector.broadcast %47 : vector<16x1xf32> to vector<16x64xf32>
    %49 = arith.mulf %46, %48 : vector<16x64xf32>
    %c0_27 = arith.constant 0 : index
    %c0_28 = arith.constant 0 : index
    %c128 = arith.constant 128 : index
    %50 = vector.load %arg2[%c0_27, %c0_28, %c128] : memref<1x16x256xbf16, #tpu.memory_space<vmem>>, vector<1x16x64xbf16>
    %51 = vector.shape_cast %50 : vector<1x16x64xbf16> to vector<16x64xbf16>
    %c0_29 = arith.constant 0 : index
    %c0_30 = arith.constant 0 : index
    %c128_31 = arith.constant 128 : index
    %52 = vector.load %arg3[%c0_29, %c0_30, %c128_31] : memref<1x16x256xbf16, #tpu.memory_space<vmem>>, vector<1x16x64xbf16>
    %53 = vector.shape_cast %52 : vector<1x16x64xbf16> to vector<16x64xbf16>
    %c0_32 = arith.constant 0 : index
    %c0_33 = arith.constant 0 : index
    %c128_34 = arith.constant 128 : index
    %54 = vector.load %arg4[%c0_32, %c0_33, %c128_34] : memref<1x16x256xbf16, #tpu.memory_space<vmem>>, vector<1x16x64xbf16>
    %55 = vector.shape_cast %54 : vector<1x16x64xbf16> to vector<16x64xbf16>
    %cst_35 = arith.constant dense<0.000000e+00> : vector<16x16xf32>
    %56 = tpu.matmul %51, %53, %cst_35 {dimension_numbers = #tpu.dot_dimension_numbers<[1], [1], [0], [0], [0, 0, 1, 0], [], []>} : vector<16x64xbf16>, vector<16x64xbf16>, vector<16x16xf32> -> vector<16x16xf32>
    %cst_36 = arith.constant 1.250000e-01 : f32
    %57 = vector.broadcast %cst_36 : f32 to vector<16x16xf32>
    %58 = arith.mulf %56, %57 : vector<16x16xf32>
    %59 = arith.addf %58, %5 : vector<16x16xf32>
    %cst_37 = arith.constant dense<0xFF800000> : vector<16xf32>
    %60 = vector.multi_reduction <maximumf>, %59, %cst_37 [1] : vector<16x16xf32> to vector<16xf32>
    %61 = vector.shape_cast %60 : vector<16xf32> to vector<16x1xf32>
    %62 = vector.broadcast %61 : vector<16x1xf32> to vector<16x16xf32>
    %63 = arith.subf %59, %62 : vector<16x16xf32>
    %64 = math.exp %63 : vector<16x16xf32>
    %cst_38 = arith.constant dense<0.000000e+00> : vector<16xf32>
    %65 = vector.multi_reduction <add>, %64, %cst_38 [1] : vector<16x16xf32> to vector<16xf32>
    %66 = vector.shape_cast %65 : vector<16xf32> to vector<16x1xf32>
    %67 = arith.truncf %64 : vector<16x16xf32> to vector<16x16xbf16>
    %cst_39 = arith.constant dense<0.000000e+00> : vector<16x64xf32>
    %68 = tpu.matmul %67, %55, %cst_39 {dimension_numbers = #tpu.dot_dimension_numbers<[1], [0], [0], [1], [0, 0, 1, 1], [], []>} : vector<16x16xbf16>, vector<16x64xbf16>, vector<16x64xf32> -> vector<16x64xf32>
    %69 = tpu.reciprocal %66 {approx = true} : vector<16x1xf32> -> vector<16x1xf32>
    %70 = vector.broadcast %69 : vector<16x1xf32> to vector<16x64xf32>
    %71 = arith.mulf %68, %70 : vector<16x64xf32>
    %c0_40 = arith.constant 0 : index
    %c0_41 = arith.constant 0 : index
    %c192 = arith.constant 192 : index
    %72 = vector.load %arg2[%c0_40, %c0_41, %c192] : memref<1x16x256xbf16, #tpu.memory_space<vmem>>, vector<1x16x64xbf16>
    %73 = vector.shape_cast %72 : vector<1x16x64xbf16> to vector<16x64xbf16>
    %c0_42 = arith.constant 0 : index
    %c0_43 = arith.constant 0 : index
    %c192_44 = arith.constant 192 : index
    %74 = vector.load %arg3[%c0_42, %c0_43, %c192_44] : memref<1x16x256xbf16, #tpu.memory_space<vmem>>, vector<1x16x64xbf16>
    %75 = vector.shape_cast %74 : vector<1x16x64xbf16> to vector<16x64xbf16>
    %c0_45 = arith.constant 0 : index
    %c0_46 = arith.constant 0 : index
    %c192_47 = arith.constant 192 : index
    %76 = vector.load %arg4[%c0_45, %c0_46, %c192_47] : memref<1x16x256xbf16, #tpu.memory_space<vmem>>, vector<1x16x64xbf16>
    %77 = vector.shape_cast %76 : vector<1x16x64xbf16> to vector<16x64xbf16>
    %cst_48 = arith.constant dense<0.000000e+00> : vector<16x16xf32>
    %78 = tpu.matmul %73, %75, %cst_48 {dimension_numbers = #tpu.dot_dimension_numbers<[1], [1], [0], [0], [0, 0, 1, 0], [], []>} : vector<16x64xbf16>, vector<16x64xbf16>, vector<16x16xf32> -> vector<16x16xf32>
    %cst_49 = arith.constant 1.250000e-01 : f32
    %79 = vector.broadcast %cst_49 : f32 to vector<16x16xf32>
    %80 = arith.mulf %78, %79 : vector<16x16xf32>
    %81 = arith.addf %80, %5 : vector<16x16xf32>
    %cst_50 = arith.constant dense<0xFF800000> : vector<16xf32>
    %82 = vector.multi_reduction <maximumf>, %81, %cst_50 [1] : vector<16x16xf32> to vector<16xf32>
    %83 = vector.shape_cast %82 : vector<16xf32> to vector<16x1xf32>
    %84 = vector.broadcast %83 : vector<16x1xf32> to vector<16x16xf32>
    %85 = arith.subf %81, %84 : vector<16x16xf32>
    %86 = math.exp %85 : vector<16x16xf32>
    %cst_51 = arith.constant dense<0.000000e+00> : vector<16xf32>
    %87 = vector.multi_reduction <add>, %86, %cst_51 [1] : vector<16x16xf32> to vector<16xf32>
    %88 = vector.shape_cast %87 : vector<16xf32> to vector<16x1xf32>
    %89 = arith.truncf %86 : vector<16x16xf32> to vector<16x16xbf16>
    %cst_52 = arith.constant dense<0.000000e+00> : vector<16x64xf32>
    %90 = tpu.matmul %89, %77, %cst_52 {dimension_numbers = #tpu.dot_dimension_numbers<[1], [0], [0], [1], [0, 0, 1, 1], [], []>} : vector<16x16xbf16>, vector<16x64xbf16>, vector<16x64xf32> -> vector<16x64xf32>
    %91 = tpu.reciprocal %88 {approx = true} : vector<16x1xf32> -> vector<16x1xf32>
    %92 = vector.broadcast %91 : vector<16x1xf32> to vector<16x64xf32>
    %93 = arith.mulf %90, %92 : vector<16x64xf32>
    %94 = tpu.concatenate %27, %49, %71, %93 in 1 : vector<16x64xf32>, vector<16x64xf32>, vector<16x64xf32>, vector<16x64xf32> -> vector<16x256xf32>
    %95 = arith.truncf %94 : vector<16x256xf32> to vector<16x256xbf16>
    %c0_53 = arith.constant 0 : index
    %c0_54 = arith.constant 0 : index
    %c0_55 = arith.constant 0 : index
    %96 = vector.load %arg5[%c0_53, %c0_54, %c0_55] : memref<1x16x256xbf16, #tpu.memory_space<vmem>>, vector<1x16x256xbf16>
    %97 = vector.shape_cast %96 : vector<1x16x256xbf16> to vector<16x256xbf16>
    %98 = vector.shape_cast %95 : vector<16x256xbf16> to vector<1x16x256xbf16>
    tpu.vector_store %arg5[%c0_53, %c0_54, %c0_55], %98 {strides = array<i32>} : memref<1x16x256xbf16, #tpu.memory_space<vmem>>, vector<1x16x256xbf16>,
    return
  }
  func.func @transform_0(%arg0: i32, %arg1: i32) -> (i32, i32, i32) {
    %c0_i32 = arith.constant 0 : i32
    %c0_i32_0 = arith.constant 0 : i32
    return %arg0, %c0_i32, %arg1 : i32, i32, i32
  }
  func.func @transform_1(%arg0: i32, %arg1: i32) -> (i32, i32, i32) {
    %c1_i32 = arith.constant 1 : i32
    %0 = arith.addi %c1_i32, %arg1 : i32
    %c0_i32 = arith.constant 0 : i32
    %c0_i32_0 = arith.constant 0 : i32
    return %arg0, %c0_i32, %0 : i32, i32, i32
  }
  func.func @transform_2(%arg0: i32, %arg1: i32) -> (i32, i32, i32) {
    %c2_i32 = arith.constant 2 : i32
    %0 = arith.addi %c2_i32, %arg1 : i32
    %c0_i32 = arith.constant 0 : i32
    %c0_i32_0 = arith.constant 0 : i32
    return %arg0, %c0_i32, %0 : i32, i32, i32
  }
  func.func @transform_3(%arg0: i32, %arg1: i32) -> (i32, i32, i32) {
    %c0_i32 = arith.constant 0 : i32
    %c0_i32_0 = arith.constant 0 : i32
    return %arg0, %c0_i32, %arg1 : i32, i32, i32
  }
}

module attributes {stable_mosaic.version = 11 : i64} {
  func.func @_norm_matmul_kernel(%arg0: i32, %arg1: memref<1x32x256xf32, #tpu.memory_space<vmem>>, %arg2: memref<1x256xf32, #tpu.memory_space<vmem>>, %arg3: memref<1x256xf32, #tpu.memory_space<vmem>>, %arg4: memref<256x768xbf16, #tpu.memory_space<vmem>>, %arg5: memref<1x768xf32, #tpu.memory_space<vmem>>, %arg6: memref<32x768xbf16, #tpu.memory_space<vmem>>, %arg7: memref<32x256xbf16, #tpu.memory_space<vmem>>) attributes {dimension_semantics = [#tpu.dimension_semantics<arbitrary>], iteration_bounds = array<i64: 1>, scalar_prefetch = 0 : i64, scratch_operands = 1 : i64, tpu.core_type = #tpu.core_type<tc>, window_params = [{pipeline_mode = #tpu.pipeline_mode<synchronous>, transform_indices = @transform_0, window_bounds = array<i64: 1, 32, 256>}, {pipeline_mode = #tpu.pipeline_mode<synchronous>, transform_indices = @transform_1, window_bounds = array<i64: 1, 256>}, {pipeline_mode = #tpu.pipeline_mode<synchronous>, transform_indices = @transform_2, window_bounds = array<i64: 1, 256>}, {transform_indices = @transform_3, window_bounds = array<i64: 256, 768>}, {transform_indices = @transform_4, window_bounds = array<i64: 1, 768>}, {transform_indices = @transform_5, window_bounds = array<i64: 32, 768>}]} {
    %c0_i32 = arith.constant 0 : i32
    %0 = arith.cmpi eq, %arg0, %c0_i32 : i32
    %1 = arith.extui %0 : i1 to i32
    %c0_i32_0 = arith.constant 0 : i32
    %2 = arith.cmpi ne, %1, %c0_i32_0 : i32
    scf.if %2 {
      %c0_8 = arith.constant 0 : index
      %c0_9 = arith.constant 0 : index
      %c0_10 = arith.constant 0 : index
      %11 = vector.load %arg1[%c0_8, %c0_9, %c0_10] : memref<1x32x256xf32, #tpu.memory_space<vmem>>, vector<1x32x256xf32>
      %cst_11 = arith.constant dense<0.000000e+00> : vector<32x256xf32>
      %12 = vector.multi_reduction <add>, %11, %cst_11 [0] : vector<1x32x256xf32> to vector<32x256xf32>
      %cst_12 = arith.constant dense<0.000000e+00> : vector<32xf32>
      %13 = vector.multi_reduction <add>, %12, %cst_12 [1] : vector<32x256xf32> to vector<32xf32>
      %14 = vector.shape_cast %13 : vector<32xf32> to vector<32x1xf32>
      %cst_13 = arith.constant 2.560000e+02 : f32
      %15 = vector.broadcast %cst_13 : f32 to vector<32x1xf32>
      %16 = arith.divf %14, %15 : vector<32x1xf32>
      %17 = vector.broadcast %16 : vector<32x1xf32> to vector<32x256xf32>
      %18 = arith.subf %12, %17 : vector<32x256xf32>
      %19 = arith.mulf %18, %18 : vector<32x256xf32>
      %cst_14 = arith.constant dense<0.000000e+00> : vector<32xf32>
      %20 = vector.multi_reduction <add>, %19, %cst_14 [1] : vector<32x256xf32> to vector<32xf32>
      %21 = vector.shape_cast %20 : vector<32xf32> to vector<32x1xf32>
      %cst_15 = arith.constant 2.560000e+02 : f32
      %22 = vector.broadcast %cst_15 : f32 to vector<32x1xf32>
      %23 = arith.divf %21, %22 : vector<32x1xf32>
      %cst_16 = arith.constant 9.99999974E-6 : f32
      %24 = vector.broadcast %cst_16 : f32 to vector<32x1xf32>
      %25 = arith.addf %23, %24 : vector<32x1xf32>
      %26 = math.rsqrt %25 : vector<32x1xf32>
      %27 = vector.broadcast %26 : vector<32x1xf32> to vector<32x256xf32>
      %28 = arith.mulf %18, %27 : vector<32x256xf32>
      %c0_17 = arith.constant 0 : index
      %c0_18 = arith.constant 0 : index
      %29 = vector.load %arg2[%c0_17, %c0_18] : memref<1x256xf32, #tpu.memory_space<vmem>>, vector<1x256xf32>
      %30 = vector.broadcast %29 : vector<1x256xf32> to vector<32x256xf32>
      %31 = arith.mulf %28, %30 : vector<32x256xf32>
      %c0_19 = arith.constant 0 : index
      %c0_20 = arith.constant 0 : index
      %32 = vector.load %arg3[%c0_19, %c0_20] : memref<1x256xf32, #tpu.memory_space<vmem>>, vector<1x256xf32>
      %33 = vector.broadcast %32 : vector<1x256xf32> to vector<32x256xf32>
      %34 = arith.addf %31, %33 : vector<32x256xf32>
      %35 = arith.truncf %34 : vector<32x256xf32> to vector<32x256xbf16>
      %c0_21 = arith.constant 0 : index
      %c0_22 = arith.constant 0 : index
      %36 = vector.load %arg7[%c0_21, %c0_22] : memref<32x256xbf16, #tpu.memory_space<vmem>>, vector<32x256xbf16>
      tpu.vector_store %arg7[%c0_21, %c0_22], %35 {strides = array<i32>} : memref<32x256xbf16, #tpu.memory_space<vmem>>, vector<32x256xbf16>,
    } else {
    }
    %c0 = arith.constant 0 : index
    %c0_1 = arith.constant 0 : index
    %3 = vector.load %arg7[%c0, %c0_1] : memref<32x256xbf16, #tpu.memory_space<vmem>>, vector<32x256xbf16>
    %c0_2 = arith.constant 0 : index
    %c0_3 = arith.constant 0 : index
    %4 = vector.load %arg4[%c0_2, %c0_3] : memref<256x768xbf16, #tpu.memory_space<vmem>>, vector<256x768xbf16>
    %cst = arith.constant dense<0.000000e+00> : vector<32x768xf32>
    %5 = tpu.matmul %3, %4, %cst {dimension_numbers = #tpu.dot_dimension_numbers<[1], [0], [0], [1], [0, 0, 1, 1], [], []>} : vector<32x256xbf16>, vector<256x768xbf16>, vector<32x768xf32> -> vector<32x768xf32>
    %c0_4 = arith.constant 0 : index
    %c0_5 = arith.constant 0 : index
    %6 = vector.load %arg5[%c0_4, %c0_5] : memref<1x768xf32, #tpu.memory_space<vmem>>, vector<1x768xf32>
    %7 = vector.broadcast %6 : vector<1x768xf32> to vector<32x768xf32>
    %8 = arith.addf %5, %7 : vector<32x768xf32>
    %9 = arith.truncf %8 : vector<32x768xf32> to vector<32x768xbf16>
    %c0_6 = arith.constant 0 : index
    %c0_7 = arith.constant 0 : index
    %10 = vector.load %arg6[%c0_6, %c0_7] : memref<32x768xbf16, #tpu.memory_space<vmem>>, vector<32x768xbf16>
    tpu.vector_store %arg6[%c0_6, %c0_7], %9 {strides = array<i32>} : memref<32x768xbf16, #tpu.memory_space<vmem>>, vector<32x768xbf16>,
    return
  }
  func.func @transform_0(%arg0: i32) -> (i32, i32, i32) {
    %c0_i32 = arith.constant 0 : i32
    %c0_i32_0 = arith.constant 0 : i32
    %c0_i32_1 = arith.constant 0 : i32
    %c0_i32_2 = arith.constant 0 : i32
    return %c0_i32, %c0_i32_0, %c0_i32_1 : i32, i32, i32
  }
  func.func @transform_1(%arg0: i32) -> (i32, i32) {
    %c0_i32 = arith.constant 0 : i32
    %c0_i32_0 = arith.constant 0 : i32
    %c0_i32_1 = arith.constant 0 : i32
    return %c0_i32, %c0_i32_0 : i32, i32
  }
  func.func @transform_2(%arg0: i32) -> (i32, i32) {
    %c0_i32 = arith.constant 0 : i32
    %c0_i32_0 = arith.constant 0 : i32
    %c0_i32_1 = arith.constant 0 : i32
    return %c0_i32, %c0_i32_0 : i32, i32
  }
  func.func @transform_3(%arg0: i32) -> (i32, i32) {
    %c0_i32 = arith.constant 0 : i32
    %c0_i32_0 = arith.constant 0 : i32
    return %c0_i32, %arg0 : i32, i32
  }
  func.func @transform_4(%arg0: i32) -> (i32, i32) {
    %c0_i32 = arith.constant 0 : i32
    %c0_i32_0 = arith.constant 0 : i32
    return %c0_i32, %arg0 : i32, i32
  }
  func.func @transform_5(%arg0: i32) -> (i32, i32) {
    %c0_i32 = arith.constant 0 : i32
    %c0_i32_0 = arith.constant 0 : i32
    return %c0_i32, %arg0 : i32, i32
  }
}

module attributes {stable_mosaic.version = 11 : i64} {
  func.func @_proj_residual_kernel(%arg0: i32, %arg1: memref<32x256xbf16, #tpu.memory_space<vmem>>, %arg2: memref<256x256xbf16, #tpu.memory_space<vmem>>, %arg3: memref<1x256xf32, #tpu.memory_space<vmem>>, %arg4: memref<1x32x256xf32, #tpu.memory_space<vmem>>, %arg5: memref<32x256xf32, #tpu.memory_space<vmem>>) attributes {dimension_semantics = [#tpu.dimension_semantics<parallel>], iteration_bounds = array<i64: 1>, scalar_prefetch = 0 : i64, scratch_operands = 0 : i64, tpu.core_type = #tpu.core_type<tc>, window_params = [{pipeline_mode = #tpu.pipeline_mode<synchronous>, transform_indices = @transform_0, window_bounds = array<i64: 32, 256>}, {transform_indices = @transform_1, window_bounds = array<i64: 256, 256>}, {transform_indices = @transform_2, window_bounds = array<i64: 1, 256>}, {transform_indices = @transform_3, window_bounds = array<i64: 1, 32, 256>}, {transform_indices = @transform_4, window_bounds = array<i64: 32, 256>}]} {
    %c0 = arith.constant 0 : index
    %c0_0 = arith.constant 0 : index
    %0 = vector.load %arg1[%c0, %c0_0] : memref<32x256xbf16, #tpu.memory_space<vmem>>, vector<32x256xbf16>
    %c0_1 = arith.constant 0 : index
    %c0_2 = arith.constant 0 : index
    %1 = vector.load %arg2[%c0_1, %c0_2] : memref<256x256xbf16, #tpu.memory_space<vmem>>, vector<256x256xbf16>
    %cst = arith.constant dense<0.000000e+00> : vector<32x256xf32>
    %2 = tpu.matmul %0, %1, %cst {dimension_numbers = #tpu.dot_dimension_numbers<[1], [0], [0], [1], [0, 0, 1, 1], [], []>} : vector<32x256xbf16>, vector<256x256xbf16>, vector<32x256xf32> -> vector<32x256xf32>
    %c0_3 = arith.constant 0 : index
    %c0_4 = arith.constant 0 : index
    %c0_5 = arith.constant 0 : index
    %3 = vector.load %arg4[%c0_3, %c0_4, %c0_5] : memref<1x32x256xf32, #tpu.memory_space<vmem>>, vector<1x32x256xf32>
    %cst_6 = arith.constant dense<0.000000e+00> : vector<32x256xf32>
    %4 = vector.multi_reduction <add>, %3, %cst_6 [0] : vector<1x32x256xf32> to vector<32x256xf32>
    %5 = arith.addf %2, %4 : vector<32x256xf32>
    %c0_7 = arith.constant 0 : index
    %c0_8 = arith.constant 0 : index
    %6 = vector.load %arg3[%c0_7, %c0_8] : memref<1x256xf32, #tpu.memory_space<vmem>>, vector<1x256xf32>
    %7 = vector.broadcast %6 : vector<1x256xf32> to vector<32x256xf32>
    %8 = arith.addf %5, %7 : vector<32x256xf32>
    %c0_9 = arith.constant 0 : index
    %c0_10 = arith.constant 0 : index
    %9 = vector.load %arg5[%c0_9, %c0_10] : memref<32x256xf32, #tpu.memory_space<vmem>>, vector<32x256xf32>
    tpu.vector_store %arg5[%c0_9, %c0_10], %8 {strides = array<i32>} : memref<32x256xf32, #tpu.memory_space<vmem>>, vector<32x256xf32>,
    return
  }
  func.func @transform_0(%arg0: i32) -> (i32, i32) {
    %c0_i32 = arith.constant 0 : i32
    %c0_i32_0 = arith.constant 0 : i32
    %c0_i32_1 = arith.constant 0 : i32
    return %c0_i32, %c0_i32_0 : i32, i32
  }
  func.func @transform_1(%arg0: i32) -> (i32, i32) {
    %c0_i32 = arith.constant 0 : i32
    %c0_i32_0 = arith.constant 0 : i32
    return %c0_i32, %arg0 : i32, i32
  }
  func.func @transform_2(%arg0: i32) -> (i32, i32) {
    %c0_i32 = arith.constant 0 : i32
    %c0_i32_0 = arith.constant 0 : i32
    return %c0_i32, %arg0 : i32, i32
  }
  func.func @transform_3(%arg0: i32) -> (i32, i32, i32) {
    %c0_i32 = arith.constant 0 : i32
    %c0_i32_0 = arith.constant 0 : i32
    %c0_i32_1 = arith.constant 0 : i32
    return %c0_i32, %c0_i32_0, %arg0 : i32, i32, i32
  }
  func.func @transform_4(%arg0: i32) -> (i32, i32) {
    %c0_i32 = arith.constant 0 : i32
    %c0_i32_0 = arith.constant 0 : i32
    return %c0_i32, %arg0 : i32, i32
  }
}

module attributes {stable_mosaic.version = 11 : i64} {
  func.func @_clip_ffn_kernel(%arg0: i32, %arg1: i32, %arg2: memref<32x256xf32, #tpu.memory_space<vmem>>, %arg3: memref<1x256xf32, #tpu.memory_space<vmem>>, %arg4: memref<1x256xf32, #tpu.memory_space<vmem>>, %arg5: memref<256x512xbf16, #tpu.memory_space<vmem>>, %arg6: memref<1x512xf32, #tpu.memory_space<vmem>>, %arg7: memref<512x256xbf16, #tpu.memory_space<vmem>>, %arg8: memref<1x256xf32, #tpu.memory_space<vmem>>, %arg9: memref<1x32x256xf32, #tpu.memory_space<vmem>>, %arg10: memref<32x256xbf16, #tpu.memory_space<vmem>>) attributes {dimension_semantics = [#tpu.dimension_semantics<parallel>, #tpu.dimension_semantics<arbitrary>], iteration_bounds = array<i64: 2, 1>, scalar_prefetch = 0 : i64, scratch_operands = 1 : i64, tpu.core_type = #tpu.core_type<tc>, window_params = [{pipeline_mode = #tpu.pipeline_mode<synchronous>, transform_indices = @transform_0, window_bounds = array<i64: 32, 256>}, {pipeline_mode = #tpu.pipeline_mode<synchronous>, transform_indices = @transform_1, window_bounds = array<i64: 1, 256>}, {pipeline_mode = #tpu.pipeline_mode<synchronous>, transform_indices = @transform_2, window_bounds = array<i64: 1, 256>}, {transform_indices = @transform_3, window_bounds = array<i64: 256, 512>}, {transform_indices = @transform_4, window_bounds = array<i64: 1, 512>}, {transform_indices = @transform_5, window_bounds = array<i64: 512, 256>}, {pipeline_mode = #tpu.pipeline_mode<synchronous>, transform_indices = @transform_6, window_bounds = array<i64: 1, 256>}, {transform_indices = @transform_7, window_bounds = array<i64: 1, 32, 256>}]} {
    %c0_i32 = arith.constant 0 : i32
    %0 = arith.cmpi eq, %arg1, %c0_i32 : i32
    %1 = arith.extui %0 : i1 to i32
    %c0_i32_0 = arith.constant 0 : i32
    %2 = arith.cmpi ne, %1, %c0_i32_0 : i32
    scf.if %2 {
      %c0_17 = arith.constant 0 : index
      %c0_18 = arith.constant 0 : index
      %26 = vector.load %arg2[%c0_17, %c0_18] : memref<32x256xf32, #tpu.memory_space<vmem>>, vector<32x256xf32>
      %cst_19 = arith.constant dense<0.000000e+00> : vector<32xf32>
      %27 = vector.multi_reduction <add>, %26, %cst_19 [1] : vector<32x256xf32> to vector<32xf32>
      %28 = vector.shape_cast %27 : vector<32xf32> to vector<32x1xf32>
      %cst_20 = arith.constant 2.560000e+02 : f32
      %29 = vector.broadcast %cst_20 : f32 to vector<32x1xf32>
      %30 = arith.divf %28, %29 : vector<32x1xf32>
      %31 = vector.broadcast %30 : vector<32x1xf32> to vector<32x256xf32>
      %32 = arith.subf %26, %31 : vector<32x256xf32>
      %33 = arith.mulf %32, %32 : vector<32x256xf32>
      %cst_21 = arith.constant dense<0.000000e+00> : vector<32xf32>
      %34 = vector.multi_reduction <add>, %33, %cst_21 [1] : vector<32x256xf32> to vector<32xf32>
      %35 = vector.shape_cast %34 : vector<32xf32> to vector<32x1xf32>
      %cst_22 = arith.constant 2.560000e+02 : f32
      %36 = vector.broadcast %cst_22 : f32 to vector<32x1xf32>
      %37 = arith.divf %35, %36 : vector<32x1xf32>
      %cst_23 = arith.constant 9.99999974E-6 : f32
      %38 = vector.broadcast %cst_23 : f32 to vector<32x1xf32>
      %39 = arith.addf %37, %38 : vector<32x1xf32>
      %40 = math.rsqrt %39 : vector<32x1xf32>
      %41 = vector.broadcast %40 : vector<32x1xf32> to vector<32x256xf32>
      %42 = arith.mulf %32, %41 : vector<32x256xf32>
      %c0_24 = arith.constant 0 : index
      %c0_25 = arith.constant 0 : index
      %43 = vector.load %arg3[%c0_24, %c0_25] : memref<1x256xf32, #tpu.memory_space<vmem>>, vector<1x256xf32>
      %44 = vector.broadcast %43 : vector<1x256xf32> to vector<32x256xf32>
      %45 = arith.mulf %42, %44 : vector<32x256xf32>
      %c0_26 = arith.constant 0 : index
      %c0_27 = arith.constant 0 : index
      %46 = vector.load %arg4[%c0_26, %c0_27] : memref<1x256xf32, #tpu.memory_space<vmem>>, vector<1x256xf32>
      %47 = vector.broadcast %46 : vector<1x256xf32> to vector<32x256xf32>
      %48 = arith.addf %45, %47 : vector<32x256xf32>
      %49 = arith.truncf %48 : vector<32x256xf32> to vector<32x256xbf16>
      %c0_28 = arith.constant 0 : index
      %c0_29 = arith.constant 0 : index
      %50 = vector.load %arg10[%c0_28, %c0_29] : memref<32x256xbf16, #tpu.memory_space<vmem>>, vector<32x256xbf16>
      tpu.vector_store %arg10[%c0_28, %c0_29], %49 {strides = array<i32>} : memref<32x256xbf16, #tpu.memory_space<vmem>>, vector<32x256xbf16>,
      %c0_30 = arith.constant 0 : index
      %c0_31 = arith.constant 0 : index
      %51 = vector.load %arg8[%c0_30, %c0_31] : memref<1x256xf32, #tpu.memory_space<vmem>>, vector<1x256xf32>
      %52 = vector.broadcast %51 : vector<1x256xf32> to vector<32x256xf32>
      %53 = arith.addf %26, %52 : vector<32x256xf32>
      %c0_i32_32 = arith.constant 0 : i32
      %54 = arith.cmpi eq, %arg0, %c0_i32_32 : i32
      %55 = arith.extui %54 : i1 to i32
      %56 = arith.sitofp %55 : i32 to f32
      %57 = vector.broadcast %56 : f32 to vector<32x256xf32>
      %58 = arith.mulf %53, %57 : vector<32x256xf32>
      %c0_33 = arith.constant 0 : index
      %c0_34 = arith.constant 0 : index
      %c0_35 = arith.constant 0 : index
      %59 = vector.load %arg9[%c0_33, %c0_34, %c0_35] : memref<1x32x256xf32, #tpu.memory_space<vmem>>, vector<1x32x256xf32>
      %60 = vector.shape_cast %59 : vector<1x32x256xf32> to vector<32x256xf32>
      %61 = vector.shape_cast %58 : vector<32x256xf32> to vector<1x32x256xf32>
      tpu.vector_store %arg9[%c0_33, %c0_34, %c0_35], %61 {strides = array<i32>} : memref<1x32x256xf32, #tpu.memory_space<vmem>>, vector<1x32x256xf32>,
    } else {
    }
    %c0 = arith.constant 0 : index
    %c0_1 = arith.constant 0 : index
    %3 = vector.load %arg10[%c0, %c0_1] : memref<32x256xbf16, #tpu.memory_space<vmem>>, vector<32x256xbf16>
    %c0_2 = arith.constant 0 : index
    %c0_3 = arith.constant 0 : index
    %4 = vector.load %arg5[%c0_2, %c0_3] : memref<256x512xbf16, #tpu.memory_space<vmem>>, vector<256x512xbf16>
    %cst = arith.constant dense<0.000000e+00> : vector<32x512xf32>
    %5 = tpu.matmul %3, %4, %cst {dimension_numbers = #tpu.dot_dimension_numbers<[1], [0], [0], [1], [0, 0, 1, 1], [], []>} : vector<32x256xbf16>, vector<256x512xbf16>, vector<32x512xf32> -> vector<32x512xf32>
    %c0_4 = arith.constant 0 : index
    %c0_5 = arith.constant 0 : index
    %6 = vector.load %arg6[%c0_4, %c0_5] : memref<1x512xf32, #tpu.memory_space<vmem>>, vector<1x512xf32>
    %7 = vector.broadcast %6 : vector<1x512xf32> to vector<32x512xf32>
    %8 = arith.addf %5, %7 : vector<32x512xf32>
    %cst_6 = arith.constant 1.702000e+00 : f32
    %9 = vector.broadcast %cst_6 : f32 to vector<32x512xf32>
    %10 = arith.mulf %9, %8 : vector<32x512xf32>
    %11 = arith.negf %10 : vector<32x512xf32>
    %12 = math.exp %11 : vector<32x512xf32>
    %cst_7 = arith.constant 1.000000e+00 : f32
    %13 = vector.broadcast %cst_7 : f32 to vector<32x512xf32>
    %14 = arith.addf %13, %12 : vector<32x512xf32>
    %15 = arith.divf %13, %14 : vector<32x512xf32>
    %16 = arith.mulf %8, %15 : vector<32x512xf32>
    %17 = arith.truncf %16 : vector<32x512xf32> to vector<32x512xbf16>
    %c0_8 = arith.constant 0 : index
    %c0_9 = arith.constant 0 : index
    %c0_10 = arith.constant 0 : index
    %18 = vector.load %arg9[%c0_8, %c0_9, %c0_10] : memref<1x32x256xf32, #tpu.memory_space<vmem>>, vector<1x32x256xf32>
    %19 = vector.shape_cast %18 : vector<1x32x256xf32> to vector<32x256xf32>
    %c0_11 = arith.constant 0 : index
    %c0_12 = arith.constant 0 : index
    %20 = vector.load %arg7[%c0_11, %c0_12] : memref<512x256xbf16, #tpu.memory_space<vmem>>, vector<512x256xbf16>
    %cst_13 = arith.constant dense<0.000000e+00> : vector<32x256xf32>
    %21 = tpu.matmul %17, %20, %cst_13 {dimension_numbers = #tpu.dot_dimension_numbers<[1], [0], [0], [1], [0, 0, 1, 1], [], []>} : vector<32x512xbf16>, vector<512x256xbf16>, vector<32x256xf32> -> vector<32x256xf32>
    %22 = arith.addf %19, %21 : vector<32x256xf32>
    %c0_14 = arith.constant 0 : index
    %c0_15 = arith.constant 0 : index
    %c0_16 = arith.constant 0 : index
    %23 = vector.load %arg9[%c0_14, %c0_15, %c0_16] : memref<1x32x256xf32, #tpu.memory_space<vmem>>, vector<1x32x256xf32>
    %24 = vector.shape_cast %23 : vector<1x32x256xf32> to vector<32x256xf32>
    %25 = vector.shape_cast %22 : vector<32x256xf32> to vector<1x32x256xf32>
    tpu.vector_store %arg9[%c0_14, %c0_15, %c0_16], %25 {strides = array<i32>} : memref<1x32x256xf32, #tpu.memory_space<vmem>>, vector<1x32x256xf32>,
    return
  }
  func.func @transform_0(%arg0: i32, %arg1: i32) -> (i32, i32) {
    %c0_i32 = arith.constant 0 : i32
    %c0_i32_0 = arith.constant 0 : i32
    %c0_i32_1 = arith.constant 0 : i32
    return %c0_i32, %c0_i32_0 : i32, i32
  }
  func.func @transform_1(%arg0: i32, %arg1: i32) -> (i32, i32) {
    %c0_i32 = arith.constant 0 : i32
    %c0_i32_0 = arith.constant 0 : i32
    %c0_i32_1 = arith.constant 0 : i32
    return %c0_i32, %c0_i32_0 : i32, i32
  }
  func.func @transform_2(%arg0: i32, %arg1: i32) -> (i32, i32) {
    %c0_i32 = arith.constant 0 : i32
    %c0_i32_0 = arith.constant 0 : i32
    %c0_i32_1 = arith.constant 0 : i32
    return %c0_i32, %c0_i32_0 : i32, i32
  }
  func.func @transform_3(%arg0: i32, %arg1: i32) -> (i32, i32) {
    %c1_i32 = arith.constant 1 : i32
    %0 = arith.muli %arg0, %c1_i32 : i32
    %1 = arith.addi %0, %arg1 : i32
    %c0_i32 = arith.constant 0 : i32
    %c0_i32_0 = arith.constant 0 : i32
    return %c0_i32, %1 : i32, i32
  }
  func.func @transform_4(%arg0: i32, %arg1: i32) -> (i32, i32) {
    %c1_i32 = arith.constant 1 : i32
    %0 = arith.muli %arg0, %c1_i32 : i32
    %1 = arith.addi %0, %arg1 : i32
    %c0_i32 = arith.constant 0 : i32
    %c0_i32_0 = arith.constant 0 : i32
    return %c0_i32, %1 : i32, i32
  }
  func.func @transform_5(%arg0: i32, %arg1: i32) -> (i32, i32) {
    %c1_i32 = arith.constant 1 : i32
    %0 = arith.muli %arg0, %c1_i32 : i32
    %1 = arith.addi %0, %arg1 : i32
    %c0_i32 = arith.constant 0 : i32
    %c0_i32_0 = arith.constant 0 : i32
    return %1, %c0_i32 : i32, i32
  }
  func.func @transform_6(%arg0: i32, %arg1: i32) -> (i32, i32) {
    %c0_i32 = arith.constant 0 : i32
    %c0_i32_0 = arith.constant 0 : i32
    %c0_i32_1 = arith.constant 0 : i32
    return %c0_i32, %c0_i32_0 : i32, i32
  }
  func.func @transform_7(%arg0: i32, %arg1: i32) -> (i32, i32, i32) {
    %c0_i32 = arith.constant 0 : i32
    %c0_i32_0 = arith.constant 0 : i32
    %c0_i32_1 = arith.constant 0 : i32
    return %arg0, %c0_i32, %c0_i32_0 : i32, i32, i32
  }
}

module attributes {stable_mosaic.version = 11 : i64} {
  func.func @_norm_matmul_kernel(%arg0: i32, %arg1: memref<2x32x256xf32, #tpu.memory_space<vmem>>, %arg2: memref<1x256xf32, #tpu.memory_space<vmem>>, %arg3: memref<1x256xf32, #tpu.memory_space<vmem>>, %arg4: memref<256x768xbf16, #tpu.memory_space<vmem>>, %arg5: memref<1x768xf32, #tpu.memory_space<vmem>>, %arg6: memref<32x768xbf16, #tpu.memory_space<vmem>>, %arg7: memref<32x256xbf16, #tpu.memory_space<vmem>>) attributes {dimension_semantics = [#tpu.dimension_semantics<arbitrary>], iteration_bounds = array<i64: 1>, scalar_prefetch = 0 : i64, scratch_operands = 1 : i64, tpu.core_type = #tpu.core_type<tc>, window_params = [{pipeline_mode = #tpu.pipeline_mode<synchronous>, transform_indices = @transform_0, window_bounds = array<i64: 2, 32, 256>}, {pipeline_mode = #tpu.pipeline_mode<synchronous>, transform_indices = @transform_1, window_bounds = array<i64: 1, 256>}, {pipeline_mode = #tpu.pipeline_mode<synchronous>, transform_indices = @transform_2, window_bounds = array<i64: 1, 256>}, {transform_indices = @transform_3, window_bounds = array<i64: 256, 768>}, {transform_indices = @transform_4, window_bounds = array<i64: 1, 768>}, {transform_indices = @transform_5, window_bounds = array<i64: 32, 768>}]} {
    %c0_i32 = arith.constant 0 : i32
    %0 = arith.cmpi eq, %arg0, %c0_i32 : i32
    %1 = arith.extui %0 : i1 to i32
    %c0_i32_0 = arith.constant 0 : i32
    %2 = arith.cmpi ne, %1, %c0_i32_0 : i32
    scf.if %2 {
      %c0_8 = arith.constant 0 : index
      %c0_9 = arith.constant 0 : index
      %c0_10 = arith.constant 0 : index
      %11 = vector.load %arg1[%c0_8, %c0_9, %c0_10] : memref<2x32x256xf32, #tpu.memory_space<vmem>>, vector<2x32x256xf32>
      %cst_11 = arith.constant dense<0.000000e+00> : vector<32x256xf32>
      %12 = vector.multi_reduction <add>, %11, %cst_11 [0] : vector<2x32x256xf32> to vector<32x256xf32>
      %cst_12 = arith.constant dense<0.000000e+00> : vector<32xf32>
      %13 = vector.multi_reduction <add>, %12, %cst_12 [1] : vector<32x256xf32> to vector<32xf32>
      %14 = vector.shape_cast %13 : vector<32xf32> to vector<32x1xf32>
      %cst_13 = arith.constant 2.560000e+02 : f32
      %15 = vector.broadcast %cst_13 : f32 to vector<32x1xf32>
      %16 = arith.divf %14, %15 : vector<32x1xf32>
      %17 = vector.broadcast %16 : vector<32x1xf32> to vector<32x256xf32>
      %18 = arith.subf %12, %17 : vector<32x256xf32>
      %19 = arith.mulf %18, %18 : vector<32x256xf32>
      %cst_14 = arith.constant dense<0.000000e+00> : vector<32xf32>
      %20 = vector.multi_reduction <add>, %19, %cst_14 [1] : vector<32x256xf32> to vector<32xf32>
      %21 = vector.shape_cast %20 : vector<32xf32> to vector<32x1xf32>
      %cst_15 = arith.constant 2.560000e+02 : f32
      %22 = vector.broadcast %cst_15 : f32 to vector<32x1xf32>
      %23 = arith.divf %21, %22 : vector<32x1xf32>
      %cst_16 = arith.constant 9.99999974E-6 : f32
      %24 = vector.broadcast %cst_16 : f32 to vector<32x1xf32>
      %25 = arith.addf %23, %24 : vector<32x1xf32>
      %26 = math.rsqrt %25 : vector<32x1xf32>
      %27 = vector.broadcast %26 : vector<32x1xf32> to vector<32x256xf32>
      %28 = arith.mulf %18, %27 : vector<32x256xf32>
      %c0_17 = arith.constant 0 : index
      %c0_18 = arith.constant 0 : index
      %29 = vector.load %arg2[%c0_17, %c0_18] : memref<1x256xf32, #tpu.memory_space<vmem>>, vector<1x256xf32>
      %30 = vector.broadcast %29 : vector<1x256xf32> to vector<32x256xf32>
      %31 = arith.mulf %28, %30 : vector<32x256xf32>
      %c0_19 = arith.constant 0 : index
      %c0_20 = arith.constant 0 : index
      %32 = vector.load %arg3[%c0_19, %c0_20] : memref<1x256xf32, #tpu.memory_space<vmem>>, vector<1x256xf32>
      %33 = vector.broadcast %32 : vector<1x256xf32> to vector<32x256xf32>
      %34 = arith.addf %31, %33 : vector<32x256xf32>
      %35 = arith.truncf %34 : vector<32x256xf32> to vector<32x256xbf16>
      %c0_21 = arith.constant 0 : index
      %c0_22 = arith.constant 0 : index
      %36 = vector.load %arg7[%c0_21, %c0_22] : memref<32x256xbf16, #tpu.memory_space<vmem>>, vector<32x256xbf16>
      tpu.vector_store %arg7[%c0_21, %c0_22], %35 {strides = array<i32>} : memref<32x256xbf16, #tpu.memory_space<vmem>>, vector<32x256xbf16>,
    } else {
    }
    %c0 = arith.constant 0 : index
    %c0_1 = arith.constant 0 : index
    %3 = vector.load %arg7[%c0, %c0_1] : memref<32x256xbf16, #tpu.memory_space<vmem>>, vector<32x256xbf16>
    %c0_2 = arith.constant 0 : index
    %c0_3 = arith.constant 0 : index
    %4 = vector.load %arg4[%c0_2, %c0_3] : memref<256x768xbf16, #tpu.memory_space<vmem>>, vector<256x768xbf16>
    %cst = arith.constant dense<0.000000e+00> : vector<32x768xf32>
    %5 = tpu.matmul %3, %4, %cst {dimension_numbers = #tpu.dot_dimension_numbers<[1], [0], [0], [1], [0, 0, 1, 1], [], []>} : vector<32x256xbf16>, vector<256x768xbf16>, vector<32x768xf32> -> vector<32x768xf32>
    %c0_4 = arith.constant 0 : index
    %c0_5 = arith.constant 0 : index
    %6 = vector.load %arg5[%c0_4, %c0_5] : memref<1x768xf32, #tpu.memory_space<vmem>>, vector<1x768xf32>
    %7 = vector.broadcast %6 : vector<1x768xf32> to vector<32x768xf32>
    %8 = arith.addf %5, %7 : vector<32x768xf32>
    %9 = arith.truncf %8 : vector<32x768xf32> to vector<32x768xbf16>
    %c0_6 = arith.constant 0 : index
    %c0_7 = arith.constant 0 : index
    %10 = vector.load %arg6[%c0_6, %c0_7] : memref<32x768xbf16, #tpu.memory_space<vmem>>, vector<32x768xbf16>
    tpu.vector_store %arg6[%c0_6, %c0_7], %9 {strides = array<i32>} : memref<32x768xbf16, #tpu.memory_space<vmem>>, vector<32x768xbf16>,
    return
  }
  func.func @transform_0(%arg0: i32) -> (i32, i32, i32) {
    %c0_i32 = arith.constant 0 : i32
    %c0_i32_0 = arith.constant 0 : i32
    %c0_i32_1 = arith.constant 0 : i32
    %c0_i32_2 = arith.constant 0 : i32
    return %c0_i32, %c0_i32_0, %c0_i32_1 : i32, i32, i32
  }
  func.func @transform_1(%arg0: i32) -> (i32, i32) {
    %c0_i32 = arith.constant 0 : i32
    %c0_i32_0 = arith.constant 0 : i32
    %c0_i32_1 = arith.constant 0 : i32
    return %c0_i32, %c0_i32_0 : i32, i32
  }
  func.func @transform_2(%arg0: i32) -> (i32, i32) {
    %c0_i32 = arith.constant 0 : i32
    %c0_i32_0 = arith.constant 0 : i32
    %c0_i32_1 = arith.constant 0 : i32
    return %c0_i32, %c0_i32_0 : i32, i32
  }
  func.func @transform_3(%arg0: i32) -> (i32, i32) {
    %c0_i32 = arith.constant 0 : i32
    %c0_i32_0 = arith.constant 0 : i32
    return %c0_i32, %arg0 : i32, i32
  }
  func.func @transform_4(%arg0: i32) -> (i32, i32) {
    %c0_i32 = arith.constant 0 : i32
    %c0_i32_0 = arith.constant 0 : i32
    return %c0_i32, %arg0 : i32, i32
  }
  func.func @transform_5(%arg0: i32) -> (i32, i32) {
    %c0_i32 = arith.constant 0 : i32
    %c0_i32_0 = arith.constant 0 : i32
    return %c0_i32, %arg0 : i32, i32
  }
}

module attributes {stable_mosaic.version = 11 : i64} {
  func.func @_proj_residual_kernel(%arg0: i32, %arg1: memref<32x256xbf16, #tpu.memory_space<vmem>>, %arg2: memref<256x256xbf16, #tpu.memory_space<vmem>>, %arg3: memref<1x256xf32, #tpu.memory_space<vmem>>, %arg4: memref<2x32x256xf32, #tpu.memory_space<vmem>>, %arg5: memref<32x256xf32, #tpu.memory_space<vmem>>) attributes {dimension_semantics = [#tpu.dimension_semantics<parallel>], iteration_bounds = array<i64: 1>, scalar_prefetch = 0 : i64, scratch_operands = 0 : i64, tpu.core_type = #tpu.core_type<tc>, window_params = [{pipeline_mode = #tpu.pipeline_mode<synchronous>, transform_indices = @transform_0, window_bounds = array<i64: 32, 256>}, {transform_indices = @transform_1, window_bounds = array<i64: 256, 256>}, {transform_indices = @transform_2, window_bounds = array<i64: 1, 256>}, {transform_indices = @transform_3, window_bounds = array<i64: 2, 32, 256>}, {transform_indices = @transform_4, window_bounds = array<i64: 32, 256>}]} {
    %c0 = arith.constant 0 : index
    %c0_0 = arith.constant 0 : index
    %0 = vector.load %arg1[%c0, %c0_0] : memref<32x256xbf16, #tpu.memory_space<vmem>>, vector<32x256xbf16>
    %c0_1 = arith.constant 0 : index
    %c0_2 = arith.constant 0 : index
    %1 = vector.load %arg2[%c0_1, %c0_2] : memref<256x256xbf16, #tpu.memory_space<vmem>>, vector<256x256xbf16>
    %cst = arith.constant dense<0.000000e+00> : vector<32x256xf32>
    %2 = tpu.matmul %0, %1, %cst {dimension_numbers = #tpu.dot_dimension_numbers<[1], [0], [0], [1], [0, 0, 1, 1], [], []>} : vector<32x256xbf16>, vector<256x256xbf16>, vector<32x256xf32> -> vector<32x256xf32>
    %c0_3 = arith.constant 0 : index
    %c0_4 = arith.constant 0 : index
    %c0_5 = arith.constant 0 : index
    %3 = vector.load %arg4[%c0_3, %c0_4, %c0_5] : memref<2x32x256xf32, #tpu.memory_space<vmem>>, vector<2x32x256xf32>
    %cst_6 = arith.constant dense<0.000000e+00> : vector<32x256xf32>
    %4 = vector.multi_reduction <add>, %3, %cst_6 [0] : vector<2x32x256xf32> to vector<32x256xf32>
    %5 = arith.addf %2, %4 : vector<32x256xf32>
    %c0_7 = arith.constant 0 : index
    %c0_8 = arith.constant 0 : index
    %6 = vector.load %arg3[%c0_7, %c0_8] : memref<1x256xf32, #tpu.memory_space<vmem>>, vector<1x256xf32>
    %7 = vector.broadcast %6 : vector<1x256xf32> to vector<32x256xf32>
    %8 = arith.addf %5, %7 : vector<32x256xf32>
    %c0_9 = arith.constant 0 : index
    %c0_10 = arith.constant 0 : index
    %9 = vector.load %arg5[%c0_9, %c0_10] : memref<32x256xf32, #tpu.memory_space<vmem>>, vector<32x256xf32>
    tpu.vector_store %arg5[%c0_9, %c0_10], %8 {strides = array<i32>} : memref<32x256xf32, #tpu.memory_space<vmem>>, vector<32x256xf32>,
    return
  }
  func.func @transform_0(%arg0: i32) -> (i32, i32) {
    %c0_i32 = arith.constant 0 : i32
    %c0_i32_0 = arith.constant 0 : i32
    %c0_i32_1 = arith.constant 0 : i32
    return %c0_i32, %c0_i32_0 : i32, i32
  }
  func.func @transform_1(%arg0: i32) -> (i32, i32) {
    %c0_i32 = arith.constant 0 : i32
    %c0_i32_0 = arith.constant 0 : i32
    return %c0_i32, %arg0 : i32, i32
  }
  func.func @transform_2(%arg0: i32) -> (i32, i32) {
    %c0_i32 = arith.constant 0 : i32
    %c0_i32_0 = arith.constant 0 : i32
    return %c0_i32, %arg0 : i32, i32
  }
  func.func @transform_3(%arg0: i32) -> (i32, i32, i32) {
    %c0_i32 = arith.constant 0 : i32
    %c0_i32_0 = arith.constant 0 : i32
    %c0_i32_1 = arith.constant 0 : i32
    return %c0_i32, %c0_i32_0, %arg0 : i32, i32, i32
  }
  func.func @transform_4(%arg0: i32) -> (i32, i32) {
    %c0_i32 = arith.constant 0 : i32
    %c0_i32_0 = arith.constant 0 : i32
    return %c0_i32, %arg0 : i32, i32
  }
}

module attributes {stable_mosaic.version = 11 : i64} {
  func.func @_norm_kernel(%arg0: i32, %arg1: memref<2x32x256xf32, #tpu.memory_space<vmem>>, %arg2: memref<1x256xf32, #tpu.memory_space<vmem>>, %arg3: memref<1x256xf32, #tpu.memory_space<vmem>>, %arg4: memref<32x256xf32, #tpu.memory_space<vmem>>) attributes {dimension_semantics = [#tpu.dimension_semantics<arbitrary>], iteration_bounds = array<i64: 1>, scalar_prefetch = 0 : i64, scratch_operands = 0 : i64, tpu.core_type = #tpu.core_type<tc>, window_params = [{pipeline_mode = #tpu.pipeline_mode<synchronous>, transform_indices = @transform_0, window_bounds = array<i64: 2, 32, 256>}, {pipeline_mode = #tpu.pipeline_mode<synchronous>, transform_indices = @transform_1, window_bounds = array<i64: 1, 256>}, {pipeline_mode = #tpu.pipeline_mode<synchronous>, transform_indices = @transform_2, window_bounds = array<i64: 1, 256>}, {pipeline_mode = #tpu.pipeline_mode<synchronous>, transform_indices = @transform_3, window_bounds = array<i64: 32, 256>}]} {
    %c0 = arith.constant 0 : index
    %c0_0 = arith.constant 0 : index
    %c0_1 = arith.constant 0 : index
    %0 = vector.load %arg1[%c0, %c0_0, %c0_1] : memref<2x32x256xf32, #tpu.memory_space<vmem>>, vector<2x32x256xf32>
    %cst = arith.constant dense<0.000000e+00> : vector<32x256xf32>
    %1 = vector.multi_reduction <add>, %0, %cst [0] : vector<2x32x256xf32> to vector<32x256xf32>
    %cst_2 = arith.constant dense<0.000000e+00> : vector<32xf32>
    %2 = vector.multi_reduction <add>, %1, %cst_2 [1] : vector<32x256xf32> to vector<32xf32>
    %3 = vector.shape_cast %2 : vector<32xf32> to vector<32x1xf32>
    %cst_3 = arith.constant 2.560000e+02 : f32
    %4 = vector.broadcast %cst_3 : f32 to vector<32x1xf32>
    %5 = arith.divf %3, %4 : vector<32x1xf32>
    %6 = vector.broadcast %5 : vector<32x1xf32> to vector<32x256xf32>
    %7 = arith.subf %1, %6 : vector<32x256xf32>
    %8 = arith.mulf %7, %7 : vector<32x256xf32>
    %cst_4 = arith.constant dense<0.000000e+00> : vector<32xf32>
    %9 = vector.multi_reduction <add>, %8, %cst_4 [1] : vector<32x256xf32> to vector<32xf32>
    %10 = vector.shape_cast %9 : vector<32xf32> to vector<32x1xf32>
    %cst_5 = arith.constant 2.560000e+02 : f32
    %11 = vector.broadcast %cst_5 : f32 to vector<32x1xf32>
    %12 = arith.divf %10, %11 : vector<32x1xf32>
    %cst_6 = arith.constant 9.99999974E-6 : f32
    %13 = vector.broadcast %cst_6 : f32 to vector<32x1xf32>
    %14 = arith.addf %12, %13 : vector<32x1xf32>
    %15 = math.rsqrt %14 : vector<32x1xf32>
    %16 = vector.broadcast %15 : vector<32x1xf32> to vector<32x256xf32>
    %17 = arith.mulf %7, %16 : vector<32x256xf32>
    %c0_7 = arith.constant 0 : index
    %c0_8 = arith.constant 0 : index
    %18 = vector.load %arg2[%c0_7, %c0_8] : memref<1x256xf32, #tpu.memory_space<vmem>>, vector<1x256xf32>
    %19 = vector.broadcast %18 : vector<1x256xf32> to vector<32x256xf32>
    %20 = arith.mulf %17, %19 : vector<32x256xf32>
    %c0_9 = arith.constant 0 : index
    %c0_10 = arith.constant 0 : index
    %21 = vector.load %arg3[%c0_9, %c0_10] : memref<1x256xf32, #tpu.memory_space<vmem>>, vector<1x256xf32>
    %22 = vector.broadcast %21 : vector<1x256xf32> to vector<32x256xf32>
    %23 = arith.addf %20, %22 : vector<32x256xf32>
    %c0_11 = arith.constant 0 : index
    %c0_12 = arith.constant 0 : index
    %24 = vector.load %arg4[%c0_11, %c0_12] : memref<32x256xf32, #tpu.memory_space<vmem>>, vector<32x256xf32>
    tpu.vector_store %arg4[%c0_11, %c0_12], %23 {strides = array<i32>} : memref<32x256xf32, #tpu.memory_space<vmem>>, vector<32x256xf32>,
    return
  }
  func.func @transform_0(%arg0: i32) -> (i32, i32, i32) {
    %c0_i32 = arith.constant 0 : i32
    %c0_i32_0 = arith.constant 0 : i32
    %c0_i32_1 = arith.constant 0 : i32
    %c0_i32_2 = arith.constant 0 : i32
    return %c0_i32, %c0_i32_0, %c0_i32_1 : i32, i32, i32
  }
  func.func @transform_1(%arg0: i32) -> (i32, i32) {
    %c0_i32 = arith.constant 0 : i32
    %c0_i32_0 = arith.constant 0 : i32
    %c0_i32_1 = arith.constant 0 : i32
    return %c0_i32, %c0_i32_0 : i32, i32
  }
  func.func @transform_2(%arg0: i32) -> (i32, i32) {
    %c0_i32 = arith.constant 0 : i32
    %c0_i32_0 = arith.constant 0 : i32
    %c0_i32_1 = arith.constant 0 : i32
    return %c0_i32, %c0_i32_0 : i32, i32
  }
  func.func @transform_3(%arg0: i32) -> (i32, i32) {
    %c0_i32 = arith.constant 0 : i32
    %c0_i32_0 = arith.constant 0 : i32
    %c0_i32_1 = arith.constant 0 : i32
    return %c0_i32, %c0_i32_0 : i32, i32
  }
}

</mosaic_0001>

<bundles_post_ra>
// kernel: frozen_clip_t5_forward.29
= control target key start
LH: loop header
LB: loop body
LE: loop exit
PB: predicated region body
PF: predicated region fallthrough
CT: control target
= control target key end

     0   :  { %s609_s1 = inlined_call_operand.vmem [shape: bf16[256,256], index: 1, kind: input, shape index: {}]   ;;  %s610_s0 = inlined_call_operand.vmem [shape: bf16[32,256], index: 0, kind: input, shape index: {}]   ;;  %s611_s2 = inlined_call_operand.vmem [shape: f32[1,32,256], index: 2, kind: input, shape index: {}]   ;;  %s612_s3 = inlined_call_operand.vmem [shape: f32[32,256], index: 3, kind: output, shape index: {}]  }
   0x1   :  { %v379_v0 = vld [vmem:[%s609_s1 + $0x4] ss:$8 sps:$4 sm:$0xff]   ;;  %v381_v1 = vld [vmem:[%s609_s1] ss:$8 sps:$4 sm:$0xff]   ;;  %v382_v2 = vld [vmem:[%s609_s1 + $0x14] ss:$8 sps:$4 sm:$0xff]  }
   0x2   :  { %246 = vmatprep.subr.bf16.mxu0 %v379_v0  ;;  %347 = vmatprep.subr.bf16.mxu1 %v379_v0  ;;  %v384_v3 = vld [vmem:[%s609_s1 + $0x10] ss:$8 sps:$4 sm:$0xff]   ;;  %v385_v4 = vld [vmem:[%s609_s1 + $0x24] ss:$8 sps:$4 sm:$0xff]   ;;  %v387_v5 = vld [vmem:[%s609_s1 + $0x20] ss:$8 sps:$4 sm:$0xff]  }
   0x3   :  { %247 = vmatpush1.bf16.msra.mxu0 %v381_v1  ;;  %363 = vmatpush1.bf16.msra.mxu1 %v381_v1  ;;  %v388_v6 = vld [vmem:[%s609_s1 + $0x34] ss:$8 sps:$4 sm:$0xff]   ;;  %v390_v7 = vld [vmem:[%s609_s1 + $0x30] ss:$8 sps:$4 sm:$0xff]   ;;  %v391_v8 = vld [vmem:[%s609_s1 + $0x44] ss:$8 sps:$4 sm:$0xff]  }
   0x4   :  { %248 = vmatprep.subr.bf16.mxu0 %v382_v2  ;;  %348 = vmatprep.subr.bf16.mxu1 %v382_v2  ;;  %v393_v9 = vld [vmem:[%s609_s1 + $0x40] ss:$8 sps:$4 sm:$0xff]   ;;  %v394_v10 = vld [vmem:[%s609_s1 + $0x54] ss:$8 sps:$4 sm:$0xff]   ;;  %v396_v11 = vld [vmem:[%s609_s1 + $0x50] ss:$8 sps:$4 sm:$0xff]  }
   0x5   :  { %v397_v12 = vld [vmem:[%s609_s1 + $0x64] ss:$8 sps:$4 sm:$0xff]   ;;  %v399_v14 = vld [vmem:[%s609_s1 + $0x60] ss:$8 sps:$4 sm:$0xff]   ;;  %v432_v15 = vld [vmem:[%s610_s0 + $0x14] ss:$8 sps:$4 sm:$0xff]  }
   0x6   :  { %v429_v13 = vld [vmem:[%s610_s0 + $0x4] ss:$8 sps:$4 sm:$0xff]   ;;  %v400_v16 = vld [vmem:[%s609_s1 + $0x74] ss:$8 sps:$4 sm:$0xff]   ;;  %288 = vmatprep.mubr.bf16.mxu1 %v432_v15  ;;  %v402_v17 = vld [vmem:[%s609_s1 + $0x70] ss:$8 sps:$4 sm:$0xff]  }
   0x7   :  { %249 = vmatpush1.bf16.msra.mxu0 %v384_v3  ;;  %364 = vmatpush1.bf16.msra.mxu1 %v384_v3  ;;  %v403_v18 = vld [vmem:[%s609_s1 + $0x84] ss:$8 sps:$4 sm:$0xff]   ;;  %v405_v19 = vld [vmem:[%s609_s1 + $0x80] ss:$8 sps:$4 sm:$0xff]   ;;  %v406_v20 = vld [vmem:[%s609_s1 + $0x94] ss:$8 sps:$4 sm:$0xff]  }
   0x8   :  { %250 = vmatprep.subr.bf16.mxu0 %v385_v4  ;;  %349 = vmatprep.subr.bf16.mxu1 %v385_v4  ;;  %v408_v21 = vld [vmem:[%s609_s1 + $0x90] ss:$8 sps:$4 sm:$0xff]   ;;  %v409_v22 = vld [vmem:[%s609_s1 + $0xa4] ss:$8 sps:$4 sm:$0xff]   ;;  %v411_v23 = vld [vmem:[%s609_s1 + $0xa0] ss:$8 sps:$4 sm:$0xff]  }
   0x9   :  { %278 = vmatprep.mubr.bf16.mxu0 %v429_v13  ;;  %v412_v24 = vld [vmem:[%s609_s1 + $0xb4] ss:$8 sps:$4 sm:$0xff]   ;;  %v414_v25 = vld [vmem:[%s609_s1 + $0xb0] ss:$8 sps:$4 sm:$0xff]   ;;  %v415_v26 = vld [vmem:[%s609_s1 + $0xc4] ss:$8 sps:$4 sm:$0xff]  }
   0xa   :  { %v417_v27 = vld [vmem:[%s609_s1 + $0xc0] ss:$8 sps:$4 sm:$0xff]   ;;  %v418_v28 = vld [vmem:[%s609_s1 + $0xd4] ss:$8 sps:$4 sm:$0xff]   ;;  %v420_v29 = vld [vmem:[%s609_s1 + $0xd0] ss:$8 sps:$4 sm:$0xff]  }
   0xb   :  { %251 = vmatpush1.bf16.msra.mxu0 %v387_v5  ;;  %365 = vmatpush1.bf16.msra.mxu1 %v387_v5  ;;  %v421_v30 = vld [vmem:[%s609_s1 + $0xe4] ss:$8 sps:$4 sm:$0xff]   ;;  %v423_v31 = vld [vmem:[%s609_s1 + $0xe0] ss:$8 sps:$4 sm:$0xff]   ;;  %v424_v32 = vld [vmem:[%s609_s1 + $0xf4] ss:$8 sps:$4 sm:$0xff]  }
   0xc   :  { %252 = vmatprep.subr.bf16.mxu0 %v388_v6  ;;  %350 = vmatprep.subr.bf16.mxu1 %v388_v6  ;;  %v426_v33 = vld [vmem:[%s609_s1 + $0xf0] ss:$8 sps:$4 sm:$0xff]   ;;  %v427_v34 = vld [vmem:[%s610_s0] ss:$8 sps:$4 sm:$0xff]  }
   0xd   :  { %v430_v35 = vld [vmem:[%s610_s0 + $0x10] ss:$8 sps:$4 sm:$0xff]   ;;  %v50_v36 = vld [vmem:[%s611_s2] sm:$0xff]  ;;  %v51_v38 = vld [vmem:[%s611_s2 + $0x8] sm:$0xff] }
   0xe   :  { %v54_v37 = vld [vmem:[%s611_s2 + $0x20] sm:$0xff]  ;;  %v55_v39 = vld [vmem:[%s611_s2 + $0x28] sm:$0xff]  ;;  %v52_v42 = vld [vmem:[%s611_s2 + $0x10] sm:$0xff] }
   0xf   :  { %253 = vmatpush1.bf16.msra.mxu0 %v390_v7  ;;  %366 = vmatpush1.bf16.msra.mxu1 %v390_v7  ;;  %v56_v43 = vld [vmem:[%s611_s2 + $0x30] sm:$0xff]  ;;  %v53_v48 = vld [vmem:[%s611_s2 + $0x18] sm:$0xff] }
  0x10   :  { %254 = vmatprep.subr.bf16.mxu0 %v391_v8  ;;  %351 = vmatprep.subr.bf16.mxu1 %v391_v8  ;;  %v57_v49 = vld [vmem:[%s611_s2 + $0x38] sm:$0xff] }
  0x13   :  { %255 = vmatpush1.bf16.msra.mxu0 %v393_v9  ;;  %367 = vmatpush1.bf16.msra.mxu1 %v393_v9 }
  0x14   :  { %256 = vmatprep.subr.bf16.mxu0 %v394_v10  ;;  %352 = vmatprep.subr.bf16.mxu1 %v394_v10 }
  0x17   :  { %257 = vmatpush1.bf16.msra.mxu0 %v396_v11  ;;  %368 = vmatpush1.bf16.msra.mxu1 %v396_v11 }
  0x18   :  { %258 = vmatprep.subr.bf16.mxu0 %v397_v12  ;;  %353 = vmatprep.subr.bf16.mxu1 %v397_v12 }
  0x1b   :  { %259 = vmatpush1.bf16.msra.mxu0 %v399_v14  ;;  %369 = vmatpush1.bf16.msra.mxu1 %v399_v14 }
  0x1c   :  { %260 = vmatprep.subr.bf16.mxu0 %v400_v16  ;;  %354 = vmatprep.subr.bf16.mxu1 %v400_v16 }
  0x1f   :  { %261 = vmatpush1.bf16.msra.mxu0 %v402_v17  ;;  %370 = vmatpush1.bf16.msra.mxu1 %v402_v17 }
  0x20   :  { %262 = vmatprep.subr.bf16.mxu0 %v403_v18  ;;  %355 = vmatprep.subr.bf16.mxu1 %v403_v18 }
  0x23   :  { %263 = vmatpush1.bf16.msra.mxu0 %v405_v19  ;;  %371 = vmatpush1.bf16.msra.mxu1 %v405_v19 }
  0x24   :  { %264 = vmatprep.subr.bf16.mxu0 %v406_v20  ;;  %356 = vmatprep.subr.bf16.mxu1 %v406_v20 }
  0x27   :  { %265 = vmatpush1.bf16.msra.mxu0 %v408_v21  ;;  %372 = vmatpush1.bf16.msra.mxu1 %v408_v21 }
  0x28   :  { %266 = vmatprep.subr.bf16.mxu0 %v409_v22  ;;  %357 = vmatprep.subr.bf16.mxu1 %v409_v22 }
  0x2b   :  { %267 = vmatpush1.bf16.msra.mxu0 %v411_v23  ;;  %373 = vmatpush1.bf16.msra.mxu1 %v411_v23 }
  0x2c   :  { %268 = vmatprep.subr.bf16.mxu0 %v412_v24  ;;  %358 = vmatprep.subr.bf16.mxu1 %v412_v24 }
  0x2f   :  { %269 = vmatpush1.bf16.msra.mxu0 %v414_v25  ;;  %374 = vmatpush1.bf16.msra.mxu1 %v414_v25 }
  0x30   :  { %270 = vmatprep.subr.bf16.mxu0 %v415_v26  ;;  %359 = vmatprep.subr.bf16.mxu1 %v415_v26 }
  0x33   :  { %271 = vmatpush1.bf16.msra.mxu0 %v417_v27  ;;  %375 = vmatpush1.bf16.msra.mxu1 %v417_v27 }
  0x34   :  { %272 = vmatprep.subr.bf16.mxu0 %v418_v28  ;;  %360 = vmatprep.subr.bf16.mxu1 %v418_v28 }
  0x37   :  { %273 = vmatpush1.bf16.msra.mxu0 %v420_v29  ;;  %376 = vmatpush1.bf16.msra.mxu1 %v420_v29 }
  0x38   :  { %274 = vmatprep.subr.bf16.mxu0 %v421_v30  ;;  %361 = vmatprep.subr.bf16.mxu1 %v421_v30 }
  0x3b   :  { %275 = vmatpush1.bf16.msra.mxu0 %v423_v31  ;;  %377 = vmatpush1.bf16.msra.mxu1 %v423_v31 }
  0x3c   :  { %276 = vmatprep.subr.bf16.mxu0 %v424_v32  ;;  %362 = vmatprep.subr.bf16.mxu1 %v424_v32 }
  0x3f   :  { %277 = vmatpush1.bf16.msra.mxu0 %v426_v33  ;;  %378 = vmatpush1.bf16.msra.mxu1 %v426_v33 }
  0x42   :  { %279 = vmatmul.mubr.bf16.vlgmr.msra.gmra.mrb[0].mxu0 %v427_v34  ;;  %289 = vmatmul.mubr.bf16.vlgmr.msra.gmra.mrb[0].mxu1 %v430_v35 }
 0x115   :  { %v280_v40 = vpop.f32.mrb[0].mxu0  ;;  %v290_v41 = vpop.f32.mrb[0].mxu1 }
 0x116   :  { %v281_v44 = vadd.f32 %v280_v40, %v50_v36  ;;  %v291_v45 = vadd.f32 %v290_v41, %v54_v37  ;;  %v282_v46 = vpop.f32.mrb[1].mxu0  ;;  %v292_v47 = vpop.f32.mrb[1].mxu1 }
 0x117   :  { %v283_v50 = vadd.f32 %v282_v46, %v51_v38  ;;  %v293_v51 = vadd.f32 %v292_v47, %v55_v39  ;;  %v284_v52 = vpop.f32.mrb[2].mxu0  ;;  %v294_v53 = vpop.f32.mrb[2].mxu1 }
 0x118   :  { %299 = vst [vmem:[%s612_s3] sm:$0xff] %v281_v44  ;;  %303 = vst [vmem:[%s612_s3 + $0x20] sm:$0xff] %v291_v45  ;;  %v285_v54 = vadd.f32 %v284_v52, %v52_v42  ;;  %v295_v55 = vadd.f32 %v294_v53, %v56_v43  ;;  %v286_v56 = vpop.f32.mrb[3].mxu0  ;;  %v296_v57 = vpop.f32.mrb[3].mxu1 }
 0x119   :  { %300 = vst [vmem:[%s612_s3 + $0x8] sm:$0xff] %v283_v50  ;;  %304 = vst [vmem:[%s612_s3 + $0x28] sm:$0xff] %v293_v51  ;;  %v287_v58 = vadd.f32 %v286_v56, %v53_v48  ;;  %v297_v59 = vadd.f32 %v296_v57, %v57_v49 }
 0x11a   :  { %301 = vst [vmem:[%s612_s3 + $0x10] sm:$0xff] %v285_v54  ;;  %305 = vst [vmem:[%s612_s3 + $0x30] sm:$0xff] %v295_v55 }
 0x11b   :  { %302 = vst [vmem:[%s612_s3 + $0x18] sm:$0xff] %v287_v58  ;;  %306 = vst [vmem:[%s612_s3 + $0x38] sm:$0xff] %v297_v59 }

// kernel: frozen_clip_t5_forward.28
= control target key start
LH: loop header
LB: loop body
LE: loop exit
PB: predicated region body
PF: predicated region fallthrough
CT: control target
= control target key end

     0   :  { %s1480_s18 = smov 0   ;;  %s1482_s19 = smov 0   ;;  %s1702_s0 = inlined_call_operand.vmem [shape: bf16[2,16,768], index: 0, kind: input, shape index: {}, may-alias: {0,1,2}]   ;;  %s1703_s1 = inlined_call_operand.vmem [shape: bf16[2,16,768], index: 1, kind: input, shape index: {}, may-alias: {0,1,2}]   ;;  %s1704_s2 = inlined_call_operand.vmem [shape: bf16[2,16,768], index: 2, kind: input, shape index: {}, may-alias: {0,1,2}]   ;;  %s1705_s3 = inlined_call_operand.vmem [shape: f32[4,16,16], index: 3, kind: input, shape index: {}]   ;;  %s1706_s4 = inlined_call_operand.vmem [shape: f32[2,1,16], index: 4, kind: input, shape index: {}]   ;;  %s1707_s5 = inlined_call_operand.vmem [shape: bf16[2,16,256], index: 5, kind: output, shape index: {}]  }
   0x1   :  { %s1484_s20 = smov 0   ;;  %s1486_s21 = smov 0  }
   0x2   :  { %s1488_s22 = smov 0  }
   0x3 LB: > { %s27_s23 = sadd.s32 1, %s1441_s21  ;;  %p43_p1 = scmp.ne.s32.totalorder %s1433_s19, %s1429_s18  ;;  %s1445_s22 = sphi %s1488_s22, %s15_s22   ;;  %s1441_s21 = sphi %s1486_s21, %s1712_s21   ;;  %s1437_s20 = sphi %s1484_s20, %s1711_s20   ;;  %s1433_s19 = sphi %s1482_s19, %s1710_s19   ;;  %s1429_s18 = sphi %s1480_s18, %s1709_s18  }
   0x4   : > { %p29_p0 = scmp.ge.s32.totalorder %s27_s23, 2  ;;  %p44_p2 = scmp.eq.s32.totalorder %s1445_s22, 0 }
   0x5   : > { %s36_s26 = sadd.s32 1, %s1433_s19  ;;  %p1206_p5 = scmp.ge.s32.totalorder %s1445_s22, 2 }
   0x6   : > { %s1714_s23 = smov (%p29_p0, %s27_s23), 0  ;;  %p1511_p3 = por %p44_p2, %p43_p1 }
   0x7   : > { %s31_s25 = ssub.s32 %s1441_s21, %s1714_s23  ;;  %219 = sbr.rel (%p1206_p5) target bundleno = 35 (0x23), region = 20 }
   0x8   : > { %p34_p4 = scmp.eq.s32.totalorder %s31_s25, 0 }
   0xa   : > { %s1519_s27 = scalar_select %p34_p4, %s1433_s19, %s36_s26  }
   0xe   : > { %222 = sbr.rel (!%p1511_p3) target bundleno = 21 (0x15), region = 24  ;;  %s224_s28 = sand.u32 (%p1511_p3), 1, %s1433_s19  }
   0xf   : > { %s1315_s29 = smul.u32 (%p1511_p3), 48, %s1441_s21  ;;  %s1207_s30 = sshll.u32 (%p1511_p3), %s224_s28, 4 }
  0x10   : > { %s226_s9 = scalar_lea.vmem (%p1511_p3), [#allocation2], %s1207_s30 }
  0x11   : > { %s231_s8 = scalar_lea.vmem (%p1511_p3), %s1702_s0, %s1315_s29 }
  0x12   : > { %v261_v0 = vld [vmem:[%s231_s8] sm:$0xff] (%p1511_p3)  ;;  %v263_v1 = vld [vmem:[%s231_s8 + $0x18] sm:$0xff] (%p1511_p3) }
  0x13   : > { %262 = vst [vmem:[%s226_s9] sm:$0xff] (%p1511_p3), %v261_v0  ;;  %264 = vst [vmem:[%s226_s9 + $0x8] sm:$0xff] (%p1511_p3), %v263_v1 }
  0x15 PF: > { %270 = sbr.rel (!%p1511_p3) target bundleno = 28 (0x1c), region = 62  ;;  %s272_s10 = sand.u32 (%p1511_p3), 1, %s1433_s19  }
  0x16   : > { %s1210_s11 = smul.u32 (%p1511_p3), 48, %s1441_s21  ;;  %s1209_s12 = sshll.u32 (%p1511_p3), %s272_s10, 4 }
  0x17   : > { %s274_s16 = scalar_lea.vmem (%p1511_p3), [#allocation3], %s1209_s12 }
  0x18   : > { %s1089_s15 = scalar_lea.vmem (%p1511_p3), %s1703_s1, %s1210_s11 }
  0x19   : > { %v1211_v2 = vld [vmem:[%s1089_s15 + $0x8] sm:$0xff] (%p1511_p3)  ;;  %v1212_v3 = vld [vmem:[%s1089_s15 + $0x20] sm:$0xff] (%p1511_p3) }
  0x1a   : > { %311 = vst [vmem:[%s274_s16] sm:$0xff] (%p1511_p3), %v1211_v2  ;;  %313 = vst [vmem:[%s274_s16 + $0x8] sm:$0xff] (%p1511_p3), %v1212_v3 }
  0x1c PF: > { %319 = sbr.rel (!%p1511_p3) target bundleno = 35 (0x23), region = 100  ;;  %s321_s17 = sand.u32 (%p1511_p3), 1, %s1433_s19  }
  0x1d   : > { %s1214_s25 = smul.u32 (%p1511_p3), 48, %s1441_s21  ;;  %s1213_s26 = sshll.u32 (%p1511_p3), %s321_s17, 4 }
  0x1e   : > { %s323_s6 = scalar_lea.vmem (%p1511_p3), [#allocation4], %s1213_s26 }
  0x1f   : > { %s1097_s30 = scalar_lea.vmem (%p1511_p3), %s1704_s2, %s1214_s25 }
  0x20   : > { %v1215_v4 = vld [vmem:[%s1097_s30 + $0x10] sm:$0xff] (%p1511_p3)  ;;  %v1216_v5 = vld [vmem:[%s1097_s30 + $0x28] sm:$0xff] (%p1511_p3) }
  0x21   : > { %360 = vst [vmem:[%s323_s6] sm:$0xff] (%p1511_p3), %v1215_v4  ;;  %362 = vst [vmem:[%s323_s6 + $0x8] sm:$0xff] (%p1511_p3), %v1216_v5 }
  0x23 PF: > { %p1217_p6 = scmp.ge.s32.totalorder %s1445_s22, 1  ;;  %p373_p7 = scmp.lt.s32.totalorder %s1445_s22, 3 }
  0x25   : > { %p374_p8 = pnand %p1217_p6, %p373_p7 }
  0x26   : > { %s380_s24 = sand.u32 (!%p374_p8), 1, %s1429_s18   ;;  %v1447_v6 = vmov (!%p374_p8), 0.0   ;;  %vm1448_vm0 = vmmov (!%p374_p8), 0   ;;  %vm487_vm1 = vcmask (!%p374_p8), 523264   ;;  %s1449_s9 = smov (!%p374_p8), 64   ;;  %v475_v11 = vld [vmem:[%s1705_s3] sm:$0xff] (!%p374_p8) }
  0x27   : > { %377 = sbr.rel (%p374_p8) target bundleno = 1173 (0x495), region = 142  ;;  %1267 = vmatprep.subr.bf16.mxu0 (!%p374_p8), %v1447_v6  ;;  %s1547_s7 = sshll.u32 (!%p374_p8), %s380_s24, 4  ;;  %1269 = vmatprep.mubr.msk.bf16.mxu0 (!%p374_p8), %vm1448_vm0, %v1447_v6  ;;  %v476_v13 = vld [vmem:[%s1705_s3 + $0x8] sm:$0xff] (!%p374_p8)  ;;  %vm543_vm2 = vcmask (!%p374_p8), 130048   ;;  %v1229_v46 = vld [vmem:[%s1705_s3 + $0x10] sm:$0xff] (!%p374_p8)  ;;  %v1230_v48 = vld [vmem:[%s1705_s3 + $0x18] sm:$0xff] (!%p374_p8) }
  0x28   : > { %1273 = vmatprep.subr.bf16.mxu1 (!%p374_p8), %v1447_v6  ;;  %1275 = vmatprep.mubr.msk.bf16.mxu1 (!%p374_p8), %vm1448_vm0, %v1447_v6  ;;  %s389_s18 = scalar_lea.vmem (!%p374_p8), [#allocation3], %s1547_s7  ;;  %s382_s8 = scalar_lea.vmem (!%p374_p8), [#allocation2], %s1547_s7  ;;  %v1233_v57 = vld [vmem:[%s1705_s3 + $0x20] sm:$0xff] (!%p374_p8)  ;;  %v1234_v60 = vld [vmem:[%s1705_s3 + $0x28] sm:$0xff] (!%p374_p8)  ;;  %v1240_v5 = vld [vmem:[%s1705_s3 + $0x30] sm:$0xff] (!%p374_p8) }
  0x29   : > { %v1369_v7 = vld [vmem:[%s389_s18] ss:$8 sps:$4 sm:$0xff] (!%p374_p8)   ;;  %v1372_v10 = vld [vmem:[%s382_s8 + $0x4] ss:$8 sps:$4 sm:$0xff] (!%p374_p8)   ;;  %p454_p9 = scmp.lt.s32.totalorder (!%p374_p8), %s1437_s20, 1  ;;  %s396_s17 = scalar_lea.vmem (!%p374_p8), [#allocation4], %s1547_s7 }
  0x2a   : > { %v492_v8 = vsel (!%p374_p8), %vm487_vm1, %v1369_v7, 0  ;;  %v1370_v9 = vld [vmem:[%s382_s8] ss:$8 sps:$4 sm:$0xff] (!%p374_p8)   ;;  %622 = vrot.lane.b32.xlu1 (!%p374_p8), %v1369_v7, %s1449_s9  ;;  %v1371_v24 = vld [vmem:[%s389_s18 + $0x4] ss:$8 sps:$4 sm:$0xff] (!%p374_p8)  }
  0x2b   : > { %1268 = vmatpush3.bf16.xpose.msra.mxu0 (!%p374_p8), %v492_v8  ;;  %v1591_v25 = vld [vmem:[%s396_s17] ss:$8 sps:$4 sm:$0xff] (!%p374_p8)   ;;  %v766_v38 = vsel (!%p374_p8), %vm487_vm1, %v1371_v24, 0 }
  0x2c   : > { %1285 = vmatprep.subr.bf16.mxu0 (!%p374_p8), %v1447_v6  ;;  %1274 = vmatpush3.bf16.msra.mxu1 (!%p374_p8), %v1591_v25  ;;  %v1241_v8 = vld [vmem:[%s1705_s3 + $0x38] sm:$0xff] (!%p374_p8) }
  0x2d   : > { %1279 = vmatprep.subr.bf16.mxu1 (!%p374_p8), %v1447_v6 }
  0x2e   : > { %620 = vrot.lane.b32.xlu1 %v1370_v9, %s1449_s9  ;;  %s1716_s20 = smov (!%p454_p9, %s1437_s20), 1 }
  0x2f   : > { %s456_s12 = scalar_lea.vmem %s1706_s4, %s1716_s20  ;;  %s1248_s7 = sshll.u32 %s1716_s20, 4 }
  0x30   : > { %v1580_v14 = vld [vmem:[%s456_s12] ss:$0 sm:$0xff]  ;;  %s465_s14 = scalar_lea.vmem %s1707_s5, %s1248_s7 }
  0x32   : > { %1270 = vmatmul.mubr.msk.bf16.vlgmr.msra.gmra.mrb[0].mxu0 %vm487_vm1, %v1370_v9  ;;  %887 = vrot.lane.b32.xlu1 %v1372_v10, %s1449_s9 }
  0x33   : > { %1287 = vmatprep.mubr.msk.bf16.mxu0 %vm1448_vm0, %v1447_v6 }
  0x9c   : > { %v623_v32 = vpop.permute.xlu1 %622 }
  0x9d   : > { %v628_v35 = vsel %vm487_vm1, %v623_v32, 0 }
  0xa0   : > { %v621_v37 = vpop.permute.xlu1 %620 }
  0xa4   : > { %v888_v41 = vpop.permute.xlu1 %887 }
 0x105   : > { %v528_v12 = vpop.f32.mrb[0].mxu0 }
 0x106   : > { %v529_v15 = vadd.f32 %v528_v12, %v475_v11  ;;  %v1271_v16 = vpop.f32.mrb[1].mxu0 }
 0x107   : > { %v531_v17 = vpop.f32.mrb[2].mxu0 }
 0x108   : > { %v532_v18 = vadd.f32 %v531_v17, %v476_v13  ;;  %v1272_v19 = vpop.f32.mrb[3].mxu0  ;;  %v541_v20 = vadd.f32 %v1580_v14, %v529_v15 }
 0x10a   : > { %v544_v21 = vsel %vm543_vm2, %v541_v20, -inf  ;;  %v542_v22 = vadd.f32 %v1580_v14, %v532_v18 }
 0x10b   : > { %545 = vmax.xlane.f32.xlu0 %v544_v21 }
 0x10c   : > { %v547_v23 = vsel %vm543_vm2, %v542_v22, -inf }
 0x10f   : > { %548 = vmax.xlane.f32.xlu0 %v547_v23 }
 0x125   : > { %889 = vrot.lane.b32.xlu0 %v1371_v24, %s1449_s9 }
 0x198   : > { %v546_v26 = vpop.xlane.xlu0 %545 }
 0x199   : > { %v550_v27 = vsub.f32 %v541_v20, %v546_v26  ;;  %v1374_v20 = vld [vmem:[%s396_s17 + $0x4] ss:$8 sps:$4 sm:$0xff]  }
 0x19b   : > { %v552_v28 = vmul.f32 1.442695, %v550_v27 }
 0x19c   : > { %v549_v29 = vpop.xlane.xlu0 %548 }
 0x19d   : > { %v551_v30 = vsub.f32 %v542_v22, %v549_v29  ;;  %1375 = vpow2.f32 %v552_v28 }
 0x19f   : > { %v554_v31 = vmul.f32 1.442695, %v551_v30 }
 0x1a0   : > { %v890_v39 = vpop.permute.xlu0 %889 }
 0x1a1   : > { %1377 = vpow2.f32 %v554_v31  ;;  %v895_v40 = vsel %vm487_vm1, %v890_v39, 0 }
 0x1a7   : > { %v1596_v33 = vpop.eup %1375 }
 0x1ab   : > { %v1598_v34 = vpop.eup %1377 }
 0x1ac   : > { %v562_v36 = vpack.c.bf16 %v1598_v34, %v1596_v33 }
 0x1ae   : > { %1276 = vmatmul.mubr.msk.bf16.vlgmr.msra.gmra.mrb[0].mxu1 %vm543_vm2, %v562_v36 }
 0x1af   : > { %1280 = vmatpush3.bf16.xpose.msra.mxu1 %v628_v35  ;;  %1281 = vmatprep.mubr.msk.bf16.mxu1 %vm1448_vm0, %v1447_v6 }
 0x1b0   : > { %1291 = vmatprep.subr.bf16.mxu1 %v1447_v6 }
 0x1b6   : > { %1282 = vmatmul.mubr.msk.bf16.vlgmr.msra.gmra.mrb[4].mxu1 %vm487_vm1, %v621_v37 }
 0x1b7   : > { %1292 = vmatpush3.bf16.xpose.msra.mxu1 %v766_v38  ;;  %1293 = vmatprep.mubr.msk.bf16.mxu1 %vm1448_vm0, %v1447_v6 }
 0x1b8   : > { %1303 = vmatprep.subr.bf16.mxu1 %v1447_v6 }
 0x1be   : > { %1294 = vmatmul.mubr.msk.bf16.vlgmr.msra.gmra.mrb[8].mxu1 %vm487_vm1, %v1372_v10 }
 0x1bf   : > { %1304 = vmatpush3.bf16.xpose.msra.mxu1 %v895_v40  ;;  %1305 = vmatprep.mubr.msk.bf16.mxu1 %vm1448_vm0, %v1447_v6 }
 0x1c6   : > { %1306 = vmatmul.mubr.msk.bf16.vlgmr.msra.gmra.mrb[12].mxu1 %vm487_vm1, %v888_v41 }
 0x281   : > { %v1617_v42 = vpop.f32.mrb[0].mxu1 }
 0x282   : > { %v1277_v43 = vpop.f32.mrb[1].mxu1 }
 0x283   : > { %v1619_v44 = vpop.f32.mrb[2].mxu1 }
 0x284   : > { %v1278_v45 = vpop.f32.mrb[3].mxu1 }
 0x289   : > { %v664_v47 = vpop.f32.mrb[4].mxu1 }
 0x28a   : > { %v665_v49 = vadd.f32 %v1229_v46, %v664_v47  ;;  %v1283_v50 = vpop.f32.mrb[5].mxu1 }
 0x28b   : > { %v667_v51 = vpop.f32.mrb[6].mxu1 }
 0x28c   : > { %v668_v52 = vadd.f32 %v1230_v48, %v667_v51  ;;  %v1284_v53 = vpop.f32.mrb[7].mxu1  ;;  %v671_v54 = vadd.f32 %v1580_v14, %v665_v49 }
 0x28e   : > { %v673_v55 = vsel %vm543_vm2, %v671_v54, -inf  ;;  %v672_v56 = vadd.f32 %v1580_v14, %v668_v52 }
 0x28f   : > { %674 = vmax.xlane.f32.xlu1 %v673_v55 }
 0x290   : > { %v676_v58 = vsel %vm543_vm2, %v672_v56, -inf }
 0x291   : > { %677 = vmax.xlane.f32.xlu0 %v676_v58  ;;  %v802_v59 = vpop.f32.mrb[8].mxu1  ;;  %v559_v58 = vsel %vm543_vm2, %v1598_v34, 0.0 }
 0x292   : > { %v803_v61 = vadd.f32 %v1233_v57, %v802_v59  ;;  %v1295_v62 = vpop.f32.mrb[9].mxu1 }
 0x293   : > { %v805_v63 = vpop.f32.mrb[10].mxu1 }
 0x294   : > { %v806_v0 = vadd.f32 %v1234_v60, %v805_v63  ;;  %v1296_v1 = vpop.f32.mrb[11].mxu1  ;;  %v809_v2 = vadd.f32 %v1580_v14, %v803_v61 }
 0x296   : > { %v811_v3 = vsel %vm543_vm2, %v809_v2, -inf  ;;  %v810_v4 = vadd.f32 %v1580_v14, %v806_v0 }
 0x297   : > { %812 = vmax.xlane.f32.xlu1 %v811_v3 }
 0x298   : > { %v814_v11 = vsel %vm543_vm2, %v810_v4, -inf }
 0x299   : > { %v931_v7 = vpop.f32.mrb[12].mxu1 }
 0x29a   : > { %v932_v9 = vadd.f32 %v1240_v5, %v931_v7  ;;  %v1307_v10 = vpop.f32.mrb[13].mxu1 }
 0x29b   : > { %815 = vmax.xlane.f32.xlu1 %v814_v11  ;;  %v934_v12 = vpop.f32.mrb[14].mxu1 }
 0x29c   : > { %v935_v13 = vadd.f32 %v1241_v8, %v934_v12  ;;  %v1308_v15 = vpop.f32.mrb[15].mxu1  ;;  %v938_v16 = vadd.f32 %v1580_v14, %v932_v9 }
 0x29e   : > { %v940_v17 = vsel %vm543_vm2, %v938_v16, -inf  ;;  %v939_v18 = vadd.f32 %v1580_v14, %v935_v13 }
 0x29f   : > { %941 = vmax.xlane.f32.xlu1 %v940_v17 }
 0x2a0   : > { %v943_v19 = vsel %vm543_vm2, %v939_v18, -inf }
 0x2a3   : > { %944 = vmax.xlane.f32.xlu1 %v943_v19 }
 0x2a7   : > { %692 = vrot.lane.b32.xlu0 %v1591_v25, %s1449_s9 }
 0x2b4   : > { %959 = vrot.lane.b32.xlu1 %v1374_v20, %s1449_s9 }
 0x31c   : > { %v675_v21 = vpop.xlane.xlu1 %674 }
 0x31d   : > { %v679_v22 = vsub.f32 %v671_v54, %v675_v21 }
 0x31e   : > { %v678_v23 = vpop.xlane.xlu0 %677 }
 0x31f   : > { %v681_v24 = vmul.f32 1.442695, %v679_v22  ;;  %v680_v26 = vsub.f32 %v672_v56, %v678_v23  ;;  %v556_v56 = vsel %vm543_vm2, %v1596_v33, 0.0 }
 0x321   : > { %1379 = vpow2.f32 %v681_v24  ;;  %v683_v27 = vmul.f32 1.442695, %v680_v26 }
 0x322   : > { %v693_v28 = vpop.permute.xlu0 %692 }
 0x323   : > { %1381 = vpow2.f32 %v683_v27  ;;  %1286 = vmatpush3.bf16.msra.mxu0 %v693_v28 }
 0x324   : > { %v813_v14 = vpop.xlane.xlu1 %812  ;;  %1297 = vmatprep.subr.bf16.mxu0 %v1447_v6 }
 0x325   : > { %v817_v29 = vsub.f32 %v809_v2, %v813_v14 }
 0x327   : > { %v819_v30 = vmul.f32 1.442695, %v817_v29 }
 0x328   : > { %v816_v25 = vpop.xlane.xlu1 %815 }
 0x329   : > { %v818_v31 = vsub.f32 %v810_v4, %v816_v25  ;;  %1383 = vpow2.f32 %v819_v30 }
 0x32b   : > { %v1380_v32 = vpop.eup %1379  ;;  %v821_v35 = vmul.f32 1.442695, %v818_v31 }
 0x32c   : > { %v942_v36 = vpop.xlane.xlu1 %941  ;;  %v685_v37 = vsel %vm543_vm2, %v1380_v32, 0.0 }
 0x32d   : > { %v1382_v38 = vpop.eup %1381  ;;  %1385 = vpow2.f32 %v821_v35  ;;  %v946_v39 = vsub.f32 %v938_v16, %v942_v36  ;;  %686 = vadd.xlane.f32.xlu1 %v685_v37 }
 0x32e   : > { %v688_v40 = vsel %vm543_vm2, %v1382_v38, 0.0  ;;  %v691_v41 = vpack.c.bf16 %v1382_v38, %v1380_v32 }
 0x32f   : > { %v948_v43 = vmul.f32 1.442695, %v946_v39  ;;  %689 = vadd.xlane.f32.xlu0 %v688_v40 }
 0x330   : > { %v945_v45 = vpop.xlane.xlu1 %944  ;;  %1288 = vmatmul.mubr.msk.bf16.vlgmr.msra.gmra.mrb[4].mxu0 %vm543_vm2, %v691_v41 }
 0x331   : > { %1387 = vpow2.f32 %v948_v43  ;;  %v947_v46 = vsub.f32 %v939_v18, %v945_v45  ;;  %1298 = vmatpush3.bf16.msra.mxu0 %v1374_v20  ;;  %1299 = vmatprep.mubr.msk.bf16.mxu0 %vm1448_vm0, %v1447_v6 }
 0x332   : > { %1309 = vmatprep.subr.bf16.mxu0 %v1447_v6 }
 0x333   : > { %v950_v47 = vmul.f32 1.442695, %v947_v46  ;;  %v1384_v48 = vpop.eup %1383 }
 0x334   : > { %v960_v50 = vpop.permute.xlu1 %959  ;;  %v823_v59 = vsel %vm543_vm2, %v1384_v48, 0.0 }
 0x335   : > { %1389 = vpow2.f32 %v950_v47 }
 0x337   : > { %v1386_v49 = vpop.eup %1385 }
 0x338   : > { %v829_v51 = vpack.c.bf16 %v1386_v49, %v1384_v48 }
 0x33a   : > { %1300 = vmatmul.mubr.msk.bf16.vlgmr.msra.gmra.mrb[8].mxu0 %vm543_vm2, %v829_v51 }
 0x33b   : > { %v1388_v52 = vpop.eup %1387  ;;  %1310 = vmatpush3.bf16.msra.mxu0 %v960_v50  ;;  %1311 = vmatprep.mubr.msk.bf16.mxu0 %vm1448_vm0, %v1447_v6  ;;  %v826_v6 = vsel %vm543_vm2, %v1386_v49, 0.0 }
 0x33c   : > { %v952_v53 = vsel %vm543_vm2, %v1388_v52, 0.0 }
 0x33d   : > { %953 = vadd.xlane.f32.xlu0 %v952_v53 }
 0x33f   : > { %v1390_v54 = vpop.eup %1389 }
 0x340   : > { %v955_v55 = vsel %vm543_vm2, %v1390_v54, 0.0  ;;  %v958_v57 = vpack.c.bf16 %v1390_v54, %v1388_v52 }
 0x341   : > { %956 = vadd.xlane.f32.xlu1 %v955_v55  ;;  %557 = vadd.xlane.f32.xlu0 %v556_v56 }
 0x342   : > { %1312 = vmatmul.mubr.msk.bf16.vlgmr.msra.gmra.mrb[12].mxu0 %vm543_vm2, %v958_v57 }
 0x345   : > { %560 = vadd.xlane.f32.xlu1 %v559_v58  ;;  %824 = vadd.xlane.f32.xlu0 %v823_v59 }
 0x349   : > { %827 = vadd.xlane.f32.xlu1 %v826_v6 }
 0x3ba   : > { %v687_v60 = vpop.xlane.xlu1 %686 }
 0x3bb   : > { %1391 = vrcp.f32 %v687_v60 }
 0x3bc   : > { %v690_v61 = vpop.xlane.xlu0 %689 }
 0x3bd   : > { %1393 = vrcp.f32 %v690_v61 }
 0x3c5   : > { %v1392_v62 = vpop.eup %1391 }
 0x3c7   : > { %v1394_v0 = vpop.eup %1393 }
 0x3ca   : > { %v954_v5 = vpop.xlane.xlu0 %953 }
 0x3cb   : > { %1395 = vrcp.f32 %v954_v5 }
 0x3ce   : > { %v957_v7 = vpop.xlane.xlu1 %956  ;;  %v558_v22 = vpop.xlane.xlu0 %557 }
 0x3cf   : > { %1397 = vrcp.f32 %v957_v7 }
 0x3d0   : > { %1399 = vrcp.f32 %v558_v22 }
 0x3d2   : > { %v561_v23 = vpop.xlane.xlu1 %560  ;;  %v825_v24 = vpop.xlane.xlu0 %824 }
 0x3d3   : > { %1401 = vrcp.f32 %v561_v23 }
 0x3d4   : > { %1403 = vrcp.f32 %v825_v24 }
 0x3d5   : > { %v1396_v13 = vpop.eup %1395 }
 0x3d6   : > { %v828_v26 = vpop.xlane.xlu1 %827 }
 0x3d7   : > { %1405 = vrcp.f32 %v828_v26 }
 0x3d9   : > { %v1398_v16 = vpop.eup %1397 }
 0x3da   : > { %v1400_v27 = vpop.eup %1399 }
 0x3db   : > { %v615_v32 = vmul.f32 %v1400_v27, %v1617_v42 }
 0x3dd   : > { %v1402_v14 = vpop.eup %1401 }
 0x3de   : > { %v1404_v29 = vpop.eup %1403  ;;  %v616_v35 = vmul.f32 %v1402_v14, %v1619_v44 }
 0x3e1   : > { %v1406_v31 = vpop.eup %1405 }
 0x403   : > { %v732_v33 = vpop.f32.mrb[4].mxu0 }
 0x404   : > { %v1289_v63 = vpop.f32.mrb[5].mxu0  ;;  %v741_v2 = vmul.f32 %v1392_v62, %v732_v33 }
 0x405   : > { %v735_v1 = vpop.f32.mrb[6].mxu0 }
 0x406   : > { %v742_v3 = vmul.f32 %v1394_v0, %v735_v1  ;;  %v1290_v4 = vpop.f32.mrb[7].mxu0 }
 0x408   : > { %v1359_v34 = vpack.i.bf16 %v742_v3, %v741_v2 }
 0x40a   : > { %1360 = vrot.lane.b32.xlu0 %v1359_v34, %s1449_s9 }
 0x40d   : > { %v873_v8 = vpop.f32.mrb[8].mxu0 }
 0x40e   : > { %v1301_v9 = vpop.f32.mrb[9].mxu0  ;;  %v882_v37 = vmul.f32 %v1404_v29, %v873_v8 }
 0x40f   : > { %v876_v10 = vpop.f32.mrb[10].mxu0 }
 0x410   : > { %v1302_v11 = vpop.f32.mrb[11].mxu0  ;;  %v883_v38 = vmul.f32 %v1406_v31, %v876_v10 }
 0x415   : > { %v999_v12 = vpop.f32.mrb[12].mxu0 }
 0x416   : > { %v1313_v15 = vpop.f32.mrb[13].mxu0  ;;  %v1008_v18 = vmul.f32 %v1396_v13, %v999_v12 }
 0x417   : > { %v1002_v17 = vpop.f32.mrb[14].mxu0 }
 0x418   : > { %v1009_v19 = vmul.f32 %v1398_v16, %v1002_v17  ;;  %v1314_v20 = vpop.f32.mrb[15].mxu0 }
 0x41a   : > { %v1364_v21 = vpack.i.bf16 %v1009_v19, %v1008_v18 }
 0x41c   : > { %1365 = vrot.lane.b32.xlu1 %v1364_v21, %s1449_s9 }
 0x47c   : > { %v1361_v28 = vpop.permute.xlu0 %1360 }
 0x47d   : > { %v1363_v30 = vunpack.i.h.bf16 %v1361_v28  ;;  %v1362_v25 = vunpack.i.l.bf16 %v1361_v28 }
 0x47f   : > { %v1027_v41 = vsel %vm487_vm1, %v616_v35, %v1363_v30  ;;  %v1026_v43 = vsel %vm487_vm1, %v615_v32, %v1362_v25 }
 0x48e   : > { %v1366_v36 = vpop.permute.xlu1 %1365 }
 0x48f   : > { %v1368_v39 = vunpack.i.h.bf16 %v1366_v36  ;;  %v1367_v40 = vunpack.i.l.bf16 %v1366_v36 }
 0x491   : > { %v1029_v45 = vsel %vm487_vm1, %v883_v38, %v1368_v39  ;;  %v1028_v42 = vsel %vm487_vm1, %v882_v37, %v1367_v40 }
 0x492   : > { %v1250_v46 = vpack.c.bf16 %v1029_v45, %v1027_v41  ;;  %v1249_v44 = vpack.c.bf16 %v1028_v42, %v1026_v43 }
 0x494   : > { %1043 = vst [vmem:[%s465_s14 + $0x8] sm:$0xff] %v1250_v46  ;;  %1042 = vst [vmem:[%s465_s14] sm:$0xff] %v1249_v44 }
 0x495 PF: > { %s15_s22 = sadd.s32 1, %s1445_s22   ;;  %s1709_s18 = smov %s1433_s19 }
 0x496   : > { %p12_p10 = scmp.ge.s32.totalorder %s15_s22, 4   ;;  %s1710_s19 = smov %s1519_s27 }
 0x497   : > { %s1711_s20 = smov %s1441_s21  ;;  %s1712_s21 = smov %s1714_s23 }
 0x498   :  { %14 = sbr.rel (!%p12_p10) target bundleno = 3 (0x3), region = 214 }

// kernel: frozen_clip_t5_forward.27
= control target key start
LH: loop header
LB: loop body
LE: loop exit
PB: predicated region body
PF: predicated region fallthrough
CT: control target
= control target key end

     0   :  { %s1655_s0 = inlined_call_operand.vmem [shape: f32[1,32,256], index: 0, kind: input, shape index: {}]   ;;  %s1656_s2 = inlined_call_operand.vmem [shape: bf16[256,768], index: 2, kind: input, shape index: {}]   ;;  %s1657_s1 = inlined_call_operand.vmem [shape: f32[1,256], index: 1, kind: input, shape index: {}]   ;;  %s1658_s3 = inlined_call_operand.vmem [shape: bf16[32,768], index: 3, kind: output, shape index: {}]  }
   0x1   :  { %v1257_v0 = vld [vmem:[%s1655_s0] sm:$0xff]  ;;  %v1262_v1 = vld [vmem:[%s1655_s0 + $0x8] sm:$0xff]  ;;  %v1267_v2 = vld [vmem:[%s1655_s0 + $0x10] sm:$0xff] }
   0x2   :  { %v34_v3 = vmul.f32 %v1257_v0, %v1257_v0  ;;  %v35_v4 = vmul.f32 %v1262_v1, %v1262_v1  ;;  %v1276_v5 = vld [vmem:[%s1655_s0 + $0x18] sm:$0xff]  ;;  %v36_v6 = vmul.f32 %v1267_v2, %v1267_v2  ;;  %v1283_v7 = vld [vmem:[%s1655_s0 + $0x20] sm:$0xff]  ;;  %v1288_v8 = vld [vmem:[%s1655_s0 + $0x28] sm:$0xff] }
   0x3   :  { %v37_v9 = vmul.f32 %v1276_v5, %v1276_v5  ;;  %v38_v10 = vmul.f32 %v1283_v7, %v1283_v7  ;;  %v39_v11 = vmul.f32 %v1288_v8, %v1288_v8  ;;  %v1299_v12 = vld [vmem:[%s1655_s0 + $0x30] sm:$0xff]  ;;  %v1304_v13 = vld [vmem:[%s1655_s0 + $0x38] sm:$0xff]  ;;  %v1084_v19 = vld [vmem:[%s1656_s2 + $0xc] ss:$24 sps:$4 sm:$0xff]  }
   0x4   :  { %v42_v14 = vadd.f32 %v35_v4, %v34_v3  ;;  %v40_v15 = vmul.f32 %v1299_v12, %v1299_v12  ;;  %v41_v16 = vmul.f32 %v1304_v13, %v1304_v13  ;;  %v1082_v17 = vld [vmem:[%s1656_s2 + $0x4] ss:$24 sps:$4 sm:$0xff]   ;;  %v1086_v20 = vld [vmem:[%s1656_s2] ss:$24 sps:$4 sm:$0xff]   ;;  %736 = vmatprep.subr.bf16.mxu1 %v1084_v19  ;;  %v1088_v24 = vld [vmem:[%s1656_s2 + $0x34] ss:$24 sps:$4 sm:$0xff]  }
   0x5   :  { %v48_v18 = vadd.f32 %v39_v11, %v38_v10  ;;  %v45_v21 = vadd.f32 %v37_v9, %v36_v6  ;;  %683 = vmatprep.subr.bf16.mxu0 %v1082_v17  ;;  %v1087_v22 = vld [vmem:[%s1656_s2 + $0x8] ss:$24 sps:$4 sm:$0xff]   ;;  %v1090_v25 = vld [vmem:[%s1656_s2 + $0x3c] ss:$24 sps:$4 sm:$0xff]   ;;  %v1093_v27 = vld [vmem:[%s1656_s2 + $0x38] ss:$24 sps:$4 sm:$0xff]  }
   0x6   :  { %43 = vadd.xlane.f32.xlu0 %v42_v14  ;;  %v51_v23 = vadd.f32 %v41_v16, %v40_v15  ;;  %684 = vmatpush1.bf16.msra.mxu0 %v1086_v20  ;;  %v1092_v26 = vld [vmem:[%s1656_s2 + $0x30] ss:$24 sps:$4 sm:$0xff]   ;;  %v1094_v28 = vld [vmem:[%s1656_s2 + $0x64] ss:$24 sps:$4 sm:$0xff]   ;;  %v1098_v30 = vld [vmem:[%s1656_s2 + $0x60] ss:$24 sps:$4 sm:$0xff]  }
   0x7   :  { %49 = vadd.xlane.f32.xlu1 %v48_v18  ;;  %737 = vmatpush1.bf16.msra.mxu1 %v1087_v22  ;;  %v1096_v29 = vld [vmem:[%s1656_s2 + $0x6c] ss:$24 sps:$4 sm:$0xff]   ;;  %v1099_v31 = vld [vmem:[%s1656_s2 + $0x68] ss:$24 sps:$4 sm:$0xff]   ;;  %v1102_v33 = vld [vmem:[%s1656_s2 + $0x9c] ss:$24 sps:$4 sm:$0xff]  }
   0x8   :  { %685 = vmatprep.subr.bf16.mxu0 %v1088_v24  ;;  %738 = vmatprep.subr.bf16.mxu1 %v1090_v25  ;;  %v1100_v32 = vld [vmem:[%s1656_s2 + $0x94] ss:$24 sps:$4 sm:$0xff]   ;;  %v1104_v34 = vld [vmem:[%s1656_s2 + $0x90] ss:$24 sps:$4 sm:$0xff]   ;;  %v1106_v36 = vld [vmem:[%s1656_s2 + $0xc4] ss:$24 sps:$4 sm:$0xff]  }
   0x9   :  { %v1105_v35 = vld [vmem:[%s1656_s2 + $0x98] ss:$24 sps:$4 sm:$0xff]   ;;  %v1108_v37 = vld [vmem:[%s1656_s2 + $0xcc] ss:$24 sps:$4 sm:$0xff]   ;;  %v1111_v39 = vld [vmem:[%s1656_s2 + $0xc8] ss:$24 sps:$4 sm:$0xff]  }
   0xa   :  { %46 = vadd.xlane.f32.xlu0 %v45_v21  ;;  %686 = vmatpush1.bf16.msra.mxu0 %v1092_v26  ;;  %v1110_v38 = vld [vmem:[%s1656_s2 + $0xc0] ss:$24 sps:$4 sm:$0xff]   ;;  %v1112_v40 = vld [vmem:[%s1656_s2 + $0xf4] ss:$24 sps:$4 sm:$0xff]   ;;  %v1116_v42 = vld [vmem:[%s1656_s2 + $0xf0] ss:$24 sps:$4 sm:$0xff]  }
   0xb   :  { %52 = vadd.xlane.f32.xlu1 %v51_v23  ;;  %739 = vmatpush1.bf16.msra.mxu1 %v1093_v27  ;;  %v1114_v41 = vld [vmem:[%s1656_s2 + $0xfc] ss:$24 sps:$4 sm:$0xff]   ;;  %v1117_v43 = vld [vmem:[%s1656_s2 + $0xf8] ss:$24 sps:$4 sm:$0xff]   ;;  %v1120_v45 = vld [vmem:[%s1656_s2 + $0x12c] ss:$24 sps:$4 sm:$0xff]  }
   0xc   :  { %687 = vmatprep.subr.bf16.mxu0 %v1094_v28  ;;  %740 = vmatprep.subr.bf16.mxu1 %v1096_v29  ;;  %v1118_v44 = vld [vmem:[%s1656_s2 + $0x124] ss:$24 sps:$4 sm:$0xff]   ;;  %v1122_v46 = vld [vmem:[%s1656_s2 + $0x120] ss:$24 sps:$4 sm:$0xff]   ;;  %v1124_v48 = vld [vmem:[%s1656_s2 + $0x154] ss:$24 sps:$4 sm:$0xff]  }
   0xd   :  { %v1123_v47 = vld [vmem:[%s1656_s2 + $0x128] ss:$24 sps:$4 sm:$0xff]   ;;  %v1126_v49 = vld [vmem:[%s1656_s2 + $0x15c] ss:$24 sps:$4 sm:$0xff]   ;;  %v1129_v51 = vld [vmem:[%s1656_s2 + $0x158] ss:$24 sps:$4 sm:$0xff]  }
   0xe   :  { %688 = vmatpush1.bf16.msra.mxu0 %v1098_v30  ;;  %v1128_v50 = vld [vmem:[%s1656_s2 + $0x150] ss:$24 sps:$4 sm:$0xff]   ;;  %v1130_v52 = vld [vmem:[%s1656_s2 + $0x184] ss:$24 sps:$4 sm:$0xff]   ;;  %v1134_v54 = vld [vmem:[%s1656_s2 + $0x180] ss:$24 sps:$4 sm:$0xff]  }
   0xf   :  { %741 = vmatpush1.bf16.msra.mxu1 %v1099_v31  ;;  %689 = vmatprep.subr.bf16.mxu0 %v1100_v32  ;;  %v1132_v53 = vld [vmem:[%s1656_s2 + $0x18c] ss:$24 sps:$4 sm:$0xff]   ;;  %v1135_v55 = vld [vmem:[%s1656_s2 + $0x188] ss:$24 sps:$4 sm:$0xff]   ;;  %v1138_v57 = vld [vmem:[%s1656_s2 + $0x1bc] ss:$24 sps:$4 sm:$0xff]  }
  0x10   :  { %742 = vmatprep.subr.bf16.mxu1 %v1102_v33  ;;  %v1136_v56 = vld [vmem:[%s1656_s2 + $0x1b4] ss:$24 sps:$4 sm:$0xff]   ;;  %v1140_v58 = vld [vmem:[%s1656_s2 + $0x1b0] ss:$24 sps:$4 sm:$0xff]   ;;  %v1142_v60 = vld [vmem:[%s1656_s2 + $0x1e4] ss:$24 sps:$4 sm:$0xff]  }
  0x11   :  { %v1141_v59 = vld [vmem:[%s1656_s2 + $0x1b8] ss:$24 sps:$4 sm:$0xff]   ;;  %v1144_v61 = vld [vmem:[%s1656_s2 + $0x1ec] ss:$24 sps:$4 sm:$0xff]   ;;  %v1147_v63 = vld [vmem:[%s1656_s2 + $0x1e8] ss:$24 sps:$4 sm:$0xff]  }
  0x12   :  { %690 = vmatpush1.bf16.msra.mxu0 %v1104_v34  ;;  %v1146_v62 = vld [vmem:[%s1656_s2 + $0x1e0] ss:$24 sps:$4 sm:$0xff]   ;;  %v1148_v3 = vld [vmem:[%s1656_s2 + $0x214] ss:$24 sps:$4 sm:$0xff]   ;;  %v1152_v6 = vld [vmem:[%s1656_s2 + $0x210] ss:$24 sps:$4 sm:$0xff]  }
  0x13   :  { %743 = vmatpush1.bf16.msra.mxu1 %v1105_v35  ;;  %691 = vmatprep.subr.bf16.mxu0 %v1106_v36  ;;  %v1150_v4 = vld [vmem:[%s1656_s2 + $0x21c] ss:$24 sps:$4 sm:$0xff]   ;;  %v1153_v9 = vld [vmem:[%s1656_s2 + $0x218] ss:$24 sps:$4 sm:$0xff]   ;;  %v1156_v11 = vld [vmem:[%s1656_s2 + $0x24c] ss:$24 sps:$4 sm:$0xff]  }
  0x14   :  { %744 = vmatprep.subr.bf16.mxu1 %v1108_v37  ;;  %v1154_v10 = vld [vmem:[%s1656_s2 + $0x244] ss:$24 sps:$4 sm:$0xff]   ;;  %v1158_v14 = vld [vmem:[%s1656_s2 + $0x240] ss:$24 sps:$4 sm:$0xff]   ;;  %v1160_v16 = vld [vmem:[%s1656_s2 + $0x274] ss:$24 sps:$4 sm:$0xff]  }
  0x15   :  { %v1159_v15 = vld [vmem:[%s1656_s2 + $0x248] ss:$24 sps:$4 sm:$0xff]   ;;  %v1162_v17 = vld [vmem:[%s1656_s2 + $0x27c] ss:$24 sps:$4 sm:$0xff]   ;;  %v1165_v19 = vld [vmem:[%s1656_s2 + $0x278] ss:$24 sps:$4 sm:$0xff]  }
  0x16   :  { %692 = vmatpush1.bf16.msra.mxu0 %v1110_v38  ;;  %v1164_v18 = vld [vmem:[%s1656_s2 + $0x270] ss:$24 sps:$4 sm:$0xff]   ;;  %v1166_v20 = vld [vmem:[%s1656_s2 + $0x2a4] ss:$24 sps:$4 sm:$0xff]   ;;  %v1170_v22 = vld [vmem:[%s1656_s2 + $0x2a0] ss:$24 sps:$4 sm:$0xff]   ;;  %v77_v38 = vlaneseq }
  0x17   :  { %745 = vmatpush1.bf16.msra.mxu1 %v1111_v39  ;;  %693 = vmatprep.subr.bf16.mxu0 %v1112_v40  ;;  %v1168_v21 = vld [vmem:[%s1656_s2 + $0x2ac] ss:$24 sps:$4 sm:$0xff]   ;;  %v1171_v23 = vld [vmem:[%s1656_s2 + $0x2a8] ss:$24 sps:$4 sm:$0xff]   ;;  %v1174_v25 = vld [vmem:[%s1656_s2 + $0x2dc] ss:$24 sps:$4 sm:$0xff]  }
  0x18   :  { %746 = vmatprep.subr.bf16.mxu1 %v1114_v41  ;;  %v1172_v24 = vld [vmem:[%s1656_s2 + $0x2d4] ss:$24 sps:$4 sm:$0xff]   ;;  %v1176_v26 = vld [vmem:[%s1656_s2 + $0x2d0] ss:$24 sps:$4 sm:$0xff]  }
  0x19   :  { %v1177_v27 = vld [vmem:[%s1656_s2 + $0x2d8] ss:$24 sps:$4 sm:$0xff]   ;;  %v1180_v28 = vld [vmem:[%s1656_s2 + $0x14] ss:$24 sps:$4 sm:$0xff]  }
  0x1a   :  { %694 = vmatpush1.bf16.msra.mxu0 %v1116_v42  ;;  %v78_v42 = vshrl.u32 %v77_v38, 7  ;;  %v1223_v38 = vld [vmem:[%s1656_s2 + $0x2e0] ss:$24 sps:$4 sm:$0xff]  }
  0x1b   :  { %747 = vmatpush1.bf16.msra.mxu1 %v1117_v43  ;;  %695 = vmatprep.subr.bf16.mxu0 %v1118_v44  ;;  %v75_v44 = vld [vmem:[%s1657_s1] sm:$0x3] }
  0x1c   :  { %748 = vmatprep.subr.bf16.mxu1 %v1120_v45  ;;  %v83_v43 = vsub.s32 1, %v78_v42  ;;  %v79_v45 = vsub.s32 0, %v78_v42 }
  0x1e   :  { %696 = vmatpush1.bf16.msra.mxu0 %v1122_v46 }
  0x1f   :  { %749 = vmatpush1.bf16.msra.mxu1 %v1123_v47  ;;  %697 = vmatprep.subr.bf16.mxu0 %v1124_v48 }
  0x20   :  { %750 = vmatprep.subr.bf16.mxu1 %v1126_v49  ;;  %v84_v49 = vrot.slane %v75_v44, %v83_v43 }
  0x22   :  { %698 = vmatpush1.bf16.msra.mxu0 %v1128_v50 }
  0x23   :  { %751 = vmatpush1.bf16.msra.mxu1 %v1129_v51  ;;  %699 = vmatprep.subr.bf16.mxu0 %v1130_v52  ;;  %v80_v51 = vrot.slane %v75_v44, %v79_v45 }
  0x24   :  { %752 = vmatprep.subr.bf16.mxu1 %v1132_v53 }
  0x26   :  { %700 = vmatpush1.bf16.msra.mxu0 %v1134_v54 }
  0x27   :  { %753 = vmatpush1.bf16.msra.mxu1 %v1135_v55  ;;  %701 = vmatprep.subr.bf16.mxu0 %v1136_v56 }
  0x28   :  { %754 = vmatprep.subr.bf16.mxu1 %v1138_v57 }
  0x2a   :  { %702 = vmatpush1.bf16.msra.mxu0 %v1140_v58 }
  0x2b   :  { %755 = vmatpush1.bf16.msra.mxu1 %v1141_v59  ;;  %703 = vmatprep.subr.bf16.mxu0 %v1142_v60 }
  0x2c   :  { %756 = vmatprep.subr.bf16.mxu1 %v1144_v61 }
  0x2e   :  { %704 = vmatpush1.bf16.msra.mxu0 %v1146_v62 }
  0x2f   :  { %757 = vmatpush1.bf16.msra.mxu1 %v1147_v63  ;;  %705 = vmatprep.subr.bf16.mxu0 %v1148_v3 }
  0x30   :  { %758 = vmatprep.subr.bf16.mxu1 %v1150_v4  ;;  %v1181_v4 = vld [vmem:[%s1656_s2 + $0x40] ss:$24 sps:$4 sm:$0xff]  }
  0x32   :  { %706 = vmatpush1.bf16.msra.mxu0 %v1152_v6  ;;  %v1186_v6 = vld [vmem:[%s1656_s2 + $0x74] ss:$24 sps:$4 sm:$0xff]  }
  0x33   :  { %759 = vmatpush1.bf16.msra.mxu1 %v1153_v9  ;;  %707 = vmatprep.subr.bf16.mxu0 %v1154_v10  ;;  %v1184_v10 = vld [vmem:[%s1656_s2 + $0x70] ss:$24 sps:$4 sm:$0xff]  }
  0x34   :  { %760 = vmatprep.subr.bf16.mxu1 %v1156_v11  ;;  %v1189_v11 = vld [vmem:[%s1656_s2 + $0xa4] ss:$24 sps:$4 sm:$0xff]  }
  0x36   :  { %708 = vmatpush1.bf16.msra.mxu0 %v1158_v14  ;;  %v1187_v14 = vld [vmem:[%s1656_s2 + $0xa0] ss:$24 sps:$4 sm:$0xff]  }
  0x37   :  { %761 = vmatpush1.bf16.msra.mxu1 %v1159_v15  ;;  %709 = vmatprep.subr.bf16.mxu0 %v1160_v16  ;;  %v1192_v15 = vld [vmem:[%s1656_s2 + $0xd4] ss:$24 sps:$4 sm:$0xff]   ;;  %v1190_v16 = vld [vmem:[%s1656_s2 + $0xd0] ss:$24 sps:$4 sm:$0xff]  }
  0x38   :  { %762 = vmatprep.subr.bf16.mxu1 %v1162_v17  ;;  %v1195_v17 = vld [vmem:[%s1656_s2 + $0x104] ss:$24 sps:$4 sm:$0xff]  }
  0x3a   :  { %710 = vmatpush1.bf16.msra.mxu0 %v1164_v18  ;;  %v1193_v18 = vld [vmem:[%s1656_s2 + $0x100] ss:$24 sps:$4 sm:$0xff]  }
  0x3b   :  { %763 = vmatpush1.bf16.msra.mxu1 %v1165_v19  ;;  %711 = vmatprep.subr.bf16.mxu0 %v1166_v20  ;;  %v1198_v19 = vld [vmem:[%s1656_s2 + $0x134] ss:$24 sps:$4 sm:$0xff]   ;;  %v1196_v20 = vld [vmem:[%s1656_s2 + $0x130] ss:$24 sps:$4 sm:$0xff]  }
  0x3c   :  { %764 = vmatprep.subr.bf16.mxu1 %v1168_v21  ;;  %v1201_v21 = vld [vmem:[%s1656_s2 + $0x164] ss:$24 sps:$4 sm:$0xff]  }
  0x3e   :  { %712 = vmatpush1.bf16.msra.mxu0 %v1170_v22  ;;  %v1199_v22 = vld [vmem:[%s1656_s2 + $0x160] ss:$24 sps:$4 sm:$0xff]  }
  0x3f   :  { %765 = vmatpush1.bf16.msra.mxu1 %v1171_v23  ;;  %713 = vmatprep.subr.bf16.mxu0 %v1172_v24  ;;  %v1204_v23 = vld [vmem:[%s1656_s2 + $0x194] ss:$24 sps:$4 sm:$0xff]   ;;  %v1202_v24 = vld [vmem:[%s1656_s2 + $0x190] ss:$24 sps:$4 sm:$0xff]  }
  0x40   :  { %766 = vmatprep.subr.bf16.mxu1 %v1174_v25  ;;  %v1207_v25 = vld [vmem:[%s1656_s2 + $0x1c4] ss:$24 sps:$4 sm:$0xff]  }
  0x42   :  { %714 = vmatpush1.bf16.msra.mxu0 %v1176_v26  ;;  %v1205_v26 = vld [vmem:[%s1656_s2 + $0x1c0] ss:$24 sps:$4 sm:$0xff]  }
  0x43   :  { %767 = vmatpush1.bf16.msra.mxu1 %v1177_v27  ;;  %789 = vmatprep.subr.bf16.mxu0 %v1180_v28  ;;  %v1210_v27 = vld [vmem:[%s1656_s2 + $0x1f4] ss:$24 sps:$4 sm:$0xff]  }
  0x44   :  { %1050 = vmatprep.subr.bf16.mxu1 %v1180_v28  ;;  %v1208_v28 = vld [vmem:[%s1656_s2 + $0x1f0] ss:$24 sps:$4 sm:$0xff]  }
  0x93   :  { %v44_v29 = vpop.xlane.xlu0 %43 }
  0x94   :  { %v55_v30 = vmul.f32 0.00390625, %v44_v29  ;;  %v50_v31 = vpop.xlane.xlu1 %49  ;;  %v1213_v29 = vld [vmem:[%s1656_s2 + $0x224] ss:$24 sps:$4 sm:$0xff]  }
  0x95   :  { %v57_v32 = vmul.f32 0.00390625, %v50_v31  ;;  %v1216_v31 = vld [vmem:[%s1656_s2 + $0x254] ss:$24 sps:$4 sm:$0xff]  }
  0x96   :  { %v59_v33 = vadd.f32 1e-06, %v55_v30  ;;  %v1211_v30 = vld [vmem:[%s1656_s2 + $0x220] ss:$24 sps:$4 sm:$0xff]  }
  0x97   :  { %v47_v34 = vpop.xlane.xlu0 %46  ;;  %v61_v35 = vadd.f32 1e-06, %v57_v32  ;;  %v1214_v32 = vld [vmem:[%s1656_s2 + $0x250] ss:$24 sps:$4 sm:$0xff]  }
  0x98   :  { %1226 = vrsqrt.f32 %v59_v33  ;;  %v56_v36 = vmul.f32 0.00390625, %v47_v34  ;;  %v53_v37 = vpop.xlane.xlu1 %52  ;;  %v1219_v33 = vld [vmem:[%s1656_s2 + $0x284] ss:$24 sps:$4 sm:$0xff]   ;;  %v1217_v34 = vld [vmem:[%s1656_s2 + $0x280] ss:$24 sps:$4 sm:$0xff]  }
  0x99   :  { %1228 = vrsqrt.f32 %v61_v35  ;;  %v58_v39 = vmul.f32 0.00390625, %v53_v37  ;;  %v1222_v35 = vld [vmem:[%s1656_s2 + $0x2b4] ss:$24 sps:$4 sm:$0xff]   ;;  %v1225_v37 = vld [vmem:[%s1656_s2 + $0x2e4] ss:$24 sps:$4 sm:$0xff]  }
  0x9a   :  { %v60_v40 = vadd.f32 1e-06, %v56_v36  ;;  %v1220_v36 = vld [vmem:[%s1656_s2 + $0x2b0] ss:$24 sps:$4 sm:$0xff]  }
  0x9b   :  { %v62_v41 = vadd.f32 1e-06, %v58_v39 }
  0x9c   :  { %1230 = vrsqrt.f32 %v60_v40 }
  0x9d   :  { %1232 = vrsqrt.f32 %v62_v41 }
  0xa2   :  { %v1227_v46 = vpop.eup %1226 }
  0xa3   :  { %v1229_v47 = vpop.eup %1228  ;;  %v68_v48 = vmul.f32 %v1227_v46, %v1262_v1  ;;  %v67_v50 = vmul.f32 %v1227_v46, %v1257_v0 }
  0xa4   :  { %v72_v52 = vmul.f32 %v1229_v47, %v1288_v8  ;;  %v71_v63 = vmul.f32 %v1229_v47, %v1283_v7  ;;  %v1178_v8 = vld [vmem:[%s1656_s2 + $0x10] ss:$24 sps:$4 sm:$0xff]  }
  0xa5   :  { %v88_v57 = vmul.f32 %v84_v49, %v68_v48  ;;  %v87_v60 = vmul.f32 %v80_v51, %v67_v50 }
  0xa6   :  { %v1231_v53 = vpop.eup %1230  ;;  %v92_v62 = vmul.f32 %v84_v49, %v72_v52  ;;  %v91_v7 = vmul.f32 %v80_v51, %v71_v63 }
  0xa7   :  { %v1233_v54 = vpop.eup %1232  ;;  %v70_v55 = vmul.f32 %v1231_v53, %v1276_v5  ;;  %v69_v56 = vmul.f32 %v1231_v53, %v1267_v2  ;;  %v1183_v2 = vld [vmem:[%s1656_s2 + $0x44] ss:$24 sps:$4 sm:$0xff]  }
  0xa8   :  { %v74_v58 = vmul.f32 %v1233_v54, %v1304_v13  ;;  %v73_v0 = vmul.f32 %v1233_v54, %v1299_v12 }
  0xa9   :  { %v90_v59 = vmul.f32 %v84_v49, %v70_v55  ;;  %v89_v61 = vmul.f32 %v80_v51, %v69_v56 }
  0xaa   :  { %v94_v1 = vmul.f32 %v84_v49, %v74_v58  ;;  %v93_v12 = vmul.f32 %v80_v51, %v73_v0 }
  0xab   :  { %v96_v3 = vpack.c.bf16 %v90_v59, %v88_v57  ;;  %v1519_v5 = vpack.c.bf16 %v89_v61, %v87_v60 }
  0xac   :  { %v98_v13 = vpack.c.bf16 %v94_v1, %v92_v62  ;;  %v1532_v9 = vpack.c.bf16 %v93_v12, %v91_v7 }
  0xad   :  { %715 = vmatprep.mubr.bf16.mxu0 %v96_v3  ;;  %768 = vmatprep.mubr.bf16.mxu1 %v96_v3 }
  0xae   :  { %716 = vmatmul.mubr.bf16.vlgmr.msra.gmra.mrb[0].mxu0 %v1519_v5  ;;  %769 = vmatmul.mubr.bf16.vlgmr.msra.gmra.mrb[0].mxu1 %v1519_v5 }
  0xaf   :  { %790 = vmatpush1.bf16.msra.mxu0 %v1178_v8  ;;  %1066 = vmatpush1.bf16.msra.mxu1 %v1178_v8 }
  0xb0   :  { %791 = vmatprep.subr.bf16.mxu0 %v1183_v2  ;;  %1051 = vmatprep.subr.bf16.mxu1 %v1183_v2 }
  0xb1   :  { %725 = vmatprep.mubr.bf16.mxu0 %v98_v13  ;;  %778 = vmatprep.mubr.bf16.mxu1 %v98_v13 }
  0xb3   :  { %792 = vmatpush1.bf16.msra.mxu0 %v1181_v4  ;;  %1067 = vmatpush1.bf16.msra.mxu1 %v1181_v4 }
  0xb4   :  { %793 = vmatprep.subr.bf16.mxu0 %v1186_v6  ;;  %1052 = vmatprep.subr.bf16.mxu1 %v1186_v6 }
  0xb6   :  { %726 = vmatmul.mubr.bf16.gmra.mrb[4].mxu0 %v1532_v9  ;;  %779 = vmatmul.mubr.bf16.gmra.mrb[4].mxu1 %v1532_v9 }
  0xb7   :  { %794 = vmatpush1.bf16.msra.mxu0 %v1184_v10  ;;  %1068 = vmatpush1.bf16.msra.mxu1 %v1184_v10 }
  0xb8   :  { %821 = vmatprep.mubr.bf16.mxu0 %v96_v3  ;;  %795 = vmatprep.subr.bf16.mxu0 %v1189_v11 }
  0xb9   :  { %1053 = vmatprep.subr.bf16.mxu1 %v1189_v11  ;;  %831 = vmatprep.mubr.bf16.mxu1 %v98_v13 }
  0xbb   :  { %796 = vmatpush1.bf16.msra.mxu0 %v1187_v14  ;;  %1069 = vmatpush1.bf16.msra.mxu1 %v1187_v14 }
  0xbc   :  { %797 = vmatprep.subr.bf16.mxu0 %v1192_v15  ;;  %1054 = vmatprep.subr.bf16.mxu1 %v1192_v15 }
  0xbf   :  { %798 = vmatpush1.bf16.msra.mxu0 %v1190_v16  ;;  %1070 = vmatpush1.bf16.msra.mxu1 %v1190_v16 }
  0xc0   :  { %799 = vmatprep.subr.bf16.mxu0 %v1195_v17  ;;  %1055 = vmatprep.subr.bf16.mxu1 %v1195_v17 }
  0xc3   :  { %800 = vmatpush1.bf16.msra.mxu0 %v1193_v18  ;;  %1071 = vmatpush1.bf16.msra.mxu1 %v1193_v18 }
  0xc4   :  { %801 = vmatprep.subr.bf16.mxu0 %v1198_v19  ;;  %1056 = vmatprep.subr.bf16.mxu1 %v1198_v19 }
  0xc7   :  { %802 = vmatpush1.bf16.msra.mxu0 %v1196_v20  ;;  %1072 = vmatpush1.bf16.msra.mxu1 %v1196_v20 }
  0xc8   :  { %803 = vmatprep.subr.bf16.mxu0 %v1201_v21  ;;  %1057 = vmatprep.subr.bf16.mxu1 %v1201_v21 }
  0xcb   :  { %804 = vmatpush1.bf16.msra.mxu0 %v1199_v22  ;;  %1073 = vmatpush1.bf16.msra.mxu1 %v1199_v22 }
  0xcc   :  { %805 = vmatprep.subr.bf16.mxu0 %v1204_v23  ;;  %1058 = vmatprep.subr.bf16.mxu1 %v1204_v23 }
  0xcf   :  { %806 = vmatpush1.bf16.msra.mxu0 %v1202_v24  ;;  %1074 = vmatpush1.bf16.msra.mxu1 %v1202_v24 }
  0xd0   :  { %807 = vmatprep.subr.bf16.mxu0 %v1207_v25  ;;  %1059 = vmatprep.subr.bf16.mxu1 %v1207_v25 }
  0xd3   :  { %808 = vmatpush1.bf16.msra.mxu0 %v1205_v26  ;;  %1075 = vmatpush1.bf16.msra.mxu1 %v1205_v26 }
  0xd4   :  { %809 = vmatprep.subr.bf16.mxu0 %v1210_v27  ;;  %1060 = vmatprep.subr.bf16.mxu1 %v1210_v27 }
  0xd7   :  { %810 = vmatpush1.bf16.msra.mxu0 %v1208_v28  ;;  %1076 = vmatpush1.bf16.msra.mxu1 %v1208_v28 }
  0xd8   :  { %811 = vmatprep.subr.bf16.mxu0 %v1213_v29  ;;  %1061 = vmatprep.subr.bf16.mxu1 %v1213_v29 }
  0xdb   :  { %812 = vmatpush1.bf16.msra.mxu0 %v1211_v30  ;;  %1077 = vmatpush1.bf16.msra.mxu1 %v1211_v30 }
  0xdc   :  { %813 = vmatprep.subr.bf16.mxu0 %v1216_v31  ;;  %1062 = vmatprep.subr.bf16.mxu1 %v1216_v31 }
  0xdf   :  { %814 = vmatpush1.bf16.msra.mxu0 %v1214_v32  ;;  %1078 = vmatpush1.bf16.msra.mxu1 %v1214_v32 }
  0xe0   :  { %815 = vmatprep.subr.bf16.mxu0 %v1219_v33  ;;  %1063 = vmatprep.subr.bf16.mxu1 %v1219_v33 }
  0xe3   :  { %816 = vmatpush1.bf16.msra.mxu0 %v1217_v34  ;;  %1079 = vmatpush1.bf16.msra.mxu1 %v1217_v34 }
  0xe4   :  { %817 = vmatprep.subr.bf16.mxu0 %v1222_v35  ;;  %1064 = vmatprep.subr.bf16.mxu1 %v1222_v35 }
  0xe7   :  { %818 = vmatpush1.bf16.msra.mxu0 %v1220_v36  ;;  %1080 = vmatpush1.bf16.msra.mxu1 %v1220_v36 }
  0xe8   :  { %819 = vmatprep.subr.bf16.mxu0 %v1225_v37  ;;  %1065 = vmatprep.subr.bf16.mxu1 %v1225_v37 }
  0xeb   :  { %820 = vmatpush1.bf16.msra.mxu0 %v1223_v38  ;;  %1081 = vmatpush1.bf16.msra.mxu1 %v1223_v38 }
  0xee   :  { %822 = vmatmul.mubr.bf16.vlgmr.msra.gmra.mrb[8].mxu0 %v1519_v5  ;;  %832 = vmatmul.mubr.bf16.vlgmr.msra.gmra.mrb[8].mxu1 %v1532_v9 }
 0x181   :  { %v717_v39 = vpop.f32.mrb[0].mxu0  ;;  %v770_v40 = vpop.f32.mrb[0].mxu1 }
 0x182   :  { %v719_v41 = vpop.f32.mrb[1].mxu0  ;;  %v772_v42 = vpop.f32.mrb[1].mxu1 }
 0x183   :  { %v1038_v43 = vpack.c.bf16 %v719_v41, %v717_v39  ;;  %v1039_v44 = vpack.c.bf16 %v772_v42, %v770_v40  ;;  %v721_v45 = vpop.f32.mrb[2].mxu0  ;;  %v774_v46 = vpop.f32.mrb[2].mxu1 }
 0x184   :  { %v723_v47 = vpop.f32.mrb[3].mxu0  ;;  %v776_v48 = vpop.f32.mrb[3].mxu1 }
 0x185   :  { %914 = vst [vmem:[%s1658_s3] sm:$0xff] %v1038_v43  ;;  %915 = vst [vmem:[%s1658_s3 + $0x8] sm:$0xff] %v1039_v44  ;;  %v1041_v49 = vpack.c.bf16 %v723_v47, %v721_v45  ;;  %v1042_v50 = vpack.c.bf16 %v776_v48, %v774_v46 }
 0x187   :  { %917 = vst [vmem:[%s1658_s3 + $0x18] sm:$0xff] %v1041_v49  ;;  %918 = vst [vmem:[%s1658_s3 + $0x20] sm:$0xff] %v1042_v50 }
 0x189   :  { %v727_v51 = vpop.f32.mrb[4].mxu0  ;;  %v780_v52 = vpop.f32.mrb[4].mxu1 }
 0x18a   :  { %v729_v53 = vpop.f32.mrb[5].mxu0  ;;  %v782_v54 = vpop.f32.mrb[5].mxu1 }
 0x18b   :  { %v1044_v55 = vpack.c.bf16 %v729_v53, %v727_v51  ;;  %v1045_v56 = vpack.c.bf16 %v782_v54, %v780_v52  ;;  %v731_v57 = vpop.f32.mrb[6].mxu0  ;;  %v784_v58 = vpop.f32.mrb[6].mxu1 }
 0x18c   :  { %v733_v59 = vpop.f32.mrb[7].mxu0  ;;  %v786_v60 = vpop.f32.mrb[7].mxu1 }
 0x18d   :  { %920 = vst [vmem:[%s1658_s3 + $0x30] sm:$0xff] %v1044_v55  ;;  %921 = vst [vmem:[%s1658_s3 + $0x38] sm:$0xff] %v1045_v56  ;;  %v1047_v61 = vpack.c.bf16 %v733_v59, %v731_v57  ;;  %v1048_v62 = vpack.c.bf16 %v786_v60, %v784_v58 }
 0x18f   :  { %923 = vst [vmem:[%s1658_s3 + $0x48] sm:$0xff] %v1047_v61  ;;  %924 = vst [vmem:[%s1658_s3 + $0x50] sm:$0xff] %v1048_v62 }
 0x1c1   :  { %v823_v1 = vpop.f32.mrb[8].mxu0  ;;  %v833_v63 = vpop.f32.mrb[8].mxu1 }
 0x1c2   :  { %v825_v0 = vpop.f32.mrb[9].mxu0  ;;  %v835_v3 = vpop.f32.mrb[9].mxu1 }
 0x1c3   :  { %v1040_v8 = vpack.c.bf16 %v825_v0, %v823_v1  ;;  %v1046_v5 = vpack.c.bf16 %v835_v3, %v833_v63  ;;  %v827_v2 = vpop.f32.mrb[10].mxu0  ;;  %v837_v13 = vpop.f32.mrb[10].mxu1 }
 0x1c4   :  { %v829_v7 = vpop.f32.mrb[11].mxu0  ;;  %v839_v12 = vpop.f32.mrb[11].mxu1 }
 0x1c5   :  { %916 = vst [vmem:[%s1658_s3 + $0x10] sm:$0xff] %v1040_v8  ;;  %922 = vst [vmem:[%s1658_s3 + $0x40] sm:$0xff] %v1046_v5  ;;  %v1043_v4 = vpack.c.bf16 %v829_v7, %v827_v2  ;;  %v1049_v6 = vpack.c.bf16 %v839_v12, %v837_v13 }
 0x1c7   :  { %919 = vst [vmem:[%s1658_s3 + $0x28] sm:$0xff] %v1043_v4  ;;  %925 = vst [vmem:[%s1658_s3 + $0x58] sm:$0xff] %v1049_v6 }

// kernel: frozen_clip_t5_forward.33
= control target key start
LH: loop header
LB: loop body
LE: loop exit
PB: predicated region body
PF: predicated region fallthrough
CT: control target
= control target key end

     0   :  { %s641_s1 = inlined_call_operand.vmem [shape: bf16[256,256], index: 1, kind: input, shape index: {}]   ;;  %s642_s0 = inlined_call_operand.vmem [shape: bf16[32,256], index: 0, kind: input, shape index: {}]   ;;  %s643_s2 = inlined_call_operand.vmem [shape: f32[2,32,256], index: 2, kind: input, shape index: {}]   ;;  %s644_s3 = inlined_call_operand.vmem [shape: f32[32,256], index: 3, kind: output, shape index: {}]  }
   0x1   :  { %v387_v0 = vld [vmem:[%s641_s1 + $0x4] ss:$8 sps:$4 sm:$0xff]   ;;  %v389_v1 = vld [vmem:[%s641_s1] ss:$8 sps:$4 sm:$0xff]   ;;  %v390_v2 = vld [vmem:[%s641_s1 + $0x14] ss:$8 sps:$4 sm:$0xff]  }
   0x2   :  { %254 = vmatprep.subr.bf16.mxu0 %v387_v0  ;;  %355 = vmatprep.subr.bf16.mxu1 %v387_v0  ;;  %v392_v3 = vld [vmem:[%s641_s1 + $0x10] ss:$8 sps:$4 sm:$0xff]   ;;  %v393_v4 = vld [vmem:[%s641_s1 + $0x24] ss:$8 sps:$4 sm:$0xff]   ;;  %v395_v5 = vld [vmem:[%s641_s1 + $0x20] ss:$8 sps:$4 sm:$0xff]  }
   0x3   :  { %255 = vmatpush1.bf16.msra.mxu0 %v389_v1  ;;  %371 = vmatpush1.bf16.msra.mxu1 %v389_v1  ;;  %v396_v6 = vld [vmem:[%s641_s1 + $0x34] ss:$8 sps:$4 sm:$0xff]   ;;  %v398_v7 = vld [vmem:[%s641_s1 + $0x30] ss:$8 sps:$4 sm:$0xff]   ;;  %v399_v8 = vld [vmem:[%s641_s1 + $0x44] ss:$8 sps:$4 sm:$0xff]  }
   0x4   :  { %256 = vmatprep.subr.bf16.mxu0 %v390_v2  ;;  %356 = vmatprep.subr.bf16.mxu1 %v390_v2  ;;  %v401_v9 = vld [vmem:[%s641_s1 + $0x40] ss:$8 sps:$4 sm:$0xff]   ;;  %v402_v10 = vld [vmem:[%s641_s1 + $0x54] ss:$8 sps:$4 sm:$0xff]   ;;  %v404_v11 = vld [vmem:[%s641_s1 + $0x50] ss:$8 sps:$4 sm:$0xff]  }
   0x5   :  { %v405_v12 = vld [vmem:[%s641_s1 + $0x64] ss:$8 sps:$4 sm:$0xff]   ;;  %v407_v14 = vld [vmem:[%s641_s1 + $0x60] ss:$8 sps:$4 sm:$0xff]   ;;  %v440_v15 = vld [vmem:[%s642_s0 + $0x14] ss:$8 sps:$4 sm:$0xff]  }
   0x6   :  { %v437_v13 = vld [vmem:[%s642_s0 + $0x4] ss:$8 sps:$4 sm:$0xff]   ;;  %v408_v16 = vld [vmem:[%s641_s1 + $0x74] ss:$8 sps:$4 sm:$0xff]   ;;  %296 = vmatprep.mubr.bf16.mxu1 %v440_v15  ;;  %v410_v17 = vld [vmem:[%s641_s1 + $0x70] ss:$8 sps:$4 sm:$0xff]  }
   0x7   :  { %257 = vmatpush1.bf16.msra.mxu0 %v392_v3  ;;  %372 = vmatpush1.bf16.msra.mxu1 %v392_v3  ;;  %v411_v18 = vld [vmem:[%s641_s1 + $0x84] ss:$8 sps:$4 sm:$0xff]   ;;  %v413_v19 = vld [vmem:[%s641_s1 + $0x80] ss:$8 sps:$4 sm:$0xff]   ;;  %v414_v20 = vld [vmem:[%s641_s1 + $0x94] ss:$8 sps:$4 sm:$0xff]  }
   0x8   :  { %258 = vmatprep.subr.bf16.mxu0 %v393_v4  ;;  %357 = vmatprep.subr.bf16.mxu1 %v393_v4  ;;  %v416_v21 = vld [vmem:[%s641_s1 + $0x90] ss:$8 sps:$4 sm:$0xff]   ;;  %v417_v22 = vld [vmem:[%s641_s1 + $0xa4] ss:$8 sps:$4 sm:$0xff]   ;;  %v419_v23 = vld [vmem:[%s641_s1 + $0xa0] ss:$8 sps:$4 sm:$0xff]  }
   0x9   :  { %286 = vmatprep.mubr.bf16.mxu0 %v437_v13  ;;  %v420_v24 = vld [vmem:[%s641_s1 + $0xb4] ss:$8 sps:$4 sm:$0xff]   ;;  %v422_v25 = vld [vmem:[%s641_s1 + $0xb0] ss:$8 sps:$4 sm:$0xff]   ;;  %v423_v26 = vld [vmem:[%s641_s1 + $0xc4] ss:$8 sps:$4 sm:$0xff]  }
   0xa   :  { %v425_v27 = vld [vmem:[%s641_s1 + $0xc0] ss:$8 sps:$4 sm:$0xff]   ;;  %v426_v28 = vld [vmem:[%s641_s1 + $0xd4] ss:$8 sps:$4 sm:$0xff]   ;;  %v428_v29 = vld [vmem:[%s641_s1 + $0xd0] ss:$8 sps:$4 sm:$0xff]  }
   0xb   :  { %259 = vmatpush1.bf16.msra.mxu0 %v395_v5  ;;  %373 = vmatpush1.bf16.msra.mxu1 %v395_v5  ;;  %v429_v30 = vld [vmem:[%s641_s1 + $0xe4] ss:$8 sps:$4 sm:$0xff]   ;;  %v431_v31 = vld [vmem:[%s641_s1 + $0xe0] ss:$8 sps:$4 sm:$0xff]   ;;  %v432_v32 = vld [vmem:[%s641_s1 + $0xf4] ss:$8 sps:$4 sm:$0xff]  }
   0xc   :  { %260 = vmatprep.subr.bf16.mxu0 %v396_v6  ;;  %358 = vmatprep.subr.bf16.mxu1 %v396_v6  ;;  %v434_v33 = vld [vmem:[%s641_s1 + $0xf0] ss:$8 sps:$4 sm:$0xff]   ;;  %v435_v34 = vld [vmem:[%s642_s0] ss:$8 sps:$4 sm:$0xff]  }
   0xd   :  { %v438_v35 = vld [vmem:[%s642_s0 + $0x10] ss:$8 sps:$4 sm:$0xff]   ;;  %v50_v36 = vld [vmem:[%s643_s2] sm:$0xff]  ;;  %v51_v40 = vld [vmem:[%s643_s2 + $0x8] sm:$0xff] }
   0xe   :  { %v58_v37 = vld [vmem:[%s643_s2 + $0x40] sm:$0xff]  ;;  %v59_v41 = vld [vmem:[%s643_s2 + $0x48] sm:$0xff]  ;;  %v52_v44 = vld [vmem:[%s643_s2 + $0x10] sm:$0xff] }
   0xf   :  { %261 = vmatpush1.bf16.msra.mxu0 %v398_v7  ;;  %374 = vmatpush1.bf16.msra.mxu1 %v398_v7  ;;  %v54_v38 = vld [vmem:[%s643_s2 + $0x20] sm:$0xff]  ;;  %v55_v42 = vld [vmem:[%s643_s2 + $0x28] sm:$0xff]  ;;  %v60_v45 = vld [vmem:[%s643_s2 + $0x50] sm:$0xff]  ;;  %v66_v49 = vadd.f32 %v58_v37, %v50_v36  ;;  %v67_v54 = vadd.f32 %v59_v41, %v51_v40 }
  0x10   :  { %262 = vmatprep.subr.bf16.mxu0 %v399_v8  ;;  %359 = vmatprep.subr.bf16.mxu1 %v399_v8  ;;  %v62_v39 = vld [vmem:[%s643_s2 + $0x60] sm:$0xff]  ;;  %v63_v43 = vld [vmem:[%s643_s2 + $0x68] sm:$0xff]  ;;  %v56_v46 = vld [vmem:[%s643_s2 + $0x30] sm:$0xff]  ;;  %v68_v56 = vadd.f32 %v60_v45, %v52_v44 }
  0x11   :  { %v64_v47 = vld [vmem:[%s643_s2 + $0x70] sm:$0xff]  ;;  %v53_v48 = vld [vmem:[%s643_s2 + $0x18] sm:$0xff]  ;;  %v70_v50 = vadd.f32 %v62_v39, %v54_v38  ;;  %v71_v55 = vadd.f32 %v63_v43, %v55_v42 }
  0x12   :  { %v61_v51 = vld [vmem:[%s643_s2 + $0x58] sm:$0xff]  ;;  %v72_v57 = vadd.f32 %v64_v47, %v56_v46 }
  0x13   :  { %263 = vmatpush1.bf16.msra.mxu0 %v401_v9  ;;  %375 = vmatpush1.bf16.msra.mxu1 %v401_v9  ;;  %v57_v52 = vld [vmem:[%s643_s2 + $0x38] sm:$0xff]  ;;  %v69_v60 = vadd.f32 %v61_v51, %v53_v48 }
  0x14   :  { %264 = vmatprep.subr.bf16.mxu0 %v402_v10  ;;  %360 = vmatprep.subr.bf16.mxu1 %v402_v10  ;;  %v65_v53 = vld [vmem:[%s643_s2 + $0x78] sm:$0xff] }
  0x15   :  { %v73_v61 = vadd.f32 %v65_v53, %v57_v52 }
  0x17   :  { %265 = vmatpush1.bf16.msra.mxu0 %v404_v11  ;;  %376 = vmatpush1.bf16.msra.mxu1 %v404_v11 }
  0x18   :  { %266 = vmatprep.subr.bf16.mxu0 %v405_v12  ;;  %361 = vmatprep.subr.bf16.mxu1 %v405_v12 }
  0x1b   :  { %267 = vmatpush1.bf16.msra.mxu0 %v407_v14  ;;  %377 = vmatpush1.bf16.msra.mxu1 %v407_v14 }
  0x1c   :  { %268 = vmatprep.subr.bf16.mxu0 %v408_v16  ;;  %362 = vmatprep.subr.bf16.mxu1 %v408_v16 }
  0x1f   :  { %269 = vmatpush1.bf16.msra.mxu0 %v410_v17  ;;  %378 = vmatpush1.bf16.msra.mxu1 %v410_v17 }
  0x20   :  { %270 = vmatprep.subr.bf16.mxu0 %v411_v18  ;;  %363 = vmatprep.subr.bf16.mxu1 %v411_v18 }
  0x23   :  { %271 = vmatpush1.bf16.msra.mxu0 %v413_v19  ;;  %379 = vmatpush1.bf16.msra.mxu1 %v413_v19 }
  0x24   :  { %272 = vmatprep.subr.bf16.mxu0 %v414_v20  ;;  %364 = vmatprep.subr.bf16.mxu1 %v414_v20 }
  0x27   :  { %273 = vmatpush1.bf16.msra.mxu0 %v416_v21  ;;  %380 = vmatpush1.bf16.msra.mxu1 %v416_v21 }
  0x28   :  { %274 = vmatprep.subr.bf16.mxu0 %v417_v22  ;;  %365 = vmatprep.subr.bf16.mxu1 %v417_v22 }
  0x2b   :  { %275 = vmatpush1.bf16.msra.mxu0 %v419_v23  ;;  %381 = vmatpush1.bf16.msra.mxu1 %v419_v23 }
  0x2c   :  { %276 = vmatprep.subr.bf16.mxu0 %v420_v24  ;;  %366 = vmatprep.subr.bf16.mxu1 %v420_v24 }
  0x2f   :  { %277 = vmatpush1.bf16.msra.mxu0 %v422_v25  ;;  %382 = vmatpush1.bf16.msra.mxu1 %v422_v25 }
  0x30   :  { %278 = vmatprep.subr.bf16.mxu0 %v423_v26  ;;  %367 = vmatprep.subr.bf16.mxu1 %v423_v26 }
  0x33   :  { %279 = vmatpush1.bf16.msra.mxu0 %v425_v27  ;;  %383 = vmatpush1.bf16.msra.mxu1 %v425_v27 }
  0x34   :  { %280 = vmatprep.subr.bf16.mxu0 %v426_v28  ;;  %368 = vmatprep.subr.bf16.mxu1 %v426_v28 }
  0x37   :  { %281 = vmatpush1.bf16.msra.mxu0 %v428_v29  ;;  %384 = vmatpush1.bf16.msra.mxu1 %v428_v29 }
  0x38   :  { %282 = vmatprep.subr.bf16.mxu0 %v429_v30  ;;  %369 = vmatprep.subr.bf16.mxu1 %v429_v30 }
  0x3b   :  { %283 = vmatpush1.bf16.msra.mxu0 %v431_v31  ;;  %385 = vmatpush1.bf16.msra.mxu1 %v431_v31 }
  0x3c   :  { %284 = vmatprep.subr.bf16.mxu0 %v432_v32  ;;  %370 = vmatprep.subr.bf16.mxu1 %v432_v32 }
  0x3f   :  { %285 = vmatpush1.bf16.msra.mxu0 %v434_v33  ;;  %386 = vmatpush1.bf16.msra.mxu1 %v434_v33 }
  0x42   :  { %287 = vmatmul.mubr.bf16.vlgmr.msra.gmra.mrb[0].mxu0 %v435_v34  ;;  %297 = vmatmul.mubr.bf16.vlgmr.msra.gmra.mrb[0].mxu1 %v438_v35 }
 0x115   :  { %v288_v58 = vpop.f32.mrb[0].mxu0  ;;  %v298_v59 = vpop.f32.mrb[0].mxu1 }
 0x116   :  { %v289_v62 = vadd.f32 %v288_v58, %v66_v49  ;;  %v299_v63 = vadd.f32 %v298_v59, %v70_v50  ;;  %v290_v0 = vpop.f32.mrb[1].mxu0  ;;  %v300_v1 = vpop.f32.mrb[1].mxu1 }
 0x117   :  { %v291_v2 = vadd.f32 %v290_v0, %v67_v54  ;;  %v301_v3 = vadd.f32 %v300_v1, %v71_v55  ;;  %v292_v4 = vpop.f32.mrb[2].mxu0  ;;  %v302_v5 = vpop.f32.mrb[2].mxu1 }
 0x118   :  { %307 = vst [vmem:[%s644_s3] sm:$0xff] %v289_v62  ;;  %311 = vst [vmem:[%s644_s3 + $0x20] sm:$0xff] %v299_v63  ;;  %v293_v6 = vadd.f32 %v292_v4, %v68_v56  ;;  %v303_v7 = vadd.f32 %v302_v5, %v72_v57  ;;  %v294_v8 = vpop.f32.mrb[3].mxu0  ;;  %v304_v9 = vpop.f32.mrb[3].mxu1 }
 0x119   :  { %308 = vst [vmem:[%s644_s3 + $0x8] sm:$0xff] %v291_v2  ;;  %312 = vst [vmem:[%s644_s3 + $0x28] sm:$0xff] %v301_v3  ;;  %v295_v10 = vadd.f32 %v294_v8, %v69_v60  ;;  %v305_v11 = vadd.f32 %v304_v9, %v73_v61 }
 0x11a   :  { %309 = vst [vmem:[%s644_s3 + $0x10] sm:$0xff] %v293_v6  ;;  %313 = vst [vmem:[%s644_s3 + $0x30] sm:$0xff] %v303_v7 }
 0x11b   :  { %310 = vst [vmem:[%s644_s3 + $0x18] sm:$0xff] %v295_v10  ;;  %314 = vst [vmem:[%s644_s3 + $0x38] sm:$0xff] %v305_v11 }

// kernel: frozen_clip_t5_forward.31
= control target key start
LH: loop header
LB: loop body
LE: loop exit
PB: predicated region body
PF: predicated region fallthrough
CT: control target
= control target key end

     0   :  { %s1687_s0 = inlined_call_operand.vmem [shape: f32[2,32,256], index: 0, kind: input, shape index: {}]   ;;  %s1688_s2 = inlined_call_operand.vmem [shape: bf16[256,768], index: 2, kind: input, shape index: {}]   ;;  %s1689_s1 = inlined_call_operand.vmem [shape: f32[1,256], index: 1, kind: input, shape index: {}]   ;;  %s1690_s3 = inlined_call_operand.vmem [shape: bf16[32,768], index: 3, kind: output, shape index: {}]  }
   0x1   :  { %v18_v0 = vld [vmem:[%s1687_s0] sm:$0xff]  ;;  %v19_v1 = vld [vmem:[%s1687_s0 + $0x8] sm:$0xff]  ;;  %v20_v5 = vld [vmem:[%s1687_s0 + $0x10] sm:$0xff] }
   0x2   :  { %v26_v2 = vld [vmem:[%s1687_s0 + $0x40] sm:$0xff]  ;;  %v27_v3 = vld [vmem:[%s1687_s0 + $0x48] sm:$0xff]  ;;  %v21_v6 = vld [vmem:[%s1687_s0 + $0x18] sm:$0xff] }
   0x3   :  { %v1274_v4 = vadd.f32 %v26_v2, %v18_v0  ;;  %v1282_v7 = vadd.f32 %v27_v3, %v19_v1  ;;  %v28_v8 = vld [vmem:[%s1687_s0 + $0x50] sm:$0xff]  ;;  %v29_v9 = vld [vmem:[%s1687_s0 + $0x58] sm:$0xff]  ;;  %v22_v10 = vld [vmem:[%s1687_s0 + $0x20] sm:$0xff] }
   0x4   :  { %v1295_v12 = vadd.f32 %v28_v8, %v20_v5  ;;  %v1297_v13 = vadd.f32 %v29_v9, %v21_v6  ;;  %v23_v14 = vld [vmem:[%s1687_s0 + $0x28] sm:$0xff]  ;;  %v30_v15 = vld [vmem:[%s1687_s0 + $0x60] sm:$0xff]  ;;  %v24_v20 = vld [vmem:[%s1687_s0 + $0x30] sm:$0xff] }
   0x5   :  { %v42_v11 = vmul.f32 %v1274_v4, %v1274_v4  ;;  %v31_v16 = vld [vmem:[%s1687_s0 + $0x68] sm:$0xff]  ;;  %v43_v17 = vmul.f32 %v1282_v7, %v1282_v7  ;;  %v1310_v18 = vadd.f32 %v30_v15, %v22_v10  ;;  %v25_v21 = vld [vmem:[%s1687_s0 + $0x38] sm:$0xff]  ;;  %v32_v22 = vld [vmem:[%s1687_s0 + $0x70] sm:$0xff] }
   0x6   :  { %v1312_v19 = vadd.f32 %v31_v16, %v23_v14  ;;  %v44_v23 = vmul.f32 %v1295_v12, %v1295_v12  ;;  %v45_v24 = vmul.f32 %v1297_v13, %v1297_v13  ;;  %v33_v25 = vld [vmem:[%s1687_s0 + $0x78] sm:$0xff]  ;;  %v1330_v26 = vadd.f32 %v32_v22, %v24_v20  ;;  %v1092_v33 = vld [vmem:[%s1688_s2 + $0xc] ss:$24 sps:$4 sm:$0xff]   ;;  %v1095_v35 = vld [vmem:[%s1688_s2 + $0x8] ss:$24 sps:$4 sm:$0xff]  }
   0x7   :  { %v50_v27 = vadd.f32 %v43_v17, %v42_v11  ;;  %v46_v28 = vmul.f32 %v1310_v18, %v1310_v18  ;;  %v1336_v30 = vadd.f32 %v33_v25, %v25_v21  ;;  %v1090_v31 = vld [vmem:[%s1688_s2 + $0x4] ss:$24 sps:$4 sm:$0xff]   ;;  %v1094_v34 = vld [vmem:[%s1688_s2] ss:$24 sps:$4 sm:$0xff]   ;;  %v1096_v39 = vld [vmem:[%s1688_s2 + $0x34] ss:$24 sps:$4 sm:$0xff]   ;;  %744 = vmatprep.subr.bf16.mxu1 %v1092_v33 }
   0x8   :  { %v47_v29 = vmul.f32 %v1312_v19, %v1312_v19  ;;  %v48_v32 = vmul.f32 %v1330_v26, %v1330_v26  ;;  %v53_v36 = vadd.f32 %v45_v24, %v44_v23  ;;  %691 = vmatprep.subr.bf16.mxu0 %v1090_v31  ;;  %v1098_v40 = vld [vmem:[%s1688_s2 + $0x3c] ss:$24 sps:$4 sm:$0xff]   ;;  %745 = vmatpush1.bf16.msra.mxu1 %v1095_v35  ;;  %v1100_v42 = vld [vmem:[%s1688_s2 + $0x30] ss:$24 sps:$4 sm:$0xff]   ;;  %v1104_v45 = vld [vmem:[%s1688_s2 + $0x6c] ss:$24 sps:$4 sm:$0xff]  }
   0x9   :  { %51 = vadd.xlane.f32.xlu0 %v50_v27  ;;  %v49_v38 = vmul.f32 %v1336_v30, %v1336_v30  ;;  %692 = vmatpush1.bf16.msra.mxu0 %v1094_v34  ;;  %v1101_v43 = vld [vmem:[%s1688_s2 + $0x38] ss:$24 sps:$4 sm:$0xff]   ;;  %v1102_v44 = vld [vmem:[%s1688_s2 + $0x64] ss:$24 sps:$4 sm:$0xff]   ;;  %v1107_v47 = vld [vmem:[%s1688_s2 + $0x68] ss:$24 sps:$4 sm:$0xff]  }
   0xa   :  { %v56_v37 = vadd.f32 %v47_v29, %v46_v28  ;;  %693 = vmatprep.subr.bf16.mxu0 %v1096_v39  ;;  %746 = vmatprep.subr.bf16.mxu1 %v1098_v40  ;;  %v1106_v46 = vld [vmem:[%s1688_s2 + $0x60] ss:$24 sps:$4 sm:$0xff]   ;;  %v1108_v48 = vld [vmem:[%s1688_s2 + $0x94] ss:$24 sps:$4 sm:$0xff]   ;;  %v1112_v50 = vld [vmem:[%s1688_s2 + $0x90] ss:$24 sps:$4 sm:$0xff]  }
   0xb   :  { %v59_v41 = vadd.f32 %v49_v38, %v48_v32  ;;  %v1110_v49 = vld [vmem:[%s1688_s2 + $0x9c] ss:$24 sps:$4 sm:$0xff]   ;;  %v1113_v51 = vld [vmem:[%s1688_s2 + $0x98] ss:$24 sps:$4 sm:$0xff]   ;;  %v1116_v53 = vld [vmem:[%s1688_s2 + $0xcc] ss:$24 sps:$4 sm:$0xff]  }
   0xc   :  { %57 = vadd.xlane.f32.xlu1 %v56_v37  ;;  %747 = vmatpush1.bf16.msra.mxu1 %v1101_v43  ;;  %v1114_v52 = vld [vmem:[%s1688_s2 + $0xc4] ss:$24 sps:$4 sm:$0xff]   ;;  %v1118_v54 = vld [vmem:[%s1688_s2 + $0xc0] ss:$24 sps:$4 sm:$0xff]   ;;  %v1120_v56 = vld [vmem:[%s1688_s2 + $0xf4] ss:$24 sps:$4 sm:$0xff]  }
   0xd   :  { %54 = vadd.xlane.f32.xlu0 %v53_v36  ;;  %694 = vmatpush1.bf16.msra.mxu0 %v1100_v42  ;;  %v1119_v55 = vld [vmem:[%s1688_s2 + $0xc8] ss:$24 sps:$4 sm:$0xff]   ;;  %v1122_v57 = vld [vmem:[%s1688_s2 + $0xfc] ss:$24 sps:$4 sm:$0xff]   ;;  %v1125_v59 = vld [vmem:[%s1688_s2 + $0xf8] ss:$24 sps:$4 sm:$0xff]  }
   0xe   :  { %695 = vmatprep.subr.bf16.mxu0 %v1102_v44  ;;  %748 = vmatprep.subr.bf16.mxu1 %v1104_v45  ;;  %v1124_v58 = vld [vmem:[%s1688_s2 + $0xf0] ss:$24 sps:$4 sm:$0xff]   ;;  %v1126_v60 = vld [vmem:[%s1688_s2 + $0x124] ss:$24 sps:$4 sm:$0xff]   ;;  %v1130_v62 = vld [vmem:[%s1688_s2 + $0x120] ss:$24 sps:$4 sm:$0xff]  }
   0xf   :  { %v1128_v61 = vld [vmem:[%s1688_s2 + $0x12c] ss:$24 sps:$4 sm:$0xff]   ;;  %v1131_v63 = vld [vmem:[%s1688_s2 + $0x128] ss:$24 sps:$4 sm:$0xff]   ;;  %v1134_v1 = vld [vmem:[%s1688_s2 + $0x15c] ss:$24 sps:$4 sm:$0xff]  }
  0x10   :  { %60 = vadd.xlane.f32.xlu1 %v59_v41  ;;  %749 = vmatpush1.bf16.msra.mxu1 %v1107_v47  ;;  %v1132_v0 = vld [vmem:[%s1688_s2 + $0x154] ss:$24 sps:$4 sm:$0xff]   ;;  %v1136_v2 = vld [vmem:[%s1688_s2 + $0x150] ss:$24 sps:$4 sm:$0xff]   ;;  %v1138_v5 = vld [vmem:[%s1688_s2 + $0x184] ss:$24 sps:$4 sm:$0xff]  }
  0x11   :  { %696 = vmatpush1.bf16.msra.mxu0 %v1106_v46  ;;  %750 = vmatprep.subr.bf16.mxu1 %v1110_v49  ;;  %v1137_v3 = vld [vmem:[%s1688_s2 + $0x158] ss:$24 sps:$4 sm:$0xff]   ;;  %v1140_v6 = vld [vmem:[%s1688_s2 + $0x18c] ss:$24 sps:$4 sm:$0xff]   ;;  %v1143_v9 = vld [vmem:[%s1688_s2 + $0x188] ss:$24 sps:$4 sm:$0xff]  }
  0x12   :  { %697 = vmatprep.subr.bf16.mxu0 %v1108_v48  ;;  %v1142_v8 = vld [vmem:[%s1688_s2 + $0x180] ss:$24 sps:$4 sm:$0xff]   ;;  %v1144_v10 = vld [vmem:[%s1688_s2 + $0x1b4] ss:$24 sps:$4 sm:$0xff]   ;;  %v1148_v14 = vld [vmem:[%s1688_s2 + $0x1b0] ss:$24 sps:$4 sm:$0xff]  }
  0x13   :  { %v1146_v11 = vld [vmem:[%s1688_s2 + $0x1bc] ss:$24 sps:$4 sm:$0xff]   ;;  %v1149_v15 = vld [vmem:[%s1688_s2 + $0x1b8] ss:$24 sps:$4 sm:$0xff]   ;;  %v1152_v17 = vld [vmem:[%s1688_s2 + $0x1ec] ss:$24 sps:$4 sm:$0xff]  }
  0x14   :  { %751 = vmatpush1.bf16.msra.mxu1 %v1113_v51  ;;  %v1150_v16 = vld [vmem:[%s1688_s2 + $0x1e4] ss:$24 sps:$4 sm:$0xff]   ;;  %v1154_v20 = vld [vmem:[%s1688_s2 + $0x1e0] ss:$24 sps:$4 sm:$0xff]   ;;  %v1156_v22 = vld [vmem:[%s1688_s2 + $0x214] ss:$24 sps:$4 sm:$0xff]  }
  0x15   :  { %698 = vmatpush1.bf16.msra.mxu0 %v1112_v50  ;;  %752 = vmatprep.subr.bf16.mxu1 %v1116_v53  ;;  %v1155_v21 = vld [vmem:[%s1688_s2 + $0x1e8] ss:$24 sps:$4 sm:$0xff]   ;;  %v1158_v23 = vld [vmem:[%s1688_s2 + $0x21c] ss:$24 sps:$4 sm:$0xff]   ;;  %v1161_v25 = vld [vmem:[%s1688_s2 + $0x218] ss:$24 sps:$4 sm:$0xff]   ;;  %v85_v53 = vlaneseq }
  0x16   :  { %699 = vmatprep.subr.bf16.mxu0 %v1114_v52  ;;  %v1160_v24 = vld [vmem:[%s1688_s2 + $0x210] ss:$24 sps:$4 sm:$0xff]   ;;  %v1162_v27 = vld [vmem:[%s1688_s2 + $0x244] ss:$24 sps:$4 sm:$0xff]   ;;  %v1166_v29 = vld [vmem:[%s1688_s2 + $0x240] ss:$24 sps:$4 sm:$0xff]  }
  0x17   :  { %v1164_v28 = vld [vmem:[%s1688_s2 + $0x24c] ss:$24 sps:$4 sm:$0xff]   ;;  %v1167_v31 = vld [vmem:[%s1688_s2 + $0x248] ss:$24 sps:$4 sm:$0xff]   ;;  %v1170_v33 = vld [vmem:[%s1688_s2 + $0x27c] ss:$24 sps:$4 sm:$0xff]  }
  0x18   :  { %753 = vmatpush1.bf16.msra.mxu1 %v1119_v55  ;;  %v1168_v32 = vld [vmem:[%s1688_s2 + $0x274] ss:$24 sps:$4 sm:$0xff]   ;;  %v1172_v34 = vld [vmem:[%s1688_s2 + $0x270] ss:$24 sps:$4 sm:$0xff]   ;;  %v1174_v36 = vld [vmem:[%s1688_s2 + $0x2a4] ss:$24 sps:$4 sm:$0xff]  }
  0x19   :  { %700 = vmatpush1.bf16.msra.mxu0 %v1118_v54  ;;  %754 = vmatprep.subr.bf16.mxu1 %v1122_v57  ;;  %v1173_v35 = vld [vmem:[%s1688_s2 + $0x278] ss:$24 sps:$4 sm:$0xff]   ;;  %v1176_v37 = vld [vmem:[%s1688_s2 + $0x2ac] ss:$24 sps:$4 sm:$0xff]   ;;  %v1179_v39 = vld [vmem:[%s1688_s2 + $0x2a8] ss:$24 sps:$4 sm:$0xff]  }
  0x1a   :  { %701 = vmatprep.subr.bf16.mxu0 %v1120_v56  ;;  %v1178_v38 = vld [vmem:[%s1688_s2 + $0x2a0] ss:$24 sps:$4 sm:$0xff]   ;;  %v1180_v40 = vld [vmem:[%s1688_s2 + $0x2d4] ss:$24 sps:$4 sm:$0xff]   ;;  %v1184_v42 = vld [vmem:[%s1688_s2 + $0x2d0] ss:$24 sps:$4 sm:$0xff]  }
  0x1b   :  { %v1182_v41 = vld [vmem:[%s1688_s2 + $0x2dc] ss:$24 sps:$4 sm:$0xff]   ;;  %v1185_v43 = vld [vmem:[%s1688_s2 + $0x2d8] ss:$24 sps:$4 sm:$0xff]  }
  0x1c   :  { %755 = vmatpush1.bf16.msra.mxu1 %v1125_v59  ;;  %v1188_v44 = vld [vmem:[%s1688_s2 + $0x14] ss:$24 sps:$4 sm:$0xff]  }
  0x1d   :  { %702 = vmatpush1.bf16.msra.mxu0 %v1124_v58  ;;  %756 = vmatprep.subr.bf16.mxu1 %v1128_v61  ;;  %v86_v58 = vshrl.u32 %v85_v53, 7  ;;  %v83_v61 = vld [vmem:[%s1689_s1] sm:$0x3]  ;;  %v1233_v53 = vld [vmem:[%s1688_s2 + $0x2e4] ss:$24 sps:$4 sm:$0xff]  }
  0x1e   :  { %703 = vmatprep.subr.bf16.mxu0 %v1126_v60 }
  0x1f   :  { %v91_v59 = vsub.s32 1, %v86_v58  ;;  %v87_v60 = vsub.s32 0, %v86_v58 }
  0x20   :  { %757 = vmatpush1.bf16.msra.mxu1 %v1131_v63 }
  0x21   :  { %704 = vmatpush1.bf16.msra.mxu0 %v1130_v62  ;;  %758 = vmatprep.subr.bf16.mxu1 %v1134_v1  ;;  %v92_v1 = vrot.slane %v83_v61, %v91_v59 }
  0x22   :  { %705 = vmatprep.subr.bf16.mxu0 %v1132_v0 }
  0x24   :  { %759 = vmatpush1.bf16.msra.mxu1 %v1137_v3  ;;  %v88_v3 = vrot.slane %v83_v61, %v87_v60 }
  0x25   :  { %706 = vmatpush1.bf16.msra.mxu0 %v1136_v2  ;;  %760 = vmatprep.subr.bf16.mxu1 %v1140_v6 }
  0x26   :  { %707 = vmatprep.subr.bf16.mxu0 %v1138_v5 }
  0x28   :  { %761 = vmatpush1.bf16.msra.mxu1 %v1143_v9 }
  0x29   :  { %708 = vmatpush1.bf16.msra.mxu0 %v1142_v8  ;;  %762 = vmatprep.subr.bf16.mxu1 %v1146_v11 }
  0x2a   :  { %709 = vmatprep.subr.bf16.mxu0 %v1144_v10 }
  0x2c   :  { %763 = vmatpush1.bf16.msra.mxu1 %v1149_v15 }
  0x2d   :  { %710 = vmatpush1.bf16.msra.mxu0 %v1148_v14  ;;  %764 = vmatprep.subr.bf16.mxu1 %v1152_v17 }
  0x2e   :  { %711 = vmatprep.subr.bf16.mxu0 %v1150_v16 }
  0x30   :  { %765 = vmatpush1.bf16.msra.mxu1 %v1155_v21 }
  0x31   :  { %712 = vmatpush1.bf16.msra.mxu0 %v1154_v20  ;;  %766 = vmatprep.subr.bf16.mxu1 %v1158_v23  ;;  %v1189_v23 = vld [vmem:[%s1688_s2 + $0x40] ss:$24 sps:$4 sm:$0xff]  }
  0x32   :  { %713 = vmatprep.subr.bf16.mxu0 %v1156_v22  ;;  %v1191_v22 = vld [vmem:[%s1688_s2 + $0x44] ss:$24 sps:$4 sm:$0xff]  }
  0x34   :  { %767 = vmatpush1.bf16.msra.mxu1 %v1161_v25 }
  0x35   :  { %714 = vmatpush1.bf16.msra.mxu0 %v1160_v24  ;;  %768 = vmatprep.subr.bf16.mxu1 %v1164_v28  ;;  %v1194_v24 = vld [vmem:[%s1688_s2 + $0x74] ss:$24 sps:$4 sm:$0xff]   ;;  %v1197_v28 = vld [vmem:[%s1688_s2 + $0xa4] ss:$24 sps:$4 sm:$0xff]  }
  0x36   :  { %715 = vmatprep.subr.bf16.mxu0 %v1162_v27  ;;  %v1192_v27 = vld [vmem:[%s1688_s2 + $0x70] ss:$24 sps:$4 sm:$0xff]  }
  0x38   :  { %769 = vmatpush1.bf16.msra.mxu1 %v1167_v31  ;;  %v1200_v31 = vld [vmem:[%s1688_s2 + $0xd4] ss:$24 sps:$4 sm:$0xff]  }
  0x39   :  { %716 = vmatpush1.bf16.msra.mxu0 %v1166_v29  ;;  %770 = vmatprep.subr.bf16.mxu1 %v1170_v33  ;;  %v1195_v29 = vld [vmem:[%s1688_s2 + $0xa0] ss:$24 sps:$4 sm:$0xff]   ;;  %v1203_v33 = vld [vmem:[%s1688_s2 + $0x104] ss:$24 sps:$4 sm:$0xff]  }
  0x3a   :  { %717 = vmatprep.subr.bf16.mxu0 %v1168_v32  ;;  %v1198_v32 = vld [vmem:[%s1688_s2 + $0xd0] ss:$24 sps:$4 sm:$0xff]  }
  0x3c   :  { %771 = vmatpush1.bf16.msra.mxu1 %v1173_v35  ;;  %v1206_v35 = vld [vmem:[%s1688_s2 + $0x134] ss:$24 sps:$4 sm:$0xff]  }
  0x3d   :  { %718 = vmatpush1.bf16.msra.mxu0 %v1172_v34  ;;  %772 = vmatprep.subr.bf16.mxu1 %v1176_v37  ;;  %v1201_v34 = vld [vmem:[%s1688_s2 + $0x100] ss:$24 sps:$4 sm:$0xff]   ;;  %v1209_v37 = vld [vmem:[%s1688_s2 + $0x164] ss:$24 sps:$4 sm:$0xff]  }
  0x3e   :  { %719 = vmatprep.subr.bf16.mxu0 %v1174_v36  ;;  %v1204_v36 = vld [vmem:[%s1688_s2 + $0x130] ss:$24 sps:$4 sm:$0xff]  }
  0x40   :  { %773 = vmatpush1.bf16.msra.mxu1 %v1179_v39  ;;  %v1212_v39 = vld [vmem:[%s1688_s2 + $0x194] ss:$24 sps:$4 sm:$0xff]  }
  0x41   :  { %720 = vmatpush1.bf16.msra.mxu0 %v1178_v38  ;;  %774 = vmatprep.subr.bf16.mxu1 %v1182_v41  ;;  %v1207_v38 = vld [vmem:[%s1688_s2 + $0x160] ss:$24 sps:$4 sm:$0xff]   ;;  %v1215_v41 = vld [vmem:[%s1688_s2 + $0x1c4] ss:$24 sps:$4 sm:$0xff]  }
  0x42   :  { %721 = vmatprep.subr.bf16.mxu0 %v1180_v40  ;;  %v1210_v40 = vld [vmem:[%s1688_s2 + $0x190] ss:$24 sps:$4 sm:$0xff]  }
  0x44   :  { %775 = vmatpush1.bf16.msra.mxu1 %v1185_v43  ;;  %v1218_v43 = vld [vmem:[%s1688_s2 + $0x1f4] ss:$24 sps:$4 sm:$0xff]  }
  0x45   :  { %722 = vmatpush1.bf16.msra.mxu0 %v1184_v42  ;;  %1058 = vmatprep.subr.bf16.mxu1 %v1188_v44  ;;  %v1213_v42 = vld [vmem:[%s1688_s2 + $0x1c0] ss:$24 sps:$4 sm:$0xff]  }
  0x46   :  { %797 = vmatprep.subr.bf16.mxu0 %v1188_v44  ;;  %v1216_v44 = vld [vmem:[%s1688_s2 + $0x1f0] ss:$24 sps:$4 sm:$0xff]  }
  0x96   :  { %v52_v45 = vpop.xlane.xlu0 %51 }
  0x97   :  { %v63_v46 = vmul.f32 0.00390625, %v52_v45  ;;  %v1221_v45 = vld [vmem:[%s1688_s2 + $0x224] ss:$24 sps:$4 sm:$0xff]  }
  0x99   :  { %v58_v47 = vpop.xlane.xlu1 %57  ;;  %v67_v48 = vadd.f32 1e-06, %v63_v46  ;;  %v1219_v46 = vld [vmem:[%s1688_s2 + $0x220] ss:$24 sps:$4 sm:$0xff]  }
  0x9a   :  { %v65_v49 = vmul.f32 0.00390625, %v58_v47  ;;  %v55_v50 = vpop.xlane.xlu0 %54  ;;  %v1224_v47 = vld [vmem:[%s1688_s2 + $0x254] ss:$24 sps:$4 sm:$0xff]  }
  0x9b   :  { %1234 = vrsqrt.f32 %v67_v48  ;;  %v64_v51 = vmul.f32 0.00390625, %v55_v50  ;;  %v1222_v48 = vld [vmem:[%s1688_s2 + $0x250] ss:$24 sps:$4 sm:$0xff]   ;;  %v1225_v50 = vld [vmem:[%s1688_s2 + $0x280] ss:$24 sps:$4 sm:$0xff]  }
  0x9c   :  { %v69_v52 = vadd.f32 1e-06, %v65_v49  ;;  %v1227_v49 = vld [vmem:[%s1688_s2 + $0x284] ss:$24 sps:$4 sm:$0xff]  }
  0x9d   :  { %v61_v54 = vpop.xlane.xlu1 %60  ;;  %v68_v55 = vadd.f32 1e-06, %v64_v51  ;;  %v1230_v51 = vld [vmem:[%s1688_s2 + $0x2b4] ss:$24 sps:$4 sm:$0xff]  }
  0x9e   :  { %1236 = vrsqrt.f32 %v69_v52  ;;  %v66_v56 = vmul.f32 0.00390625, %v61_v54  ;;  %v1228_v52 = vld [vmem:[%s1688_s2 + $0x2b0] ss:$24 sps:$4 sm:$0xff]   ;;  %v1231_v54 = vld [vmem:[%s1688_s2 + $0x2e0] ss:$24 sps:$4 sm:$0xff]  }
  0x9f   :  { %1238 = vrsqrt.f32 %v68_v55 }
  0xa0   :  { %v70_v57 = vadd.f32 1e-06, %v66_v56 }
  0xa2   :  { %1240 = vrsqrt.f32 %v70_v57 }
  0xa5   :  { %v1235_v62 = vpop.eup %1234 }
  0xa6   :  { %v76_v0 = vmul.f32 %v1235_v62, %v1282_v7  ;;  %v75_v2 = vmul.f32 %v1235_v62, %v1274_v4 }
  0xa8   :  { %v1237_v63 = vpop.eup %1236  ;;  %v96_v11 = vmul.f32 %v92_v1, %v76_v0  ;;  %v95_v14 = vmul.f32 %v88_v3, %v75_v2 }
  0xa9   :  { %v80_v5 = vmul.f32 %v1237_v63, %v1312_v19  ;;  %v1239_v6 = vpop.eup %1238  ;;  %v79_v7 = vmul.f32 %v1237_v63, %v1310_v18  ;;  %v1186_v19 = vld [vmem:[%s1688_s2 + $0x10] ss:$24 sps:$4 sm:$0xff]  }
  0xaa   :  { %v78_v8 = vmul.f32 %v1239_v6, %v1297_v13  ;;  %v77_v9 = vmul.f32 %v1239_v6, %v1295_v12 }
  0xab   :  { %v100_v20 = vmul.f32 %v92_v1, %v80_v5  ;;  %v99_v18 = vmul.f32 %v88_v3, %v79_v7 }
  0xac   :  { %v1241_v10 = vpop.eup %1240  ;;  %v98_v15 = vmul.f32 %v92_v1, %v78_v8  ;;  %v97_v16 = vmul.f32 %v88_v3, %v77_v9 }
  0xad   :  { %v82_v17 = vmul.f32 %v1241_v10, %v1336_v30  ;;  %v81_v4 = vmul.f32 %v1241_v10, %v1330_v26 }
  0xae   :  { %v104_v21 = vpack.c.bf16 %v98_v15, %v96_v11  ;;  %v1551_v13 = vpack.c.bf16 %v97_v16, %v95_v14 }
  0xaf   :  { %v102_v12 = vmul.f32 %v92_v1, %v82_v17  ;;  %v101_v26 = vmul.f32 %v88_v3, %v81_v4 }
  0xb0   :  { %723 = vmatprep.mubr.bf16.mxu0 %v104_v21  ;;  %776 = vmatprep.mubr.bf16.mxu1 %v104_v21 }
  0xb1   :  { %v106_v30 = vpack.c.bf16 %v102_v12, %v100_v20  ;;  %724 = vmatmul.mubr.bf16.vlgmr.msra.gmra.mrb[0].mxu0 %v1551_v13  ;;  %777 = vmatmul.mubr.bf16.vlgmr.msra.gmra.mrb[0].mxu1 %v1551_v13  ;;  %v1564_v25 = vpack.c.bf16 %v101_v26, %v99_v18 }
  0xb2   :  { %798 = vmatpush1.bf16.msra.mxu0 %v1186_v19  ;;  %1074 = vmatpush1.bf16.msra.mxu1 %v1186_v19 }
  0xb3   :  { %799 = vmatprep.subr.bf16.mxu0 %v1191_v22  ;;  %1059 = vmatprep.subr.bf16.mxu1 %v1191_v22 }
  0xb4   :  { %733 = vmatprep.mubr.bf16.mxu0 %v106_v30  ;;  %786 = vmatprep.mubr.bf16.mxu1 %v106_v30 }
  0xb6   :  { %800 = vmatpush1.bf16.msra.mxu0 %v1189_v23  ;;  %1075 = vmatpush1.bf16.msra.mxu1 %v1189_v23 }
  0xb7   :  { %801 = vmatprep.subr.bf16.mxu0 %v1194_v24  ;;  %1060 = vmatprep.subr.bf16.mxu1 %v1194_v24 }
  0xb9   :  { %734 = vmatmul.mubr.bf16.gmra.mrb[4].mxu0 %v1564_v25  ;;  %787 = vmatmul.mubr.bf16.gmra.mrb[4].mxu1 %v1564_v25 }
  0xba   :  { %802 = vmatpush1.bf16.msra.mxu0 %v1192_v27  ;;  %1076 = vmatpush1.bf16.msra.mxu1 %v1192_v27 }
  0xbb   :  { %829 = vmatprep.mubr.bf16.mxu0 %v104_v21  ;;  %803 = vmatprep.subr.bf16.mxu0 %v1197_v28 }
  0xbc   :  { %1061 = vmatprep.subr.bf16.mxu1 %v1197_v28  ;;  %839 = vmatprep.mubr.bf16.mxu1 %v106_v30 }
  0xbe   :  { %804 = vmatpush1.bf16.msra.mxu0 %v1195_v29  ;;  %1077 = vmatpush1.bf16.msra.mxu1 %v1195_v29 }
  0xbf   :  { %805 = vmatprep.subr.bf16.mxu0 %v1200_v31  ;;  %1062 = vmatprep.subr.bf16.mxu1 %v1200_v31 }
  0xc2   :  { %806 = vmatpush1.bf16.msra.mxu0 %v1198_v32  ;;  %1078 = vmatpush1.bf16.msra.mxu1 %v1198_v32 }
  0xc3   :  { %807 = vmatprep.subr.bf16.mxu0 %v1203_v33  ;;  %1063 = vmatprep.subr.bf16.mxu1 %v1203_v33 }
  0xc6   :  { %808 = vmatpush1.bf16.msra.mxu0 %v1201_v34  ;;  %1079 = vmatpush1.bf16.msra.mxu1 %v1201_v34 }
  0xc7   :  { %809 = vmatprep.subr.bf16.mxu0 %v1206_v35  ;;  %1064 = vmatprep.subr.bf16.mxu1 %v1206_v35 }
  0xca   :  { %810 = vmatpush1.bf16.msra.mxu0 %v1204_v36  ;;  %1080 = vmatpush1.bf16.msra.mxu1 %v1204_v36 }
  0xcb   :  { %811 = vmatprep.subr.bf16.mxu0 %v1209_v37  ;;  %1065 = vmatprep.subr.bf16.mxu1 %v1209_v37 }
  0xce   :  { %812 = vmatpush1.bf16.msra.mxu0 %v1207_v38  ;;  %1081 = vmatpush1.bf16.msra.mxu1 %v1207_v38 }
  0xcf   :  { %813 = vmatprep.subr.bf16.mxu0 %v1212_v39  ;;  %1066 = vmatprep.subr.bf16.mxu1 %v1212_v39 }
  0xd2   :  { %814 = vmatpush1.bf16.msra.mxu0 %v1210_v40  ;;  %1082 = vmatpush1.bf16.msra.mxu1 %v1210_v40 }
  0xd3   :  { %815 = vmatprep.subr.bf16.mxu0 %v1215_v41  ;;  %1067 = vmatprep.subr.bf16.mxu1 %v1215_v41 }
  0xd6   :  { %816 = vmatpush1.bf16.msra.mxu0 %v1213_v42  ;;  %1083 = vmatpush1.bf16.msra.mxu1 %v1213_v42 }
  0xd7   :  { %817 = vmatprep.subr.bf16.mxu0 %v1218_v43  ;;  %1068 = vmatprep.subr.bf16.mxu1 %v1218_v43 }
  0xda   :  { %818 = vmatpush1.bf16.msra.mxu0 %v1216_v44  ;;  %1084 = vmatpush1.bf16.msra.mxu1 %v1216_v44 }
  0xdb   :  { %819 = vmatprep.subr.bf16.mxu0 %v1221_v45  ;;  %1069 = vmatprep.subr.bf16.mxu1 %v1221_v45 }
  0xde   :  { %820 = vmatpush1.bf16.msra.mxu0 %v1219_v46  ;;  %1085 = vmatpush1.bf16.msra.mxu1 %v1219_v46 }
  0xdf   :  { %821 = vmatprep.subr.bf16.mxu0 %v1224_v47  ;;  %1070 = vmatprep.subr.bf16.mxu1 %v1224_v47 }
  0xe2   :  { %822 = vmatpush1.bf16.msra.mxu0 %v1222_v48  ;;  %1086 = vmatpush1.bf16.msra.mxu1 %v1222_v48 }
  0xe3   :  { %823 = vmatprep.subr.bf16.mxu0 %v1227_v49  ;;  %1071 = vmatprep.subr.bf16.mxu1 %v1227_v49 }
  0xe6   :  { %824 = vmatpush1.bf16.msra.mxu0 %v1225_v50  ;;  %1087 = vmatpush1.bf16.msra.mxu1 %v1225_v50 }
  0xe7   :  { %825 = vmatprep.subr.bf16.mxu0 %v1230_v51  ;;  %1072 = vmatprep.subr.bf16.mxu1 %v1230_v51 }
  0xea   :  { %826 = vmatpush1.bf16.msra.mxu0 %v1228_v52  ;;  %1088 = vmatpush1.bf16.msra.mxu1 %v1228_v52 }
  0xeb   :  { %827 = vmatprep.subr.bf16.mxu0 %v1233_v53  ;;  %1073 = vmatprep.subr.bf16.mxu1 %v1233_v53 }
  0xee   :  { %828 = vmatpush1.bf16.msra.mxu0 %v1231_v54  ;;  %1089 = vmatpush1.bf16.msra.mxu1 %v1231_v54 }
  0xf1   :  { %830 = vmatmul.mubr.bf16.vlgmr.msra.gmra.mrb[8].mxu0 %v1551_v13  ;;  %840 = vmatmul.mubr.bf16.vlgmr.msra.gmra.mrb[8].mxu1 %v1564_v25 }
 0x184   :  { %v725_v55 = vpop.f32.mrb[0].mxu0  ;;  %v778_v56 = vpop.f32.mrb[0].mxu1 }
 0x185   :  { %v727_v57 = vpop.f32.mrb[1].mxu0  ;;  %v780_v58 = vpop.f32.mrb[1].mxu1 }
 0x186   :  { %v1046_v59 = vpack.c.bf16 %v727_v57, %v725_v55  ;;  %v1047_v60 = vpack.c.bf16 %v780_v58, %v778_v56  ;;  %v729_v61 = vpop.f32.mrb[2].mxu0  ;;  %v782_v62 = vpop.f32.mrb[2].mxu1 }
 0x187   :  { %v731_v63 = vpop.f32.mrb[3].mxu0  ;;  %v784_v0 = vpop.f32.mrb[3].mxu1 }
 0x188   :  { %922 = vst [vmem:[%s1690_s3] sm:$0xff] %v1046_v59  ;;  %923 = vst [vmem:[%s1690_s3 + $0x8] sm:$0xff] %v1047_v60  ;;  %v1049_v1 = vpack.c.bf16 %v731_v63, %v729_v61  ;;  %v1050_v2 = vpack.c.bf16 %v784_v0, %v782_v62 }
 0x18a   :  { %925 = vst [vmem:[%s1690_s3 + $0x18] sm:$0xff] %v1049_v1  ;;  %926 = vst [vmem:[%s1690_s3 + $0x20] sm:$0xff] %v1050_v2 }
 0x18c   :  { %v735_v3 = vpop.f32.mrb[4].mxu0  ;;  %v788_v5 = vpop.f32.mrb[4].mxu1 }
 0x18d   :  { %v737_v6 = vpop.f32.mrb[5].mxu0  ;;  %v790_v8 = vpop.f32.mrb[5].mxu1 }
 0x18e   :  { %v1052_v9 = vpack.c.bf16 %v737_v6, %v735_v3  ;;  %v1053_v10 = vpack.c.bf16 %v790_v8, %v788_v5  ;;  %v739_v11 = vpop.f32.mrb[6].mxu0  ;;  %v792_v14 = vpop.f32.mrb[6].mxu1 }
 0x18f   :  { %v741_v15 = vpop.f32.mrb[7].mxu0  ;;  %v794_v16 = vpop.f32.mrb[7].mxu1 }
 0x190   :  { %928 = vst [vmem:[%s1690_s3 + $0x30] sm:$0xff] %v1052_v9  ;;  %929 = vst [vmem:[%s1690_s3 + $0x38] sm:$0xff] %v1053_v10  ;;  %v1055_v17 = vpack.c.bf16 %v741_v15, %v739_v11  ;;  %v1056_v20 = vpack.c.bf16 %v794_v16, %v792_v14 }
 0x192   :  { %931 = vst [vmem:[%s1690_s3 + $0x48] sm:$0xff] %v1055_v17  ;;  %932 = vst [vmem:[%s1690_s3 + $0x50] sm:$0xff] %v1056_v20 }
 0x1c4   :  { %v831_v7 = vpop.f32.mrb[8].mxu0  ;;  %v841_v4 = vpop.f32.mrb[8].mxu1 }
 0x1c5   :  { %v833_v21 = vpop.f32.mrb[9].mxu0  ;;  %v843_v19 = vpop.f32.mrb[9].mxu1 }
 0x1c6   :  { %v1048_v13 = vpack.c.bf16 %v833_v21, %v831_v7  ;;  %v1054_v12 = vpack.c.bf16 %v843_v19, %v841_v4  ;;  %v835_v22 = vpop.f32.mrb[10].mxu0  ;;  %v845_v30 = vpop.f32.mrb[10].mxu1 }
 0x1c7   :  { %v837_v18 = vpop.f32.mrb[11].mxu0  ;;  %v847_v26 = vpop.f32.mrb[11].mxu1 }
 0x1c8   :  { %924 = vst [vmem:[%s1690_s3 + $0x10] sm:$0xff] %v1048_v13  ;;  %930 = vst [vmem:[%s1690_s3 + $0x40] sm:$0xff] %v1054_v12  ;;  %v1051_v23 = vpack.c.bf16 %v837_v18, %v835_v22  ;;  %v1057_v24 = vpack.c.bf16 %v847_v26, %v845_v30 }
 0x1ca   :  { %927 = vst [vmem:[%s1690_s3 + $0x28] sm:$0xff] %v1051_v23  ;;  %933 = vst [vmem:[%s1690_s3 + $0x58] sm:$0xff] %v1057_v24 }

// kernel: frozen_clip_t5_forward.30
= control target key start
LH: loop header
LB: loop body
LE: loop exit
PB: predicated region body
PF: predicated region fallthrough
CT: control target
= control target key end

     0   :  { %s3121_s18 = smov 0   ;;  %s3123_s19 = smov 0   ;;  %s3930_s0 = inlined_call_operand.vmem [shape: f32[32,256], index: 0, kind: input, shape index: {}]   ;;  %s3931_s1 = inlined_call_operand.vmem [shape: f32[1,256], index: 1, kind: input, shape index: {}]   ;;  %s3932_s2 = inlined_call_operand.vmem [shape: bf16[256,1024], index: 2, kind: input, shape index: {}]   ;;  %s3933_s3 = inlined_call_operand.vmem [shape: bf16[256,1024], index: 3, kind: input, shape index: {}]   ;;  %s3934_s4 = inlined_call_operand.vmem [shape: bf16[1024,256], index: 4, kind: input, shape index: {}]   ;;  %s3935_s5 = inlined_call_operand.vmem [shape: f32[2,32,256], index: 5, kind: output, shape index: {}]  }
   0x1   :  { %s3125_s20 = smov 0   ;;  %s3127_s21 = smov 0  }
   0x2   :  { %s3129_s22 = smov 0  }
   0x3 LB: > { %s27_s23 = sadd.s32 1, %s3085_s21  ;;  %p85_p1 = scmp.ne.s32.totalorder %s3077_s19, %s3073_s18  ;;  %s3089_s22 = sphi %s3129_s22, %s15_s22   ;;  %s3085_s21 = sphi %s3127_s21, %s3940_s21   ;;  %s3081_s20 = sphi %s3125_s20, %s3939_s20   ;;  %s3077_s19 = sphi %s3123_s19, %s3938_s19   ;;  %s3073_s18 = sphi %s3121_s18, %s3937_s18  }
   0x4   : > { %p29_p0 = scmp.ge.s32.totalorder %s27_s23, 2  ;;  %p86_p2 = scmp.eq.s32.totalorder %s3089_s22, 0 }
   0x5   : > { %s78_s26 = sadd.s32 1, %s3077_s19  ;;  %p2462_p5 = scmp.ge.s32.totalorder %s3089_s22, 2 }
   0x6   : > { %s3942_s23 = smov (%p29_p0, %s27_s23), 0  ;;  %p3152_p3 = por %p86_p2, %p85_p1 }
   0x7   : > { %s75_s25 = ssub.s32 %s3085_s21, %s3942_s23  ;;  %199 = sbr.rel (%p2462_p5) target bundleno = 86 (0x56), region = 24 }
   0x8   : > { %p76_p4 = scmp.eq.s32.totalorder %s75_s25, 0 }
   0xa   : > { %s3160_s27 = scalar_select %p76_p4, %s3077_s19, %s78_s26  }
   0xe   : > { %202 = sbr.rel (!%p3152_p3) target bundleno = 50 (0x32), region = 28  ;;  %s204_s28 = sand.u32 (%p3152_p3), 1, %s3077_s19  }
   0xf   : > { %s2671_s29 = sshll.u32 (%p3152_p3), %s3085_s21, 4  ;;  %s2463_s30 = sshll.u32 (%p3152_p3), %s204_s28, 9 }
  0x10   : > { %s3170_s8 = scalar_lea.vmem (%p3152_p3), %s3932_s2, %s2671_s29  ;;  %s3175_s9 = scalar_lea.vmem (%p3152_p3), [#allocation3], %s2463_s30 }
  0x11   : > { %v223_v0 = vld [vmem:[%s3170_s8] sm:$0xff] (%p3152_p3)  ;;  %v225_v1 = vld [vmem:[%s3170_s8 + $0x8] sm:$0xff] (%p3152_p3) }
  0x12   : > { %v227_v2 = vld [vmem:[%s3170_s8 + $0x20] sm:$0xff] (%p3152_p3)  ;;  %224 = vst [vmem:[%s3175_s9] sm:$0xff] (%p3152_p3), %v223_v0  ;;  %226 = vst [vmem:[%s3175_s9 + $0x8] sm:$0xff] (%p3152_p3), %v225_v1  ;;  %v229_v3 = vld [vmem:[%s3170_s8 + $0x28] sm:$0xff] (%p3152_p3) }
  0x13   : > { %228 = vst [vmem:[%s3175_s9 + $0x10] sm:$0xff] (%p3152_p3), %v227_v2  ;;  %v231_v4 = vld [vmem:[%s3170_s8 + $0x40] sm:$0xff] (%p3152_p3)  ;;  %v233_v5 = vld [vmem:[%s3170_s8 + $0x48] sm:$0xff] (%p3152_p3)  ;;  %230 = vst [vmem:[%s3175_s9 + $0x18] sm:$0xff] (%p3152_p3), %v229_v3 }
  0x14   : > { %232 = vst [vmem:[%s3175_s9 + $0x20] sm:$0xff] (%p3152_p3), %v231_v4  ;;  %234 = vst [vmem:[%s3175_s9 + $0x28] sm:$0xff] (%p3152_p3), %v233_v5  ;;  %v235_v6 = vld [vmem:[%s3170_s8 + $0x60] sm:$0xff] (%p3152_p3)  ;;  %v237_v7 = vld [vmem:[%s3170_s8 + $0x68] sm:$0xff] (%p3152_p3) }
  0x15   : > { %v239_v8 = vld [vmem:[%s3170_s8 + $0x80] sm:$0xff]  ;;  %236 = vst [vmem:[%s3175_s9 + $0x30] sm:$0xff] %v235_v6  ;;  %238 = vst [vmem:[%s3175_s9 + $0x38] sm:$0xff] %v237_v7  ;;  %v241_v9 = vld [vmem:[%s3170_s8 + $0x88] sm:$0xff] }
  0x16   : > { %240 = vst [vmem:[%s3175_s9 + $0x40] sm:$0xff] %v239_v8  ;;  %v243_v10 = vld [vmem:[%s3170_s8 + $0xa0] sm:$0xff]  ;;  %v245_v11 = vld [vmem:[%s3170_s8 + $0xa8] sm:$0xff]  ;;  %242 = vst [vmem:[%s3175_s9 + $0x48] sm:$0xff] %v241_v9 }
  0x17   : > { %244 = vst [vmem:[%s3175_s9 + $0x50] sm:$0xff] %v243_v10  ;;  %246 = vst [vmem:[%s3175_s9 + $0x58] sm:$0xff] %v245_v11  ;;  %v247_v12 = vld [vmem:[%s3170_s8 + $0xc0] sm:$0xff]  ;;  %v249_v13 = vld [vmem:[%s3170_s8 + $0xc8] sm:$0xff] }
  0x18   : > { %v251_v14 = vld [vmem:[%s3170_s8 + $0xe0] sm:$0xff]  ;;  %248 = vst [vmem:[%s3175_s9 + $0x60] sm:$0xff] %v247_v12  ;;  %250 = vst [vmem:[%s3175_s9 + $0x68] sm:$0xff] %v249_v13  ;;  %v253_v15 = vld [vmem:[%s3170_s8 + $0xe8] sm:$0xff] }
  0x19   : > { %252 = vst [vmem:[%s3175_s9 + $0x70] sm:$0xff] %v251_v14  ;;  %v255_v16 = vld [vmem:[%s3170_s8 + $0x100] sm:$0xff]  ;;  %v257_v17 = vld [vmem:[%s3170_s8 + $0x108] sm:$0xff]  ;;  %254 = vst [vmem:[%s3175_s9 + $0x78] sm:$0xff] %v253_v15 }
  0x1a   : > { %256 = vst [vmem:[%s3175_s9 + $0x80] sm:$0xff] %v255_v16  ;;  %258 = vst [vmem:[%s3175_s9 + $0x88] sm:$0xff] %v257_v17  ;;  %v259_v18 = vld [vmem:[%s3170_s8 + $0x120] sm:$0xff]  ;;  %v261_v19 = vld [vmem:[%s3170_s8 + $0x128] sm:$0xff] }
  0x1b   : > { %v263_v20 = vld [vmem:[%s3170_s8 + $0x140] sm:$0xff]  ;;  %260 = vst [vmem:[%s3175_s9 + $0x90] sm:$0xff] %v259_v18  ;;  %262 = vst [vmem:[%s3175_s9 + $0x98] sm:$0xff] %v261_v19  ;;  %v265_v21 = vld [vmem:[%s3170_s8 + $0x148] sm:$0xff] }
  0x1c   : > { %264 = vst [vmem:[%s3175_s9 + $0xa0] sm:$0xff] %v263_v20  ;;  %v267_v22 = vld [vmem:[%s3170_s8 + $0x160] sm:$0xff]  ;;  %v269_v23 = vld [vmem:[%s3170_s8 + $0x168] sm:$0xff]  ;;  %266 = vst [vmem:[%s3175_s9 + $0xa8] sm:$0xff] %v265_v21 }
  0x1d   : > { %268 = vst [vmem:[%s3175_s9 + $0xb0] sm:$0xff] %v267_v22  ;;  %270 = vst [vmem:[%s3175_s9 + $0xb8] sm:$0xff] %v269_v23  ;;  %v271_v24 = vld [vmem:[%s3170_s8 + $0x180] sm:$0xff]  ;;  %v273_v25 = vld [vmem:[%s3170_s8 + $0x188] sm:$0xff] }
  0x1e   : > { %v275_v26 = vld [vmem:[%s3170_s8 + $0x1a0] sm:$0xff]  ;;  %272 = vst [vmem:[%s3175_s9 + $0xc0] sm:$0xff] %v271_v24  ;;  %274 = vst [vmem:[%s3175_s9 + $0xc8] sm:$0xff] %v273_v25  ;;  %v277_v27 = vld [vmem:[%s3170_s8 + $0x1a8] sm:$0xff] }
  0x1f   : > { %276 = vst [vmem:[%s3175_s9 + $0xd0] sm:$0xff] %v275_v26  ;;  %v279_v28 = vld [vmem:[%s3170_s8 + $0x1c0] sm:$0xff]  ;;  %v281_v29 = vld [vmem:[%s3170_s8 + $0x1c8] sm:$0xff]  ;;  %278 = vst [vmem:[%s3175_s9 + $0xd8] sm:$0xff] %v277_v27 }
  0x20   : > { %280 = vst [vmem:[%s3175_s9 + $0xe0] sm:$0xff] %v279_v28  ;;  %282 = vst [vmem:[%s3175_s9 + $0xe8] sm:$0xff] %v281_v29  ;;  %v283_v30 = vld [vmem:[%s3170_s8 + $0x1e0] sm:$0xff]  ;;  %v285_v31 = vld [vmem:[%s3170_s8 + $0x1e8] sm:$0xff] }
  0x21   : > { %v287_v32 = vld [vmem:[%s3170_s8 + $0x200] sm:$0xff]  ;;  %284 = vst [vmem:[%s3175_s9 + $0xf0] sm:$0xff] %v283_v30  ;;  %286 = vst [vmem:[%s3175_s9 + $0xf8] sm:$0xff] %v285_v31  ;;  %v289_v33 = vld [vmem:[%s3170_s8 + $0x208] sm:$0xff] }
  0x22   : > { %288 = vst [vmem:[%s3175_s9 + $0x100] sm:$0xff] %v287_v32  ;;  %v291_v34 = vld [vmem:[%s3170_s8 + $0x220] sm:$0xff]  ;;  %v293_v35 = vld [vmem:[%s3170_s8 + $0x228] sm:$0xff]  ;;  %290 = vst [vmem:[%s3175_s9 + $0x108] sm:$0xff] %v289_v33 }
  0x23   : > { %292 = vst [vmem:[%s3175_s9 + $0x110] sm:$0xff] %v291_v34  ;;  %294 = vst [vmem:[%s3175_s9 + $0x118] sm:$0xff] %v293_v35  ;;  %v295_v36 = vld [vmem:[%s3170_s8 + $0x240] sm:$0xff]  ;;  %v297_v37 = vld [vmem:[%s3170_s8 + $0x248] sm:$0xff] }
  0x24   : > { %v299_v38 = vld [vmem:[%s3170_s8 + $0x260] sm:$0xff]  ;;  %296 = vst [vmem:[%s3175_s9 + $0x120] sm:$0xff] %v295_v36  ;;  %298 = vst [vmem:[%s3175_s9 + $0x128] sm:$0xff] %v297_v37  ;;  %v301_v39 = vld [vmem:[%s3170_s8 + $0x268] sm:$0xff] }
  0x25   : > { %300 = vst [vmem:[%s3175_s9 + $0x130] sm:$0xff] %v299_v38  ;;  %v303_v40 = vld [vmem:[%s3170_s8 + $0x280] sm:$0xff]  ;;  %v305_v41 = vld [vmem:[%s3170_s8 + $0x288] sm:$0xff]  ;;  %302 = vst [vmem:[%s3175_s9 + $0x138] sm:$0xff] %v301_v39 }
  0x26   : > { %304 = vst [vmem:[%s3175_s9 + $0x140] sm:$0xff] %v303_v40  ;;  %306 = vst [vmem:[%s3175_s9 + $0x148] sm:$0xff] %v305_v41  ;;  %v307_v42 = vld [vmem:[%s3170_s8 + $0x2a0] sm:$0xff]  ;;  %v309_v43 = vld [vmem:[%s3170_s8 + $0x2a8] sm:$0xff] }
  0x27   : > { %v311_v44 = vld [vmem:[%s3170_s8 + $0x2c0] sm:$0xff]  ;;  %308 = vst [vmem:[%s3175_s9 + $0x150] sm:$0xff] %v307_v42  ;;  %310 = vst [vmem:[%s3175_s9 + $0x158] sm:$0xff] %v309_v43  ;;  %v313_v45 = vld [vmem:[%s3170_s8 + $0x2c8] sm:$0xff] }
  0x28   : > { %312 = vst [vmem:[%s3175_s9 + $0x160] sm:$0xff] %v311_v44  ;;  %v315_v46 = vld [vmem:[%s3170_s8 + $0x2e0] sm:$0xff]  ;;  %v317_v47 = vld [vmem:[%s3170_s8 + $0x2e8] sm:$0xff]  ;;  %314 = vst [vmem:[%s3175_s9 + $0x168] sm:$0xff] %v313_v45 }
  0x29   : > { %316 = vst [vmem:[%s3175_s9 + $0x170] sm:$0xff] %v315_v46  ;;  %318 = vst [vmem:[%s3175_s9 + $0x178] sm:$0xff] %v317_v47  ;;  %v319_v48 = vld [vmem:[%s3170_s8 + $0x300] sm:$0xff]  ;;  %v321_v49 = vld [vmem:[%s3170_s8 + $0x308] sm:$0xff] }
  0x2a   : > { %v323_v50 = vld [vmem:[%s3170_s8 + $0x320] sm:$0xff]  ;;  %320 = vst [vmem:[%s3175_s9 + $0x180] sm:$0xff] %v319_v48  ;;  %322 = vst [vmem:[%s3175_s9 + $0x188] sm:$0xff] %v321_v49  ;;  %v325_v51 = vld [vmem:[%s3170_s8 + $0x328] sm:$0xff] }
  0x2b   : > { %324 = vst [vmem:[%s3175_s9 + $0x190] sm:$0xff] %v323_v50  ;;  %v327_v52 = vld [vmem:[%s3170_s8 + $0x340] sm:$0xff]  ;;  %v329_v53 = vld [vmem:[%s3170_s8 + $0x348] sm:$0xff]  ;;  %326 = vst [vmem:[%s3175_s9 + $0x198] sm:$0xff] %v325_v51 }
  0x2c   : > { %328 = vst [vmem:[%s3175_s9 + $0x1a0] sm:$0xff] %v327_v52  ;;  %330 = vst [vmem:[%s3175_s9 + $0x1a8] sm:$0xff] %v329_v53  ;;  %v331_v54 = vld [vmem:[%s3170_s8 + $0x360] sm:$0xff]  ;;  %v333_v55 = vld [vmem:[%s3170_s8 + $0x368] sm:$0xff] }
  0x2d   : > { %v335_v56 = vld [vmem:[%s3170_s8 + $0x380] sm:$0xff]  ;;  %332 = vst [vmem:[%s3175_s9 + $0x1b0] sm:$0xff] %v331_v54  ;;  %334 = vst [vmem:[%s3175_s9 + $0x1b8] sm:$0xff] %v333_v55  ;;  %v337_v57 = vld [vmem:[%s3170_s8 + $0x388] sm:$0xff] }
  0x2e   : > { %336 = vst [vmem:[%s3175_s9 + $0x1c0] sm:$0xff] %v335_v56  ;;  %v339_v58 = vld [vmem:[%s3170_s8 + $0x3a0] sm:$0xff]  ;;  %v341_v59 = vld [vmem:[%s3170_s8 + $0x3a8] sm:$0xff]  ;;  %338 = vst [vmem:[%s3175_s9 + $0x1c8] sm:$0xff] %v337_v57 }
  0x2f   : > { %340 = vst [vmem:[%s3175_s9 + $0x1d0] sm:$0xff] %v339_v58  ;;  %342 = vst [vmem:[%s3175_s9 + $0x1d8] sm:$0xff] %v341_v59  ;;  %v343_v60 = vld [vmem:[%s3170_s8 + $0x3c0] sm:$0xff]  ;;  %v345_v61 = vld [vmem:[%s3170_s8 + $0x3c8] sm:$0xff] }
  0x30   : > { %v347_v62 = vld [vmem:[%s3170_s8 + $0x3e0] sm:$0xff]  ;;  %344 = vst [vmem:[%s3175_s9 + $0x1e0] sm:$0xff] %v343_v60  ;;  %346 = vst [vmem:[%s3175_s9 + $0x1e8] sm:$0xff] %v345_v61  ;;  %v349_v63 = vld [vmem:[%s3170_s8 + $0x3e8] sm:$0xff] }
  0x31   : > { %348 = vst [vmem:[%s3175_s9 + $0x1f0] sm:$0xff] %v347_v62  ;;  %350 = vst [vmem:[%s3175_s9 + $0x1f8] sm:$0xff] %v349_v63 }
  0x32 PF: > { %356 = sbr.rel (!%p3152_p3) target bundleno = 86 (0x56), region = 51  ;;  %s358_s10 = sand.u32 (%p3152_p3), 1, %s3077_s19  }
  0x33   : > { %s2672_s11 = sshll.u32 (%p3152_p3), %s3085_s21, 4  ;;  %s2466_s12 = sshll.u32 (%p3152_p3), %s358_s10, 9 }
  0x34   : > { %s3309_s15 = scalar_lea.vmem (%p3152_p3), %s3933_s3, %s2672_s11  ;;  %s3314_s16 = scalar_lea.vmem (%p3152_p3), [#allocation4], %s2466_s12 }
  0x35   : > { %v377_v0 = vld [vmem:[%s3309_s15] sm:$0xff] (%p3152_p3)  ;;  %v379_v1 = vld [vmem:[%s3309_s15 + $0x8] sm:$0xff] (%p3152_p3) }
  0x36   : > { %v381_v2 = vld [vmem:[%s3309_s15 + $0x20] sm:$0xff] (%p3152_p3)  ;;  %378 = vst [vmem:[%s3314_s16] sm:$0xff] (%p3152_p3), %v377_v0  ;;  %380 = vst [vmem:[%s3314_s16 + $0x8] sm:$0xff] (%p3152_p3), %v379_v1  ;;  %v383_v3 = vld [vmem:[%s3309_s15 + $0x28] sm:$0xff] (%p3152_p3) }
  0x37   : > { %382 = vst [vmem:[%s3314_s16 + $0x10] sm:$0xff] (%p3152_p3), %v381_v2  ;;  %v385_v4 = vld [vmem:[%s3309_s15 + $0x40] sm:$0xff] (%p3152_p3)  ;;  %v387_v5 = vld [vmem:[%s3309_s15 + $0x48] sm:$0xff] (%p3152_p3)  ;;  %384 = vst [vmem:[%s3314_s16 + $0x18] sm:$0xff] (%p3152_p3), %v383_v3 }
  0x38   : > { %386 = vst [vmem:[%s3314_s16 + $0x20] sm:$0xff] (%p3152_p3), %v385_v4  ;;  %388 = vst [vmem:[%s3314_s16 + $0x28] sm:$0xff] (%p3152_p3), %v387_v5  ;;  %v389_v6 = vld [vmem:[%s3309_s15 + $0x60] sm:$0xff] (%p3152_p3)  ;;  %v391_v7 = vld [vmem:[%s3309_s15 + $0x68] sm:$0xff] (%p3152_p3) }
  0x39   : > { %v393_v8 = vld [vmem:[%s3309_s15 + $0x80] sm:$0xff]  ;;  %390 = vst [vmem:[%s3314_s16 + $0x30] sm:$0xff] %v389_v6  ;;  %392 = vst [vmem:[%s3314_s16 + $0x38] sm:$0xff] %v391_v7  ;;  %v395_v9 = vld [vmem:[%s3309_s15 + $0x88] sm:$0xff] }
  0x3a   : > { %394 = vst [vmem:[%s3314_s16 + $0x40] sm:$0xff] %v393_v8  ;;  %v397_v10 = vld [vmem:[%s3309_s15 + $0xa0] sm:$0xff]  ;;  %v399_v11 = vld [vmem:[%s3309_s15 + $0xa8] sm:$0xff]  ;;  %396 = vst [vmem:[%s3314_s16 + $0x48] sm:$0xff] %v395_v9 }
  0x3b   : > { %398 = vst [vmem:[%s3314_s16 + $0x50] sm:$0xff] %v397_v10  ;;  %400 = vst [vmem:[%s3314_s16 + $0x58] sm:$0xff] %v399_v11  ;;  %v401_v12 = vld [vmem:[%s3309_s15 + $0xc0] sm:$0xff]  ;;  %v403_v13 = vld [vmem:[%s3309_s15 + $0xc8] sm:$0xff] }
  0x3c   : > { %v405_v14 = vld [vmem:[%s3309_s15 + $0xe0] sm:$0xff]  ;;  %402 = vst [vmem:[%s3314_s16 + $0x60] sm:$0xff] %v401_v12  ;;  %404 = vst [vmem:[%s3314_s16 + $0x68] sm:$0xff] %v403_v13  ;;  %v407_v15 = vld [vmem:[%s3309_s15 + $0xe8] sm:$0xff] }
  0x3d   : > { %406 = vst [vmem:[%s3314_s16 + $0x70] sm:$0xff] %v405_v14  ;;  %v409_v16 = vld [vmem:[%s3309_s15 + $0x100] sm:$0xff]  ;;  %v411_v17 = vld [vmem:[%s3309_s15 + $0x108] sm:$0xff]  ;;  %408 = vst [vmem:[%s3314_s16 + $0x78] sm:$0xff] %v407_v15 }
  0x3e   : > { %410 = vst [vmem:[%s3314_s16 + $0x80] sm:$0xff] %v409_v16  ;;  %412 = vst [vmem:[%s3314_s16 + $0x88] sm:$0xff] %v411_v17  ;;  %v413_v18 = vld [vmem:[%s3309_s15 + $0x120] sm:$0xff]  ;;  %v415_v19 = vld [vmem:[%s3309_s15 + $0x128] sm:$0xff] }
  0x3f   : > { %v417_v20 = vld [vmem:[%s3309_s15 + $0x140] sm:$0xff]  ;;  %414 = vst [vmem:[%s3314_s16 + $0x90] sm:$0xff] %v413_v18  ;;  %416 = vst [vmem:[%s3314_s16 + $0x98] sm:$0xff] %v415_v19  ;;  %v419_v21 = vld [vmem:[%s3309_s15 + $0x148] sm:$0xff] }
  0x40   : > { %418 = vst [vmem:[%s3314_s16 + $0xa0] sm:$0xff] %v417_v20  ;;  %v421_v22 = vld [vmem:[%s3309_s15 + $0x160] sm:$0xff]  ;;  %v423_v23 = vld [vmem:[%s3309_s15 + $0x168] sm:$0xff]  ;;  %420 = vst [vmem:[%s3314_s16 + $0xa8] sm:$0xff] %v419_v21 }
  0x41   : > { %422 = vst [vmem:[%s3314_s16 + $0xb0] sm:$0xff] %v421_v22  ;;  %424 = vst [vmem:[%s3314_s16 + $0xb8] sm:$0xff] %v423_v23  ;;  %v425_v24 = vld [vmem:[%s3309_s15 + $0x180] sm:$0xff]  ;;  %v427_v25 = vld [vmem:[%s3309_s15 + $0x188] sm:$0xff] }
  0x42   : > { %v429_v26 = vld [vmem:[%s3309_s15 + $0x1a0] sm:$0xff]  ;;  %426 = vst [vmem:[%s3314_s16 + $0xc0] sm:$0xff] %v425_v24  ;;  %428 = vst [vmem:[%s3314_s16 + $0xc8] sm:$0xff] %v427_v25  ;;  %v431_v27 = vld [vmem:[%s3309_s15 + $0x1a8] sm:$0xff] }
  0x43   : > { %430 = vst [vmem:[%s3314_s16 + $0xd0] sm:$0xff] %v429_v26  ;;  %v433_v28 = vld [vmem:[%s3309_s15 + $0x1c0] sm:$0xff]  ;;  %v435_v29 = vld [vmem:[%s3309_s15 + $0x1c8] sm:$0xff]  ;;  %432 = vst [vmem:[%s3314_s16 + $0xd8] sm:$0xff] %v431_v27 }
  0x44   : > { %434 = vst [vmem:[%s3314_s16 + $0xe0] sm:$0xff] %v433_v28  ;;  %436 = vst [vmem:[%s3314_s16 + $0xe8] sm:$0xff] %v435_v29  ;;  %v437_v30 = vld [vmem:[%s3309_s15 + $0x1e0] sm:$0xff]  ;;  %v439_v31 = vld [vmem:[%s3309_s15 + $0x1e8] sm:$0xff] }
  0x45   : > { %v441_v32 = vld [vmem:[%s3309_s15 + $0x200] sm:$0xff]  ;;  %438 = vst [vmem:[%s3314_s16 + $0xf0] sm:$0xff] %v437_v30  ;;  %440 = vst [vmem:[%s3314_s16 + $0xf8] sm:$0xff] %v439_v31  ;;  %v443_v33 = vld [vmem:[%s3309_s15 + $0x208] sm:$0xff] }
  0x46   : > { %442 = vst [vmem:[%s3314_s16 + $0x100] sm:$0xff] %v441_v32  ;;  %v445_v34 = vld [vmem:[%s3309_s15 + $0x220] sm:$0xff]  ;;  %v447_v35 = vld [vmem:[%s3309_s15 + $0x228] sm:$0xff]  ;;  %444 = vst [vmem:[%s3314_s16 + $0x108] sm:$0xff] %v443_v33 }
  0x47   : > { %446 = vst [vmem:[%s3314_s16 + $0x110] sm:$0xff] %v445_v34  ;;  %448 = vst [vmem:[%s3314_s16 + $0x118] sm:$0xff] %v447_v35  ;;  %v449_v36 = vld [vmem:[%s3309_s15 + $0x240] sm:$0xff]  ;;  %v451_v37 = vld [vmem:[%s3309_s15 + $0x248] sm:$0xff] }
  0x48   : > { %v453_v38 = vld [vmem:[%s3309_s15 + $0x260] sm:$0xff]  ;;  %450 = vst [vmem:[%s3314_s16 + $0x120] sm:$0xff] %v449_v36  ;;  %452 = vst [vmem:[%s3314_s16 + $0x128] sm:$0xff] %v451_v37  ;;  %v455_v39 = vld [vmem:[%s3309_s15 + $0x268] sm:$0xff] }
  0x49   : > { %454 = vst [vmem:[%s3314_s16 + $0x130] sm:$0xff] %v453_v38  ;;  %v457_v40 = vld [vmem:[%s3309_s15 + $0x280] sm:$0xff]  ;;  %v459_v41 = vld [vmem:[%s3309_s15 + $0x288] sm:$0xff]  ;;  %456 = vst [vmem:[%s3314_s16 + $0x138] sm:$0xff] %v455_v39 }
  0x4a   : > { %458 = vst [vmem:[%s3314_s16 + $0x140] sm:$0xff] %v457_v40  ;;  %460 = vst [vmem:[%s3314_s16 + $0x148] sm:$0xff] %v459_v41  ;;  %v461_v42 = vld [vmem:[%s3309_s15 + $0x2a0] sm:$0xff]  ;;  %v463_v43 = vld [vmem:[%s3309_s15 + $0x2a8] sm:$0xff] }
  0x4b   : > { %v465_v44 = vld [vmem:[%s3309_s15 + $0x2c0] sm:$0xff]  ;;  %462 = vst [vmem:[%s3314_s16 + $0x150] sm:$0xff] %v461_v42  ;;  %464 = vst [vmem:[%s3314_s16 + $0x158] sm:$0xff] %v463_v43  ;;  %v467_v45 = vld [vmem:[%s3309_s15 + $0x2c8] sm:$0xff] }
  0x4c   : > { %466 = vst [vmem:[%s3314_s16 + $0x160] sm:$0xff] %v465_v44  ;;  %v469_v46 = vld [vmem:[%s3309_s15 + $0x2e0] sm:$0xff]  ;;  %v471_v47 = vld [vmem:[%s3309_s15 + $0x2e8] sm:$0xff]  ;;  %468 = vst [vmem:[%s3314_s16 + $0x168] sm:$0xff] %v467_v45 }
  0x4d   : > { %470 = vst [vmem:[%s3314_s16 + $0x170] sm:$0xff] %v469_v46  ;;  %472 = vst [vmem:[%s3314_s16 + $0x178] sm:$0xff] %v471_v47  ;;  %v473_v48 = vld [vmem:[%s3309_s15 + $0x300] sm:$0xff]  ;;  %v475_v49 = vld [vmem:[%s3309_s15 + $0x308] sm:$0xff] }
  0x4e   : > { %v477_v50 = vld [vmem:[%s3309_s15 + $0x320] sm:$0xff]  ;;  %474 = vst [vmem:[%s3314_s16 + $0x180] sm:$0xff] %v473_v48  ;;  %476 = vst [vmem:[%s3314_s16 + $0x188] sm:$0xff] %v475_v49  ;;  %v479_v51 = vld [vmem:[%s3309_s15 + $0x328] sm:$0xff] }
  0x4f   : > { %478 = vst [vmem:[%s3314_s16 + $0x190] sm:$0xff] %v477_v50  ;;  %v481_v52 = vld [vmem:[%s3309_s15 + $0x340] sm:$0xff]  ;;  %v483_v53 = vld [vmem:[%s3309_s15 + $0x348] sm:$0xff]  ;;  %480 = vst [vmem:[%s3314_s16 + $0x198] sm:$0xff] %v479_v51 }
  0x50   : > { %482 = vst [vmem:[%s3314_s16 + $0x1a0] sm:$0xff] %v481_v52  ;;  %484 = vst [vmem:[%s3314_s16 + $0x1a8] sm:$0xff] %v483_v53  ;;  %v485_v54 = vld [vmem:[%s3309_s15 + $0x360] sm:$0xff]  ;;  %v487_v55 = vld [vmem:[%s3309_s15 + $0x368] sm:$0xff] }
  0x51   : > { %v489_v56 = vld [vmem:[%s3309_s15 + $0x380] sm:$0xff]  ;;  %486 = vst [vmem:[%s3314_s16 + $0x1b0] sm:$0xff] %v485_v54  ;;  %488 = vst [vmem:[%s3314_s16 + $0x1b8] sm:$0xff] %v487_v55  ;;  %v491_v57 = vld [vmem:[%s3309_s15 + $0x388] sm:$0xff] }
  0x52   : > { %490 = vst [vmem:[%s3314_s16 + $0x1c0] sm:$0xff] %v489_v56  ;;  %v493_v58 = vld [vmem:[%s3309_s15 + $0x3a0] sm:$0xff]  ;;  %v495_v59 = vld [vmem:[%s3309_s15 + $0x3a8] sm:$0xff]  ;;  %492 = vst [vmem:[%s3314_s16 + $0x1c8] sm:$0xff] %v491_v57 }
  0x53   : > { %494 = vst [vmem:[%s3314_s16 + $0x1d0] sm:$0xff] %v493_v58  ;;  %496 = vst [vmem:[%s3314_s16 + $0x1d8] sm:$0xff] %v495_v59  ;;  %v497_v60 = vld [vmem:[%s3309_s15 + $0x3c0] sm:$0xff]  ;;  %v499_v61 = vld [vmem:[%s3309_s15 + $0x3c8] sm:$0xff] }
  0x54   : > { %v501_v62 = vld [vmem:[%s3309_s15 + $0x3e0] sm:$0xff]  ;;  %498 = vst [vmem:[%s3314_s16 + $0x1e0] sm:$0xff] %v497_v60  ;;  %500 = vst [vmem:[%s3314_s16 + $0x1e8] sm:$0xff] %v499_v61  ;;  %v503_v63 = vld [vmem:[%s3309_s15 + $0x3e8] sm:$0xff] }
  0x55   : > { %502 = vst [vmem:[%s3314_s16 + $0x1f0] sm:$0xff] %v501_v62  ;;  %504 = vst [vmem:[%s3314_s16 + $0x1f8] sm:$0xff] %v503_v63 }
  0x56 PF: > { %p2469_p6 = scmp.ge.s32.totalorder %s3089_s22, 1  ;;  %p521_p7 = scmp.lt.s32.totalorder %s3089_s22, 3 }
  0x58   : > { %p522_p8 = pnand %p2469_p6, %p521_p7 }
  0x59   : > { %v3446_v0 = vld [vmem:[%s3930_s0] sm:$0xff] (!%p522_p8)  ;;  %v3451_v1 = vld [vmem:[%s3930_s0 + $0x8] sm:$0xff] (!%p522_p8)  ;;  %p672_p9 = scmp.eq.s32.totalorder (!%p522_p8), %s3081_s20, 0  ;;  %p586_p10 = scmp.lt.s32.totalorder (!%p522_p8), %s3081_s20, 1  ;;  %v3458_v2 = vld [vmem:[%s3930_s0 + $0x10] sm:$0xff] (!%p522_p8) }
  0x5a   : > { %525 = sbr.rel (%p522_p8) target bundleno = 836 (0x344), region = 78  ;;  %v603_v3 = vmul.f32 (!%p522_p8), %v3446_v0, %v3446_v0  ;;  %v604_v4 = vmul.f32 (!%p522_p8), %v3451_v1, %v3451_v1  ;;  %v3467_v5 = vld [vmem:[%s3930_s0 + $0x18] sm:$0xff] (!%p522_p8)  ;;  %v605_v6 = vmul.f32 (!%p522_p8), %v3458_v2, %v3458_v2  ;;  %v3474_v7 = vld [vmem:[%s3930_s0 + $0x20] sm:$0xff] (!%p522_p8)  ;;  %v3479_v8 = vld [vmem:[%s3930_s0 + $0x28] sm:$0xff] (!%p522_p8)  ;;  %s528_s11 = sand.u32 (!%p522_p8), 1, %s3073_s18  }
  0x5b   : > { %v606_v9 = vmul.f32 (!%p522_p8), %v3467_v5, %v3467_v5  ;;  %v607_v10 = vmul.f32 (!%p522_p8), %v3474_v7, %v3474_v7  ;;  %v608_v11 = vmul.f32 (!%p522_p8), %v3479_v8, %v3479_v8  ;;  %v3491_v12 = vld [vmem:[%s3930_s0 + $0x30] sm:$0xff] (!%p522_p8)  ;;  %v3496_v13 = vld [vmem:[%s3930_s0 + $0x38] sm:$0xff] (!%p522_p8)  ;;  %s2470_s24 = sshll.u32 (!%p522_p8), %s528_s11, 9  ;;  %s2472_s9 = sshll.u32 (!%p522_p8), %s3081_s20, 6 }
  0x5c   : > { %v611_v14 = vadd.f32 (!%p522_p8), %v604_v4, %v603_v3  ;;  %v609_v15 = vmul.f32 (!%p522_p8), %v3491_v12, %v3491_v12  ;;  %v610_v16 = vmul.f32 (!%p522_p8), %v3496_v13, %v3496_v13  ;;  %s3510_s30 = scalar_lea.vmem (!%p522_p8), [#allocation3], %s2470_s24  ;;  %s3518_s6 = scalar_lea.vmem (!%p522_p8), [#allocation4], %s2470_s24 }
  0x5d   : > { %v617_v17 = vadd.f32 (!%p522_p8), %v608_v11, %v607_v10  ;;  %v614_v18 = vadd.f32 (!%p522_p8), %v606_v9, %v605_v6  ;;  %v2723_v21 = vld [vmem:[%s3510_s30 + $0x4] ss:$16 sps:$4 sm:$0xff] (!%p522_p8)   ;;  %v2725_v26 = vld [vmem:[%s3510_s30] ss:$16 sps:$4 sm:$0xff] (!%p522_p8)   ;;  %p579_p11 = scmp.lt.s32.totalorder (!%p522_p8), %s2472_s9, 127 }
  0x5e   : > { %612 = vadd.xlane.f32.xlu0 (!%p522_p8), %v611_v14  ;;  %v620_v20 = vadd.f32 (!%p522_p8), %v610_v16, %v609_v15  ;;  %1080 = vmatprep.subr.bf16.mxu1 (!%p522_p8), %v2723_v21  ;;  %v2726_v31 = vld [vmem:[%s3518_s6 + $0x4] ss:$16 sps:$4 sm:$0xff] (!%p522_p8)   ;;  %v2728_v32 = vld [vmem:[%s3518_s6] ss:$16 sps:$4 sm:$0xff] (!%p522_p8)  }
  0x5f   : > { %618 = vadd.xlane.f32.xlu1 (!%p522_p8), %v617_v17  ;;  %1081 = vmatpush1.bf16.msra.mxu1 (!%p522_p8), %v2725_v26  ;;  %v2729_v33 = vld [vmem:[%s3510_s30 + $0x24] ss:$16 sps:$4 sm:$0xff] (!%p522_p8)   ;;  %v2731_v34 = vld [vmem:[%s3510_s30 + $0x20] ss:$16 sps:$4 sm:$0xff] (!%p522_p8)  }
  0x60   : > { %1570 = vmatprep.subr.bf16.mxu0 (!%p522_p8), %v2726_v31  ;;  %v2732_v35 = vld [vmem:[%s3518_s6 + $0x24] ss:$16 sps:$4 sm:$0xff] (!%p522_p8)   ;;  %1082 = vmatprep.subr.bf16.mxu1 (!%p522_p8), %v2729_v33  ;;  %v2734_v36 = vld [vmem:[%s3518_s6 + $0x20] ss:$16 sps:$4 sm:$0xff] (!%p522_p8)  }
  0x61   : > { %s673_s12 = scalar_select %p672_p9, 1, 0  ;;  %1571 = vmatpush1.bf16.msra.mxu0 %v2728_v32  ;;  %v2735_v37 = vld [vmem:[%s3510_s30 + $0x44] ss:$16 sps:$4 sm:$0xff]   ;;  %v2737_v38 = vld [vmem:[%s3510_s30 + $0x40] ss:$16 sps:$4 sm:$0xff]  }
  0x62   : > { %s587_s18 = scalar_select %p586_p10, %s3081_s20, 1  ;;  %615 = vadd.xlane.f32.xlu0 %v614_v18  ;;  %1572 = vmatprep.subr.bf16.mxu0 %v2732_v35  ;;  %v2738_v39 = vld [vmem:[%s3518_s6 + $0x44] ss:$16 sps:$4 sm:$0xff]   ;;  %v2740_v41 = vld [vmem:[%s3518_s6 + $0x40] ss:$16 sps:$4 sm:$0xff]  }
  0x63   : > { %s674_s17 = scvt.s32.f32 %s673_s12  ;;  %621 = vadd.xlane.f32.xlu1 %v620_v20  ;;  %1083 = vmatpush1.bf16.msra.mxu1 %v2731_v34  ;;  %v2741_v40 = vld [vmem:[%s3510_s30 + $0x64] ss:$16 sps:$4 sm:$0xff]   ;;  %v2743_v43 = vld [vmem:[%s3510_s30 + $0x60] ss:$16 sps:$4 sm:$0xff]   ;;  %s3944_s9 = smov (!%p579_p11, %s2472_s9), 127 }
  0x64   : > { %s2674_s25 = sshll.u32 %s587_s18, 6  ;;  %1084 = vmatprep.subr.bf16.mxu1 %v2735_v37  ;;  %v2744_v42 = vld [vmem:[%s3518_s6 + $0x64] ss:$16 sps:$4 sm:$0xff]   ;;  %v2746_v45 = vld [vmem:[%s3518_s6 + $0x60] ss:$16 sps:$4 sm:$0xff]   ;;  %s2673_s10 = sshll.u32 %s3944_s9, 3 }
  0x65   : > { %v675_v19 = vstv %s674_s17  ;;  %s3508_s29 = scalar_lea.vmem %s3935_s5, %s2674_s25  ;;  %1573 = vmatpush1.bf16.msra.mxu0 %v2734_v36  ;;  %v2747_v44 = vld [vmem:[%s3510_s30 + $0x84] ss:$16 sps:$4 sm:$0xff]   ;;  %v2749_v47 = vld [vmem:[%s3510_s30 + $0x80] ss:$16 sps:$4 sm:$0xff]   ;;  %v2821_v37 = vld [vmem:[%s3510_s30 + $0xc] ss:$16 sps:$4 sm:$0xff]   ;;  %s3637_s20 = scalar_lea.vmem %s3934_s4, %s2673_s10 }
  0x66   : > { %v676_v22 = vmul.f32 %v675_v19, %v3446_v0  ;;  %v677_v23 = vmul.f32 %v675_v19, %v3451_v1  ;;  %v678_v24 = vmul.f32 %v675_v19, %v3458_v2  ;;  %v679_v25 = vmul.f32 %v675_v19, %v3467_v5  ;;  %1574 = vmatprep.subr.bf16.mxu0 %v2738_v39  ;;  %v2750_v46 = vld [vmem:[%s3518_s6 + $0x84] ss:$16 sps:$4 sm:$0xff]   ;;  %v2752_v49 = vld [vmem:[%s3518_s6 + $0x80] ss:$16 sps:$4 sm:$0xff]  }
  0x67   : > { %v680_v27 = vmul.f32 %v675_v19, %v3474_v7  ;;  %v681_v28 = vmul.f32 %v675_v19, %v3479_v8  ;;  %v682_v29 = vmul.f32 %v675_v19, %v3491_v12  ;;  %v683_v30 = vmul.f32 %v675_v19, %v3496_v13  ;;  %1085 = vmatpush1.bf16.msra.mxu1 %v2737_v38  ;;  %v2753_v48 = vld [vmem:[%s3510_s30 + $0xa4] ss:$16 sps:$4 sm:$0xff]   ;;  %v2755_v51 = vld [vmem:[%s3510_s30 + $0xa0] ss:$16 sps:$4 sm:$0xff]  }
  0x68   : > { %684 = vst [vmem:[%s3508_s29] sm:$0xff] %v676_v22  ;;  %685 = vst [vmem:[%s3508_s29 + $0x8] sm:$0xff] %v677_v23  ;;  %1086 = vmatprep.subr.bf16.mxu1 %v2741_v40  ;;  %v2756_v50 = vld [vmem:[%s3518_s6 + $0xa4] ss:$16 sps:$4 sm:$0xff]   ;;  %v2758_v53 = vld [vmem:[%s3518_s6 + $0xa0] ss:$16 sps:$4 sm:$0xff]  }
  0x69   : > { %686 = vst [vmem:[%s3508_s29 + $0x10] sm:$0xff] %v678_v24  ;;  %687 = vst [vmem:[%s3508_s29 + $0x18] sm:$0xff] %v679_v25  ;;  %1575 = vmatpush1.bf16.msra.mxu0 %v2740_v41  ;;  %v2759_v52 = vld [vmem:[%s3510_s30 + $0xc4] ss:$16 sps:$4 sm:$0xff]   ;;  %v2761_v55 = vld [vmem:[%s3510_s30 + $0xc0] ss:$16 sps:$4 sm:$0xff]  }
  0x6a   : > { %688 = vst [vmem:[%s3508_s29 + $0x20] sm:$0xff] %v680_v27  ;;  %689 = vst [vmem:[%s3508_s29 + $0x28] sm:$0xff] %v681_v28  ;;  %1576 = vmatprep.subr.bf16.mxu0 %v2744_v42  ;;  %v2762_v54 = vld [vmem:[%s3518_s6 + $0xc4] ss:$16 sps:$4 sm:$0xff]   ;;  %v2764_v57 = vld [vmem:[%s3518_s6 + $0xc0] ss:$16 sps:$4 sm:$0xff]  }
  0x6b   : > { %690 = vst [vmem:[%s3508_s29 + $0x30] sm:$0xff] %v682_v29  ;;  %691 = vst [vmem:[%s3508_s29 + $0x38] sm:$0xff] %v683_v30  ;;  %1087 = vmatpush1.bf16.msra.mxu1 %v2743_v43  ;;  %v2765_v56 = vld [vmem:[%s3510_s30 + $0xe4] ss:$16 sps:$4 sm:$0xff]   ;;  %v2767_v59 = vld [vmem:[%s3510_s30 + $0xe0] ss:$16 sps:$4 sm:$0xff]  }
  0x6c   : > { %1088 = vmatprep.subr.bf16.mxu1 %v2747_v44  ;;  %v2768_v58 = vld [vmem:[%s3518_s6 + $0xe4] ss:$16 sps:$4 sm:$0xff]   ;;  %v2770_v61 = vld [vmem:[%s3518_s6 + $0xe0] ss:$16 sps:$4 sm:$0xff]  }
  0x6d   : > { %1577 = vmatpush1.bf16.msra.mxu0 %v2746_v45  ;;  %v2771_v60 = vld [vmem:[%s3510_s30 + $0x104] ss:$16 sps:$4 sm:$0xff]   ;;  %v2773_v63 = vld [vmem:[%s3510_s30 + $0x100] ss:$16 sps:$4 sm:$0xff]  }
  0x6e   : > { %1578 = vmatprep.subr.bf16.mxu0 %v2750_v46  ;;  %v2774_v62 = vld [vmem:[%s3518_s6 + $0x104] ss:$16 sps:$4 sm:$0xff]   ;;  %v2776_v4 = vld [vmem:[%s3518_s6 + $0x100] ss:$16 sps:$4 sm:$0xff]  }
  0x6f   : > { %1089 = vmatpush1.bf16.msra.mxu1 %v2749_v47  ;;  %v2777_v3 = vld [vmem:[%s3510_s30 + $0x124] ss:$16 sps:$4 sm:$0xff]   ;;  %v2779_v9 = vld [vmem:[%s3510_s30 + $0x120] ss:$16 sps:$4 sm:$0xff]  }
  0x70   : > { %1090 = vmatprep.subr.bf16.mxu1 %v2753_v48  ;;  %v2780_v6 = vld [vmem:[%s3518_s6 + $0x124] ss:$16 sps:$4 sm:$0xff]   ;;  %v2782_v11 = vld [vmem:[%s3518_s6 + $0x120] ss:$16 sps:$4 sm:$0xff]   ;;  %v646_v48 = vlaneseq }
  0x71   : > { %1579 = vmatpush1.bf16.msra.mxu0 %v2752_v49  ;;  %v2783_v10 = vld [vmem:[%s3510_s30 + $0x144] ss:$16 sps:$4 sm:$0xff]   ;;  %v2785_v15 = vld [vmem:[%s3510_s30 + $0x140] ss:$16 sps:$4 sm:$0xff]  }
  0x72   : > { %1580 = vmatprep.subr.bf16.mxu0 %v2756_v50  ;;  %v2786_v14 = vld [vmem:[%s3518_s6 + $0x144] ss:$16 sps:$4 sm:$0xff]   ;;  %v2788_v17 = vld [vmem:[%s3518_s6 + $0x140] ss:$16 sps:$4 sm:$0xff]  }
  0x73   : > { %1091 = vmatpush1.bf16.msra.mxu1 %v2755_v51  ;;  %v2789_v16 = vld [vmem:[%s3510_s30 + $0x164] ss:$16 sps:$4 sm:$0xff]   ;;  %v2791_v19 = vld [vmem:[%s3510_s30 + $0x160] ss:$16 sps:$4 sm:$0xff]   ;;  %v647_v51 = vshrl.u32 %v646_v48, 7 }
  0x74   : > { %1092 = vmatprep.subr.bf16.mxu1 %v2759_v52  ;;  %v2792_v18 = vld [vmem:[%s3518_s6 + $0x164] ss:$16 sps:$4 sm:$0xff]   ;;  %v2794_v21 = vld [vmem:[%s3518_s6 + $0x160] ss:$16 sps:$4 sm:$0xff]  }
  0x75   : > { %1581 = vmatpush1.bf16.msra.mxu0 %v2758_v53  ;;  %v2795_v20 = vld [vmem:[%s3510_s30 + $0x184] ss:$16 sps:$4 sm:$0xff]   ;;  %v2797_v22 = vld [vmem:[%s3510_s30 + $0x180] ss:$16 sps:$4 sm:$0xff]   ;;  %v652_v52 = vsub.s32 1, %v647_v51  ;;  %v648_v53 = vsub.s32 0, %v647_v51 }
  0x76   : > { %1582 = vmatprep.subr.bf16.mxu0 %v2762_v54  ;;  %v2798_v23 = vld [vmem:[%s3518_s6 + $0x184] ss:$16 sps:$4 sm:$0xff]   ;;  %v2800_v24 = vld [vmem:[%s3518_s6 + $0x180] ss:$16 sps:$4 sm:$0xff]   ;;  %v2854_v51 = vld [vmem:[%s3510_s30 + $0x16c] ss:$16 sps:$4 sm:$0xff]  }
  0x77   : > { %1093 = vmatpush1.bf16.msra.mxu1 %v2761_v55  ;;  %v2801_v25 = vld [vmem:[%s3510_s30 + $0x1a4] ss:$16 sps:$4 sm:$0xff]   ;;  %v2803_v27 = vld [vmem:[%s3510_s30 + $0x1a0] ss:$16 sps:$4 sm:$0xff]  }
  0x78   : > { %1094 = vmatprep.subr.bf16.mxu1 %v2765_v56  ;;  %v2804_v26 = vld [vmem:[%s3518_s6 + $0x1a4] ss:$16 sps:$4 sm:$0xff]   ;;  %v2806_v28 = vld [vmem:[%s3518_s6 + $0x1a0] ss:$16 sps:$4 sm:$0xff]  }
  0x79   : > { %1583 = vmatpush1.bf16.msra.mxu0 %v2764_v57  ;;  %v2807_v29 = vld [vmem:[%s3510_s30 + $0x1c4] ss:$16 sps:$4 sm:$0xff]   ;;  %v2809_v31 = vld [vmem:[%s3510_s30 + $0x1c0] ss:$16 sps:$4 sm:$0xff]  }
  0x7a   : > { %1584 = vmatprep.subr.bf16.mxu0 %v2768_v58  ;;  %v2810_v30 = vld [vmem:[%s3518_s6 + $0x1c4] ss:$16 sps:$4 sm:$0xff]   ;;  %v2812_v32 = vld [vmem:[%s3518_s6 + $0x1c0] ss:$16 sps:$4 sm:$0xff]  }
  0x7b   : > { %1095 = vmatpush1.bf16.msra.mxu1 %v2767_v59  ;;  %v2813_v33 = vld [vmem:[%s3510_s30 + $0x1e4] ss:$16 sps:$4 sm:$0xff]   ;;  %v2815_v35 = vld [vmem:[%s3510_s30 + $0x1e0] ss:$16 sps:$4 sm:$0xff]  }
  0x7c   : > { %1096 = vmatprep.subr.bf16.mxu1 %v2771_v60  ;;  %v2816_v34 = vld [vmem:[%s3518_s6 + $0x1e4] ss:$16 sps:$4 sm:$0xff]   ;;  %v2818_v36 = vld [vmem:[%s3518_s6 + $0x1e0] ss:$16 sps:$4 sm:$0xff]  }
  0x7d   : > { %1585 = vmatpush1.bf16.msra.mxu0 %v2770_v61  ;;  %v644_v55 = vld [vmem:[%s3931_s1] sm:$0x3]  ;;  %v2930_v48 = vld [vmem:[%s3637_s20 + $0x50] ss:$8 sps:$4 sm:$0xff]  }
  0x7e   : > { %1586 = vmatprep.subr.bf16.mxu0 %v2774_v62  ;;  %v653_v59 = vrot.slane %v644_v55, %v652_v52  ;;  %v649_v61 = vrot.slane %v644_v55, %v648_v53  ;;  %v2933_v52 = vld [vmem:[%s3637_s20 + $0x60] ss:$8 sps:$4 sm:$0xff]  }
  0x7f   : > { %1097 = vmatpush1.bf16.msra.mxu1 %v2773_v63  ;;  %v2852_v53 = vld [vmem:[%s3510_s30 + $0x168] ss:$16 sps:$4 sm:$0xff]  }
  0x80   : > { %1098 = vmatprep.subr.bf16.mxu1 %v2777_v3  ;;  %v2855_v55 = vld [vmem:[%s3510_s30 + $0x188] ss:$16 sps:$4 sm:$0xff]  }
  0x81   : > { %1587 = vmatpush1.bf16.msra.mxu0 %v2776_v4 }
  0x82   : > { %1588 = vmatprep.subr.bf16.mxu0 %v2780_v6 }
  0x83   : > { %1099 = vmatpush1.bf16.msra.mxu1 %v2779_v9 }
  0x84   : > { %1100 = vmatprep.subr.bf16.mxu1 %v2783_v10 }
  0x85   : > { %1589 = vmatpush1.bf16.msra.mxu0 %v2782_v11 }
  0x86   : > { %1590 = vmatprep.subr.bf16.mxu0 %v2786_v14 }
  0x87   : > { %1101 = vmatpush1.bf16.msra.mxu1 %v2785_v15 }
  0x88   : > { %1102 = vmatprep.subr.bf16.mxu1 %v2789_v16 }
  0x89   : > { %1591 = vmatpush1.bf16.msra.mxu0 %v2788_v17  ;;  %v2819_v17 = vld [vmem:[%s3510_s30 + $0x8] ss:$16 sps:$4 sm:$0xff]  }
  0x8a   : > { %1592 = vmatprep.subr.bf16.mxu0 %v2792_v18  ;;  %v2822_v18 = vld [vmem:[%s3510_s30 + $0x28] ss:$16 sps:$4 sm:$0xff]  }
  0x8b   : > { %1103 = vmatpush1.bf16.msra.mxu1 %v2791_v19  ;;  %v2827_v19 = vld [vmem:[%s3510_s30 + $0x4c] ss:$16 sps:$4 sm:$0xff]  }
  0x8c   : > { %1104 = vmatprep.subr.bf16.mxu1 %v2795_v20 }
  0x8d   : > { %1593 = vmatpush1.bf16.msra.mxu0 %v2794_v21  ;;  %v2825_v21 = vld [vmem:[%s3510_s30 + $0x48] ss:$16 sps:$4 sm:$0xff]  }
  0x8e   : > { %1594 = vmatprep.subr.bf16.mxu0 %v2798_v23  ;;  %v2828_v23 = vld [vmem:[%s3510_s30 + $0x68] ss:$16 sps:$4 sm:$0xff]  }
  0x8f   : > { %1105 = vmatpush1.bf16.msra.mxu1 %v2797_v22  ;;  %v2830_v22 = vld [vmem:[%s3510_s30 + $0x6c] ss:$16 sps:$4 sm:$0xff]  }
  0x90   : > { %1106 = vmatprep.subr.bf16.mxu1 %v2801_v25  ;;  %v2831_v25 = vld [vmem:[%s3510_s30 + $0x88] ss:$16 sps:$4 sm:$0xff]  }
  0x91   : > { %1595 = vmatpush1.bf16.msra.mxu0 %v2800_v24  ;;  %v2833_v24 = vld [vmem:[%s3510_s30 + $0x8c] ss:$16 sps:$4 sm:$0xff]  }
  0x92   : > { %1596 = vmatprep.subr.bf16.mxu0 %v2804_v26  ;;  %v2836_v26 = vld [vmem:[%s3510_s30 + $0xac] ss:$16 sps:$4 sm:$0xff]  }
  0x93   : > { %1107 = vmatpush1.bf16.msra.mxu1 %v2803_v27  ;;  %v2915_v27 = vld [vmem:[%s3637_s20] ss:$8 sps:$4 sm:$0xff]  }
  0x94   : > { %1108 = vmatprep.subr.bf16.mxu1 %v2807_v29  ;;  %v2834_v29 = vld [vmem:[%s3510_s30 + $0xa8] ss:$16 sps:$4 sm:$0xff]  }
  0x95   : > { %1597 = vmatpush1.bf16.msra.mxu0 %v2806_v28  ;;  %v2917_v28 = vld [vmem:[%s3637_s20 + $0x4] ss:$8 sps:$4 sm:$0xff]  }
  0x96   : > { %1598 = vmatprep.subr.bf16.mxu0 %v2810_v30  ;;  %v2920_v30 = vld [vmem:[%s3637_s20 + $0x14] ss:$8 sps:$4 sm:$0xff]  }
  0x97   : > { %1109 = vmatpush1.bf16.msra.mxu1 %v2809_v31  ;;  %v2839_v31 = vld [vmem:[%s3510_s30 + $0xcc] ss:$16 sps:$4 sm:$0xff]  }
  0x98   : > { %1110 = vmatprep.subr.bf16.mxu1 %v2813_v33  ;;  %v2923_v33 = vld [vmem:[%s3637_s20 + $0x24] ss:$8 sps:$4 sm:$0xff]  }
  0x99   : > { %1599 = vmatpush1.bf16.msra.mxu0 %v2812_v32  ;;  %v2918_v32 = vld [vmem:[%s3637_s20 + $0x10] ss:$8 sps:$4 sm:$0xff]  }
  0x9a   : > { %1600 = vmatprep.subr.bf16.mxu0 %v2816_v34  ;;  %v2837_v34 = vld [vmem:[%s3510_s30 + $0xc8] ss:$16 sps:$4 sm:$0xff]  }
  0x9b   : > { %1111 = vmatpush1.bf16.msra.mxu1 %v2815_v35  ;;  %v2842_v35 = vld [vmem:[%s3510_s30 + $0xec] ss:$16 sps:$4 sm:$0xff]  }
  0x9c   : > { %1133 = vmatprep.subr.bf16.mxu1 %v2821_v37  ;;  %v2921_v37 = vld [vmem:[%s3637_s20 + $0x20] ss:$8 sps:$4 sm:$0xff]  }
  0x9d   : > { %1601 = vmatpush1.bf16.msra.mxu0 %v2818_v36  ;;  %v2840_v36 = vld [vmem:[%s3510_s30 + $0xe8] ss:$16 sps:$4 sm:$0xff]  }
  0x9e   : > { %2236 = vmatprep.subr.bf16.mxu0 %v2917_v28  ;;  %v2894_v28 = vld [vmem:[%s3518_s6 + $0x128] ss:$16 sps:$4 sm:$0xff]  }
  0xeb   : > { %v613_v38 = vpop.xlane.xlu0 %612 }
  0xec   : > { %v624_v39 = vmul.f32 0.00390625, %v613_v38  ;;  %v619_v40 = vpop.xlane.xlu1 %618  ;;  %v2845_v38 = vld [vmem:[%s3510_s30 + $0x10c] ss:$16 sps:$4 sm:$0xff]  }
  0xed   : > { %v626_v41 = vmul.f32 0.00390625, %v619_v40  ;;  %v2924_v40 = vld [vmem:[%s3637_s20 + $0x30] ss:$8 sps:$4 sm:$0xff]  }
  0xee   : > { %v628_v42 = vadd.f32 1e-06, %v624_v39  ;;  %v2926_v39 = vld [vmem:[%s3637_s20 + $0x34] ss:$8 sps:$4 sm:$0xff]  }
  0xef   : > { %v616_v43 = vpop.xlane.xlu0 %615  ;;  %v630_v44 = vadd.f32 1e-06, %v626_v41  ;;  %v2929_v41 = vld [vmem:[%s3637_s20 + $0x44] ss:$8 sps:$4 sm:$0xff]  }
  0xf0   : > { %3011 = vrsqrt.f32 %v628_v42  ;;  %v625_v45 = vmul.f32 0.00390625, %v616_v43  ;;  %v622_v46 = vpop.xlane.xlu1 %621  ;;  %v2843_v42 = vld [vmem:[%s3510_s30 + $0x108] ss:$16 sps:$4 sm:$0xff]   ;;  %v2848_v43 = vld [vmem:[%s3510_s30 + $0x12c] ss:$16 sps:$4 sm:$0xff]  }
  0xf1   : > { %3013 = vrsqrt.f32 %v630_v44  ;;  %v627_v47 = vmul.f32 0.00390625, %v622_v46  ;;  %v2927_v44 = vld [vmem:[%s3637_s20 + $0x40] ss:$8 sps:$4 sm:$0xff]  }
  0xf2   : > { %v629_v49 = vadd.f32 1e-06, %v625_v45  ;;  %v2932_v45 = vld [vmem:[%s3637_s20 + $0x54] ss:$8 sps:$4 sm:$0xff]   ;;  %v2846_v46 = vld [vmem:[%s3510_s30 + $0x128] ss:$16 sps:$4 sm:$0xff]  }
  0xf3   : > { %v631_v50 = vadd.f32 1e-06, %v627_v47  ;;  %v2851_v47 = vld [vmem:[%s3510_s30 + $0x14c] ss:$16 sps:$4 sm:$0xff]  }
  0xf4   : > { %3015 = vrsqrt.f32 %v629_v49  ;;  %v2935_v49 = vld [vmem:[%s3637_s20 + $0x64] ss:$8 sps:$4 sm:$0xff]  }
  0xf5   : > { %3017 = vrsqrt.f32 %v631_v50  ;;  %v2849_v50 = vld [vmem:[%s3510_s30 + $0x148] ss:$16 sps:$4 sm:$0xff]  }
  0xfa   : > { %v3012_v54 = vpop.eup %3011 }
  0xfb   : > { %v3014_v56 = vpop.eup %3013  ;;  %v637_v58 = vmul.f32 %v3012_v54, %v3451_v1  ;;  %v636_v60 = vmul.f32 %v3012_v54, %v3446_v0  ;;  %v2857_v54 = vld [vmem:[%s3510_s30 + $0x18c] ss:$16 sps:$4 sm:$0xff]  }
  0xfc   : > { %v641_v57 = vmul.f32 %v3014_v56, %v3479_v8  ;;  %v640_v0 = vmul.f32 %v3014_v56, %v3474_v7  ;;  %v2860_v56 = vld [vmem:[%s3510_s30 + $0x1ac] ss:$16 sps:$4 sm:$0xff]  }
  0xfd   : > { %v657_v10 = vmul.f32 %v653_v59, %v637_v58  ;;  %v656_v8 = vmul.f32 %v649_v61, %v636_v60  ;;  %v2863_v58 = vld [vmem:[%s3510_s30 + $0x1cc] ss:$16 sps:$4 sm:$0xff]  }
  0xfe   : > { %v3016_v62 = vpop.eup %3015  ;;  %v661_v9 = vmul.f32 %v653_v59, %v641_v57  ;;  %v660_v7 = vmul.f32 %v649_v61, %v640_v0  ;;  %v2858_v57 = vld [vmem:[%s3510_s30 + $0x1a8] ss:$16 sps:$4 sm:$0xff]   ;;  %v2866_v60 = vld [vmem:[%s3510_s30 + $0x1ec] ss:$16 sps:$4 sm:$0xff]  }
  0xff   : > { %v3018_v63 = vpop.eup %3017  ;;  %v639_v3 = vmul.f32 %v3016_v62, %v3467_v5  ;;  %v638_v4 = vmul.f32 %v3016_v62, %v3458_v2  ;;  %v2824_v2 = vld [vmem:[%s3510_s30 + $0x2c] ss:$16 sps:$4 sm:$0xff]   ;;  %v2882_v0 = vld [vmem:[%s3518_s6 + $0xa8] ss:$16 sps:$4 sm:$0xff]  }
 0x100   : > { %v643_v6 = vmul.f32 %v3018_v63, %v3496_v13  ;;  %v642_v15 = vmul.f32 %v3018_v63, %v3491_v12  ;;  %v2869_v62 = vld [vmem:[%s3518_s6 + $0xc] ss:$16 sps:$4 sm:$0xff]   ;;  %v2867_v63 = vld [vmem:[%s3518_s6 + $0x8] ss:$16 sps:$4 sm:$0xff]  }
 0x101   : > { %v659_v11 = vmul.f32 %v653_v59, %v639_v3  ;;  %v658_v14 = vmul.f32 %v649_v61, %v638_v4  ;;  %v2872_v3 = vld [vmem:[%s3518_s6 + $0x2c] ss:$16 sps:$4 sm:$0xff]   ;;  %v2870_v4 = vld [vmem:[%s3518_s6 + $0x28] ss:$16 sps:$4 sm:$0xff]  }
 0x102   : > { %v663_v1 = vmul.f32 %v653_v59, %v643_v6  ;;  %v662_v12 = vmul.f32 %v649_v61, %v642_v15  ;;  %v2861_v59 = vld [vmem:[%s3510_s30 + $0x1c8] ss:$16 sps:$4 sm:$0xff]   ;;  %v2875_v6 = vld [vmem:[%s3518_s6 + $0x4c] ss:$16 sps:$4 sm:$0xff]  }
 0x103   : > { %v3606_v16 = vpack.c.bf16 %v659_v11, %v657_v10  ;;  %v3609_v5 = vpack.c.bf16 %v658_v14, %v656_v8  ;;  %v2864_v61 = vld [vmem:[%s3510_s30 + $0x1e8] ss:$16 sps:$4 sm:$0xff]   ;;  %v2878_v10 = vld [vmem:[%s3518_s6 + $0x6c] ss:$16 sps:$4 sm:$0xff]  }
 0x104   : > { %v3612_v13 = vpack.c.bf16 %v663_v1, %v661_v9  ;;  %v3622_v20 = vpack.c.bf16 %v662_v12, %v660_v7  ;;  %v2873_v9 = vld [vmem:[%s3518_s6 + $0x48] ss:$16 sps:$4 sm:$0xff]   ;;  %v2881_v8 = vld [vmem:[%s3518_s6 + $0x8c] ss:$16 sps:$4 sm:$0xff]  }
 0x105   : > { %1112 = vmatprep.mubr.bf16.mxu1 %v3606_v16  ;;  %1602 = vmatprep.mubr.bf16.mxu0 %v3606_v16  ;;  %v2876_v11 = vld [vmem:[%s3518_s6 + $0x68] ss:$16 sps:$4 sm:$0xff]   ;;  %v2884_v1 = vld [vmem:[%s3518_s6 + $0xac] ss:$16 sps:$4 sm:$0xff]  }
 0x106   : > { %1113 = vmatmul.mubr.bf16.vlgmr.msra.gmra.mrb[0].mxu1 %v3609_v5  ;;  %1603 = vmatmul.mubr.bf16.vlgmr.msra.gmra.mrb[0].mxu0 %v3609_v5  ;;  %v2879_v14 = vld [vmem:[%s3518_s6 + $0x88] ss:$16 sps:$4 sm:$0xff]   ;;  %v2887_v15 = vld [vmem:[%s3518_s6 + $0xcc] ss:$16 sps:$4 sm:$0xff]  }
 0x107   : > { %1134 = vmatpush1.bf16.msra.mxu1 %v2819_v17  ;;  %1122 = vmatprep.mubr.bf16.mxu1 %v3612_v13  ;;  %v2938_v17 = vld [vmem:[%s3637_s20 + $0x74] ss:$8 sps:$4 sm:$0xff]   ;;  %v2941_v12 = vld [vmem:[%s3637_s20 + $0x84] ss:$8 sps:$4 sm:$0xff]  }
 0x108   : > { %1135 = vmatprep.subr.bf16.mxu1 %v2824_v2  ;;  %1612 = vmatprep.mubr.bf16.mxu0 %v3612_v13  ;;  %v2885_v2 = vld [vmem:[%s3518_s6 + $0xc8] ss:$16 sps:$4 sm:$0xff]   ;;  %v2890_v7 = vld [vmem:[%s3518_s6 + $0xec] ss:$16 sps:$4 sm:$0xff]  }
 0x109   : > { %2237 = vmatpush1.bf16.msra.mxu0 %v2915_v27  ;;  %v2945_v27 = vld [vmem:[%s3637_s20 + $0xa0] ss:$8 sps:$4 sm:$0xff]  }
 0x10a   : > { %2238 = vmatprep.subr.bf16.mxu0 %v2920_v30  ;;  %v2950_v30 = vld [vmem:[%s3637_s20 + $0xb4] ss:$8 sps:$4 sm:$0xff]  }
 0x10b   : > { %1136 = vmatpush1.bf16.msra.mxu1 %v2822_v18  ;;  %v2939_v18 = vld [vmem:[%s3637_s20 + $0x80] ss:$8 sps:$4 sm:$0xff]  }
 0x10c   : > { %1137 = vmatprep.subr.bf16.mxu1 %v2827_v19  ;;  %v2888_v19 = vld [vmem:[%s3518_s6 + $0xe8] ss:$16 sps:$4 sm:$0xff]  }
 0x10d   : > { %2239 = vmatpush1.bf16.msra.mxu0 %v2918_v32  ;;  %v2897_v32 = vld [vmem:[%s3518_s6 + $0x148] ss:$16 sps:$4 sm:$0xff]  }
 0x10e   : > { %1123 = vmatmul.mubr.bf16.gmra.mrb[4].mxu1 %v3622_v20  ;;  %1613 = vmatmul.mubr.bf16.gmra.mrb[4].mxu0 %v3622_v20 }
 0x10f   : > { %1138 = vmatpush1.bf16.msra.mxu1 %v2825_v21  ;;  %1165 = vmatprep.mubr.bf16.mxu1 %v3606_v16  ;;  %v2893_v21 = vld [vmem:[%s3518_s6 + $0x10c] ss:$16 sps:$4 sm:$0xff]  }
 0x110   : > { %1139 = vmatprep.subr.bf16.mxu1 %v2830_v22  ;;  %2240 = vmatprep.subr.bf16.mxu0 %v2923_v33  ;;  %v2944_v22 = vld [vmem:[%s3637_s20 + $0x94] ss:$8 sps:$4 sm:$0xff]  }
 0x111   : > { %2241 = vmatpush1.bf16.msra.mxu0 %v2921_v37  ;;  %v2902_v33 = vld [vmem:[%s3518_s6 + $0x16c] ss:$16 sps:$4 sm:$0xff]  }
 0x112   : > { %2242 = vmatprep.subr.bf16.mxu0 %v2926_v39  ;;  %v2905_v37 = vld [vmem:[%s3518_s6 + $0x18c] ss:$16 sps:$4 sm:$0xff]   ;;  %v2954_v39 = vld [vmem:[%s3637_s20 + $0xd0] ss:$8 sps:$4 sm:$0xff]  }
 0x113   : > { %1140 = vmatpush1.bf16.msra.mxu1 %v2828_v23  ;;  %v2942_v23 = vld [vmem:[%s3637_s20 + $0x90] ss:$8 sps:$4 sm:$0xff]  }
 0x114   : > { %1141 = vmatprep.subr.bf16.mxu1 %v2833_v24  ;;  %v2891_v24 = vld [vmem:[%s3518_s6 + $0x108] ss:$16 sps:$4 sm:$0xff]  }
 0x115   : > { %2243 = vmatpush1.bf16.msra.mxu0 %v2924_v40  ;;  %v2903_v40 = vld [vmem:[%s3518_s6 + $0x188] ss:$16 sps:$4 sm:$0xff]  }
 0x116   : > { %2244 = vmatprep.subr.bf16.mxu0 %v2929_v41  ;;  %v2908_v41 = vld [vmem:[%s3518_s6 + $0x1ac] ss:$16 sps:$4 sm:$0xff]  }
 0x117   : > { %1142 = vmatpush1.bf16.msra.mxu1 %v2831_v25  ;;  %v2896_v25 = vld [vmem:[%s3518_s6 + $0x12c] ss:$16 sps:$4 sm:$0xff]  }
 0x118   : > { %1143 = vmatprep.subr.bf16.mxu1 %v2836_v26  ;;  %v2947_v26 = vld [vmem:[%s3637_s20 + $0xa4] ss:$8 sps:$4 sm:$0xff]  }
 0x119   : > { %2245 = vmatpush1.bf16.msra.mxu0 %v2927_v44  ;;  %v2906_v44 = vld [vmem:[%s3518_s6 + $0x1a8] ss:$16 sps:$4 sm:$0xff]  }
 0x11a   : > { %2246 = vmatprep.subr.bf16.mxu0 %v2932_v45  ;;  %v2911_v45 = vld [vmem:[%s3518_s6 + $0x1cc] ss:$16 sps:$4 sm:$0xff]  }
 0x11b   : > { %1144 = vmatpush1.bf16.msra.mxu1 %v2834_v29  ;;  %v2899_v29 = vld [vmem:[%s3518_s6 + $0x14c] ss:$16 sps:$4 sm:$0xff]  }
 0x11c   : > { %1145 = vmatprep.subr.bf16.mxu1 %v2839_v31  ;;  %v2948_v31 = vld [vmem:[%s3637_s20 + $0xb0] ss:$8 sps:$4 sm:$0xff]  }
 0x11d   : > { %2247 = vmatpush1.bf16.msra.mxu0 %v2930_v48  ;;  %v2909_v48 = vld [vmem:[%s3518_s6 + $0x1c8] ss:$16 sps:$4 sm:$0xff]  }
 0x11e   : > { %2248 = vmatprep.subr.bf16.mxu0 %v2935_v49  ;;  %v2914_v49 = vld [vmem:[%s3518_s6 + $0x1ec] ss:$16 sps:$4 sm:$0xff]  }
 0x11f   : > { %1146 = vmatpush1.bf16.msra.mxu1 %v2837_v34  ;;  %v2953_v34 = vld [vmem:[%s3637_s20 + $0xc4] ss:$8 sps:$4 sm:$0xff]  }
 0x120   : > { %1147 = vmatprep.subr.bf16.mxu1 %v2842_v35  ;;  %v2951_v35 = vld [vmem:[%s3637_s20 + $0xc0] ss:$8 sps:$4 sm:$0xff]  }
 0x121   : > { %2249 = vmatpush1.bf16.msra.mxu0 %v2933_v52 }
 0x122   : > { %2250 = vmatprep.subr.bf16.mxu0 %v2938_v17 }
 0x123   : > { %1148 = vmatpush1.bf16.msra.mxu1 %v2840_v36  ;;  %v2900_v36 = vld [vmem:[%s3518_s6 + $0x168] ss:$16 sps:$4 sm:$0xff]  }
 0x124   : > { %1149 = vmatprep.subr.bf16.mxu1 %v2845_v38  ;;  %v2956_v38 = vld [vmem:[%s3637_s20 + $0xd4] ss:$8 sps:$4 sm:$0xff]  }
 0x127   : > { %1150 = vmatpush1.bf16.msra.mxu1 %v2843_v42  ;;  %v2959_v42 = vld [vmem:[%s3637_s20 + $0xe4] ss:$8 sps:$4 sm:$0xff]  }
 0x128   : > { %1151 = vmatprep.subr.bf16.mxu1 %v2848_v43  ;;  %v2957_v43 = vld [vmem:[%s3637_s20 + $0xe0] ss:$8 sps:$4 sm:$0xff]  }
 0x12b   : > { %1152 = vmatpush1.bf16.msra.mxu1 %v2846_v46  ;;  %v2962_v46 = vld [vmem:[%s3637_s20 + $0xf4] ss:$8 sps:$4 sm:$0xff]  }
 0x12c   : > { %1153 = vmatprep.subr.bf16.mxu1 %v2851_v47  ;;  %v2960_v47 = vld [vmem:[%s3637_s20 + $0xf0] ss:$8 sps:$4 sm:$0xff]  }
 0x12f   : > { %1154 = vmatpush1.bf16.msra.mxu1 %v2849_v50  ;;  %v2912_v50 = vld [vmem:[%s3518_s6 + $0x1e8] ss:$16 sps:$4 sm:$0xff]  }
 0x130   : > { %1155 = vmatprep.subr.bf16.mxu1 %v2854_v51  ;;  %v2965_v51 = vld [vmem:[%s3637_s20 + $0x104] ss:$8 sps:$4 sm:$0xff]  }
 0x133   : > { %1156 = vmatpush1.bf16.msra.mxu1 %v2852_v53 }
 0x134   : > { %1157 = vmatprep.subr.bf16.mxu1 %v2857_v54 }
 0x137   : > { %1158 = vmatpush1.bf16.msra.mxu1 %v2855_v55 }
 0x138   : > { %1159 = vmatprep.subr.bf16.mxu1 %v2860_v56 }
 0x13b   : > { %1160 = vmatpush1.bf16.msra.mxu1 %v2858_v57 }
 0x13c   : > { %1161 = vmatprep.subr.bf16.mxu1 %v2863_v58 }
 0x13f   : > { %1162 = vmatpush1.bf16.msra.mxu1 %v2861_v59 }
 0x140   : > { %1163 = vmatprep.subr.bf16.mxu1 %v2866_v60 }
 0x143   : > { %1164 = vmatpush1.bf16.msra.mxu1 %v2864_v61 }
 0x144   : > { %1623 = vmatprep.subr.bf16.mxu1 %v2869_v62 }
 0x146   : > { %1166 = vmatmul.mubr.bf16.vlgmr.msra.gmra.mrb[8].mxu1 %v3609_v5 }
 0x147   : > { %1175 = vmatprep.mubr.bf16.mxu1 %v3612_v13  ;;  %1624 = vmatpush1.bf16.msra.mxu1 %v2867_v63 }
 0x148   : > { %1625 = vmatprep.subr.bf16.mxu1 %v2872_v3 }
 0x14b   : > { %1626 = vmatpush1.bf16.msra.mxu1 %v2870_v4 }
 0x14c   : > { %1627 = vmatprep.subr.bf16.mxu1 %v2875_v6 }
 0x14e   : > { %1176 = vmatmul.mubr.bf16.gmra.mrb[12].mxu1 %v3622_v20 }
 0x14f   : > { %1628 = vmatpush1.bf16.msra.mxu1 %v2873_v9  ;;  %1655 = vmatprep.mubr.bf16.mxu1 %v3606_v16  ;;  %v2936_v16 = vld [vmem:[%s3637_s20 + $0x70] ss:$8 sps:$4 sm:$0xff]  }
 0x150   : > { %1629 = vmatprep.subr.bf16.mxu1 %v2878_v10  ;;  %2251 = vmatpush1.bf16.msra.mxu0 %v2936_v16 }
 0x151   : > { %2252 = vmatprep.subr.bf16.mxu0 %v2941_v12 }
 0x153   : > { %1630 = vmatpush1.bf16.msra.mxu1 %v2876_v11 }
 0x154   : > { %1631 = vmatprep.subr.bf16.mxu1 %v2881_v8  ;;  %2253 = vmatpush1.bf16.msra.mxu0 %v2939_v18 }
 0x155   : > { %2254 = vmatprep.subr.bf16.mxu0 %v2944_v22 }
 0x157   : > { %1632 = vmatpush1.bf16.msra.mxu1 %v2879_v14 }
 0x158   : > { %1633 = vmatprep.subr.bf16.mxu1 %v2884_v1  ;;  %2255 = vmatpush1.bf16.msra.mxu0 %v2942_v23 }
 0x159   : > { %2256 = vmatprep.subr.bf16.mxu0 %v2947_v26 }
 0x15b   : > { %1634 = vmatpush1.bf16.msra.mxu1 %v2882_v0 }
 0x15c   : > { %1635 = vmatprep.subr.bf16.mxu1 %v2887_v15  ;;  %2257 = vmatpush1.bf16.msra.mxu0 %v2945_v27 }
 0x15d   : > { %2258 = vmatprep.subr.bf16.mxu0 %v2950_v30 }
 0x15f   : > { %1636 = vmatpush1.bf16.msra.mxu1 %v2885_v2 }
 0x160   : > { %1637 = vmatprep.subr.bf16.mxu1 %v2890_v7  ;;  %2259 = vmatpush1.bf16.msra.mxu0 %v2948_v31 }
 0x161   : > { %2260 = vmatprep.subr.bf16.mxu0 %v2953_v34 }
 0x163   : > { %1638 = vmatpush1.bf16.msra.mxu1 %v2888_v19 }
 0x164   : > { %1639 = vmatprep.subr.bf16.mxu1 %v2893_v21  ;;  %2261 = vmatpush1.bf16.msra.mxu0 %v2951_v35 }
 0x165   : > { %2262 = vmatprep.subr.bf16.mxu0 %v2956_v38 }
 0x167   : > { %1640 = vmatpush1.bf16.msra.mxu1 %v2891_v24 }
 0x168   : > { %1641 = vmatprep.subr.bf16.mxu1 %v2896_v25  ;;  %2263 = vmatpush1.bf16.msra.mxu0 %v2954_v39 }
 0x169   : > { %2264 = vmatprep.subr.bf16.mxu0 %v2959_v42 }
 0x16b   : > { %1642 = vmatpush1.bf16.msra.mxu1 %v2894_v28 }
 0x16c   : > { %1643 = vmatprep.subr.bf16.mxu1 %v2899_v29  ;;  %2265 = vmatpush1.bf16.msra.mxu0 %v2957_v43 }
 0x16d   : > { %2266 = vmatprep.subr.bf16.mxu0 %v2962_v46 }
 0x16f   : > { %1644 = vmatpush1.bf16.msra.mxu1 %v2897_v32 }
 0x170   : > { %1645 = vmatprep.subr.bf16.mxu1 %v2902_v33  ;;  %2267 = vmatpush1.bf16.msra.mxu0 %v2960_v47 }
 0x171   : > { %2289 = vmatprep.subr.bf16.mxu0 %v2965_v51 }
 0x173   : > { %1646 = vmatpush1.bf16.msra.mxu1 %v2900_v36 }
 0x174   : > { %1647 = vmatprep.subr.bf16.mxu1 %v2905_v37 }
 0x177   : > { %1648 = vmatpush1.bf16.msra.mxu1 %v2903_v40 }
 0x178   : > { %1649 = vmatprep.subr.bf16.mxu1 %v2908_v41 }
 0x17b   : > { %1650 = vmatpush1.bf16.msra.mxu1 %v2906_v44 }
 0x17c   : > { %1651 = vmatprep.subr.bf16.mxu1 %v2911_v45 }
 0x17f   : > { %1652 = vmatpush1.bf16.msra.mxu1 %v2909_v48 }
 0x180   : > { %1653 = vmatprep.subr.bf16.mxu1 %v2914_v49 }
 0x183   : > { %1654 = vmatpush1.bf16.msra.mxu1 %v2912_v50 }
 0x186   : > { %1656 = vmatmul.mubr.bf16.vlgmr.msra.gmra.mrb[16].mxu1 %v3609_v5 }
 0x187   : > { %1665 = vmatprep.mubr.bf16.mxu1 %v3612_v13 }
 0x18e   : > { %1666 = vmatmul.mubr.bf16.gmra.mrb[20].mxu1 %v3622_v20 }
 0x1d9   : > { %v3732_v52 = vpop.f32.mrb[0].mxu1  ;;  %v3734_v53 = vpop.f32.mrb[0].mxu0 }
 0x1da   : > { %v1676_v54 = vmul.f32 %v3732_v52, %v3732_v52  ;;  %v3738_v55 = vpop.f32.mrb[1].mxu1  ;;  %v3740_v56 = vpop.f32.mrb[1].mxu0 }
 0x1db   : > { %v1677_v5 = vmul.f32 %v3738_v55, %v3738_v55  ;;  %v3744_v57 = vpop.f32.mrb[2].mxu1  ;;  %v3746_v13 = vpop.f32.mrb[2].mxu0 }
 0x1dc   : > { %v1692_v20 = vmul.f32 %v1676_v54, %v3732_v52  ;;  %v1680_v58 = vmul.f32 %v3744_v57, %v3744_v57  ;;  %v3751_v59 = vpop.f32.mrb[3].mxu1  ;;  %v3753_v60 = vpop.f32.mrb[3].mxu0 }
 0x1dd   : > { %v1693_v61 = vmul.f32 %v1677_v5, %v3738_v55  ;;  %v1681_v62 = vmul.f32 %v3751_v59, %v3751_v59 }
 0x1de   : > { %v1708_v63 = vmul.f32 0.044715, %v1692_v20  ;;  %v1696_v3 = vmul.f32 %v1680_v58, %v3744_v57 }
 0x1df   : > { %v1709_v4 = vmul.f32 0.044715, %v1693_v61  ;;  %v1697_v6 = vmul.f32 %v1681_v62, %v3751_v59 }
 0x1e0   : > { %v1724_v9 = vadd.f32 %v1708_v63, %v3732_v52  ;;  %v1712_v10 = vmul.f32 0.044715, %v1696_v3 }
 0x1e1   : > { %v1725_v11 = vadd.f32 %v1709_v4, %v3738_v55  ;;  %v1713_v8 = vmul.f32 0.044715, %v1697_v6  ;;  %v3762_v14 = vpop.f32.mrb[4].mxu1  ;;  %v3764_v1 = vpop.f32.mrb[4].mxu0 }
 0x1e2   : > { %v1740_v0 = vmul.f32 0.7978846, %v1724_v9  ;;  %v1728_v15 = vadd.f32 %v1712_v10, %v3744_v57  ;;  %v1684_v17 = vmul.f32 %v3762_v14, %v3762_v14  ;;  %v3769_v16 = vpop.f32.mrb[5].mxu1  ;;  %v3771_v2 = vpop.f32.mrb[5].mxu0 }
 0x1e3   : > { %v1741_v7 = vmul.f32 0.7978846, %v1725_v11  ;;  %v1729_v12 = vadd.f32 %v1713_v8, %v3751_v59  ;;  %v1685_v18 = vmul.f32 %v3769_v16, %v3769_v16  ;;  %v3776_v19 = vpop.f32.mrb[6].mxu1  ;;  %v3778_v21 = vpop.f32.mrb[6].mxu0 }
 0x1e4   : > { %3019 = vtanh.f32 %v1740_v0  ;;  %v1744_v22 = vmul.f32 0.7978846, %v1728_v15  ;;  %v1700_v23 = vmul.f32 %v1684_v17, %v3762_v14  ;;  %v1688_v24 = vmul.f32 %v3776_v19, %v3776_v19  ;;  %v3783_v25 = vpop.f32.mrb[7].mxu1  ;;  %v3785_v26 = vpop.f32.mrb[7].mxu0 }
 0x1e5   : > { %3021 = vtanh.f32 %v1741_v7  ;;  %v1745_v27 = vmul.f32 0.7978846, %v1729_v12  ;;  %v1701_v28 = vmul.f32 %v1685_v18, %v3769_v16  ;;  %v1689_v29 = vmul.f32 %v3783_v25, %v3783_v25 }
 0x1e6   : > { %3023 = vtanh.f32 %v1744_v22  ;;  %v1716_v30 = vmul.f32 0.044715, %v1700_v23  ;;  %v1704_v31 = vmul.f32 %v1688_v24, %v3776_v19  ;;  %v2968_v23 = vld [vmem:[%s3637_s20 + $0x114] ss:$8 sps:$4 sm:$0xff]  }
 0x1e7   : > { %3025 = vtanh.f32 %v1745_v27  ;;  %v1717_v32 = vmul.f32 0.044715, %v1701_v28  ;;  %v1705_v33 = vmul.f32 %v1689_v29, %v3783_v25 }
 0x1e8   : > { %v1732_v34 = vadd.f32 %v1716_v30, %v3762_v14  ;;  %v1720_v35 = vmul.f32 0.044715, %v1704_v31 }
 0x1e9   : > { %v1733_v36 = vadd.f32 %v1717_v32, %v3769_v16  ;;  %v1721_v37 = vmul.f32 0.044715, %v1705_v33  ;;  %v2980_v33 = vld [vmem:[%s3637_s20 + $0x154] ss:$8 sps:$4 sm:$0xff]  }
 0x1ea   : > { %v1748_v38 = vmul.f32 0.7978846, %v1732_v34  ;;  %v1736_v39 = vadd.f32 %v1720_v35, %v3776_v19  ;;  %v2978_v34 = vld [vmem:[%s3637_s20 + $0x150] ss:$8 sps:$4 sm:$0xff]   ;;  %v2983_v35 = vld [vmem:[%s3637_s20 + $0x164] ss:$8 sps:$4 sm:$0xff]  }
 0x1eb   : > { %v1749_v40 = vmul.f32 0.7978846, %v1733_v36  ;;  %v1737_v41 = vadd.f32 %v1721_v37, %v3783_v25  ;;  %v2981_v36 = vld [vmem:[%s3637_s20 + $0x160] ss:$8 sps:$4 sm:$0xff]   ;;  %v2986_v37 = vld [vmem:[%s3637_s20 + $0x174] ss:$8 sps:$4 sm:$0xff]  }
 0x1ec   : > { %3027 = vtanh.f32 %v1748_v38  ;;  %v1752_v42 = vmul.f32 0.7978846, %v1736_v39  ;;  %v2984_v38 = vld [vmem:[%s3637_s20 + $0x170] ss:$8 sps:$4 sm:$0xff]   ;;  %v2989_v39 = vld [vmem:[%s3637_s20 + $0x184] ss:$8 sps:$4 sm:$0xff]  }
 0x1ed   : > { %3029 = vtanh.f32 %v1749_v40  ;;  %v1753_v43 = vmul.f32 0.7978846, %v1737_v41 }
 0x1ee   : > { %v3020_v44 = vpop.eup %3019  ;;  %3031 = vtanh.f32 %v1752_v42  ;;  %v2987_v42 = vld [vmem:[%s3637_s20 + $0x180] ss:$8 sps:$4 sm:$0xff]  }
 0x1ef   : > { %v3022_v45 = vpop.eup %3021  ;;  %v1772_v46 = vadd.f32 1.0, %v3020_v44  ;;  %3033 = vtanh.f32 %v1753_v43  ;;  %v2992_v44 = vld [vmem:[%s3637_s20 + $0x194] ss:$8 sps:$4 sm:$0xff]  }
 0x1f0   : > { %v3024_v47 = vpop.eup %3023  ;;  %v1773_v48 = vadd.f32 1.0, %v3022_v45 }
 0x1f1   : > { %v3026_v49 = vpop.eup %3025  ;;  %v1788_v50 = vmul.f32 0.5, %v1772_v46  ;;  %v1776_v51 = vadd.f32 1.0, %v3024_v47  ;;  %v2990_v46 = vld [vmem:[%s3637_s20 + $0x190] ss:$8 sps:$4 sm:$0xff]   ;;  %v2995_v47 = vld [vmem:[%s3637_s20 + $0x1a4] ss:$8 sps:$4 sm:$0xff]  }
 0x1f2   : > { %v1789_v54 = vmul.f32 0.5, %v1773_v48  ;;  %v1777_v5 = vadd.f32 1.0, %v3026_v49 }
 0x1f3   : > { %v1804_v20 = vmul.f32 %v1788_v50, %v3732_v52  ;;  %v1792_v58 = vmul.f32 0.5, %v1776_v51  ;;  %v2993_v50 = vld [vmem:[%s3637_s20 + $0x1a0] ss:$8 sps:$4 sm:$0xff]  }
 0x1f4   : > { %v1805_v61 = vmul.f32 %v1789_v54, %v3738_v55  ;;  %v1793_v62 = vmul.f32 0.5, %v1777_v5  ;;  %v2998_v54 = vld [vmem:[%s3637_s20 + $0x1b4] ss:$8 sps:$4 sm:$0xff]  }
 0x1f5   : > { %v1820_v63 = vmul.f32 %v1804_v20, %v3734_v53  ;;  %v1808_v3 = vmul.f32 %v1792_v58, %v3744_v57  ;;  %v2996_v20 = vld [vmem:[%s3637_s20 + $0x1b0] ss:$8 sps:$4 sm:$0xff]   ;;  %v3001_v58 = vld [vmem:[%s3637_s20 + $0x1c4] ss:$8 sps:$4 sm:$0xff]  }
 0x1f6   : > { %v3028_v4 = vpop.eup %3027  ;;  %v1821_v6 = vmul.f32 %v1805_v61, %v3740_v56  ;;  %v1809_v9 = vmul.f32 %v1793_v62, %v3751_v59  ;;  %v2963_v56 = vld [vmem:[%s3637_s20 + $0x100] ss:$8 sps:$4 sm:$0xff]   ;;  %v3004_v62 = vld [vmem:[%s3637_s20 + $0x1d4] ss:$8 sps:$4 sm:$0xff]  }
 0x1f7   : > { %v3030_v10 = vpop.eup %3029  ;;  %v1824_v11 = vmul.f32 %v1808_v3, %v3746_v13  ;;  %v1780_v8 = vadd.f32 1.0, %v3028_v4  ;;  %v2999_v61 = vld [vmem:[%s3637_s20 + $0x1c0] ss:$8 sps:$4 sm:$0xff]   ;;  %v3007_v4 = vld [vmem:[%s3637_s20 + $0x1e4] ss:$8 sps:$4 sm:$0xff]  }
 0x1f8   : > { %v3032_v52 = vpop.eup %3031  ;;  %v1825_v0 = vmul.f32 %v1809_v9, %v3753_v60  ;;  %v1781_v55 = vadd.f32 1.0, %v3030_v10 }
 0x1f9   : > { %v3034_v15 = vpop.eup %3033  ;;  %v1836_v17 = vpack.c.bf16 %v1824_v11, %v1820_v63  ;;  %v1796_v53 = vmul.f32 0.5, %v1780_v8  ;;  %v1784_v7 = vadd.f32 1.0, %v3032_v52  ;;  %v3002_v63 = vld [vmem:[%s3637_s20 + $0x1d0] ss:$8 sps:$4 sm:$0xff]   ;;  %v3005_v11 = vld [vmem:[%s3637_s20 + $0x1e0] ss:$8 sps:$4 sm:$0xff]  }
 0x1fa   : > { %v1837_v57 = vpack.c.bf16 %v1825_v0, %v1821_v6  ;;  %v1797_v12 = vmul.f32 0.5, %v1781_v55  ;;  %v1785_v18 = vadd.f32 1.0, %v3034_v15  ;;  %v3010_v52 = vld [vmem:[%s3637_s20 + $0x1f4] ss:$8 sps:$4 sm:$0xff]  }
 0x1fb   : > { %v1812_v59 = vmul.f32 %v1796_v53, %v3762_v14  ;;  %v1800_v22 = vmul.f32 0.5, %v1784_v7  ;;  %v2966_v14 = vld [vmem:[%s3637_s20 + $0x110] ss:$8 sps:$4 sm:$0xff]  }
 0x1fc   : > { %2268 = vmatprep.mubr.bf16.mxu0 %v1837_v57  ;;  %v1813_v13 = vmul.f32 %v1797_v12, %v3769_v16  ;;  %v1801_v60 = vmul.f32 0.5, %v1785_v18  ;;  %v2971_v16 = vld [vmem:[%s3637_s20 + $0x124] ss:$8 sps:$4 sm:$0xff]  }
 0x1fd   : > { %2269 = vmatmul.mubr.bf16.vlgmr.msra.gmra.mrb[8].mxu0 %v1836_v17  ;;  %v1828_v24 = vmul.f32 %v1812_v59, %v3764_v1  ;;  %v1816_v27 = vmul.f32 %v1800_v22, %v3776_v19  ;;  %v2969_v19 = vld [vmem:[%s3637_s20 + $0x120] ss:$8 sps:$4 sm:$0xff]   ;;  %v3008_v17 = vld [vmem:[%s3637_s20 + $0x1f0] ss:$8 sps:$4 sm:$0xff]  }
 0x1fe   : > { %v1829_v28 = vmul.f32 %v1813_v13, %v3771_v2  ;;  %v1817_v29 = vmul.f32 %v1801_v60, %v3783_v25  ;;  %2290 = vmatpush1.bf16.msra.mxu0 %v2963_v56  ;;  %v2974_v2 = vld [vmem:[%s3637_s20 + $0x134] ss:$8 sps:$4 sm:$0xff]   ;;  %v2977_v25 = vld [vmem:[%s3637_s20 + $0x144] ss:$8 sps:$4 sm:$0xff]  }
 0x1ff   : > { %v1832_v30 = vmul.f32 %v1816_v27, %v3778_v21  ;;  %2291 = vmatprep.subr.bf16.mxu0 %v2968_v23  ;;  %v2972_v21 = vld [vmem:[%s3637_s20 + $0x130] ss:$8 sps:$4 sm:$0xff]  }
 0x200   : > { %v1833_v31 = vmul.f32 %v1817_v29, %v3785_v26  ;;  %v2975_v26 = vld [vmem:[%s3637_s20 + $0x140] ss:$8 sps:$4 sm:$0xff]  }
 0x201   : > { %v1840_v32 = vpack.c.bf16 %v1832_v30, %v1828_v24 }
 0x202   : > { %v1841_v1 = vpack.c.bf16 %v1833_v31, %v1829_v28  ;;  %2292 = vmatpush1.bf16.msra.mxu0 %v2966_v14 }
 0x203   : > { %2293 = vmatprep.subr.bf16.mxu0 %v2971_v16 }
 0x204   : > { %2278 = vmatprep.mubr.bf16.mxu0 %v1841_v1 }
 0x205   : > { %2279 = vmatmul.mubr.bf16.gmra.mrb[12].mxu0 %v1840_v32 }
 0x206   : > { %2294 = vmatpush1.bf16.msra.mxu0 %v2969_v19 }
 0x207   : > { %2295 = vmatprep.subr.bf16.mxu0 %v2974_v2 }
 0x20a   : > { %2296 = vmatpush1.bf16.msra.mxu0 %v2972_v21 }
 0x20b   : > { %2297 = vmatprep.subr.bf16.mxu0 %v2977_v25 }
 0x20e   : > { %2298 = vmatpush1.bf16.msra.mxu0 %v2975_v26 }
 0x20f   : > { %2299 = vmatprep.subr.bf16.mxu0 %v2980_v33 }
 0x212   : > { %2300 = vmatpush1.bf16.msra.mxu0 %v2978_v34 }
 0x213   : > { %2301 = vmatprep.subr.bf16.mxu0 %v2983_v35 }
 0x216   : > { %2302 = vmatpush1.bf16.msra.mxu0 %v2981_v36 }
 0x217   : > { %2303 = vmatprep.subr.bf16.mxu0 %v2986_v37 }
 0x219   : > { %v3828_v40 = vpop.f32.mrb[8].mxu1 }
 0x21a   : > { %v3830_v41 = vpop.f32.mrb[9].mxu1  ;;  %2304 = vmatpush1.bf16.msra.mxu0 %v2984_v38  ;;  %v1678_v3 = vmul.f32 %v3828_v40, %v3828_v40 }
 0x21b   : > { %v3833_v43 = vpop.f32.mrb[10].mxu1  ;;  %2305 = vmatprep.subr.bf16.mxu0 %v2989_v39  ;;  %v1679_v6 = vmul.f32 %v3830_v41, %v3830_v41 }
 0x21c   : > { %v3836_v45 = vpop.f32.mrb[11].mxu1  ;;  %v1682_v9 = vmul.f32 %v3833_v43, %v3833_v43  ;;  %v1694_v8 = vmul.f32 %v1678_v3, %v3828_v40 }
 0x21d   : > { %v1683_v10 = vmul.f32 %v3836_v45, %v3836_v45  ;;  %v1695_v0 = vmul.f32 %v1679_v6, %v3830_v41 }
 0x21e   : > { %2306 = vmatpush1.bf16.msra.mxu0 %v2987_v42  ;;  %v1698_v55 = vmul.f32 %v1682_v9, %v3833_v43  ;;  %v1710_v53 = vmul.f32 0.044715, %v1694_v8 }
 0x21f   : > { %2307 = vmatprep.subr.bf16.mxu0 %v2992_v44  ;;  %v1699_v15 = vmul.f32 %v1683_v10, %v3836_v45  ;;  %v1711_v57 = vmul.f32 0.044715, %v1695_v0 }
 0x220   : > { %v1714_v18 = vmul.f32 0.044715, %v1698_v55  ;;  %v1726_v23 = vadd.f32 %v1710_v53, %v3828_v40 }
 0x221   : > { %v3840_v48 = vpop.f32.mrb[12].mxu1  ;;  %v1715_v59 = vmul.f32 0.044715, %v1699_v15  ;;  %v1727_v60 = vadd.f32 %v1711_v57, %v3830_v41 }
 0x222   : > { %v3842_v49 = vpop.f32.mrb[13].mxu1  ;;  %2308 = vmatpush1.bf16.msra.mxu0 %v2990_v46  ;;  %v1686_v7 = vmul.f32 %v3840_v48, %v3840_v48  ;;  %v1730_v27 = vadd.f32 %v1714_v18, %v3833_v43  ;;  %v1742_v30 = vmul.f32 0.7978846, %v1726_v23 }
 0x223   : > { %v3845_v51 = vpop.f32.mrb[14].mxu1  ;;  %2309 = vmatprep.subr.bf16.mxu0 %v2995_v47  ;;  %v1687_v12 = vmul.f32 %v3842_v49, %v3842_v49  ;;  %v1731_v29 = vadd.f32 %v1715_v59, %v3836_v45  ;;  %v1743_v31 = vmul.f32 0.7978846, %v1727_v60 }
 0x224   : > { %v3848_v5 = vpop.f32.mrb[15].mxu1  ;;  %v1690_v56 = vmul.f32 %v3845_v51, %v3845_v51  ;;  %v1702_v13 = vmul.f32 %v1686_v7, %v3840_v48  ;;  %v1746_v1 = vmul.f32 0.7978846, %v1730_v27  ;;  %3035 = vtanh.f32 %v1742_v30 }
 0x225   : > { %v1691_v22 = vmul.f32 %v3848_v5, %v3848_v5  ;;  %v1703_v24 = vmul.f32 %v1687_v12, %v3842_v49  ;;  %v1747_v2 = vmul.f32 0.7978846, %v1731_v29  ;;  %3037 = vtanh.f32 %v1743_v31 }
 0x226   : > { %2310 = vmatpush1.bf16.msra.mxu0 %v2993_v50  ;;  %v1706_v28 = vmul.f32 %v1690_v56, %v3845_v51  ;;  %v1718_v16 = vmul.f32 0.044715, %v1702_v13  ;;  %3039 = vtanh.f32 %v1746_v1 }
 0x227   : > { %2311 = vmatprep.subr.bf16.mxu0 %v2998_v54  ;;  %v1707_v14 = vmul.f32 %v1691_v22, %v3848_v5  ;;  %v1719_v32 = vmul.f32 0.044715, %v1703_v24  ;;  %3041 = vtanh.f32 %v1747_v2 }
 0x228   : > { %v1722_v19 = vmul.f32 0.044715, %v1706_v28  ;;  %v1734_v25 = vadd.f32 %v1718_v16, %v3840_v48 }
 0x229   : > { %v1723_v21 = vmul.f32 0.044715, %v1707_v14  ;;  %v1735_v26 = vadd.f32 %v1719_v32, %v3842_v49 }
 0x22a   : > { %2312 = vmatpush1.bf16.msra.mxu0 %v2996_v20  ;;  %v1738_v33 = vadd.f32 %v1722_v19, %v3845_v51  ;;  %v1750_v35 = vmul.f32 0.7978846, %v1734_v25  ;;  %v1846_v25 = vld [vmem:[%s3508_s29 + $0x10] sm:$0xff] }
 0x22b   : > { %2313 = vmatprep.subr.bf16.mxu0 %v3001_v58  ;;  %v1739_v34 = vadd.f32 %v1723_v21, %v3848_v5  ;;  %v1751_v36 = vmul.f32 0.7978846, %v1735_v26  ;;  %v1845_v21 = vld [vmem:[%s3508_s29 + $0x8] sm:$0xff] }
 0x22c   : > { %v1754_v37 = vmul.f32 0.7978846, %v1738_v33  ;;  %3043 = vtanh.f32 %v1750_v35  ;;  %v1847_v33 = vld [vmem:[%s3508_s29 + $0x18] sm:$0xff] }
 0x22d   : > { %v1755_v38 = vmul.f32 0.7978846, %v1739_v34  ;;  %3045 = vtanh.f32 %v1751_v36 }
 0x22e   : > { %2314 = vmatpush1.bf16.msra.mxu0 %v2999_v61  ;;  %v3036_v39 = vpop.eup %3035  ;;  %3047 = vtanh.f32 %v1754_v37 }
 0x22f   : > { %2315 = vmatprep.subr.bf16.mxu0 %v3004_v62  ;;  %v3038_v42 = vpop.eup %3037  ;;  %3049 = vtanh.f32 %v1755_v38  ;;  %v1774_v47 = vadd.f32 1.0, %v3036_v39  ;;  %v1848_v39 = vld [vmem:[%s3508_s29 + $0x20] sm:$0xff] }
 0x230   : > { %v3040_v44 = vpop.eup %3039  ;;  %v1775_v50 = vadd.f32 1.0, %v3038_v42  ;;  %v1849_v42 = vld [vmem:[%s3508_s29 + $0x28] sm:$0xff] }
 0x231   : > { %v3042_v46 = vpop.eup %3041  ;;  %v1778_v54 = vadd.f32 1.0, %v3040_v44  ;;  %v1790_v58 = vmul.f32 0.5, %v1774_v47 }
 0x232   : > { %2316 = vmatpush1.bf16.msra.mxu0 %v3002_v63  ;;  %v1779_v20 = vadd.f32 1.0, %v3042_v46  ;;  %v1791_v62 = vmul.f32 0.5, %v1775_v50  ;;  %v1850_v46 = vld [vmem:[%s3508_s29 + $0x30] sm:$0xff] }
 0x233   : > { %2317 = vmatprep.subr.bf16.mxu0 %v3007_v4  ;;  %v1794_v3 = vmul.f32 0.5, %v1778_v54  ;;  %v1806_v10 = vmul.f32 %v1790_v58, %v3828_v40  ;;  %v1851_v54 = vld [vmem:[%s3508_s29 + $0x38] sm:$0xff] }
 0x234   : > { %v1795_v6 = vmul.f32 0.5, %v1779_v20 }
 0x236   : > { %2318 = vmatpush1.bf16.msra.mxu0 %v3005_v11  ;;  %v3044_v61 = vpop.eup %3043  ;;  %v1811_v12 = vmul.f32 %v1795_v6, %v3836_v45 }
 0x237   : > { %2319 = vmatprep.subr.bf16.mxu0 %v3010_v52  ;;  %v3046_v63 = vpop.eup %3045  ;;  %v1782_v11 = vadd.f32 1.0, %v3044_v61  ;;  %v1807_v52 = vmul.f32 %v1791_v62, %v3830_v41 }
 0x238   : > { %v3048_v4 = vpop.eup %3047  ;;  %v1783_v0 = vadd.f32 1.0, %v3046_v63 }
 0x239   : > { %v3050_v9 = vpop.eup %3049  ;;  %v1786_v53 = vadd.f32 1.0, %v3048_v4  ;;  %v1798_v22 = vmul.f32 0.5, %v1782_v11 }
 0x23a   : > { %2320 = vmatpush1.bf16.msra.mxu0 %v3008_v17  ;;  %v1810_v17 = vmul.f32 %v1794_v3, %v3833_v43  ;;  %v1787_v18 = vadd.f32 1.0, %v3050_v9  ;;  %v1799_v40 = vmul.f32 0.5, %v1783_v0 }
 0x23b   : > { %v1802_v60 = vmul.f32 0.5, %v1786_v53  ;;  %v1814_v27 = vmul.f32 %v1798_v22, %v3840_v48 }
 0x23c   : > { %v1803_v41 = vmul.f32 0.5, %v1787_v18  ;;  %v1815_v43 = vmul.f32 %v1799_v40, %v3842_v49  ;;  %v1844_v49 = vld [vmem:[%s3508_s29] sm:$0xff] }
 0x23d   : > { %v1818_v14 = vmul.f32 %v1802_v60, %v3845_v51 }
 0x23e   : > { %v1819_v31 = vmul.f32 %v1803_v41, %v3848_v5 }
 0x259   : > { %v1657_v8 = vpop.f32.mrb[16].mxu1 }
 0x25a   : > { %v1822_v55 = vmul.f32 %v1806_v10, %v1657_v8  ;;  %v1659_v15 = vpop.f32.mrb[17].mxu1 }
 0x25b   : > { %v1823_v7 = vmul.f32 %v1807_v52, %v1659_v15  ;;  %v1661_v57 = vpop.f32.mrb[18].mxu1 }
 0x25c   : > { %v1826_v56 = vmul.f32 %v1810_v17, %v1661_v57  ;;  %v1663_v59 = vpop.f32.mrb[19].mxu1 }
 0x25d   : > { %v1827_v23 = vmul.f32 %v1811_v12, %v1663_v59 }
 0x25e   : > { %v1838_v13 = vpack.c.bf16 %v1826_v56, %v1822_v55 }
 0x25f   : > { %v1839_v24 = vpack.c.bf16 %v1827_v23, %v1823_v7 }
 0x261   : > { %v1667_v28 = vpop.f32.mrb[20].mxu1  ;;  %2321 = vmatprep.mubr.bf16.mxu0 %v1839_v24 }
 0x262   : > { %v1830_v29 = vmul.f32 %v1814_v27, %v1667_v28  ;;  %v1669_v45 = vpop.f32.mrb[21].mxu1  ;;  %2322 = vmatmul.mubr.bf16.vlgmr.msra.gmra.mrb[8].mxu0 %v1838_v13 }
 0x263   : > { %v1831_v30 = vmul.f32 %v1815_v43, %v1669_v45  ;;  %v1671_v16 = vpop.f32.mrb[22].mxu1 }
 0x264   : > { %v1834_v32 = vmul.f32 %v1818_v14, %v1671_v16  ;;  %v1673_v48 = vpop.f32.mrb[23].mxu1 }
 0x265   : > { %v1835_v1 = vmul.f32 %v1819_v31, %v1673_v48 }
 0x266   : > { %v1842_v19 = vpack.c.bf16 %v1834_v32, %v1830_v29 }
 0x267   : > { %v1843_v2 = vpack.c.bf16 %v1835_v1, %v1831_v30 }
 0x269   : > { %2331 = vmatprep.mubr.bf16.mxu0 %v1843_v2 }
 0x26a   : > { %2332 = vmatmul.mubr.bf16.gmra.mrb[12].mxu0 %v1842_v19 }
 0x335   : > { %v2323_v51 = vpop.f32.mrb[8].mxu0 }
 0x336   : > { %v2342_v26 = vadd.f32 %v2323_v51, %v1844_v49  ;;  %v2325_v5 = vpop.f32.mrb[9].mxu0 }
 0x337   : > { %v2343_v34 = vadd.f32 %v2325_v5, %v1845_v21  ;;  %v2327_v35 = vpop.f32.mrb[10].mxu0 }
 0x338   : > { %2350 = vst [vmem:[%s3508_s29] sm:$0xff] %v2342_v26  ;;  %v2344_v36 = vadd.f32 %v2327_v35, %v1846_v25  ;;  %v2329_v37 = vpop.f32.mrb[11].mxu0 }
 0x339   : > { %2351 = vst [vmem:[%s3508_s29 + $0x8] sm:$0xff] %v2343_v34  ;;  %v2345_v38 = vadd.f32 %v2329_v37, %v1847_v33 }
 0x33a   : > { %2352 = vst [vmem:[%s3508_s29 + $0x10] sm:$0xff] %v2344_v36 }
 0x33b   : > { %2353 = vst [vmem:[%s3508_s29 + $0x18] sm:$0xff] %v2345_v38 }
 0x33d   : > { %v2333_v44 = vpop.f32.mrb[12].mxu0 }
 0x33e   : > { %v2346_v47 = vadd.f32 %v2333_v44, %v1848_v39  ;;  %v2335_v50 = vpop.f32.mrb[13].mxu0 }
 0x33f   : > { %v2347_v20 = vadd.f32 %v2335_v50, %v1849_v42  ;;  %v2337_v58 = vpop.f32.mrb[14].mxu0 }
 0x340   : > { %2354 = vst [vmem:[%s3508_s29 + $0x20] sm:$0xff] %v2346_v47  ;;  %v2348_v61 = vadd.f32 %v2337_v58, %v1850_v46  ;;  %v2339_v62 = vpop.f32.mrb[15].mxu0 }
 0x341   : > { %2355 = vst [vmem:[%s3508_s29 + $0x28] sm:$0xff] %v2347_v20  ;;  %v2349_v63 = vadd.f32 %v2339_v62, %v1851_v54 }
 0x342   : > { %2356 = vst [vmem:[%s3508_s29 + $0x30] sm:$0xff] %v2348_v61 }
 0x343   : > { %2357 = vst [vmem:[%s3508_s29 + $0x38] sm:$0xff] %v2349_v63 }
 0x344 PF: > { %s15_s22 = sadd.s32 1, %s3089_s22   ;;  %s3937_s18 = smov %s3077_s19 }
 0x345   : > { %p12_p12 = scmp.ge.s32.totalorder %s15_s22, 4   ;;  %s3938_s19 = smov %s3160_s27 }
 0x346   : > { %s3939_s20 = smov %s3085_s21  ;;  %s3940_s21 = smov %s3942_s23 }
 0x347   :  { %14 = sbr.rel (!%p12_p12) target bundleno = 3 (0x3), region = 136 }

// kernel: frozen_clip_t5_forward.35
= control target key start
LH: loop header
LB: loop body
LE: loop exit
PB: predicated region body
PF: predicated region fallthrough
CT: control target
= control target key end

     0   :  { %s288_s0 = inlined_call_operand.vmem [shape: f32[2,32,256], index: 0, kind: input, shape index: {}]   ;;  %s289_s1 = inlined_call_operand.vmem [shape: f32[1,256], index: 1, kind: input, shape index: {}]   ;;  %s290_s2 = inlined_call_operand.vmem [shape: f32[1,256], index: 2, kind: input, shape index: {}]   ;;  %s291_s3 = inlined_call_operand.hbm [shape: f32[32,256], index: 3, kind: output, shape index: {}]  }
   0x1   :  { %v19_v0 = vld [vmem:[%s288_s0 + $0x20] sm:$0xff]  ;;  %v20_v1 = vld [vmem:[%s288_s0 + $0x28] sm:$0xff]  ;;  %v21_v10 = vld [vmem:[%s288_s0 + $0x30] sm:$0xff] }
   0x2   :  { %v27_v2 = vld [vmem:[%s288_s0 + $0x60] sm:$0xff]  ;;  %v28_v3 = vld [vmem:[%s288_s0 + $0x68] sm:$0xff]  ;;  %v22_v14 = vld [vmem:[%s288_s0 + $0x38] sm:$0xff] }
   0x3   :  { %v214_v4 = vadd.f32 %v27_v2, %v19_v0  ;;  %v15_v5 = vld [vmem:[%s288_s0] sm:$0xff]  ;;  %v16_v6 = vld [vmem:[%s288_s0 + $0x8] sm:$0xff]  ;;  %v222_v7 = vadd.f32 %v28_v3, %v20_v1  ;;  %v29_v15 = vld [vmem:[%s288_s0 + $0x70] sm:$0xff] }
   0x4   :  { %v23_v8 = vld [vmem:[%s288_s0 + $0x40] sm:$0xff]  ;;  %v24_v9 = vld [vmem:[%s288_s0 + $0x48] sm:$0xff]  ;;  %v30_v16 = vld [vmem:[%s288_s0 + $0x78] sm:$0xff]  ;;  %v246_v18 = vadd.f32 %v29_v15, %v21_v10 }
   0x5   :  { %v43_v11 = vmul.f32 %v214_v4, %v214_v4  ;;  %v31_v12 = vadd.f32 %v23_v8, %v15_v5  ;;  %v32_v13 = vadd.f32 %v24_v9, %v16_v6  ;;  %v44_v17 = vmul.f32 %v222_v7, %v222_v7  ;;  %v17_v20 = vld [vmem:[%s288_s0 + $0x10] sm:$0xff]  ;;  %v18_v21 = vld [vmem:[%s288_s0 + $0x18] sm:$0xff] }
   0x6   :  { %v248_v19 = vadd.f32 %v30_v16, %v22_v14  ;;  %v25_v22 = vld [vmem:[%s288_s0 + $0x50] sm:$0xff]  ;;  %v26_v25 = vld [vmem:[%s288_s0 + $0x58] sm:$0xff]  ;;  %v45_v28 = vmul.f32 %v246_v18, %v246_v18 }
   0x7   :  { %v39_v23 = vmul.f32 %v31_v12, %v31_v12  ;;  %v40_v24 = vmul.f32 %v32_v13, %v32_v13  ;;  %v33_v26 = vadd.f32 %v25_v22, %v17_v20  ;;  %v53_v27 = vadd.f32 %v44_v17, %v43_v11 }
   0x8   :  { %v46_v29 = vmul.f32 %v248_v19, %v248_v19  ;;  %v34_v30 = vadd.f32 %v26_v25, %v18_v21 }
   0x9   :  { %8 = vsyncpa [#allocation3], 0  ;;  %v47_v31 = vadd.f32 %v40_v24, %v39_v23  ;;  %v41_v32 = vmul.f32 %v33_v26, %v33_v26  ;;  %54 = vadd.xlane.f32.xlu1 %v53_v27  ;;  %v82_v39 = vlaneseq  ;;  %v80_v52 = vld [vmem:[%s289_s1] sm:$0x3]  ;;  %s179_s1 = smov [#allocation2]  }
   0xa   :  { %v56_v33 = vadd.f32 %v46_v29, %v45_v28  ;;  %v42_v34 = vmul.f32 %v34_v30, %v34_v30  ;;  %v100_v53 = vld [vmem:[%s290_s2] sm:$0x3]  ;;  %s133_s2 = sshll.u32 %s179_s1, 4  ;;  %s134_s2 = int_to_ptr.vmem [resolvable:$true] %s133_s2 }
   0xb   :  { %48 = vadd.xlane.f32.xlu0 %v47_v31  ;;  %v83_v46 = vshrl.u32 %v82_v39, 7  ;;  %s155_s20 = scalar_lea.vmem %s134_s2, 1024  ;;  %p160_p1 = scmp.lt.s32.totalorder %s134_s2, %s134_s2 }
   0xc   :  { %v50_v35 = vadd.f32 %v42_v34, %v41_v32  ;;  %p156_p0 = scmp.ne.s32.totalorder %s134_s2, %s155_s20  ;;  %p161_p2 = scmp.lt.s32.totalorder %s155_s20, %s155_s20 }
   0xd   :  { %57 = vadd.xlane.f32.xlu1 %v56_v33  ;;  %v84_v50 = vsub.s32 0, %v83_v46  ;;  %v88_v51 = vsub.s32 1, %v83_v46 }
   0xe   :  { %p162_p3 = por %p161_p2, %p160_p1 }
   0xf   :  { %51 = vadd.xlane.f32.xlu0 %v50_v35  ;;  %v85_v54 = vrot.slane %v80_v52, %v84_v50  ;;  %v89_v55 = vrot.slane %v80_v52, %v88_v51  ;;  %v105_v58 = vrot.slane %v100_v53, %v84_v50  ;;  %v109_v59 = vrot.slane %v100_v53, %v88_v51 }
  0x10   :  { %p163_p4 = pnand %p162_p3, %p156_p0 }
  0x96   :  { %v55_v36 = vpop.xlane.xlu1 %54 }
  0x97   :  { %v62_v37 = vmul.f32 0.00390625, %v55_v36 }
  0x98   :  { %v49_v38 = vpop.xlane.xlu0 %48 }
  0x99   :  { %v60_v40 = vmul.f32 0.00390625, %v49_v38  ;;  %v66_v41 = vadd.f32 1e-06, %v62_v37 }
  0x9a   :  { %v58_v43 = vpop.xlane.xlu1 %57 }
  0x9b   :  { %v64_v42 = vadd.f32 1e-06, %v60_v40  ;;  %147 = vrsqrt.f32 %v66_v41  ;;  %v63_v44 = vmul.f32 0.00390625, %v58_v43 }
  0x9c   :  { %v52_v45 = vpop.xlane.xlu0 %51 }
  0x9d   :  { %149 = vrsqrt.f32 %v64_v42  ;;  %v61_v47 = vmul.f32 0.00390625, %v52_v45  ;;  %v67_v48 = vadd.f32 1e-06, %v63_v44 }
  0x9f   :  { %v65_v49 = vadd.f32 1e-06, %v61_v47  ;;  %151 = vrsqrt.f32 %v67_v48 }
  0xa1   :  { %153 = vrsqrt.f32 %v65_v49 }
  0xa5   :  { %v148_v56 = vpop.eup %147 }
  0xa6   :  { %v76_v60 = vmul.f32 %v148_v56, %v214_v4  ;;  %v77_v61 = vmul.f32 %v148_v56, %v222_v7 }
  0xa7   :  { %v150_v57 = vpop.eup %149 }
  0xa8   :  { %v72_v62 = vmul.f32 %v150_v57, %v31_v12  ;;  %v73_v63 = vmul.f32 %v150_v57, %v32_v13  ;;  %v96_v0 = vmul.f32 %v85_v54, %v76_v60  ;;  %v97_v1 = vmul.f32 %v89_v55, %v77_v61 }
  0xa9   :  { %v152_v2 = vpop.eup %151 }
  0xaa   :  { %v92_v3 = vmul.f32 %v85_v54, %v72_v62  ;;  %v93_v5 = vmul.f32 %v89_v55, %v73_v63  ;;  %v116_v8 = vadd.f32 %v105_v58, %v96_v0  ;;  %v117_v9 = vadd.f32 %v109_v59, %v97_v1 }
  0xab   :  { %v154_v6 = vpop.eup %153  ;;  %v78_v10 = vmul.f32 %v152_v2, %v246_v18  ;;  %v79_v11 = vmul.f32 %v152_v2, %v248_v19 }
  0xac   :  { %v112_v14 = vadd.f32 %v105_v58, %v92_v3  ;;  %v113_v15 = vadd.f32 %v109_v59, %v93_v5  ;;  %v74_v16 = vmul.f32 %v154_v6, %v33_v26  ;;  %v75_v4 = vmul.f32 %v154_v6, %v34_v30  ;;  %124 = vst [vmem:[#allocation2 + $0x20] sm:$0xff] %v116_v8 }
  0xad   :  { %125 = vst [vmem:[#allocation2 + $0x28] sm:$0xff] %v117_v9  ;;  %v98_v7 = vmul.f32 %v85_v54, %v78_v10  ;;  %v99_v12 = vmul.f32 %v89_v55, %v79_v11 }
  0xae   :  { %120 = vst [vmem:[#allocation2] sm:$0xff] %v112_v14  ;;  %121 = vst [vmem:[#allocation2 + $0x8] sm:$0xff] %v113_v15  ;;  %v94_v13 = vmul.f32 %v85_v54, %v74_v16  ;;  %v95_v17 = vmul.f32 %v89_v55, %v75_v4 }
  0xaf   :  { %v118_v20 = vadd.f32 %v105_v58, %v98_v7  ;;  %v119_v21 = vadd.f32 %v109_v59, %v99_v12 }
  0xb0   :  { %v114_v18 = vadd.f32 %v105_v58, %v94_v13  ;;  %v115_v22 = vadd.f32 %v109_v59, %v95_v17 }
  0xb1   :  { %126 = vst [vmem:[#allocation2 + $0x30] sm:$0xff] %v118_v20  ;;  %127 = vst [vmem:[#allocation2 + $0x38] sm:$0xff] %v119_v21 }
  0xb2   :  { %122 = vst [vmem:[#allocation2 + $0x10] sm:$0xff] %v114_v18  ;;  %123 = vst [vmem:[#allocation2 + $0x18] sm:$0xff] %v115_v22 }
  0xb3   :  { %166 = shalt.err (!%p163_p4)
}
  0xb4   :  { %s167_s23 = scalar_lea.hbm %s291_s3, 1024 }
  0xb5   :  { %p168_p5 = scmp.ne.s32.totalorder %s291_s3, %s167_s23  ;;  %p171_p6 = scmp.lt.u32.totalorder %s167_s23, %s291_s3 }
  0xb7   :  { %p173_p7 = pnand %p171_p6, %p168_p5 }
  0xb9   :  { %176 = shalt.err (!%p173_p7)
}
  0xba   :  { %s180_s28 = smov 256   ;;  %s181_s29 = smov 16  }
  0xbb   :  { %139 = dma.vmem_to_hbm [thread:$0]  %s134_s2, 1024, %s291_s3, [#allocation3], %s180_s28, %s180_s28, %s181_s29  }
  0xbc   :  { %177 = dma.done.wait [#allocation3], 1024  }
  0xbd   :  { %178 = vsyncadd [#allocation3], 4294966272 }
  0xbe   :  { %143 = vsyncpa [#allocation3], 1 }

// kernel: frozen_clip_t5_forward.19
= control target key start
LH: loop header
LB: loop body
LE: loop exit
PB: predicated region body
PF: predicated region fallthrough
CT: control target
= control target key end

     0   :  { %s1344_s12 = smov 0   ;;  %s1346_s13 = smov 0   ;;  %s1539_s0 = inlined_call_operand.vmem [shape: bf16[2,16,768], index: 0, kind: input, shape index: {}, may-alias: {0,1,2}]   ;;  %s1540_s1 = inlined_call_operand.vmem [shape: bf16[2,16,768], index: 1, kind: input, shape index: {}, may-alias: {0,1,2}]   ;;  %s1541_s2 = inlined_call_operand.vmem [shape: bf16[2,16,768], index: 2, kind: input, shape index: {}, may-alias: {0,1,2}]   ;;  %s1542_s3 = inlined_call_operand.vmem [shape: bf16[2,16,256], index: 3, kind: output, shape index: {}]  }
   0x1   :  { %s1348_s14 = smov 0   ;;  %s1350_s15 = smov 0  }
   0x2   :  { %s1352_s16 = smov 0  }
   0x3 LB: > { %s25_s17 = sadd.s32 1, %s1315_s15  ;;  %p41_p1 = scmp.ne.s32.totalorder %s1307_s13, %s1303_s12  ;;  %s1319_s16 = sphi %s1352_s16, %s13_s16   ;;  %s1315_s15 = sphi %s1350_s15, %s1547_s15   ;;  %s1311_s14 = sphi %s1348_s14, %s1546_s14   ;;  %s1307_s13 = sphi %s1346_s13, %s1545_s13   ;;  %s1303_s12 = sphi %s1344_s12, %s1544_s12  }
   0x4   : > { %p27_p0 = scmp.ge.s32.totalorder %s25_s17, 2  ;;  %p42_p2 = scmp.eq.s32.totalorder %s1319_s16, 0 }
   0x5   : > { %s34_s20 = sadd.s32 1, %s1307_s13  ;;  %p1087_p5 = scmp.ge.s32.totalorder %s1319_s16, 2 }
   0x6   : > { %s1549_s17 = smov (%p27_p0, %s25_s17), 0  ;;  %p1375_p3 = por %p42_p2, %p41_p1 }
   0x7   : > { %s29_s19 = ssub.s32 %s1315_s15, %s1549_s17  ;;  %155 = sbr.rel (%p1087_p5) target bundleno = 35 (0x23), region = 16 }
   0x8   : > { %p32_p4 = scmp.eq.s32.totalorder %s29_s19, 0 }
   0xa   : > { %s1383_s21 = scalar_select %p32_p4, %s1307_s13, %s34_s20  }
   0xe   : > { %158 = sbr.rel (!%p1375_p3) target bundleno = 21 (0x15), region = 20  ;;  %s160_s22 = sand.u32 (%p1375_p3), 1, %s1307_s13  }
   0xf   : > { %s1189_s23 = smul.u32 (%p1375_p3), 48, %s1315_s15  ;;  %s1088_s24 = sshll.u32 (%p1375_p3), %s160_s22, 4 }
  0x10   : > { %s162_s28 = scalar_lea.vmem (%p1375_p3), [#allocation2], %s1088_s24 }
  0x11   : > { %s167_s27 = scalar_lea.vmem (%p1375_p3), %s1539_s0, %s1189_s23 }
  0x12   : > { %v197_v0 = vld [vmem:[%s167_s27] sm:$0xff] (%p1375_p3)  ;;  %v199_v1 = vld [vmem:[%s167_s27 + $0x18] sm:$0xff] (%p1375_p3) }
  0x13   : > { %198 = vst [vmem:[%s162_s28] sm:$0xff] (%p1375_p3), %v197_v0  ;;  %200 = vst [vmem:[%s162_s28 + $0x8] sm:$0xff] (%p1375_p3), %v199_v1 }
  0x15 PF: > { %206 = sbr.rel (!%p1375_p3) target bundleno = 28 (0x1c), region = 58  ;;  %s208_s29 = sand.u32 (%p1375_p3), 1, %s1307_s13  }
  0x16   : > { %s1091_s30 = smul.u32 (%p1375_p3), 48, %s1315_s15  ;;  %s1090_s4 = sshll.u32 (%p1375_p3), %s208_s29, 4 }
  0x17   : > { %s210_s8 = scalar_lea.vmem (%p1375_p3), [#allocation3], %s1090_s4 }
  0x18   : > { %s993_s7 = scalar_lea.vmem (%p1375_p3), %s1540_s1, %s1091_s30 }
  0x19   : > { %v1092_v2 = vld [vmem:[%s993_s7 + $0x8] sm:$0xff] (%p1375_p3)  ;;  %v1093_v3 = vld [vmem:[%s993_s7 + $0x20] sm:$0xff] (%p1375_p3) }
  0x1a   : > { %247 = vst [vmem:[%s210_s8] sm:$0xff] (%p1375_p3), %v1092_v2  ;;  %249 = vst [vmem:[%s210_s8 + $0x8] sm:$0xff] (%p1375_p3), %v1093_v3 }
  0x1c PF: > { %255 = sbr.rel (!%p1375_p3) target bundleno = 35 (0x23), region = 96  ;;  %s257_s9 = sand.u32 (%p1375_p3), 1, %s1307_s13  }
  0x1d   : > { %s1095_s10 = smul.u32 (%p1375_p3), 48, %s1315_s15  ;;  %s1094_s11 = sshll.u32 (%p1375_p3), %s257_s9, 4 }
  0x1e   : > { %s259_s23 = scalar_lea.vmem (%p1375_p3), [#allocation4], %s1094_s11 }
  0x1f   : > { %s1001_s22 = scalar_lea.vmem (%p1375_p3), %s1541_s2, %s1095_s10 }
  0x20   : > { %v1096_v4 = vld [vmem:[%s1001_s22 + $0x10] sm:$0xff] (%p1375_p3)  ;;  %v1097_v5 = vld [vmem:[%s1001_s22 + $0x28] sm:$0xff] (%p1375_p3) }
  0x21   : > { %296 = vst [vmem:[%s259_s23] sm:$0xff] (%p1375_p3), %v1096_v4  ;;  %298 = vst [vmem:[%s259_s23 + $0x8] sm:$0xff] (%p1375_p3), %v1097_v5 }
  0x23 PF: > { %p1098_p6 = scmp.ge.s32.totalorder %s1319_s16, 1  ;;  %p303_p7 = scmp.lt.s32.totalorder %s1319_s16, 3 }
  0x25   : > { %p304_p8 = pnand %p1098_p6, %p303_p7 }
  0x26   : > { %s310_s18 = sand.u32 (!%p304_p8), 1, %s1303_s12   ;;  %v1321_v6 = vmov (!%p304_p8), 0.0   ;;  %vm1322_vm0 = vmmov (!%p304_p8), 0   ;;  %vm400_vm1 = vcmask (!%p304_p8), 523264   ;;  %s1323_s26 = smov (!%p304_p8), 64   ;;  %v375_v11 = vlaneseq (!%p304_p8) }
  0x27   : > { %307 = sbr.rel (%p304_p8) target bundleno = 1173 (0x495), region = 134  ;;  %1141 = vmatprep.subr.bf16.mxu0 (!%p304_p8), %v1321_v6  ;;  %s1411_s24 = sshll.u32 (!%p304_p8), %s310_s18, 4  ;;  %1143 = vmatprep.mubr.msk.bf16.mxu0 (!%p304_p8), %vm1322_vm0, %v1321_v6  ;;  %vm452_vm4 = vcmask (!%p304_p8), 130048  }
  0x28   : > { %1147 = vmatprep.subr.bf16.mxu1 (!%p304_p8), %v1321_v6  ;;  %1149 = vmatprep.mubr.msk.bf16.mxu1 (!%p304_p8), %vm1322_vm0, %v1321_v6  ;;  %s319_s25 = scalar_lea.vmem (!%p304_p8), [#allocation3], %s1411_s24  ;;  %s312_s12 = scalar_lea.vmem (!%p304_p8), [#allocation2], %s1411_s24  ;;  %v376_v12 = vshrl.u32 (!%p304_p8), %v375_v11, 7  ;;  %v379_v13 = vand.u32 (!%p304_p8), 127, %v375_v11 }
  0x29   : > { %v1243_v7 = vld [vmem:[%s319_s25] ss:$8 sps:$4 sm:$0xff] (!%p304_p8)   ;;  %v1246_v10 = vld [vmem:[%s312_s12 + $0x4] ss:$8 sps:$4 sm:$0xff] (!%p304_p8)   ;;  %s326_s27 = scalar_lea.vmem (!%p304_p8), [#allocation4], %s1411_s24  ;;  %p365_p9 = scmp.lt.s32.totalorder (!%p304_p8), %s1311_s14, 1 }
  0x2a   : > { %v405_v8 = vsel (!%p304_p8), %vm400_vm1, %v1243_v7, 0  ;;  %v1244_v9 = vld [vmem:[%s312_s12] ss:$8 sps:$4 sm:$0xff] (!%p304_p8)   ;;  %528 = vrot.lane.b32.xlu1 (!%p304_p8), %v1243_v7, %s1323_s26  ;;  %v377_v14 = vadd.s32 (!%p304_p8), 8, %v376_v12  ;;  %vm380_vm2 = vcmp.gt.s32.totalorder (!%p304_p8), %v379_v13, %v376_v12  ;;  %v1245_v27 = vld [vmem:[%s319_s25 + $0x4] ss:$8 sps:$4 sm:$0xff] (!%p304_p8)  }
  0x2b   : > { %1142 = vmatpush3.bf16.xpose.msra.mxu0 (!%p304_p8), %v405_v8  ;;  %v1431_v16 = vsel (!%p304_p8), %vm380_vm2, -1e+09, %v1321_v6  ;;  %v1445_v28 = vld [vmem:[%s326_s27] ss:$8 sps:$4 sm:$0xff] (!%p304_p8)   ;;  %v671_v41 = vsel (!%p304_p8), %vm400_vm1, %v1245_v27, 0 }
  0x2c   : > { %1159 = vmatprep.subr.bf16.mxu0 (!%p304_p8), %v1321_v6  ;;  %vm381_vm3 = vcmp.gt.s32.totalorder (!%p304_p8), %v379_v13, %v377_v14  ;;  %1148 = vmatpush3.bf16.msra.mxu1 (!%p304_p8), %v1445_v28 }
  0x2d   : > { %v1434_v20 = vsel (!%p304_p8), %vm381_vm3, -1e+09, %v1321_v6  ;;  %1153 = vmatprep.subr.bf16.mxu1 (!%p304_p8), %v1321_v6 }
  0x2e   : > { %526 = vrot.lane.b32.xlu1 %v1244_v9, %s1323_s26  ;;  %s1551_s14 = smov (!%p365_p9, %s1311_s14), 1 }
  0x2f   : > { %s1122_s28 = sshll.u32 %s1551_s14, 4 }
  0x30   : > { %s372_s4 = scalar_lea.vmem %s1542_s3, %s1122_s28 }
  0x32   : > { %1144 = vmatmul.mubr.msk.bf16.vlgmr.msra.gmra.mrb[0].mxu0 %vm400_vm1, %v1244_v9  ;;  %791 = vrot.lane.b32.xlu1 %v1246_v10, %s1323_s26 }
  0x33   : > { %1161 = vmatprep.mubr.msk.bf16.mxu0 %vm1322_vm0, %v1321_v6 }
  0x9c   : > { %v529_v35 = vpop.permute.xlu1 %528 }
  0x9d   : > { %v534_v38 = vsel %vm400_vm1, %v529_v35, 0 }
  0xa0   : > { %v527_v40 = vpop.permute.xlu1 %526 }
  0xa4   : > { %v792_v44 = vpop.permute.xlu1 %791 }
 0x105   : > { %v441_v15 = vpop.f32.mrb[0].mxu0 }
 0x106   : > { %v448_v17 = vmul.f32 0.125, %v441_v15  ;;  %v1145_v18 = vpop.f32.mrb[1].mxu0 }
 0x107   : > { %v444_v19 = vpop.f32.mrb[2].mxu0 }
 0x108   : > { %v449_v21 = vmul.f32 0.125, %v444_v19  ;;  %v1146_v22 = vpop.f32.mrb[3].mxu0  ;;  %v450_v23 = vadd.f32 %v448_v17, %v1431_v16  ;;  %v1248_v17 = vld [vmem:[%s326_s27 + $0x4] ss:$8 sps:$4 sm:$0xff]  }
 0x10a   : > { %v453_v24 = vsel %vm452_vm4, %v450_v23, -inf  ;;  %v451_v25 = vadd.f32 %v449_v21, %v1434_v20 }
 0x10b   : > { %454 = vmax.xlane.f32.xlu0 %v453_v24 }
 0x10c   : > { %v456_v26 = vsel %vm452_vm4, %v451_v25, -inf }
 0x10f   : > { %457 = vmax.xlane.f32.xlu0 %v456_v26 }
 0x125   : > { %793 = vrot.lane.b32.xlu0 %v1245_v27, %s1323_s26 }
 0x198   : > { %v455_v29 = vpop.xlane.xlu0 %454 }
 0x199   : > { %v459_v30 = vsub.f32 %v450_v23, %v455_v29 }
 0x19b   : > { %v461_v31 = vmul.f32 1.442695, %v459_v30 }
 0x19c   : > { %v458_v32 = vpop.xlane.xlu0 %457 }
 0x19d   : > { %v460_v33 = vsub.f32 %v451_v25, %v458_v32  ;;  %1249 = vpow2.f32 %v461_v31 }
 0x19f   : > { %v463_v34 = vmul.f32 1.442695, %v460_v33 }
 0x1a0   : > { %v794_v42 = vpop.permute.xlu0 %793 }
 0x1a1   : > { %1251 = vpow2.f32 %v463_v34  ;;  %v799_v43 = vsel %vm400_vm1, %v794_v42, 0 }
 0x1a7   : > { %v1450_v36 = vpop.eup %1249 }
 0x1ab   : > { %v1452_v37 = vpop.eup %1251 }
 0x1ac   : > { %v471_v39 = vpack.c.bf16 %v1452_v37, %v1450_v36 }
 0x1ae   : > { %1150 = vmatmul.mubr.msk.bf16.vlgmr.msra.gmra.mrb[0].mxu1 %vm452_vm4, %v471_v39 }
 0x1af   : > { %1154 = vmatpush3.bf16.xpose.msra.mxu1 %v534_v38  ;;  %1155 = vmatprep.mubr.msk.bf16.mxu1 %vm1322_vm0, %v1321_v6 }
 0x1b0   : > { %1165 = vmatprep.subr.bf16.mxu1 %v1321_v6 }
 0x1b6   : > { %1156 = vmatmul.mubr.msk.bf16.vlgmr.msra.gmra.mrb[4].mxu1 %vm400_vm1, %v527_v40 }
 0x1b7   : > { %1166 = vmatpush3.bf16.xpose.msra.mxu1 %v671_v41  ;;  %1167 = vmatprep.mubr.msk.bf16.mxu1 %vm1322_vm0, %v1321_v6 }
 0x1b8   : > { %1177 = vmatprep.subr.bf16.mxu1 %v1321_v6 }
 0x1be   : > { %1168 = vmatmul.mubr.msk.bf16.vlgmr.msra.gmra.mrb[8].mxu1 %vm400_vm1, %v1246_v10 }
 0x1bf   : > { %1178 = vmatpush3.bf16.xpose.msra.mxu1 %v799_v43  ;;  %1179 = vmatprep.mubr.msk.bf16.mxu1 %vm1322_vm0, %v1321_v6 }
 0x1c6   : > { %1180 = vmatmul.mubr.msk.bf16.vlgmr.msra.gmra.mrb[12].mxu1 %vm400_vm1, %v792_v44 }
 0x281   : > { %v1471_v45 = vpop.f32.mrb[0].mxu1 }
 0x282   : > { %v1151_v46 = vpop.f32.mrb[1].mxu1 }
 0x283   : > { %v1473_v47 = vpop.f32.mrb[2].mxu1 }
 0x284   : > { %v1152_v48 = vpop.f32.mrb[3].mxu1 }
 0x289   : > { %v570_v49 = vpop.f32.mrb[4].mxu1 }
 0x28a   : > { %v577_v50 = vmul.f32 0.125, %v570_v49  ;;  %v1157_v51 = vpop.f32.mrb[5].mxu1 }
 0x28b   : > { %v573_v52 = vpop.f32.mrb[6].mxu1 }
 0x28c   : > { %v578_v53 = vmul.f32 0.125, %v573_v52  ;;  %v1158_v54 = vpop.f32.mrb[7].mxu1  ;;  %v579_v55 = vadd.f32 %v577_v50, %v1431_v16 }
 0x28e   : > { %v581_v56 = vsel %vm452_vm4, %v579_v55, -inf  ;;  %v580_v57 = vadd.f32 %v578_v53, %v1434_v20  ;;  %v465_v53 = vsel %vm452_vm4, %v1450_v36, 0.0 }
 0x28f   : > { %582 = vmax.xlane.f32.xlu1 %v581_v56 }
 0x290   : > { %v584_v58 = vsel %vm452_vm4, %v580_v57, -inf }
 0x291   : > { %585 = vmax.xlane.f32.xlu0 %v584_v58  ;;  %v707_v59 = vpop.f32.mrb[8].mxu1 }
 0x292   : > { %v714_v60 = vmul.f32 0.125, %v707_v59  ;;  %v1169_v61 = vpop.f32.mrb[9].mxu1 }
 0x293   : > { %v710_v62 = vpop.f32.mrb[10].mxu1 }
 0x294   : > { %v715_v63 = vmul.f32 0.125, %v710_v62  ;;  %v1170_v0 = vpop.f32.mrb[11].mxu1  ;;  %v716_v1 = vadd.f32 %v714_v60, %v1431_v16 }
 0x296   : > { %v718_v2 = vsel %vm452_vm4, %v716_v1, -inf  ;;  %v717_v3 = vadd.f32 %v715_v63, %v1434_v20 }
 0x297   : > { %719 = vmax.xlane.f32.xlu1 %v718_v2 }
 0x298   : > { %v721_v8 = vsel %vm452_vm4, %v717_v3, -inf }
 0x299   : > { %v835_v4 = vpop.f32.mrb[12].mxu1 }
 0x29a   : > { %v842_v5 = vmul.f32 0.125, %v835_v4  ;;  %v1181_v7 = vpop.f32.mrb[13].mxu1 }
 0x29b   : > { %722 = vmax.xlane.f32.xlu1 %v721_v8  ;;  %v838_v9 = vpop.f32.mrb[14].mxu1 }
 0x29c   : > { %v843_v10 = vmul.f32 0.125, %v838_v9  ;;  %v1182_v11 = vpop.f32.mrb[15].mxu1  ;;  %v844_v12 = vadd.f32 %v842_v5, %v1431_v16 }
 0x29e   : > { %v846_v13 = vsel %vm452_vm4, %v844_v12, -inf  ;;  %v845_v14 = vadd.f32 %v843_v10, %v1434_v20 }
 0x29f   : > { %847 = vmax.xlane.f32.xlu1 %v846_v13 }
 0x2a0   : > { %v849_v15 = vsel %vm452_vm4, %v845_v14, -inf }
 0x2a3   : > { %850 = vmax.xlane.f32.xlu1 %v849_v15 }
 0x2a7   : > { %600 = vrot.lane.b32.xlu0 %v1445_v28, %s1323_s26 }
 0x2b4   : > { %865 = vrot.lane.b32.xlu1 %v1248_v17, %s1323_s26 }
 0x31c   : > { %v583_v18 = vpop.xlane.xlu1 %582 }
 0x31d   : > { %v587_v19 = vsub.f32 %v579_v55, %v583_v18  ;;  %v468_v55 = vsel %vm452_vm4, %v1452_v37, 0.0 }
 0x31e   : > { %v586_v21 = vpop.xlane.xlu0 %585 }
 0x31f   : > { %v589_v22 = vmul.f32 1.442695, %v587_v19  ;;  %v588_v16 = vsub.f32 %v580_v57, %v586_v21 }
 0x321   : > { %1253 = vpow2.f32 %v589_v22  ;;  %v591_v23 = vmul.f32 1.442695, %v588_v16 }
 0x322   : > { %v601_v24 = vpop.permute.xlu0 %600 }
 0x323   : > { %1255 = vpow2.f32 %v591_v23  ;;  %1160 = vmatpush3.bf16.msra.mxu0 %v601_v24 }
 0x324   : > { %v720_v20 = vpop.xlane.xlu1 %719  ;;  %1171 = vmatprep.subr.bf16.mxu0 %v1321_v6 }
 0x325   : > { %v724_v25 = vsub.f32 %v716_v1, %v720_v20 }
 0x327   : > { %v726_v26 = vmul.f32 1.442695, %v724_v25 }
 0x328   : > { %v723_v27 = vpop.xlane.xlu1 %722 }
 0x329   : > { %v725_v28 = vsub.f32 %v717_v3, %v723_v27  ;;  %1257 = vpow2.f32 %v726_v26 }
 0x32b   : > { %v1254_v29 = vpop.eup %1253  ;;  %v728_v30 = vmul.f32 1.442695, %v725_v28 }
 0x32c   : > { %v848_v31 = vpop.xlane.xlu1 %847  ;;  %v593_v32 = vsel %vm452_vm4, %v1254_v29, 0.0 }
 0x32d   : > { %v1256_v33 = vpop.eup %1255  ;;  %1259 = vpow2.f32 %v728_v30  ;;  %v852_v34 = vsub.f32 %v844_v12, %v848_v31  ;;  %594 = vadd.xlane.f32.xlu1 %v593_v32 }
 0x32e   : > { %v596_v35 = vsel %vm452_vm4, %v1256_v33, 0.0  ;;  %v599_v38 = vpack.c.bf16 %v1256_v33, %v1254_v29 }
 0x32f   : > { %v854_v39 = vmul.f32 1.442695, %v852_v34  ;;  %597 = vadd.xlane.f32.xlu0 %v596_v35 }
 0x330   : > { %v851_v40 = vpop.xlane.xlu1 %850  ;;  %1162 = vmatmul.mubr.msk.bf16.vlgmr.msra.gmra.mrb[4].mxu0 %vm452_vm4, %v599_v38 }
 0x331   : > { %1261 = vpow2.f32 %v854_v39  ;;  %v853_v41 = vsub.f32 %v845_v14, %v851_v40  ;;  %1172 = vmatpush3.bf16.msra.mxu0 %v1248_v17  ;;  %1173 = vmatprep.mubr.msk.bf16.mxu0 %vm1322_vm0, %v1321_v6 }
 0x332   : > { %1183 = vmatprep.subr.bf16.mxu0 %v1321_v6 }
 0x333   : > { %v856_v42 = vmul.f32 1.442695, %v853_v41  ;;  %v1258_v43 = vpop.eup %1257 }
 0x334   : > { %v866_v46 = vpop.permute.xlu1 %865  ;;  %v730_v56 = vsel %vm452_vm4, %v1258_v43, 0.0 }
 0x335   : > { %1263 = vpow2.f32 %v856_v42 }
 0x337   : > { %v1260_v44 = vpop.eup %1259 }
 0x338   : > { %v736_v48 = vpack.c.bf16 %v1260_v44, %v1258_v43 }
 0x33a   : > { %1174 = vmatmul.mubr.msk.bf16.vlgmr.msra.gmra.mrb[8].mxu0 %vm452_vm4, %v736_v48 }
 0x33b   : > { %v1262_v49 = vpop.eup %1261  ;;  %1184 = vmatpush3.bf16.msra.mxu0 %v866_v46  ;;  %1185 = vmatprep.mubr.msk.bf16.mxu0 %vm1322_vm0, %v1321_v6  ;;  %v733_v6 = vsel %vm452_vm4, %v1260_v44, 0.0 }
 0x33c   : > { %v858_v50 = vsel %vm452_vm4, %v1262_v49, 0.0 }
 0x33d   : > { %859 = vadd.xlane.f32.xlu0 %v858_v50 }
 0x33f   : > { %v1264_v51 = vpop.eup %1263 }
 0x340   : > { %v861_v52 = vsel %vm452_vm4, %v1264_v51, 0.0  ;;  %v864_v54 = vpack.c.bf16 %v1264_v51, %v1262_v49 }
 0x341   : > { %862 = vadd.xlane.f32.xlu1 %v861_v52  ;;  %466 = vadd.xlane.f32.xlu0 %v465_v53 }
 0x342   : > { %1186 = vmatmul.mubr.msk.bf16.vlgmr.msra.gmra.mrb[12].mxu0 %vm452_vm4, %v864_v54 }
 0x345   : > { %469 = vadd.xlane.f32.xlu1 %v468_v55  ;;  %731 = vadd.xlane.f32.xlu0 %v730_v56 }
 0x349   : > { %734 = vadd.xlane.f32.xlu1 %v733_v6 }
 0x3ba   : > { %v595_v57 = vpop.xlane.xlu1 %594 }
 0x3bb   : > { %1265 = vrcp.f32 %v595_v57 }
 0x3bc   : > { %v598_v58 = vpop.xlane.xlu0 %597 }
 0x3bd   : > { %1267 = vrcp.f32 %v598_v58 }
 0x3c5   : > { %v1266_v59 = vpop.eup %1265 }
 0x3c7   : > { %v1268_v61 = vpop.eup %1267 }
 0x3ca   : > { %v860_v2 = vpop.xlane.xlu0 %859 }
 0x3cb   : > { %1269 = vrcp.f32 %v860_v2 }
 0x3ce   : > { %v863_v3 = vpop.xlane.xlu1 %862  ;;  %v467_v19 = vpop.xlane.xlu0 %466 }
 0x3cf   : > { %1271 = vrcp.f32 %v863_v3 }
 0x3d0   : > { %1273 = vrcp.f32 %v467_v19 }
 0x3d2   : > { %v470_v21 = vpop.xlane.xlu1 %469  ;;  %v732_v22 = vpop.xlane.xlu0 %731 }
 0x3d3   : > { %1275 = vrcp.f32 %v470_v21 }
 0x3d4   : > { %1277 = vrcp.f32 %v732_v22 }
 0x3d5   : > { %v1270_v10 = vpop.eup %1269 }
 0x3d6   : > { %v735_v16 = vpop.xlane.xlu1 %734 }
 0x3d7   : > { %1279 = vrcp.f32 %v735_v16 }
 0x3d9   : > { %v1272_v12 = vpop.eup %1271 }
 0x3da   : > { %v1274_v23 = vpop.eup %1273 }
 0x3db   : > { %v524_v29 = vmul.f32 %v1274_v23, %v1471_v45 }
 0x3dd   : > { %v1276_v20 = vpop.eup %1275 }
 0x3de   : > { %v1278_v25 = vpop.eup %1277  ;;  %v525_v30 = vmul.f32 %v1276_v20, %v1473_v47 }
 0x3e1   : > { %v1280_v28 = vpop.eup %1279 }
 0x403   : > { %v640_v36 = vpop.f32.mrb[4].mxu0 }
 0x404   : > { %v1163_v60 = vpop.f32.mrb[5].mxu0  ;;  %v649_v63 = vmul.f32 %v1266_v59, %v640_v36 }
 0x405   : > { %v643_v62 = vpop.f32.mrb[6].mxu0 }
 0x406   : > { %v650_v0 = vmul.f32 %v1268_v61, %v643_v62  ;;  %v1164_v1 = vpop.f32.mrb[7].mxu0 }
 0x408   : > { %v1233_v37 = vpack.i.bf16 %v650_v0, %v649_v63 }
 0x40a   : > { %1234 = vrot.lane.b32.xlu0 %v1233_v37, %s1323_s26 }
 0x40d   : > { %v780_v4 = vpop.f32.mrb[8].mxu0 }
 0x40e   : > { %v1175_v5 = vpop.f32.mrb[9].mxu0  ;;  %v789_v32 = vmul.f32 %v1278_v25, %v780_v4 }
 0x40f   : > { %v783_v7 = vpop.f32.mrb[10].mxu0 }
 0x410   : > { %v1176_v8 = vpop.f32.mrb[11].mxu0  ;;  %v790_v33 = vmul.f32 %v1280_v28, %v783_v7 }
 0x415   : > { %v905_v9 = vpop.f32.mrb[12].mxu0 }
 0x416   : > { %v1187_v11 = vpop.f32.mrb[13].mxu0  ;;  %v914_v14 = vmul.f32 %v1270_v10, %v905_v9 }
 0x417   : > { %v908_v13 = vpop.f32.mrb[14].mxu0 }
 0x418   : > { %v915_v15 = vmul.f32 %v1272_v12, %v908_v13  ;;  %v1188_v17 = vpop.f32.mrb[15].mxu0 }
 0x41a   : > { %v1238_v18 = vpack.i.bf16 %v915_v15, %v914_v14 }
 0x41c   : > { %1239 = vrot.lane.b32.xlu1 %v1238_v18, %s1323_s26 }
 0x47c   : > { %v1235_v24 = vpop.permute.xlu0 %1234 }
 0x47d   : > { %v1237_v26 = vunpack.i.h.bf16 %v1235_v24  ;;  %v1236_v27 = vunpack.i.l.bf16 %v1235_v24 }
 0x47f   : > { %v933_v38 = vsel %vm400_vm1, %v525_v30, %v1237_v26  ;;  %v932_v39 = vsel %vm400_vm1, %v524_v29, %v1236_v27 }
 0x48e   : > { %v1240_v31 = vpop.permute.xlu1 %1239 }
 0x48f   : > { %v1242_v34 = vunpack.i.h.bf16 %v1240_v31  ;;  %v1241_v35 = vunpack.i.l.bf16 %v1240_v31 }
 0x491   : > { %v935_v40 = vsel %vm400_vm1, %v790_v33, %v1242_v34  ;;  %v934_v45 = vsel %vm400_vm1, %v789_v32, %v1241_v35 }
 0x492   : > { %v1124_v41 = vpack.c.bf16 %v935_v40, %v933_v38  ;;  %v1123_v47 = vpack.c.bf16 %v934_v45, %v932_v39 }
 0x494   : > { %949 = vst [vmem:[%s372_s4 + $0x8] sm:$0xff] %v1124_v41  ;;  %948 = vst [vmem:[%s372_s4] sm:$0xff] %v1123_v47 }
 0x495 PF: > { %s13_s16 = sadd.s32 1, %s1319_s16   ;;  %s1544_s12 = smov %s1307_s13 }
 0x496   : > { %p10_p10 = scmp.ge.s32.totalorder %s13_s16, 4   ;;  %s1545_s13 = smov %s1383_s21 }
 0x497   : > { %s1546_s14 = smov %s1315_s15  ;;  %s1547_s15 = smov %s1549_s17 }
 0x498   :  { %12 = sbr.rel (!%p10_p10) target bundleno = 3 (0x3), region = 197 }

// kernel: frozen_clip_t5_forward.18
= control target key start
LH: loop header
LB: loop body
LE: loop exit
PB: predicated region body
PF: predicated region fallthrough
CT: control target
= control target key end

     0   :  { %s1803_s0 = inlined_call_operand.vmem [shape: f32[1,32,256], index: 0, kind: input, shape index: {}]   ;;  %s1804_s3 = inlined_call_operand.vmem [shape: bf16[256,768], index: 3, kind: input, shape index: {}]   ;;  %s1805_s1 = inlined_call_operand.vmem [shape: f32[1,256], index: 1, kind: input, shape index: {}]   ;;  %s1806_s2 = inlined_call_operand.vmem [shape: f32[1,256], index: 2, kind: input, shape index: {}]   ;;  %s1807_s4 = inlined_call_operand.vmem [shape: f32[1,768], index: 4, kind: input, shape index: {}]   ;;  %s1808_s5 = inlined_call_operand.vmem [shape: bf16[32,768], index: 5, kind: output, shape index: {}]  }
   0x1   :  { %v1349_v0 = vld [vmem:[%s1803_s0] sm:$0xff]  ;;  %v1354_v1 = vld [vmem:[%s1803_s0 + $0x8] sm:$0xff]  ;;  %v1371_v5 = vld [vmem:[%s1803_s0 + $0x10] sm:$0xff] }
   0x2   :  { %v1359_v2 = vld [vmem:[%s1803_s0 + $0x20] sm:$0xff]  ;;  %v40_v3 = vadd.f32 %v1354_v1, %v1349_v0  ;;  %v1366_v4 = vld [vmem:[%s1803_s0 + $0x28] sm:$0xff]  ;;  %v1376_v6 = vld [vmem:[%s1803_s0 + $0x18] sm:$0xff] }
   0x3   :  { %v46_v7 = vadd.f32 %v1366_v4, %v1359_v2  ;;  %v1383_v8 = vld [vmem:[%s1803_s0 + $0x30] sm:$0xff]  ;;  %v1388_v9 = vld [vmem:[%s1803_s0 + $0x38] sm:$0xff]  ;;  %v43_v10 = vadd.f32 %v1376_v6, %v1371_v5  ;;  %v1166_v13 = vld [vmem:[%s1804_s3 + $0xc] ss:$24 sps:$4 sm:$0xff]  }
   0x4   :  { %41 = vadd.xlane.f32.xlu0 %v40_v3  ;;  %v49_v11 = vadd.f32 %v1388_v9, %v1383_v8  ;;  %v1164_v12 = vld [vmem:[%s1804_s3 + $0x4] ss:$24 sps:$4 sm:$0xff]   ;;  %v1168_v14 = vld [vmem:[%s1804_s3] ss:$24 sps:$4 sm:$0xff]   ;;  %818 = vmatprep.subr.bf16.mxu1 %v1166_v13  ;;  %v1170_v16 = vld [vmem:[%s1804_s3 + $0x34] ss:$24 sps:$4 sm:$0xff]  }
   0x5   :  { %47 = vadd.xlane.f32.xlu1 %v46_v7  ;;  %765 = vmatprep.subr.bf16.mxu0 %v1164_v12  ;;  %v1169_v15 = vld [vmem:[%s1804_s3 + $0x8] ss:$24 sps:$4 sm:$0xff]   ;;  %v1172_v17 = vld [vmem:[%s1804_s3 + $0x3c] ss:$24 sps:$4 sm:$0xff]   ;;  %v1175_v19 = vld [vmem:[%s1804_s3 + $0x38] ss:$24 sps:$4 sm:$0xff]  }
   0x6   :  { %766 = vmatpush1.bf16.msra.mxu0 %v1168_v14  ;;  %819 = vmatpush1.bf16.msra.mxu1 %v1169_v15  ;;  %v1174_v18 = vld [vmem:[%s1804_s3 + $0x30] ss:$24 sps:$4 sm:$0xff]   ;;  %v1176_v20 = vld [vmem:[%s1804_s3 + $0x64] ss:$24 sps:$4 sm:$0xff]   ;;  %v1180_v22 = vld [vmem:[%s1804_s3 + $0x60] ss:$24 sps:$4 sm:$0xff]  }
   0x7   :  { %767 = vmatprep.subr.bf16.mxu0 %v1170_v16  ;;  %820 = vmatprep.subr.bf16.mxu1 %v1172_v17  ;;  %v1178_v21 = vld [vmem:[%s1804_s3 + $0x6c] ss:$24 sps:$4 sm:$0xff]   ;;  %v1181_v23 = vld [vmem:[%s1804_s3 + $0x68] ss:$24 sps:$4 sm:$0xff]   ;;  %v1184_v25 = vld [vmem:[%s1804_s3 + $0x9c] ss:$24 sps:$4 sm:$0xff]  }
   0x8   :  { %44 = vadd.xlane.f32.xlu0 %v43_v10  ;;  %v1182_v24 = vld [vmem:[%s1804_s3 + $0x94] ss:$24 sps:$4 sm:$0xff]   ;;  %v1186_v26 = vld [vmem:[%s1804_s3 + $0x90] ss:$24 sps:$4 sm:$0xff]   ;;  %v1188_v28 = vld [vmem:[%s1804_s3 + $0xc4] ss:$24 sps:$4 sm:$0xff]  }
   0x9   :  { %50 = vadd.xlane.f32.xlu1 %v49_v11  ;;  %v1187_v27 = vld [vmem:[%s1804_s3 + $0x98] ss:$24 sps:$4 sm:$0xff]   ;;  %v1190_v29 = vld [vmem:[%s1804_s3 + $0xcc] ss:$24 sps:$4 sm:$0xff]   ;;  %v1193_v31 = vld [vmem:[%s1804_s3 + $0xc8] ss:$24 sps:$4 sm:$0xff]  }
   0xa   :  { %768 = vmatpush1.bf16.msra.mxu0 %v1174_v18  ;;  %821 = vmatpush1.bf16.msra.mxu1 %v1175_v19  ;;  %v1192_v30 = vld [vmem:[%s1804_s3 + $0xc0] ss:$24 sps:$4 sm:$0xff]   ;;  %v1194_v32 = vld [vmem:[%s1804_s3 + $0xf4] ss:$24 sps:$4 sm:$0xff]   ;;  %v1198_v34 = vld [vmem:[%s1804_s3 + $0xf0] ss:$24 sps:$4 sm:$0xff]  }
   0xb   :  { %769 = vmatprep.subr.bf16.mxu0 %v1176_v20  ;;  %822 = vmatprep.subr.bf16.mxu1 %v1178_v21  ;;  %v1196_v33 = vld [vmem:[%s1804_s3 + $0xfc] ss:$24 sps:$4 sm:$0xff]   ;;  %v1199_v35 = vld [vmem:[%s1804_s3 + $0xf8] ss:$24 sps:$4 sm:$0xff]   ;;  %v1202_v37 = vld [vmem:[%s1804_s3 + $0x12c] ss:$24 sps:$4 sm:$0xff]  }
   0xc   :  { %v1200_v36 = vld [vmem:[%s1804_s3 + $0x124] ss:$24 sps:$4 sm:$0xff]   ;;  %v1204_v38 = vld [vmem:[%s1804_s3 + $0x120] ss:$24 sps:$4 sm:$0xff]   ;;  %v1206_v40 = vld [vmem:[%s1804_s3 + $0x154] ss:$24 sps:$4 sm:$0xff]  }
   0xd   :  { %v1205_v39 = vld [vmem:[%s1804_s3 + $0x128] ss:$24 sps:$4 sm:$0xff]   ;;  %v1208_v41 = vld [vmem:[%s1804_s3 + $0x15c] ss:$24 sps:$4 sm:$0xff]   ;;  %v1211_v43 = vld [vmem:[%s1804_s3 + $0x158] ss:$24 sps:$4 sm:$0xff]  }
   0xe   :  { %770 = vmatpush1.bf16.msra.mxu0 %v1180_v22  ;;  %823 = vmatpush1.bf16.msra.mxu1 %v1181_v23  ;;  %v1210_v42 = vld [vmem:[%s1804_s3 + $0x150] ss:$24 sps:$4 sm:$0xff]   ;;  %v1212_v44 = vld [vmem:[%s1804_s3 + $0x184] ss:$24 sps:$4 sm:$0xff]   ;;  %v1216_v46 = vld [vmem:[%s1804_s3 + $0x180] ss:$24 sps:$4 sm:$0xff]  }
   0xf   :  { %771 = vmatprep.subr.bf16.mxu0 %v1182_v24  ;;  %824 = vmatprep.subr.bf16.mxu1 %v1184_v25  ;;  %v1214_v45 = vld [vmem:[%s1804_s3 + $0x18c] ss:$24 sps:$4 sm:$0xff]   ;;  %v1217_v47 = vld [vmem:[%s1804_s3 + $0x188] ss:$24 sps:$4 sm:$0xff]   ;;  %v1220_v49 = vld [vmem:[%s1804_s3 + $0x1bc] ss:$24 sps:$4 sm:$0xff]  }
  0x10   :  { %v1218_v48 = vld [vmem:[%s1804_s3 + $0x1b4] ss:$24 sps:$4 sm:$0xff]   ;;  %v1223_v15 = vld [vmem:[%s1804_s3 + $0x1b8] ss:$24 sps:$4 sm:$0xff]   ;;  %v1224_v16 = vld [vmem:[%s1804_s3 + $0x1e4] ss:$24 sps:$4 sm:$0xff]  }
  0x11   :  { %v1226_v17 = vld [vmem:[%s1804_s3 + $0x1ec] ss:$24 sps:$4 sm:$0xff]   ;;  %v1228_v18 = vld [vmem:[%s1804_s3 + $0x1e0] ss:$24 sps:$4 sm:$0xff]   ;;  %v1232_v21 = vld [vmem:[%s1804_s3 + $0x21c] ss:$24 sps:$4 sm:$0xff]  }
  0x12   :  { %772 = vmatpush1.bf16.msra.mxu0 %v1186_v26  ;;  %825 = vmatpush1.bf16.msra.mxu1 %v1187_v27  ;;  %v1229_v19 = vld [vmem:[%s1804_s3 + $0x1e8] ss:$24 sps:$4 sm:$0xff]   ;;  %v1230_v20 = vld [vmem:[%s1804_s3 + $0x214] ss:$24 sps:$4 sm:$0xff]   ;;  %v1235_v23 = vld [vmem:[%s1804_s3 + $0x218] ss:$24 sps:$4 sm:$0xff]  }
  0x13   :  { %773 = vmatprep.subr.bf16.mxu0 %v1188_v28  ;;  %826 = vmatprep.subr.bf16.mxu1 %v1190_v29  ;;  %v1234_v22 = vld [vmem:[%s1804_s3 + $0x210] ss:$24 sps:$4 sm:$0xff]   ;;  %v1236_v24 = vld [vmem:[%s1804_s3 + $0x244] ss:$24 sps:$4 sm:$0xff]   ;;  %v1240_v26 = vld [vmem:[%s1804_s3 + $0x240] ss:$24 sps:$4 sm:$0xff]  }
  0x14   :  { %v1238_v25 = vld [vmem:[%s1804_s3 + $0x24c] ss:$24 sps:$4 sm:$0xff]   ;;  %v1241_v27 = vld [vmem:[%s1804_s3 + $0x248] ss:$24 sps:$4 sm:$0xff]   ;;  %v1244_v29 = vld [vmem:[%s1804_s3 + $0x27c] ss:$24 sps:$4 sm:$0xff]  }
  0x15   :  { %v1242_v28 = vld [vmem:[%s1804_s3 + $0x274] ss:$24 sps:$4 sm:$0xff]  }
  0x16   :  { %774 = vmatpush1.bf16.msra.mxu0 %v1192_v30  ;;  %827 = vmatpush1.bf16.msra.mxu1 %v1193_v31  ;;  %v1246_v30 = vld [vmem:[%s1804_s3 + $0x270] ss:$24 sps:$4 sm:$0xff]  }
  0x17   :  { %775 = vmatprep.subr.bf16.mxu0 %v1194_v32  ;;  %828 = vmatprep.subr.bf16.mxu1 %v1196_v33  ;;  %v1247_v31 = vld [vmem:[%s1804_s3 + $0x278] ss:$24 sps:$4 sm:$0xff]   ;;  %v1248_v32 = vld [vmem:[%s1804_s3 + $0x2a4] ss:$24 sps:$4 sm:$0xff]  }
  0x18   :  { %v1250_v33 = vld [vmem:[%s1804_s3 + $0x2ac] ss:$24 sps:$4 sm:$0xff]  }
  0x1a   :  { %776 = vmatpush1.bf16.msra.mxu0 %v1198_v34  ;;  %829 = vmatpush1.bf16.msra.mxu1 %v1199_v35  ;;  %v1252_v34 = vld [vmem:[%s1804_s3 + $0x2a0] ss:$24 sps:$4 sm:$0xff]  }
  0x1b   :  { %777 = vmatprep.subr.bf16.mxu0 %v1200_v36  ;;  %830 = vmatprep.subr.bf16.mxu1 %v1202_v37  ;;  %v1253_v35 = vld [vmem:[%s1804_s3 + $0x2a8] ss:$24 sps:$4 sm:$0xff]   ;;  %v1254_v36 = vld [vmem:[%s1804_s3 + $0x2d4] ss:$24 sps:$4 sm:$0xff]  }
  0x1c   :  { %v1256_v37 = vld [vmem:[%s1804_s3 + $0x2dc] ss:$24 sps:$4 sm:$0xff]  }
  0x1e   :  { %778 = vmatpush1.bf16.msra.mxu0 %v1204_v38  ;;  %831 = vmatpush1.bf16.msra.mxu1 %v1205_v39  ;;  %v1258_v38 = vld [vmem:[%s1804_s3 + $0x2d0] ss:$24 sps:$4 sm:$0xff]  }
  0x1f   :  { %779 = vmatprep.subr.bf16.mxu0 %v1206_v40  ;;  %832 = vmatprep.subr.bf16.mxu1 %v1208_v41  ;;  %v1259_v39 = vld [vmem:[%s1804_s3 + $0x2d8] ss:$24 sps:$4 sm:$0xff]   ;;  %v1262_v40 = vld [vmem:[%s1804_s3 + $0x14] ss:$24 sps:$4 sm:$0xff]  }
  0x22   :  { %780 = vmatpush1.bf16.msra.mxu0 %v1210_v42  ;;  %833 = vmatpush1.bf16.msra.mxu1 %v1211_v43 }
  0x23   :  { %781 = vmatprep.subr.bf16.mxu0 %v1212_v44  ;;  %834 = vmatprep.subr.bf16.mxu1 %v1214_v45  ;;  %v107_v44 = vlaneseq }
  0x26   :  { %782 = vmatpush1.bf16.msra.mxu0 %v1216_v46  ;;  %835 = vmatpush1.bf16.msra.mxu1 %v1217_v47 }
  0x27   :  { %783 = vmatprep.subr.bf16.mxu0 %v1218_v48  ;;  %836 = vmatprep.subr.bf16.mxu1 %v1220_v49 }
  0x2a   :  { %837 = vmatpush1.bf16.msra.mxu1 %v1223_v15 }
  0x2b   :  { %838 = vmatprep.subr.bf16.mxu1 %v1226_v17 }
  0x2e   :  { %839 = vmatpush1.bf16.msra.mxu1 %v1229_v19 }
  0x2f   :  { %840 = vmatprep.subr.bf16.mxu1 %v1232_v21 }
  0x32   :  { %841 = vmatpush1.bf16.msra.mxu1 %v1235_v23 }
  0x33   :  { %842 = vmatprep.subr.bf16.mxu1 %v1238_v25 }
  0x36   :  { %843 = vmatpush1.bf16.msra.mxu1 %v1241_v27  ;;  %v1265_v27 = vld [vmem:[%s1804_s3 + $0x44] ss:$24 sps:$4 sm:$0xff]  }
  0x37   :  { %844 = vmatprep.subr.bf16.mxu1 %v1244_v29 }
  0x3a   :  { %845 = vmatpush1.bf16.msra.mxu1 %v1247_v31  ;;  %v1268_v31 = vld [vmem:[%s1804_s3 + $0x74] ss:$24 sps:$4 sm:$0xff]  }
  0x3b   :  { %846 = vmatprep.subr.bf16.mxu1 %v1250_v33 }
  0x3e   :  { %847 = vmatpush1.bf16.msra.mxu1 %v1253_v35 }
  0x3f   :  { %848 = vmatprep.subr.bf16.mxu1 %v1256_v37  ;;  %v1269_v37 = vld [vmem:[%s1804_s3 + $0xa0] ss:$24 sps:$4 sm:$0xff]  }
  0x42   :  { %849 = vmatpush1.bf16.msra.mxu1 %v1259_v39  ;;  %v1272_v39 = vld [vmem:[%s1804_s3 + $0xd0] ss:$24 sps:$4 sm:$0xff]  }
  0x43   :  { %1132 = vmatprep.subr.bf16.mxu1 %v1262_v40 }
  0x91   :  { %v42_v50 = vpop.xlane.xlu0 %41 }
  0x92   :  { %v53_v51 = vmul.f32 0.00390625, %v42_v50  ;;  %v48_v52 = vpop.xlane.xlu1 %47 }
  0x93   :  { %v55_v53 = vmul.f32 0.00390625, %v48_v52 }
  0x94   :  { %v1509_v54 = vsub.f32 %v1349_v0, %v53_v51  ;;  %v1512_v55 = vsub.f32 %v1354_v1, %v53_v51  ;;  %v1629_v51 = vshrl.u32 %v107_v44, 7  ;;  %v1283_v44 = vld [vmem:[%s1804_s3 + $0x164] ss:$24 sps:$4 sm:$0xff]  }
  0x95   :  { %v1515_v56 = vsub.f32 %v1359_v2, %v55_v53  ;;  %v1518_v57 = vsub.f32 %v1366_v4, %v55_v53  ;;  %v45_v58 = vpop.xlane.xlu0 %44 }
  0x96   :  { %v54_v59 = vmul.f32 0.00390625, %v45_v58  ;;  %v51_v60 = vpop.xlane.xlu1 %50  ;;  %v65_v61 = vmul.f32 %v1509_v54, %v1509_v54  ;;  %v66_v62 = vmul.f32 %v1512_v55, %v1512_v55 }
  0x97   :  { %v56_v63 = vmul.f32 0.00390625, %v51_v60  ;;  %v69_v0 = vmul.f32 %v1515_v56, %v1515_v56  ;;  %v70_v1 = vmul.f32 %v1518_v57, %v1518_v57  ;;  %v1635_v60 = vsub.s32 0, %v1629_v51 }
  0x98   :  { %v1529_v2 = vsub.f32 %v1371_v5, %v54_v59  ;;  %v1532_v3 = vsub.f32 %v1376_v6, %v54_v59  ;;  %v73_v4 = vadd.f32 %v66_v62, %v65_v61  ;;  %v1632_v59 = vsub.s32 1, %v1629_v51  ;;  %v105_v61 = vld [vmem:[%s1805_s1] sm:$0x3] }
  0x99   :  { %v1535_v7 = vsub.f32 %v1383_v8, %v56_v63  ;;  %v1538_v10 = vsub.f32 %v1388_v9, %v56_v63  ;;  %v79_v11 = vadd.f32 %v70_v1, %v69_v0  ;;  %v1222_v9 = vld [vmem:[%s1804_s3 + $0x1b0] ss:$24 sps:$4 sm:$0xff]   ;;  %v110_v0 = vrot.slane %v105_v61, %v1635_v60 }
  0x9a   :  { %74 = vadd.xlane.f32.xlu0 %v73_v4  ;;  %v67_v12 = vmul.f32 %v1529_v2, %v1529_v2  ;;  %v68_v13 = vmul.f32 %v1532_v3, %v1532_v3  ;;  %784 = vmatpush1.bf16.msra.mxu0 %v1222_v9  ;;  %v114_v63 = vrot.slane %v105_v61, %v1632_v59  ;;  %v125_v4 = vld [vmem:[%s1806_s2] sm:$0x3]  ;;  %v1298_v61 = vld [vmem:[%s1804_s3 + $0x254] ss:$24 sps:$4 sm:$0xff]  }
  0x9b   :  { %v71_v5 = vmul.f32 %v1535_v7, %v1535_v7  ;;  %v72_v6 = vmul.f32 %v1538_v10, %v1538_v10  ;;  %785 = vmatprep.subr.bf16.mxu0 %v1224_v16 }
  0x9c   :  { %v76_v14 = vadd.f32 %v68_v13, %v67_v12 }
  0x9d   :  { %v82_v8 = vadd.f32 %v72_v6, %v71_v5  ;;  %v134_v5 = vrot.slane %v125_v4, %v1632_v59 }
  0x9e   :  { %80 = vadd.xlane.f32.xlu0 %v79_v11  ;;  %77 = vadd.xlane.f32.xlu1 %v76_v14  ;;  %v130_v14 = vrot.slane %v125_v4, %v1635_v60  ;;  %v1302_v4 = vld [vmem:[%s1804_s3 + $0x2b0] ss:$24 sps:$4 sm:$0xff]  }
  0x9f   :  { %786 = vmatpush1.bf16.msra.mxu0 %v1228_v18 }
  0xa0   :  { %787 = vmatprep.subr.bf16.mxu0 %v1230_v20 }
  0xa2   :  { %83 = vadd.xlane.f32.xlu1 %v82_v8 }
  0xa3   :  { %788 = vmatpush1.bf16.msra.mxu0 %v1234_v22 }
  0xa4   :  { %789 = vmatprep.subr.bf16.mxu0 %v1236_v24 }
  0xa7   :  { %790 = vmatpush1.bf16.msra.mxu0 %v1240_v26 }
  0xa8   :  { %791 = vmatprep.subr.bf16.mxu0 %v1242_v28 }
  0xab   :  { %792 = vmatpush1.bf16.msra.mxu0 %v1246_v30  ;;  %v1263_v30 = vld [vmem:[%s1804_s3 + $0x40] ss:$24 sps:$4 sm:$0xff]  }
  0xac   :  { %793 = vmatprep.subr.bf16.mxu0 %v1248_v32 }
  0xaf   :  { %794 = vmatpush1.bf16.msra.mxu0 %v1252_v34  ;;  %v1266_v34 = vld [vmem:[%s1804_s3 + $0x70] ss:$24 sps:$4 sm:$0xff]  }
  0xb0   :  { %795 = vmatprep.subr.bf16.mxu0 %v1254_v36  ;;  %v1271_v36 = vld [vmem:[%s1804_s3 + $0xa4] ss:$24 sps:$4 sm:$0xff]  }
  0xb3   :  { %796 = vmatpush1.bf16.msra.mxu0 %v1258_v38  ;;  %v1274_v38 = vld [vmem:[%s1804_s3 + $0xd4] ss:$24 sps:$4 sm:$0xff]  }
  0xb4   :  { %871 = vmatprep.subr.bf16.mxu0 %v1262_v40  ;;  %v1277_v40 = vld [vmem:[%s1804_s3 + $0x104] ss:$24 sps:$4 sm:$0xff]  }
 0x127   :  { %v75_v41 = vpop.xlane.xlu0 %74 }
 0x128   :  { %v85_v42 = vmul.f32 0.00390625, %v75_v41  ;;  %v1275_v41 = vld [vmem:[%s1804_s3 + $0x100] ss:$24 sps:$4 sm:$0xff]  }
 0x12a   :  { %v89_v43 = vadd.f32 1e-05, %v85_v42  ;;  %v1280_v42 = vld [vmem:[%s1804_s3 + $0x134] ss:$24 sps:$4 sm:$0xff]  }
 0x12b   :  { %v78_v45 = vpop.xlane.xlu1 %77  ;;  %v81_v46 = vpop.xlane.xlu0 %80 }
 0x12c   :  { %1308 = vrsqrt.f32 %v89_v43  ;;  %v86_v47 = vmul.f32 0.00390625, %v78_v45  ;;  %v87_v48 = vmul.f32 0.00390625, %v81_v46  ;;  %v1278_v43 = vld [vmem:[%s1804_s3 + $0x130] ss:$24 sps:$4 sm:$0xff]   ;;  %v1281_v45 = vld [vmem:[%s1804_s3 + $0x160] ss:$24 sps:$4 sm:$0xff]  }
 0x12d   :  { %v1286_v46 = vld [vmem:[%s1804_s3 + $0x194] ss:$24 sps:$4 sm:$0xff]  }
 0x12e   :  { %v90_v49 = vadd.f32 1e-05, %v86_v47  ;;  %v91_v50 = vadd.f32 1e-05, %v87_v48  ;;  %v1284_v47 = vld [vmem:[%s1804_s3 + $0x190] ss:$24 sps:$4 sm:$0xff]  }
 0x12f   :  { %v84_v52 = vpop.xlane.xlu1 %83  ;;  %v1289_v48 = vld [vmem:[%s1804_s3 + $0x1c4] ss:$24 sps:$4 sm:$0xff]  }
 0x130   :  { %1310 = vrsqrt.f32 %v90_v49  ;;  %v88_v53 = vmul.f32 0.00390625, %v84_v52  ;;  %v1287_v49 = vld [vmem:[%s1804_s3 + $0x1c0] ss:$24 sps:$4 sm:$0xff]   ;;  %v1290_v52 = vld [vmem:[%s1804_s3 + $0x1f0] ss:$24 sps:$4 sm:$0xff]  }
 0x131   :  { %1312 = vrsqrt.f32 %v91_v50  ;;  %v1292_v50 = vld [vmem:[%s1804_s3 + $0x1f4] ss:$24 sps:$4 sm:$0xff]  }
 0x132   :  { %v92_v58 = vadd.f32 1e-05, %v88_v53  ;;  %v1295_v53 = vld [vmem:[%s1804_s3 + $0x224] ss:$24 sps:$4 sm:$0xff]  }
 0x134   :  { %1314 = vrsqrt.f32 %v92_v58  ;;  %v1293_v58 = vld [vmem:[%s1804_s3 + $0x220] ss:$24 sps:$4 sm:$0xff]  }
 0x136   :  { %v1309_v62 = vpop.eup %1308 }
 0x137   :  { %v98_v1 = vmul.f32 %v1309_v62, %v1512_v55  ;;  %v97_v11 = vmul.f32 %v1309_v62, %v1509_v54  ;;  %v1296_v62 = vld [vmem:[%s1804_s3 + $0x250] ss:$24 sps:$4 sm:$0xff]  }
 0x139   :  { %v118_v13 = vmul.f32 %v114_v63, %v98_v1  ;;  %v117_v6 = vmul.f32 %v110_v0, %v97_v11  ;;  %v1304_v1 = vld [vmem:[%s1804_s3 + $0x2b4] ss:$24 sps:$4 sm:$0xff]   ;;  %v1307_v11 = vld [vmem:[%s1804_s3 + $0x2e4] ss:$24 sps:$4 sm:$0xff]  }
 0x13a   :  { %v1311_v12 = vpop.eup %1310 }
 0x13b   :  { %v1313_v8 = vpop.eup %1312  ;;  %v100_v9 = vmul.f32 %v1311_v12, %v1532_v3  ;;  %v99_v15 = vmul.f32 %v1311_v12, %v1529_v2  ;;  %v138_v19 = vadd.f32 %v134_v5, %v118_v13  ;;  %v137_v20 = vadd.f32 %v130_v14, %v117_v6  ;;  %v1260_v2 = vld [vmem:[%s1804_s3 + $0x10] ss:$24 sps:$4 sm:$0xff]   ;;  %v1305_v12 = vld [vmem:[%s1804_s3 + $0x2e0] ss:$24 sps:$4 sm:$0xff]  }
 0x13c   :  { %v102_v55 = vmul.f32 %v1313_v8, %v1518_v57  ;;  %v101_v25 = vmul.f32 %v1313_v8, %v1515_v56  ;;  %v265_v13 = vsub.s32 2, %v1629_v51  ;;  %v269_v6 = vsub.s32 3, %v1629_v51 }
 0x13d   :  { %v120_v16 = vmul.f32 %v114_v63, %v100_v9  ;;  %v119_v17 = vmul.f32 %v110_v0, %v99_v15 }
 0x13e   :  { %v1315_v18 = vpop.eup %1314  ;;  %v122_v54 = vmul.f32 %v114_v63, %v102_v55  ;;  %v121_v56 = vmul.f32 %v110_v0, %v101_v25 }
 0x13f   :  { %v140_v21 = vadd.f32 %v134_v5, %v120_v16  ;;  %v139_v22 = vadd.f32 %v130_v14, %v119_v17  ;;  %v104_v23 = vmul.f32 %v1315_v18, %v1538_v10  ;;  %v103_v24 = vmul.f32 %v1315_v18, %v1535_v7 }
 0x140   :  { %v142_v10 = vadd.f32 %v134_v5, %v122_v54  ;;  %v141_v33 = vadd.f32 %v130_v14, %v121_v56 }
 0x141   :  { %v146_v26 = vpack.c.bf16 %v140_v21, %v138_v19  ;;  %v1658_v57 = vpack.c.bf16 %v139_v22, %v137_v20  ;;  %v124_v3 = vmul.f32 %v114_v63, %v104_v23  ;;  %v123_v28 = vmul.f32 %v110_v0, %v103_v24  ;;  %v1301_v63 = vld [vmem:[%s1804_s3 + $0x284] ss:$24 sps:$4 sm:$0xff]   ;;  %v1299_v0 = vld [vmem:[%s1804_s3 + $0x280] ss:$24 sps:$4 sm:$0xff]  }
 0x143   :  { %797 = vmatprep.mubr.bf16.mxu0 %v146_v26  ;;  %850 = vmatprep.mubr.bf16.mxu1 %v146_v26  ;;  %v144_v29 = vadd.f32 %v134_v5, %v124_v3  ;;  %v143_v32 = vadd.f32 %v130_v14, %v123_v28  ;;  %v253_v5 = vld [vmem:[%s1807_s4] sm:$0x3f] }
 0x144   :  { %798 = vmatmul.mubr.bf16.vlgmr.msra.gmra.mrb[0].mxu0 %v1658_v57  ;;  %851 = vmatmul.mubr.bf16.vlgmr.msra.gmra.mrb[0].mxu1 %v1658_v57  ;;  %v258_v14 = vrot.slane %v253_v5, %v1635_v60  ;;  %v266_v8 = vrot.slane %v253_v5, %v265_v13  ;;  %v262_v9 = vrot.slane %v253_v5, %v1632_v59 }
 0x145   :  { %872 = vmatpush1.bf16.msra.mxu0 %v1260_v2  ;;  %1148 = vmatpush1.bf16.msra.mxu1 %v1260_v2  ;;  %v148_v7 = vpack.c.bf16 %v144_v29, %v142_v10  ;;  %v1674_v35 = vpack.c.bf16 %v143_v32, %v141_v33  ;;  %v270_v15 = vrot.slane %v253_v5, %v269_v6 }
 0x146   :  { %873 = vmatprep.subr.bf16.mxu0 %v1265_v27  ;;  %1133 = vmatprep.subr.bf16.mxu1 %v1265_v27 }
 0x147   :  { %807 = vmatprep.mubr.bf16.mxu0 %v148_v7  ;;  %860 = vmatprep.mubr.bf16.mxu1 %v148_v7 }
 0x149   :  { %874 = vmatpush1.bf16.msra.mxu0 %v1263_v30  ;;  %1149 = vmatpush1.bf16.msra.mxu1 %v1263_v30 }
 0x14a   :  { %875 = vmatprep.subr.bf16.mxu0 %v1268_v31  ;;  %1134 = vmatprep.subr.bf16.mxu1 %v1268_v31 }
 0x14c   :  { %808 = vmatmul.mubr.bf16.gmra.mrb[4].mxu0 %v1674_v35  ;;  %861 = vmatmul.mubr.bf16.gmra.mrb[4].mxu1 %v1674_v35 }
 0x14d   :  { %876 = vmatpush1.bf16.msra.mxu0 %v1266_v34  ;;  %1150 = vmatpush1.bf16.msra.mxu1 %v1266_v34 }
 0x14e   :  { %903 = vmatprep.mubr.bf16.mxu0 %v146_v26  ;;  %913 = vmatprep.mubr.bf16.mxu1 %v148_v7 }
 0x14f   :  { %877 = vmatprep.subr.bf16.mxu0 %v1271_v36  ;;  %1135 = vmatprep.subr.bf16.mxu1 %v1271_v36 }
 0x151   :  { %878 = vmatpush1.bf16.msra.mxu0 %v1269_v37  ;;  %1151 = vmatpush1.bf16.msra.mxu1 %v1269_v37 }
 0x152   :  { %879 = vmatprep.subr.bf16.mxu0 %v1274_v38  ;;  %1136 = vmatprep.subr.bf16.mxu1 %v1274_v38 }
 0x155   :  { %880 = vmatpush1.bf16.msra.mxu0 %v1272_v39  ;;  %1152 = vmatpush1.bf16.msra.mxu1 %v1272_v39 }
 0x156   :  { %881 = vmatprep.subr.bf16.mxu0 %v1277_v40  ;;  %1137 = vmatprep.subr.bf16.mxu1 %v1277_v40 }
 0x159   :  { %882 = vmatpush1.bf16.msra.mxu0 %v1275_v41  ;;  %1153 = vmatpush1.bf16.msra.mxu1 %v1275_v41 }
 0x15a   :  { %883 = vmatprep.subr.bf16.mxu0 %v1280_v42  ;;  %1138 = vmatprep.subr.bf16.mxu1 %v1280_v42 }
 0x15d   :  { %884 = vmatpush1.bf16.msra.mxu0 %v1278_v43  ;;  %1154 = vmatpush1.bf16.msra.mxu1 %v1278_v43 }
 0x15e   :  { %885 = vmatprep.subr.bf16.mxu0 %v1283_v44  ;;  %1139 = vmatprep.subr.bf16.mxu1 %v1283_v44 }
 0x161   :  { %886 = vmatpush1.bf16.msra.mxu0 %v1281_v45  ;;  %1155 = vmatpush1.bf16.msra.mxu1 %v1281_v45 }
 0x162   :  { %887 = vmatprep.subr.bf16.mxu0 %v1286_v46  ;;  %1140 = vmatprep.subr.bf16.mxu1 %v1286_v46  ;;  %v273_v46 = vsub.s32 4, %v1629_v51 }
 0x165   :  { %888 = vmatpush1.bf16.msra.mxu0 %v1284_v47  ;;  %1156 = vmatpush1.bf16.msra.mxu1 %v1284_v47  ;;  %v277_v47 = vsub.s32 5, %v1629_v51 }
 0x166   :  { %889 = vmatprep.subr.bf16.mxu0 %v1289_v48  ;;  %1141 = vmatprep.subr.bf16.mxu1 %v1289_v48  ;;  %v274_v48 = vrot.slane %v253_v5, %v273_v46 }
 0x169   :  { %890 = vmatpush1.bf16.msra.mxu0 %v1287_v49  ;;  %1157 = vmatpush1.bf16.msra.mxu1 %v1287_v49  ;;  %v278_v49 = vrot.slane %v253_v5, %v277_v47 }
 0x16a   :  { %891 = vmatprep.subr.bf16.mxu0 %v1292_v50  ;;  %1142 = vmatprep.subr.bf16.mxu1 %v1292_v50 }
 0x16d   :  { %892 = vmatpush1.bf16.msra.mxu0 %v1290_v52  ;;  %1158 = vmatpush1.bf16.msra.mxu1 %v1290_v52 }
 0x16e   :  { %893 = vmatprep.subr.bf16.mxu0 %v1295_v53  ;;  %1143 = vmatprep.subr.bf16.mxu1 %v1295_v53 }
 0x171   :  { %894 = vmatpush1.bf16.msra.mxu0 %v1293_v58  ;;  %1159 = vmatpush1.bf16.msra.mxu1 %v1293_v58 }
 0x172   :  { %895 = vmatprep.subr.bf16.mxu0 %v1298_v61  ;;  %1144 = vmatprep.subr.bf16.mxu1 %v1298_v61 }
 0x175   :  { %896 = vmatpush1.bf16.msra.mxu0 %v1296_v62  ;;  %1160 = vmatpush1.bf16.msra.mxu1 %v1296_v62 }
 0x176   :  { %897 = vmatprep.subr.bf16.mxu0 %v1301_v63  ;;  %1145 = vmatprep.subr.bf16.mxu1 %v1301_v63 }
 0x179   :  { %898 = vmatpush1.bf16.msra.mxu0 %v1299_v0  ;;  %1161 = vmatpush1.bf16.msra.mxu1 %v1299_v0 }
 0x17a   :  { %899 = vmatprep.subr.bf16.mxu0 %v1304_v1  ;;  %1146 = vmatprep.subr.bf16.mxu1 %v1304_v1 }
 0x17d   :  { %900 = vmatpush1.bf16.msra.mxu0 %v1302_v4  ;;  %1162 = vmatpush1.bf16.msra.mxu1 %v1302_v4 }
 0x17e   :  { %901 = vmatprep.subr.bf16.mxu0 %v1307_v11  ;;  %1147 = vmatprep.subr.bf16.mxu1 %v1307_v11 }
 0x181   :  { %902 = vmatpush1.bf16.msra.mxu0 %v1305_v12  ;;  %1163 = vmatpush1.bf16.msra.mxu1 %v1305_v12 }
 0x184   :  { %904 = vmatmul.mubr.bf16.vlgmr.msra.gmra.mrb[8].mxu0 %v1658_v57  ;;  %914 = vmatmul.mubr.bf16.vlgmr.msra.gmra.mrb[8].mxu1 %v1674_v35 }
 0x217   :  { %v799_v55 = vpop.f32.mrb[0].mxu0  ;;  %v852_v16 = vpop.f32.mrb[0].mxu1 }
 0x218   :  { %v800_v17 = vadd.f32 %v799_v55, %v258_v14  ;;  %v853_v18 = vadd.f32 %v852_v16, %v266_v8  ;;  %v801_v19 = vpop.f32.mrb[1].mxu0  ;;  %v854_v20 = vpop.f32.mrb[1].mxu1 }
 0x219   :  { %v802_v54 = vadd.f32 %v801_v19, %v262_v9  ;;  %v855_v21 = vadd.f32 %v854_v20, %v270_v15  ;;  %v803_v22 = vpop.f32.mrb[2].mxu0  ;;  %v856_v23 = vpop.f32.mrb[2].mxu1 }
 0x21a   :  { %v804_v24 = vadd.f32 %v803_v22, %v258_v14  ;;  %v857_v25 = vadd.f32 %v856_v23, %v266_v8  ;;  %v805_v26 = vpop.f32.mrb[3].mxu0  ;;  %v858_v2 = vpop.f32.mrb[3].mxu1 }
 0x21b   :  { %v1120_v57 = vpack.c.bf16 %v802_v54, %v800_v17  ;;  %v1121_v60 = vpack.c.bf16 %v855_v21, %v853_v18  ;;  %v806_v3 = vadd.f32 %v805_v26, %v262_v9  ;;  %v859_v27 = vadd.f32 %v858_v2, %v270_v15 }
 0x21d   :  { %996 = vst [vmem:[%s1808_s5] sm:$0xff] %v1120_v57  ;;  %997 = vst [vmem:[%s1808_s5 + $0x8] sm:$0xff] %v1121_v60  ;;  %v1123_v59 = vpack.c.bf16 %v806_v3, %v804_v24  ;;  %v1124_v28 = vpack.c.bf16 %v859_v27, %v857_v25 }
 0x21f   :  { %999 = vst [vmem:[%s1808_s5 + $0x18] sm:$0xff] %v1123_v59  ;;  %1000 = vst [vmem:[%s1808_s5 + $0x20] sm:$0xff] %v1124_v28  ;;  %v809_v10 = vpop.f32.mrb[4].mxu0  ;;  %v862_v29 = vpop.f32.mrb[4].mxu1 }
 0x220   :  { %v810_v56 = vadd.f32 %v809_v10, %v258_v14  ;;  %v863_v7 = vadd.f32 %v862_v29, %v266_v8  ;;  %v811_v30 = vpop.f32.mrb[5].mxu0  ;;  %v864_v31 = vpop.f32.mrb[5].mxu1 }
 0x221   :  { %v812_v32 = vadd.f32 %v811_v30, %v262_v9  ;;  %v865_v33 = vadd.f32 %v864_v31, %v270_v15  ;;  %v813_v34 = vpop.f32.mrb[6].mxu0  ;;  %v866_v35 = vpop.f32.mrb[6].mxu1 }
 0x222   :  { %v814_v36 = vadd.f32 %v813_v34, %v258_v14  ;;  %v867_v37 = vadd.f32 %v866_v35, %v266_v8  ;;  %v815_v38 = vpop.f32.mrb[7].mxu0  ;;  %v868_v39 = vpop.f32.mrb[7].mxu1 }
 0x223   :  { %v1126_v40 = vpack.c.bf16 %v812_v32, %v810_v56  ;;  %v1127_v41 = vpack.c.bf16 %v865_v33, %v863_v7  ;;  %v816_v42 = vadd.f32 %v815_v38, %v262_v9  ;;  %v869_v43 = vadd.f32 %v868_v39, %v270_v15 }
 0x225   :  { %1002 = vst [vmem:[%s1808_s5 + $0x30] sm:$0xff] %v1126_v40  ;;  %1003 = vst [vmem:[%s1808_s5 + $0x38] sm:$0xff] %v1127_v41  ;;  %v1129_v44 = vpack.c.bf16 %v816_v42, %v814_v36  ;;  %v1130_v45 = vpack.c.bf16 %v869_v43, %v867_v37 }
 0x227   :  { %1005 = vst [vmem:[%s1808_s5 + $0x48] sm:$0xff] %v1129_v44  ;;  %1006 = vst [vmem:[%s1808_s5 + $0x50] sm:$0xff] %v1130_v45 }
 0x257   :  { %v905_v50 = vpop.f32.mrb[8].mxu0  ;;  %v915_v52 = vpop.f32.mrb[8].mxu1 }
 0x258   :  { %v906_v53 = vadd.f32 %v905_v50, %v274_v48  ;;  %v916_v58 = vadd.f32 %v915_v52, %v274_v48  ;;  %v907_v61 = vpop.f32.mrb[9].mxu0  ;;  %v917_v62 = vpop.f32.mrb[9].mxu1 }
 0x259   :  { %v908_v63 = vadd.f32 %v907_v61, %v278_v49  ;;  %v918_v0 = vadd.f32 %v917_v62, %v278_v49  ;;  %v909_v1 = vpop.f32.mrb[10].mxu0  ;;  %v919_v4 = vpop.f32.mrb[10].mxu1 }
 0x25a   :  { %v910_v11 = vadd.f32 %v909_v1, %v274_v48  ;;  %v920_v12 = vadd.f32 %v919_v4, %v274_v48  ;;  %v911_v13 = vpop.f32.mrb[11].mxu0  ;;  %v921_v6 = vpop.f32.mrb[11].mxu1 }
 0x25b   :  { %v1122_v14 = vpack.c.bf16 %v908_v63, %v906_v53  ;;  %v1128_v8 = vpack.c.bf16 %v918_v0, %v916_v58  ;;  %v912_v9 = vadd.f32 %v911_v13, %v278_v49  ;;  %v922_v51 = vadd.f32 %v921_v6, %v278_v49 }
 0x25d   :  { %998 = vst [vmem:[%s1808_s5 + $0x10] sm:$0xff] %v1122_v14  ;;  %1004 = vst [vmem:[%s1808_s5 + $0x40] sm:$0xff] %v1128_v8  ;;  %v1125_v5 = vpack.c.bf16 %v912_v9, %v910_v11  ;;  %v1131_v15 = vpack.c.bf16 %v922_v51, %v920_v12 }
 0x25f   :  { %1001 = vst [vmem:[%s1808_s5 + $0x28] sm:$0xff] %v1125_v5  ;;  %1007 = vst [vmem:[%s1808_s5 + $0x58] sm:$0xff] %v1131_v15 }

// kernel: frozen_clip_t5_forward.20
= control target key start
LH: loop header
LB: loop body
LE: loop exit
PB: predicated region body
PF: predicated region fallthrough
CT: control target
= control target key end

     0   :  { %v304_v36 = vlaneseq  ;;  %s640_s1 = inlined_call_operand.vmem [shape: bf16[256,256], index: 1, kind: input, shape index: {}]   ;;  %s641_s0 = inlined_call_operand.vmem [shape: bf16[32,256], index: 0, kind: input, shape index: {}]   ;;  %s642_s2 = inlined_call_operand.vmem [shape: f32[1,256], index: 2, kind: input, shape index: {}]   ;;  %s643_s3 = inlined_call_operand.vmem [shape: f32[1,32,256], index: 3, kind: input, shape index: {}]   ;;  %s644_s4 = inlined_call_operand.vmem [shape: f32[32,256], index: 4, kind: output, shape index: {}]  }
   0x1   :  { %v402_v0 = vld [vmem:[%s640_s1 + $0x4] ss:$8 sps:$4 sm:$0xff]   ;;  %v404_v1 = vld [vmem:[%s640_s1] ss:$8 sps:$4 sm:$0xff]   ;;  %v405_v2 = vld [vmem:[%s640_s1 + $0x14] ss:$8 sps:$4 sm:$0xff]  }
   0x2   :  { %249 = vmatprep.subr.bf16.mxu0 %v402_v0  ;;  %370 = vmatprep.subr.bf16.mxu1 %v402_v0  ;;  %v407_v3 = vld [vmem:[%s640_s1 + $0x10] ss:$8 sps:$4 sm:$0xff]   ;;  %v408_v4 = vld [vmem:[%s640_s1 + $0x24] ss:$8 sps:$4 sm:$0xff]   ;;  %v410_v5 = vld [vmem:[%s640_s1 + $0x20] ss:$8 sps:$4 sm:$0xff]  }
   0x3   :  { %250 = vmatpush1.bf16.msra.mxu0 %v404_v1  ;;  %386 = vmatpush1.bf16.msra.mxu1 %v404_v1  ;;  %v411_v6 = vld [vmem:[%s640_s1 + $0x34] ss:$8 sps:$4 sm:$0xff]   ;;  %v413_v7 = vld [vmem:[%s640_s1 + $0x30] ss:$8 sps:$4 sm:$0xff]   ;;  %v414_v8 = vld [vmem:[%s640_s1 + $0x44] ss:$8 sps:$4 sm:$0xff]  }
   0x4   :  { %251 = vmatprep.subr.bf16.mxu0 %v405_v2  ;;  %371 = vmatprep.subr.bf16.mxu1 %v405_v2  ;;  %v416_v9 = vld [vmem:[%s640_s1 + $0x40] ss:$8 sps:$4 sm:$0xff]   ;;  %v417_v10 = vld [vmem:[%s640_s1 + $0x54] ss:$8 sps:$4 sm:$0xff]   ;;  %v419_v11 = vld [vmem:[%s640_s1 + $0x50] ss:$8 sps:$4 sm:$0xff]  }
   0x5   :  { %v420_v12 = vld [vmem:[%s640_s1 + $0x64] ss:$8 sps:$4 sm:$0xff]   ;;  %v422_v14 = vld [vmem:[%s640_s1 + $0x60] ss:$8 sps:$4 sm:$0xff]   ;;  %v455_v15 = vld [vmem:[%s641_s0 + $0x14] ss:$8 sps:$4 sm:$0xff]  }
   0x6   :  { %v452_v13 = vld [vmem:[%s641_s0 + $0x4] ss:$8 sps:$4 sm:$0xff]   ;;  %v423_v16 = vld [vmem:[%s640_s1 + $0x74] ss:$8 sps:$4 sm:$0xff]   ;;  %291 = vmatprep.mubr.bf16.mxu1 %v455_v15  ;;  %v425_v17 = vld [vmem:[%s640_s1 + $0x70] ss:$8 sps:$4 sm:$0xff]  }
   0x7   :  { %252 = vmatpush1.bf16.msra.mxu0 %v407_v3  ;;  %387 = vmatpush1.bf16.msra.mxu1 %v407_v3  ;;  %v426_v18 = vld [vmem:[%s640_s1 + $0x84] ss:$8 sps:$4 sm:$0xff]   ;;  %v428_v19 = vld [vmem:[%s640_s1 + $0x80] ss:$8 sps:$4 sm:$0xff]   ;;  %v429_v20 = vld [vmem:[%s640_s1 + $0x94] ss:$8 sps:$4 sm:$0xff]  }
   0x8   :  { %253 = vmatprep.subr.bf16.mxu0 %v408_v4  ;;  %372 = vmatprep.subr.bf16.mxu1 %v408_v4  ;;  %v431_v21 = vld [vmem:[%s640_s1 + $0x90] ss:$8 sps:$4 sm:$0xff]   ;;  %v432_v22 = vld [vmem:[%s640_s1 + $0xa4] ss:$8 sps:$4 sm:$0xff]   ;;  %v434_v23 = vld [vmem:[%s640_s1 + $0xa0] ss:$8 sps:$4 sm:$0xff]  }
   0x9   :  { %281 = vmatprep.mubr.bf16.mxu0 %v452_v13  ;;  %v435_v24 = vld [vmem:[%s640_s1 + $0xb4] ss:$8 sps:$4 sm:$0xff]   ;;  %v437_v25 = vld [vmem:[%s640_s1 + $0xb0] ss:$8 sps:$4 sm:$0xff]   ;;  %v438_v26 = vld [vmem:[%s640_s1 + $0xc4] ss:$8 sps:$4 sm:$0xff]  }
   0xa   :  { %v440_v27 = vld [vmem:[%s640_s1 + $0xc0] ss:$8 sps:$4 sm:$0xff]   ;;  %v441_v28 = vld [vmem:[%s640_s1 + $0xd4] ss:$8 sps:$4 sm:$0xff]   ;;  %v443_v29 = vld [vmem:[%s640_s1 + $0xd0] ss:$8 sps:$4 sm:$0xff]  }
   0xb   :  { %254 = vmatpush1.bf16.msra.mxu0 %v410_v5  ;;  %388 = vmatpush1.bf16.msra.mxu1 %v410_v5  ;;  %v444_v30 = vld [vmem:[%s640_s1 + $0xe4] ss:$8 sps:$4 sm:$0xff]   ;;  %v446_v31 = vld [vmem:[%s640_s1 + $0xe0] ss:$8 sps:$4 sm:$0xff]   ;;  %v447_v32 = vld [vmem:[%s640_s1 + $0xf4] ss:$8 sps:$4 sm:$0xff]  }
   0xc   :  { %255 = vmatprep.subr.bf16.mxu0 %v411_v6  ;;  %373 = vmatprep.subr.bf16.mxu1 %v411_v6  ;;  %v449_v33 = vld [vmem:[%s640_s1 + $0xf0] ss:$8 sps:$4 sm:$0xff]   ;;  %v450_v34 = vld [vmem:[%s641_s0] ss:$8 sps:$4 sm:$0xff]   ;;  %v305_v37 = vshrl.u32 %v304_v36, 7 }
   0xd   :  { %v453_v35 = vld [vmem:[%s641_s0 + $0x10] ss:$8 sps:$4 sm:$0xff]   ;;  %v302_v39 = vld [vmem:[%s642_s2] sm:$0x3]  ;;  %v54_v44 = vld [vmem:[%s643_s3 + $0x8] sm:$0xff] }
   0xe   :  { %v306_v38 = vsub.s32 0, %v305_v37  ;;  %v310_v40 = vsub.s32 1, %v305_v37  ;;  %v53_v41 = vld [vmem:[%s643_s3] sm:$0xff]  ;;  %v58_v45 = vld [vmem:[%s643_s3 + $0x28] sm:$0xff]  ;;  %v55_v49 = vld [vmem:[%s643_s3 + $0x10] sm:$0xff] }
   0xf   :  { %256 = vmatpush1.bf16.msra.mxu0 %v413_v7  ;;  %389 = vmatpush1.bf16.msra.mxu1 %v413_v7  ;;  %v57_v42 = vld [vmem:[%s643_s3 + $0x20] sm:$0xff]  ;;  %v59_v50 = vld [vmem:[%s643_s3 + $0x30] sm:$0xff]  ;;  %v56_v55 = vld [vmem:[%s643_s3 + $0x18] sm:$0xff] }
  0x10   :  { %257 = vmatprep.subr.bf16.mxu0 %v414_v8  ;;  %374 = vmatprep.subr.bf16.mxu1 %v414_v8  ;;  %v307_v43 = vrot.slane %v302_v39, %v306_v38  ;;  %v311_v48 = vrot.slane %v302_v39, %v310_v40  ;;  %v60_v56 = vld [vmem:[%s643_s3 + $0x38] sm:$0xff] }
  0x13   :  { %258 = vmatpush1.bf16.msra.mxu0 %v416_v9  ;;  %390 = vmatpush1.bf16.msra.mxu1 %v416_v9 }
  0x14   :  { %259 = vmatprep.subr.bf16.mxu0 %v417_v10  ;;  %375 = vmatprep.subr.bf16.mxu1 %v417_v10 }
  0x17   :  { %260 = vmatpush1.bf16.msra.mxu0 %v419_v11  ;;  %391 = vmatpush1.bf16.msra.mxu1 %v419_v11 }
  0x18   :  { %261 = vmatprep.subr.bf16.mxu0 %v420_v12  ;;  %376 = vmatprep.subr.bf16.mxu1 %v420_v12 }
  0x1b   :  { %262 = vmatpush1.bf16.msra.mxu0 %v422_v14  ;;  %392 = vmatpush1.bf16.msra.mxu1 %v422_v14 }
  0x1c   :  { %263 = vmatprep.subr.bf16.mxu0 %v423_v16  ;;  %377 = vmatprep.subr.bf16.mxu1 %v423_v16 }
  0x1f   :  { %264 = vmatpush1.bf16.msra.mxu0 %v425_v17  ;;  %393 = vmatpush1.bf16.msra.mxu1 %v425_v17 }
  0x20   :  { %265 = vmatprep.subr.bf16.mxu0 %v426_v18  ;;  %378 = vmatprep.subr.bf16.mxu1 %v426_v18 }
  0x23   :  { %266 = vmatpush1.bf16.msra.mxu0 %v428_v19  ;;  %394 = vmatpush1.bf16.msra.mxu1 %v428_v19 }
  0x24   :  { %267 = vmatprep.subr.bf16.mxu0 %v429_v20  ;;  %379 = vmatprep.subr.bf16.mxu1 %v429_v20 }
  0x27   :  { %268 = vmatpush1.bf16.msra.mxu0 %v431_v21  ;;  %395 = vmatpush1.bf16.msra.mxu1 %v431_v21 }
  0x28   :  { %269 = vmatprep.subr.bf16.mxu0 %v432_v22  ;;  %380 = vmatprep.subr.bf16.mxu1 %v432_v22 }
  0x2b   :  { %270 = vmatpush1.bf16.msra.mxu0 %v434_v23  ;;  %396 = vmatpush1.bf16.msra.mxu1 %v434_v23 }
  0x2c   :  { %271 = vmatprep.subr.bf16.mxu0 %v435_v24  ;;  %381 = vmatprep.subr.bf16.mxu1 %v435_v24 }
  0x2f   :  { %272 = vmatpush1.bf16.msra.mxu0 %v437_v25  ;;  %397 = vmatpush1.bf16.msra.mxu1 %v437_v25 }
  0x30   :  { %273 = vmatprep.subr.bf16.mxu0 %v438_v26  ;;  %382 = vmatprep.subr.bf16.mxu1 %v438_v26 }
  0x33   :  { %274 = vmatpush1.bf16.msra.mxu0 %v440_v27  ;;  %398 = vmatpush1.bf16.msra.mxu1 %v440_v27 }
  0x34   :  { %275 = vmatprep.subr.bf16.mxu0 %v441_v28  ;;  %383 = vmatprep.subr.bf16.mxu1 %v441_v28 }
  0x37   :  { %276 = vmatpush1.bf16.msra.mxu0 %v443_v29  ;;  %399 = vmatpush1.bf16.msra.mxu1 %v443_v29 }
  0x38   :  { %277 = vmatprep.subr.bf16.mxu0 %v444_v30  ;;  %384 = vmatprep.subr.bf16.mxu1 %v444_v30 }
  0x3b   :  { %278 = vmatpush1.bf16.msra.mxu0 %v446_v31  ;;  %400 = vmatpush1.bf16.msra.mxu1 %v446_v31 }
  0x3c   :  { %279 = vmatprep.subr.bf16.mxu0 %v447_v32  ;;  %385 = vmatprep.subr.bf16.mxu1 %v447_v32 }
  0x3f   :  { %280 = vmatpush1.bf16.msra.mxu0 %v449_v33  ;;  %401 = vmatpush1.bf16.msra.mxu1 %v449_v33 }
  0x42   :  { %282 = vmatmul.mubr.bf16.vlgmr.msra.gmra.mrb[0].mxu0 %v450_v34  ;;  %292 = vmatmul.mubr.bf16.vlgmr.msra.gmra.mrb[0].mxu1 %v453_v35 }
 0x115   :  { %v283_v46 = vpop.f32.mrb[0].mxu0  ;;  %v293_v47 = vpop.f32.mrb[0].mxu1 }
 0x116   :  { %v284_v51 = vadd.f32 %v283_v46, %v53_v41  ;;  %v294_v52 = vadd.f32 %v293_v47, %v57_v42  ;;  %v285_v53 = vpop.f32.mrb[1].mxu0  ;;  %v295_v54 = vpop.f32.mrb[1].mxu1 }
 0x117   :  { %v286_v57 = vadd.f32 %v285_v53, %v54_v44  ;;  %v296_v58 = vadd.f32 %v295_v54, %v58_v45  ;;  %v287_v59 = vpop.f32.mrb[2].mxu0  ;;  %v297_v60 = vpop.f32.mrb[2].mxu1 }
 0x118   :  { %v314_v61 = vadd.f32 %v307_v43, %v284_v51  ;;  %v318_v62 = vadd.f32 %v307_v43, %v294_v52  ;;  %v288_v63 = vadd.f32 %v287_v59, %v55_v49  ;;  %v298_v0 = vadd.f32 %v297_v60, %v59_v50  ;;  %v289_v1 = vpop.f32.mrb[3].mxu0  ;;  %v299_v2 = vpop.f32.mrb[3].mxu1 }
 0x119   :  { %v315_v3 = vadd.f32 %v311_v48, %v286_v57  ;;  %v319_v4 = vadd.f32 %v311_v48, %v296_v58  ;;  %v290_v5 = vadd.f32 %v289_v1, %v56_v55  ;;  %v300_v6 = vadd.f32 %v299_v2, %v60_v56 }
 0x11a   :  { %322 = vst [vmem:[%s644_s4] sm:$0xff] %v314_v61  ;;  %326 = vst [vmem:[%s644_s4 + $0x20] sm:$0xff] %v318_v62  ;;  %v316_v7 = vadd.f32 %v307_v43, %v288_v63  ;;  %v320_v8 = vadd.f32 %v307_v43, %v298_v0 }
 0x11b   :  { %323 = vst [vmem:[%s644_s4 + $0x8] sm:$0xff] %v315_v3  ;;  %327 = vst [vmem:[%s644_s4 + $0x28] sm:$0xff] %v319_v4  ;;  %v317_v9 = vadd.f32 %v311_v48, %v290_v5  ;;  %v321_v10 = vadd.f32 %v311_v48, %v300_v6 }
 0x11c   :  { %324 = vst [vmem:[%s644_s4 + $0x10] sm:$0xff] %v316_v7  ;;  %328 = vst [vmem:[%s644_s4 + $0x30] sm:$0xff] %v320_v8 }
 0x11d   :  { %325 = vst [vmem:[%s644_s4 + $0x18] sm:$0xff] %v317_v9  ;;  %329 = vst [vmem:[%s644_s4 + $0x38] sm:$0xff] %v321_v10 }

// kernel: frozen_clip_t5_forward.24
= control target key start
LH: loop header
LB: loop body
LE: loop exit
PB: predicated region body
PF: predicated region fallthrough
CT: control target
= control target key end

     0   :  { %v312_v36 = vlaneseq  ;;  %s672_s1 = inlined_call_operand.vmem [shape: bf16[256,256], index: 1, kind: input, shape index: {}]   ;;  %s673_s0 = inlined_call_operand.vmem [shape: bf16[32,256], index: 0, kind: input, shape index: {}]   ;;  %s674_s3 = inlined_call_operand.vmem [shape: f32[2,32,256], index: 3, kind: input, shape index: {}]   ;;  %s675_s2 = inlined_call_operand.vmem [shape: f32[1,256], index: 2, kind: input, shape index: {}]   ;;  %s676_s4 = inlined_call_operand.vmem [shape: f32[32,256], index: 4, kind: output, shape index: {}]  }
   0x1   :  { %v410_v0 = vld [vmem:[%s672_s1 + $0x4] ss:$8 sps:$4 sm:$0xff]   ;;  %v412_v1 = vld [vmem:[%s672_s1] ss:$8 sps:$4 sm:$0xff]   ;;  %v413_v2 = vld [vmem:[%s672_s1 + $0x14] ss:$8 sps:$4 sm:$0xff]  }
   0x2   :  { %257 = vmatprep.subr.bf16.mxu0 %v410_v0  ;;  %378 = vmatprep.subr.bf16.mxu1 %v410_v0  ;;  %v415_v3 = vld [vmem:[%s672_s1 + $0x10] ss:$8 sps:$4 sm:$0xff]   ;;  %v416_v4 = vld [vmem:[%s672_s1 + $0x24] ss:$8 sps:$4 sm:$0xff]   ;;  %v418_v5 = vld [vmem:[%s672_s1 + $0x20] ss:$8 sps:$4 sm:$0xff]  }
   0x3   :  { %258 = vmatpush1.bf16.msra.mxu0 %v412_v1  ;;  %394 = vmatpush1.bf16.msra.mxu1 %v412_v1  ;;  %v419_v6 = vld [vmem:[%s672_s1 + $0x34] ss:$8 sps:$4 sm:$0xff]   ;;  %v421_v7 = vld [vmem:[%s672_s1 + $0x30] ss:$8 sps:$4 sm:$0xff]   ;;  %v422_v8 = vld [vmem:[%s672_s1 + $0x44] ss:$8 sps:$4 sm:$0xff]  }
   0x4   :  { %259 = vmatprep.subr.bf16.mxu0 %v413_v2  ;;  %379 = vmatprep.subr.bf16.mxu1 %v413_v2  ;;  %v424_v9 = vld [vmem:[%s672_s1 + $0x40] ss:$8 sps:$4 sm:$0xff]   ;;  %v425_v10 = vld [vmem:[%s672_s1 + $0x54] ss:$8 sps:$4 sm:$0xff]   ;;  %v427_v11 = vld [vmem:[%s672_s1 + $0x50] ss:$8 sps:$4 sm:$0xff]  }
   0x5   :  { %v428_v12 = vld [vmem:[%s672_s1 + $0x64] ss:$8 sps:$4 sm:$0xff]   ;;  %v430_v14 = vld [vmem:[%s672_s1 + $0x60] ss:$8 sps:$4 sm:$0xff]   ;;  %v463_v15 = vld [vmem:[%s673_s0 + $0x14] ss:$8 sps:$4 sm:$0xff]  }
   0x6   :  { %v460_v13 = vld [vmem:[%s673_s0 + $0x4] ss:$8 sps:$4 sm:$0xff]   ;;  %v431_v16 = vld [vmem:[%s672_s1 + $0x74] ss:$8 sps:$4 sm:$0xff]   ;;  %299 = vmatprep.mubr.bf16.mxu1 %v463_v15  ;;  %v433_v17 = vld [vmem:[%s672_s1 + $0x70] ss:$8 sps:$4 sm:$0xff]  }
   0x7   :  { %260 = vmatpush1.bf16.msra.mxu0 %v415_v3  ;;  %395 = vmatpush1.bf16.msra.mxu1 %v415_v3  ;;  %v434_v18 = vld [vmem:[%s672_s1 + $0x84] ss:$8 sps:$4 sm:$0xff]   ;;  %v436_v19 = vld [vmem:[%s672_s1 + $0x80] ss:$8 sps:$4 sm:$0xff]   ;;  %v437_v20 = vld [vmem:[%s672_s1 + $0x94] ss:$8 sps:$4 sm:$0xff]  }
   0x8   :  { %261 = vmatprep.subr.bf16.mxu0 %v416_v4  ;;  %380 = vmatprep.subr.bf16.mxu1 %v416_v4  ;;  %v439_v21 = vld [vmem:[%s672_s1 + $0x90] ss:$8 sps:$4 sm:$0xff]   ;;  %v440_v22 = vld [vmem:[%s672_s1 + $0xa4] ss:$8 sps:$4 sm:$0xff]   ;;  %v442_v23 = vld [vmem:[%s672_s1 + $0xa0] ss:$8 sps:$4 sm:$0xff]  }
   0x9   :  { %289 = vmatprep.mubr.bf16.mxu0 %v460_v13  ;;  %v443_v24 = vld [vmem:[%s672_s1 + $0xb4] ss:$8 sps:$4 sm:$0xff]   ;;  %v445_v25 = vld [vmem:[%s672_s1 + $0xb0] ss:$8 sps:$4 sm:$0xff]   ;;  %v446_v26 = vld [vmem:[%s672_s1 + $0xc4] ss:$8 sps:$4 sm:$0xff]  }
   0xa   :  { %v448_v27 = vld [vmem:[%s672_s1 + $0xc0] ss:$8 sps:$4 sm:$0xff]   ;;  %v449_v28 = vld [vmem:[%s672_s1 + $0xd4] ss:$8 sps:$4 sm:$0xff]   ;;  %v451_v29 = vld [vmem:[%s672_s1 + $0xd0] ss:$8 sps:$4 sm:$0xff]  }
   0xb   :  { %262 = vmatpush1.bf16.msra.mxu0 %v418_v5  ;;  %396 = vmatpush1.bf16.msra.mxu1 %v418_v5  ;;  %v452_v30 = vld [vmem:[%s672_s1 + $0xe4] ss:$8 sps:$4 sm:$0xff]   ;;  %v454_v31 = vld [vmem:[%s672_s1 + $0xe0] ss:$8 sps:$4 sm:$0xff]   ;;  %v455_v32 = vld [vmem:[%s672_s1 + $0xf4] ss:$8 sps:$4 sm:$0xff]  }
   0xc   :  { %263 = vmatprep.subr.bf16.mxu0 %v419_v6  ;;  %381 = vmatprep.subr.bf16.mxu1 %v419_v6  ;;  %v457_v33 = vld [vmem:[%s672_s1 + $0xf0] ss:$8 sps:$4 sm:$0xff]   ;;  %v458_v34 = vld [vmem:[%s673_s0] ss:$8 sps:$4 sm:$0xff]   ;;  %v313_v37 = vshrl.u32 %v312_v36, 7 }
   0xd   :  { %v461_v35 = vld [vmem:[%s673_s0 + $0x10] ss:$8 sps:$4 sm:$0xff]   ;;  %v53_v38 = vld [vmem:[%s674_s3] sm:$0xff]  ;;  %v54_v42 = vld [vmem:[%s674_s3 + $0x8] sm:$0xff] }
   0xe   :  { %v61_v39 = vld [vmem:[%s674_s3 + $0x40] sm:$0xff]  ;;  %v62_v44 = vld [vmem:[%s674_s3 + $0x48] sm:$0xff]  ;;  %v314_v46 = vsub.s32 0, %v313_v37  ;;  %v55_v48 = vld [vmem:[%s674_s3 + $0x10] sm:$0xff]  ;;  %v318_v50 = vsub.s32 1, %v313_v37 }
   0xf   :  { %264 = vmatpush1.bf16.msra.mxu0 %v421_v7  ;;  %397 = vmatpush1.bf16.msra.mxu1 %v421_v7  ;;  %v57_v40 = vld [vmem:[%s674_s3 + $0x20] sm:$0xff]  ;;  %v58_v45 = vld [vmem:[%s674_s3 + $0x28] sm:$0xff]  ;;  %v63_v49 = vld [vmem:[%s674_s3 + $0x50] sm:$0xff]  ;;  %v69_v54 = vadd.f32 %v61_v39, %v53_v38  ;;  %v70_v59 = vadd.f32 %v62_v44, %v54_v42 }
  0x10   :  { %265 = vmatprep.subr.bf16.mxu0 %v422_v8  ;;  %382 = vmatprep.subr.bf16.mxu1 %v422_v8  ;;  %v65_v41 = vld [vmem:[%s674_s3 + $0x60] sm:$0xff]  ;;  %v66_v47 = vld [vmem:[%s674_s3 + $0x68] sm:$0xff]  ;;  %v59_v51 = vld [vmem:[%s674_s3 + $0x30] sm:$0xff]  ;;  %v71_v62 = vadd.f32 %v63_v49, %v55_v48 }
  0x11   :  { %v310_v43 = vld [vmem:[%s675_s2] sm:$0x3]  ;;  %v67_v52 = vld [vmem:[%s674_s3 + $0x70] sm:$0xff]  ;;  %v56_v53 = vld [vmem:[%s674_s3 + $0x18] sm:$0xff]  ;;  %v73_v55 = vadd.f32 %v65_v41, %v57_v40  ;;  %v74_v60 = vadd.f32 %v66_v47, %v58_v45 }
  0x12   :  { %v64_v56 = vld [vmem:[%s674_s3 + $0x58] sm:$0xff]  ;;  %v315_v61 = vrot.slane %v310_v43, %v314_v46  ;;  %v75_v63 = vadd.f32 %v67_v52, %v59_v51  ;;  %v319_v2 = vrot.slane %v310_v43, %v318_v50 }
  0x13   :  { %266 = vmatpush1.bf16.msra.mxu0 %v424_v9  ;;  %398 = vmatpush1.bf16.msra.mxu1 %v424_v9  ;;  %v60_v57 = vld [vmem:[%s674_s3 + $0x38] sm:$0xff]  ;;  %v72_v3 = vadd.f32 %v64_v56, %v56_v53 }
  0x14   :  { %267 = vmatprep.subr.bf16.mxu0 %v425_v10  ;;  %383 = vmatprep.subr.bf16.mxu1 %v425_v10  ;;  %v68_v58 = vld [vmem:[%s674_s3 + $0x78] sm:$0xff] }
  0x15   :  { %v76_v4 = vadd.f32 %v68_v58, %v60_v57 }
  0x17   :  { %268 = vmatpush1.bf16.msra.mxu0 %v427_v11  ;;  %399 = vmatpush1.bf16.msra.mxu1 %v427_v11 }
  0x18   :  { %269 = vmatprep.subr.bf16.mxu0 %v428_v12  ;;  %384 = vmatprep.subr.bf16.mxu1 %v428_v12 }
  0x1b   :  { %270 = vmatpush1.bf16.msra.mxu0 %v430_v14  ;;  %400 = vmatpush1.bf16.msra.mxu1 %v430_v14 }
  0x1c   :  { %271 = vmatprep.subr.bf16.mxu0 %v431_v16  ;;  %385 = vmatprep.subr.bf16.mxu1 %v431_v16 }
  0x1f   :  { %272 = vmatpush1.bf16.msra.mxu0 %v433_v17  ;;  %401 = vmatpush1.bf16.msra.mxu1 %v433_v17 }
  0x20   :  { %273 = vmatprep.subr.bf16.mxu0 %v434_v18  ;;  %386 = vmatprep.subr.bf16.mxu1 %v434_v18 }
  0x23   :  { %274 = vmatpush1.bf16.msra.mxu0 %v436_v19  ;;  %402 = vmatpush1.bf16.msra.mxu1 %v436_v19 }
  0x24   :  { %275 = vmatprep.subr.bf16.mxu0 %v437_v20  ;;  %387 = vmatprep.subr.bf16.mxu1 %v437_v20 }
  0x27   :  { %276 = vmatpush1.bf16.msra.mxu0 %v439_v21  ;;  %403 = vmatpush1.bf16.msra.mxu1 %v439_v21 }
  0x28   :  { %277 = vmatprep.subr.bf16.mxu0 %v440_v22  ;;  %388 = vmatprep.subr.bf16.mxu1 %v440_v22 }
  0x2b   :  { %278 = vmatpush1.bf16.msra.mxu0 %v442_v23  ;;  %404 = vmatpush1.bf16.msra.mxu1 %v442_v23 }
  0x2c   :  { %279 = vmatprep.subr.bf16.mxu0 %v443_v24  ;;  %389 = vmatprep.subr.bf16.mxu1 %v443_v24 }
  0x2f   :  { %280 = vmatpush1.bf16.msra.mxu0 %v445_v25  ;;  %405 = vmatpush1.bf16.msra.mxu1 %v445_v25 }
  0x30   :  { %281 = vmatprep.subr.bf16.mxu0 %v446_v26  ;;  %390 = vmatprep.subr.bf16.mxu1 %v446_v26 }
  0x33   :  { %282 = vmatpush1.bf16.msra.mxu0 %v448_v27  ;;  %406 = vmatpush1.bf16.msra.mxu1 %v448_v27 }
  0x34   :  { %283 = vmatprep.subr.bf16.mxu0 %v449_v28  ;;  %391 = vmatprep.subr.bf16.mxu1 %v449_v28 }
  0x37   :  { %284 = vmatpush1.bf16.msra.mxu0 %v451_v29  ;;  %407 = vmatpush1.bf16.msra.mxu1 %v451_v29 }
  0x38   :  { %285 = vmatprep.subr.bf16.mxu0 %v452_v30  ;;  %392 = vmatprep.subr.bf16.mxu1 %v452_v30 }
  0x3b   :  { %286 = vmatpush1.bf16.msra.mxu0 %v454_v31  ;;  %408 = vmatpush1.bf16.msra.mxu1 %v454_v31 }
  0x3c   :  { %287 = vmatprep.subr.bf16.mxu0 %v455_v32  ;;  %393 = vmatprep.subr.bf16.mxu1 %v455_v32 }
  0x3f   :  { %288 = vmatpush1.bf16.msra.mxu0 %v457_v33  ;;  %409 = vmatpush1.bf16.msra.mxu1 %v457_v33 }
  0x42   :  { %290 = vmatmul.mubr.bf16.vlgmr.msra.gmra.mrb[0].mxu0 %v458_v34  ;;  %300 = vmatmul.mubr.bf16.vlgmr.msra.gmra.mrb[0].mxu1 %v461_v35 }
 0x115   :  { %v291_v0 = vpop.f32.mrb[0].mxu0  ;;  %v301_v1 = vpop.f32.mrb[0].mxu1 }
 0x116   :  { %v292_v5 = vadd.f32 %v291_v0, %v69_v54  ;;  %v302_v6 = vadd.f32 %v301_v1, %v73_v55  ;;  %v293_v7 = vpop.f32.mrb[1].mxu0  ;;  %v303_v8 = vpop.f32.mrb[1].mxu1 }
 0x117   :  { %v294_v9 = vadd.f32 %v293_v7, %v70_v59  ;;  %v304_v10 = vadd.f32 %v303_v8, %v74_v60  ;;  %v295_v11 = vpop.f32.mrb[2].mxu0  ;;  %v305_v12 = vpop.f32.mrb[2].mxu1 }
 0x118   :  { %v322_v13 = vadd.f32 %v315_v61, %v292_v5  ;;  %v326_v14 = vadd.f32 %v315_v61, %v302_v6  ;;  %v296_v15 = vadd.f32 %v295_v11, %v71_v62  ;;  %v306_v16 = vadd.f32 %v305_v12, %v75_v63  ;;  %v297_v17 = vpop.f32.mrb[3].mxu0  ;;  %v307_v18 = vpop.f32.mrb[3].mxu1 }
 0x119   :  { %v323_v19 = vadd.f32 %v319_v2, %v294_v9  ;;  %v327_v20 = vadd.f32 %v319_v2, %v304_v10  ;;  %v298_v21 = vadd.f32 %v297_v17, %v72_v3  ;;  %v308_v22 = vadd.f32 %v307_v18, %v76_v4 }
 0x11a   :  { %330 = vst [vmem:[%s676_s4] sm:$0xff] %v322_v13  ;;  %334 = vst [vmem:[%s676_s4 + $0x20] sm:$0xff] %v326_v14  ;;  %v324_v23 = vadd.f32 %v315_v61, %v296_v15  ;;  %v328_v24 = vadd.f32 %v315_v61, %v306_v16 }
 0x11b   :  { %331 = vst [vmem:[%s676_s4 + $0x8] sm:$0xff] %v323_v19  ;;  %335 = vst [vmem:[%s676_s4 + $0x28] sm:$0xff] %v327_v20  ;;  %v325_v25 = vadd.f32 %v319_v2, %v298_v21  ;;  %v329_v26 = vadd.f32 %v319_v2, %v308_v22 }
 0x11c   :  { %332 = vst [vmem:[%s676_s4 + $0x10] sm:$0xff] %v324_v23  ;;  %336 = vst [vmem:[%s676_s4 + $0x30] sm:$0xff] %v328_v24 }
 0x11d   :  { %333 = vst [vmem:[%s676_s4 + $0x18] sm:$0xff] %v325_v25  ;;  %337 = vst [vmem:[%s676_s4 + $0x38] sm:$0xff] %v329_v26 }

// kernel: frozen_clip_t5_forward.26
= control target key start
LH: loop header
LB: loop body
LE: loop exit
PB: predicated region body
PF: predicated region fallthrough
CT: control target
= control target key end

     0   :  { %s302_s0 = inlined_call_operand.vmem [shape: f32[2,32,256], index: 0, kind: input, shape index: {}]   ;;  %s303_s1 = inlined_call_operand.vmem [shape: f32[1,256], index: 1, kind: input, shape index: {}]   ;;  %s304_s2 = inlined_call_operand.vmem [shape: f32[1,256], index: 2, kind: input, shape index: {}]   ;;  %s305_s3 = inlined_call_operand.hbm [shape: f32[32,256], index: 3, kind: output, shape index: {}]  }
   0x1   :  { %v15_v0 = vld [vmem:[%s302_s0] sm:$0xff]  ;;  %v16_v1 = vld [vmem:[%s302_s0 + $0x8] sm:$0xff]  ;;  %v17_v10 = vld [vmem:[%s302_s0 + $0x10] sm:$0xff] }
   0x2   :  { %v23_v2 = vld [vmem:[%s302_s0 + $0x40] sm:$0xff]  ;;  %v24_v3 = vld [vmem:[%s302_s0 + $0x48] sm:$0xff]  ;;  %v18_v13 = vld [vmem:[%s302_s0 + $0x18] sm:$0xff] }
   0x3   :  { %v31_v4 = vadd.f32 %v23_v2, %v15_v0  ;;  %v19_v5 = vld [vmem:[%s302_s0 + $0x20] sm:$0xff]  ;;  %v20_v6 = vld [vmem:[%s302_s0 + $0x28] sm:$0xff]  ;;  %v32_v7 = vadd.f32 %v24_v3, %v16_v1  ;;  %v25_v14 = vld [vmem:[%s302_s0 + $0x50] sm:$0xff] }
   0x4   :  { %v27_v8 = vld [vmem:[%s302_s0 + $0x60] sm:$0xff]  ;;  %v28_v9 = vld [vmem:[%s302_s0 + $0x68] sm:$0xff]  ;;  %v26_v15 = vld [vmem:[%s302_s0 + $0x58] sm:$0xff]  ;;  %v33_v17 = vadd.f32 %v25_v14, %v17_v10 }
   0x5   :  { %v35_v11 = vadd.f32 %v27_v8, %v19_v5  ;;  %v36_v12 = vadd.f32 %v28_v9, %v20_v6  ;;  %v39_v16 = vadd.f32 %v32_v7, %v31_v4  ;;  %v34_v18 = vadd.f32 %v26_v15, %v18_v13  ;;  %v21_v19 = vld [vmem:[%s302_s0 + $0x30] sm:$0xff]  ;;  %v22_v20 = vld [vmem:[%s302_s0 + $0x38] sm:$0xff] }
   0x6   :  { %v29_v21 = vld [vmem:[%s302_s0 + $0x70] sm:$0xff]  ;;  %v30_v23 = vld [vmem:[%s302_s0 + $0x78] sm:$0xff] }
   0x7   :  { %v45_v22 = vadd.f32 %v36_v12, %v35_v11  ;;  %v37_v24 = vadd.f32 %v29_v21, %v21_v19 }
   0x8   :  { %8 = vsyncpa [#allocation3], 0  ;;  %40 = vadd.xlane.f32.xlu0 %v39_v16  ;;  %v42_v25 = vadd.f32 %v34_v18, %v33_v17  ;;  %v38_v26 = vadd.f32 %v30_v23, %v22_v20  ;;  %v106_v58 = vlaneseq  ;;  %v124_v9 = vld [vmem:[%s304_s2] sm:$0x3] }
   0x9   :  { %46 = vadd.xlane.f32.xlu1 %v45_v22 }
   0xa   :  { %v48_v27 = vadd.f32 %v38_v26, %v37_v24  ;;  %v107_v0 = vshrl.u32 %v106_v58, 7 }
   0xc   :  { %43 = vadd.xlane.f32.xlu0 %v42_v25  ;;  %v108_v5 = vsub.s32 0, %v107_v0  ;;  %v112_v6 = vsub.s32 1, %v107_v0 }
   0xd   :  { %49 = vadd.xlane.f32.xlu1 %v48_v27 }
   0xe   :  { %v129_v13 = vrot.slane %v124_v9, %v108_v5  ;;  %v133_v14 = vrot.slane %v124_v9, %v112_v6 }
  0x95   :  { %v41_v28 = vpop.xlane.xlu0 %40 }
  0x96   :  { %v52_v29 = vmul.f32 0.00390625, %v41_v28  ;;  %v47_v30 = vpop.xlane.xlu1 %46 }
  0x97   :  { %v54_v31 = vmul.f32 0.00390625, %v47_v30 }
  0x98   :  { %v56_v32 = vsub.f32 %v31_v4, %v52_v29  ;;  %v57_v33 = vsub.f32 %v32_v7, %v52_v29  ;;  %v104_v7 = vld [vmem:[%s303_s1] sm:$0x3]  ;;  %s203_s1 = smov [#allocation2]  }
  0x99   :  { %v274_v34 = vsub.f32 %v35_v11, %v54_v31  ;;  %v276_v35 = vsub.f32 %v36_v12, %v54_v31  ;;  %v44_v36 = vpop.xlane.xlu0 %43  ;;  %v109_v10 = vrot.slane %v104_v7, %v108_v5  ;;  %v113_v11 = vrot.slane %v104_v7, %v112_v6  ;;  %s157_s2 = sshll.u32 %s203_s1, 4  ;;  %s158_s2 = int_to_ptr.vmem [resolvable:$true] %s157_s2 }
  0x9a   :  { %v53_v37 = vmul.f32 0.00390625, %v44_v36  ;;  %v50_v38 = vpop.xlane.xlu1 %49  ;;  %v64_v39 = vmul.f32 %v56_v32, %v56_v32  ;;  %v65_v40 = vmul.f32 %v57_v33, %v57_v33  ;;  %s179_s20 = scalar_lea.vmem %s158_s2, 1024  ;;  %p184_p1 = scmp.lt.s32.totalorder %s158_s2, %s158_s2 }
  0x9b   :  { %v55_v41 = vmul.f32 0.00390625, %v50_v38  ;;  %v68_v42 = vmul.f32 %v274_v34, %v274_v34  ;;  %v69_v43 = vmul.f32 %v276_v35, %v276_v35  ;;  %p180_p0 = scmp.ne.s32.totalorder %s158_s2, %s179_s20  ;;  %p185_p2 = scmp.lt.s32.totalorder %s179_s20, %s179_s20 }
  0x9c   :  { %v58_v44 = vsub.f32 %v33_v17, %v53_v37  ;;  %v59_v45 = vsub.f32 %v34_v18, %v53_v37  ;;  %v72_v46 = vadd.f32 %v65_v40, %v64_v39 }
  0x9d   :  { %v62_v47 = vsub.f32 %v37_v24, %v55_v41  ;;  %v63_v48 = vsub.f32 %v38_v26, %v55_v41  ;;  %v78_v49 = vadd.f32 %v69_v43, %v68_v42  ;;  %p186_p3 = por %p185_p2, %p184_p1 }
  0x9e   :  { %73 = vadd.xlane.f32.xlu0 %v72_v46  ;;  %v66_v50 = vmul.f32 %v58_v44, %v58_v44  ;;  %v67_v51 = vmul.f32 %v59_v45, %v59_v45 }
  0x9f   :  { %v70_v52 = vmul.f32 %v62_v47, %v62_v47  ;;  %v71_v53 = vmul.f32 %v63_v48, %v63_v48  ;;  %p187_p4 = pnand %p186_p3, %p180_p0 }
  0xa0   :  { %v75_v54 = vadd.f32 %v67_v51, %v66_v50 }
  0xa1   :  { %v81_v55 = vadd.f32 %v71_v53, %v70_v52 }
  0xa2   :  { %79 = vadd.xlane.f32.xlu0 %v78_v49  ;;  %76 = vadd.xlane.f32.xlu1 %v75_v54 }
  0xa6   :  { %82 = vadd.xlane.f32.xlu1 %v81_v55 }
 0x12b   :  { %v74_v56 = vpop.xlane.xlu0 %73 }
 0x12c   :  { %v84_v57 = vmul.f32 0.00390625, %v74_v56 }
 0x12e   :  { %v88_v59 = vadd.f32 1e-05, %v84_v57 }
 0x12f   :  { %v77_v60 = vpop.xlane.xlu1 %76  ;;  %v80_v61 = vpop.xlane.xlu0 %79 }
 0x130   :  { %171 = vrsqrt.f32 %v88_v59  ;;  %v85_v62 = vmul.f32 0.00390625, %v77_v60  ;;  %v86_v63 = vmul.f32 0.00390625, %v80_v61 }
 0x132   :  { %v89_v1 = vadd.f32 1e-05, %v85_v62  ;;  %v90_v2 = vadd.f32 1e-05, %v86_v63 }
 0x133   :  { %v83_v3 = vpop.xlane.xlu1 %82 }
 0x134   :  { %173 = vrsqrt.f32 %v89_v1  ;;  %v87_v4 = vmul.f32 0.00390625, %v83_v3 }
 0x135   :  { %175 = vrsqrt.f32 %v90_v2 }
 0x136   :  { %v91_v8 = vadd.f32 1e-05, %v87_v4 }
 0x138   :  { %177 = vrsqrt.f32 %v91_v8 }
 0x13a   :  { %v172_v12 = vpop.eup %171 }
 0x13b   :  { %v96_v15 = vmul.f32 %v172_v12, %v56_v32  ;;  %v97_v16 = vmul.f32 %v172_v12, %v57_v33 }
 0x13d   :  { %v116_v17 = vmul.f32 %v109_v10, %v96_v15  ;;  %v117_v18 = vmul.f32 %v113_v11, %v97_v16 }
 0x13e   :  { %v174_v19 = vpop.eup %173 }
 0x13f   :  { %v176_v20 = vpop.eup %175  ;;  %v136_v21 = vadd.f32 %v129_v13, %v116_v17  ;;  %v137_v22 = vadd.f32 %v133_v14, %v117_v18  ;;  %v98_v23 = vmul.f32 %v174_v19, %v58_v44  ;;  %v99_v24 = vmul.f32 %v174_v19, %v59_v45 }
 0x140   :  { %v100_v25 = vmul.f32 %v176_v20, %v274_v34  ;;  %v101_v26 = vmul.f32 %v176_v20, %v276_v35 }
 0x141   :  { %144 = vst [vmem:[#allocation2] sm:$0xff] %v136_v21  ;;  %145 = vst [vmem:[#allocation2 + $0x8] sm:$0xff] %v137_v22  ;;  %v118_v27 = vmul.f32 %v109_v10, %v98_v23  ;;  %v119_v28 = vmul.f32 %v113_v11, %v99_v24 }
 0x142   :  { %v178_v29 = vpop.eup %177  ;;  %v120_v30 = vmul.f32 %v109_v10, %v100_v25  ;;  %v121_v31 = vmul.f32 %v113_v11, %v101_v26 }
 0x143   :  { %v138_v32 = vadd.f32 %v129_v13, %v118_v27  ;;  %v139_v33 = vadd.f32 %v133_v14, %v119_v28  ;;  %v102_v36 = vmul.f32 %v178_v29, %v62_v47  ;;  %v103_v37 = vmul.f32 %v178_v29, %v63_v48 }
 0x144   :  { %v140_v38 = vadd.f32 %v129_v13, %v120_v30  ;;  %v141_v39 = vadd.f32 %v133_v14, %v121_v31 }
 0x145   :  { %146 = vst [vmem:[#allocation2 + $0x10] sm:$0xff] %v138_v32  ;;  %147 = vst [vmem:[#allocation2 + $0x18] sm:$0xff] %v139_v33  ;;  %v122_v34 = vmul.f32 %v109_v10, %v102_v36  ;;  %v123_v40 = vmul.f32 %v113_v11, %v103_v37 }
 0x146   :  { %148 = vst [vmem:[#allocation2 + $0x20] sm:$0xff] %v140_v38  ;;  %149 = vst [vmem:[#allocation2 + $0x28] sm:$0xff] %v141_v39 }
 0x147   :  { %v142_v35 = vadd.f32 %v129_v13, %v122_v34  ;;  %v143_v41 = vadd.f32 %v133_v14, %v123_v40 }
 0x149   :  { %150 = vst [vmem:[#allocation2 + $0x30] sm:$0xff] %v142_v35  ;;  %151 = vst [vmem:[#allocation2 + $0x38] sm:$0xff] %v143_v41 }
 0x14a   :  { %190 = shalt.err (!%p187_p4)
}
 0x14b   :  { %s191_s23 = scalar_lea.hbm %s305_s3, 1024 }
 0x14c   :  { %p192_p5 = scmp.ne.s32.totalorder %s305_s3, %s191_s23  ;;  %p195_p6 = scmp.lt.u32.totalorder %s191_s23, %s305_s3 }
 0x14e   :  { %p197_p7 = pnand %p195_p6, %p192_p5 }
 0x150   :  { %200 = shalt.err (!%p197_p7)
}
 0x151   :  { %s204_s28 = smov 256   ;;  %s205_s29 = smov 16  }
 0x152   :  { %163 = dma.vmem_to_hbm [thread:$0]  %s158_s2, 1024, %s305_s3, [#allocation3], %s204_s28, %s204_s28, %s205_s29  }
 0x153   :  { %201 = dma.done.wait [#allocation3], 1024  }
 0x154   :  { %202 = vsyncadd [#allocation3], 4294966272 }
 0x155   :  { %167 = vsyncpa [#allocation3], 1 }

// kernel: frozen_clip_t5_forward.21
= control target key start
LH: loop header
LB: loop body
LE: loop exit
PB: predicated region body
PF: predicated region fallthrough
CT: control target
= control target key end

     0   :  { %s2478_s24 = smov 0   ;;  %s2480_s25 = smov 0   ;;  %s3040_s0 = inlined_call_operand.vmem [shape: f32[32,256], index: 0, kind: input, shape index: {}]   ;;  %s3041_s1 = inlined_call_operand.vmem [shape: f32[1,256], index: 1, kind: input, shape index: {}]   ;;  %s3042_s2 = inlined_call_operand.vmem [shape: f32[1,256], index: 2, kind: input, shape index: {}]   ;;  %s3043_s3 = inlined_call_operand.vmem [shape: bf16[256,1024], index: 3, kind: input, shape index: {}]   ;;  %s3044_s4 = inlined_call_operand.vmem [shape: f32[1,1024], index: 4, kind: input, shape index: {}]   ;;  %s3045_s5 = inlined_call_operand.vmem [shape: bf16[1024,256], index: 5, kind: input, shape index: {}]   ;;  %s3046_s6 = inlined_call_operand.vmem [shape: f32[1,256], index: 6, kind: input, shape index: {}]   ;;  %s3047_s7 = inlined_call_operand.vmem [shape: f32[2,32,256], index: 7, kind: output, shape index: {}]  }
   0x1   :  { %s2482_s26 = smov 0   ;;  %s2484_s27 = smov 0  }
   0x2   :  { %s2486_s28 = smov 0  }
   0x3 LB: > { %s29_s29 = sadd.s32 1, %s2432_s27  ;;  %p108_p1 = scmp.ne.s32.totalorder %s2424_s25, %s2420_s24  ;;  %s2436_s28 = sphi %s2486_s28, %s17_s28   ;;  %s2432_s27 = sphi %s2484_s27, %s3051_s27   ;;  %s2428_s26 = sphi %s2482_s26, %s3050_s26   ;;  %s2424_s25 = sphi %s2480_s25, %s3049_s25   ;;  %s2420_s24 = sphi %s2478_s24, %s3048_s24  }
   0x4   : > { %p31_p0 = scmp.ge.s32.totalorder %s29_s29, 2  ;;  %p109_p2 = scmp.eq.s32.totalorder %s2436_s28, 0 }
   0x5   : > { %s101_s8 = sadd.s32 1, %s2424_s25  ;;  %p1925_p5 = scmp.ge.s32.totalorder %s2436_s28, 2 }
   0x6   : > { %s3053_s29 = smov (%p31_p0, %s29_s29), 0  ;;  %p110_p3 = por %p109_p2, %p108_p1 }
   0x7   : > { %s98_s30 = ssub.s32 %s2432_s27, %s3053_s29  ;;  %249 = sbr.rel (%p1925_p5) target bundleno = 50 (0x32), region = 32 }
   0x8   : > { %p99_p4 = scmp.eq.s32.totalorder %s98_s30, 0 }
   0xa   : > { %s2513_s9 = scalar_select %p99_p4, %s2424_s25, %s101_s8  }
   0xe   : > { %252 = sbr.rel (!%p110_p3) target bundleno = 50 (0x32), region = 36  ;;  %s254_s10 = sand.u32 (%p110_p3), 1, %s2424_s25  }
   0xf   : > { %s2083_s11 = sshll.u32 (%p110_p3), %s2432_s27, 4  ;;  %s1926_s12 = sshll.u32 (%p110_p3), %s254_s10, 9 }
  0x10   : > { %s2521_s15 = scalar_lea.vmem (%p110_p3), %s3043_s3, %s2083_s11  ;;  %s2526_s16 = scalar_lea.vmem (%p110_p3), [#allocation3], %s1926_s12 }
  0x11   : > { %v273_v0 = vld [vmem:[%s2521_s15] sm:$0xff] (%p110_p3)  ;;  %v275_v1 = vld [vmem:[%s2521_s15 + $0x8] sm:$0xff] (%p110_p3) }
  0x12   : > { %v277_v2 = vld [vmem:[%s2521_s15 + $0x20] sm:$0xff] (%p110_p3)  ;;  %274 = vst [vmem:[%s2526_s16] sm:$0xff] (%p110_p3), %v273_v0  ;;  %276 = vst [vmem:[%s2526_s16 + $0x8] sm:$0xff] (%p110_p3), %v275_v1  ;;  %v279_v3 = vld [vmem:[%s2521_s15 + $0x28] sm:$0xff] (%p110_p3) }
  0x13   : > { %278 = vst [vmem:[%s2526_s16 + $0x10] sm:$0xff] (%p110_p3), %v277_v2  ;;  %v281_v4 = vld [vmem:[%s2521_s15 + $0x40] sm:$0xff] (%p110_p3)  ;;  %v283_v5 = vld [vmem:[%s2521_s15 + $0x48] sm:$0xff] (%p110_p3)  ;;  %280 = vst [vmem:[%s2526_s16 + $0x18] sm:$0xff] (%p110_p3), %v279_v3 }
  0x14   : > { %282 = vst [vmem:[%s2526_s16 + $0x20] sm:$0xff] (%p110_p3), %v281_v4  ;;  %284 = vst [vmem:[%s2526_s16 + $0x28] sm:$0xff] (%p110_p3), %v283_v5  ;;  %v285_v6 = vld [vmem:[%s2521_s15 + $0x60] sm:$0xff] (%p110_p3)  ;;  %v287_v7 = vld [vmem:[%s2521_s15 + $0x68] sm:$0xff] (%p110_p3) }
  0x15   : > { %v289_v8 = vld [vmem:[%s2521_s15 + $0x80] sm:$0xff]  ;;  %286 = vst [vmem:[%s2526_s16 + $0x30] sm:$0xff] %v285_v6  ;;  %288 = vst [vmem:[%s2526_s16 + $0x38] sm:$0xff] %v287_v7  ;;  %v291_v9 = vld [vmem:[%s2521_s15 + $0x88] sm:$0xff] }
  0x16   : > { %290 = vst [vmem:[%s2526_s16 + $0x40] sm:$0xff] %v289_v8  ;;  %v293_v10 = vld [vmem:[%s2521_s15 + $0xa0] sm:$0xff]  ;;  %v295_v11 = vld [vmem:[%s2521_s15 + $0xa8] sm:$0xff]  ;;  %292 = vst [vmem:[%s2526_s16 + $0x48] sm:$0xff] %v291_v9 }
  0x17   : > { %294 = vst [vmem:[%s2526_s16 + $0x50] sm:$0xff] %v293_v10  ;;  %296 = vst [vmem:[%s2526_s16 + $0x58] sm:$0xff] %v295_v11  ;;  %v297_v12 = vld [vmem:[%s2521_s15 + $0xc0] sm:$0xff]  ;;  %v299_v13 = vld [vmem:[%s2521_s15 + $0xc8] sm:$0xff] }
  0x18   : > { %v301_v14 = vld [vmem:[%s2521_s15 + $0xe0] sm:$0xff]  ;;  %298 = vst [vmem:[%s2526_s16 + $0x60] sm:$0xff] %v297_v12  ;;  %300 = vst [vmem:[%s2526_s16 + $0x68] sm:$0xff] %v299_v13  ;;  %v303_v15 = vld [vmem:[%s2521_s15 + $0xe8] sm:$0xff] }
  0x19   : > { %302 = vst [vmem:[%s2526_s16 + $0x70] sm:$0xff] %v301_v14  ;;  %v305_v16 = vld [vmem:[%s2521_s15 + $0x100] sm:$0xff]  ;;  %v307_v17 = vld [vmem:[%s2521_s15 + $0x108] sm:$0xff]  ;;  %304 = vst [vmem:[%s2526_s16 + $0x78] sm:$0xff] %v303_v15 }
  0x1a   : > { %306 = vst [vmem:[%s2526_s16 + $0x80] sm:$0xff] %v305_v16  ;;  %308 = vst [vmem:[%s2526_s16 + $0x88] sm:$0xff] %v307_v17  ;;  %v309_v18 = vld [vmem:[%s2521_s15 + $0x120] sm:$0xff]  ;;  %v311_v19 = vld [vmem:[%s2521_s15 + $0x128] sm:$0xff] }
  0x1b   : > { %v313_v20 = vld [vmem:[%s2521_s15 + $0x140] sm:$0xff]  ;;  %310 = vst [vmem:[%s2526_s16 + $0x90] sm:$0xff] %v309_v18  ;;  %312 = vst [vmem:[%s2526_s16 + $0x98] sm:$0xff] %v311_v19  ;;  %v315_v21 = vld [vmem:[%s2521_s15 + $0x148] sm:$0xff] }
  0x1c   : > { %314 = vst [vmem:[%s2526_s16 + $0xa0] sm:$0xff] %v313_v20  ;;  %v317_v22 = vld [vmem:[%s2521_s15 + $0x160] sm:$0xff]  ;;  %v319_v23 = vld [vmem:[%s2521_s15 + $0x168] sm:$0xff]  ;;  %316 = vst [vmem:[%s2526_s16 + $0xa8] sm:$0xff] %v315_v21 }
  0x1d   : > { %318 = vst [vmem:[%s2526_s16 + $0xb0] sm:$0xff] %v317_v22  ;;  %320 = vst [vmem:[%s2526_s16 + $0xb8] sm:$0xff] %v319_v23  ;;  %v321_v24 = vld [vmem:[%s2521_s15 + $0x180] sm:$0xff]  ;;  %v323_v25 = vld [vmem:[%s2521_s15 + $0x188] sm:$0xff] }
  0x1e   : > { %v325_v26 = vld [vmem:[%s2521_s15 + $0x1a0] sm:$0xff]  ;;  %322 = vst [vmem:[%s2526_s16 + $0xc0] sm:$0xff] %v321_v24  ;;  %324 = vst [vmem:[%s2526_s16 + $0xc8] sm:$0xff] %v323_v25  ;;  %v327_v27 = vld [vmem:[%s2521_s15 + $0x1a8] sm:$0xff] }
  0x1f   : > { %326 = vst [vmem:[%s2526_s16 + $0xd0] sm:$0xff] %v325_v26  ;;  %v329_v28 = vld [vmem:[%s2521_s15 + $0x1c0] sm:$0xff]  ;;  %v331_v29 = vld [vmem:[%s2521_s15 + $0x1c8] sm:$0xff]  ;;  %328 = vst [vmem:[%s2526_s16 + $0xd8] sm:$0xff] %v327_v27 }
  0x20   : > { %330 = vst [vmem:[%s2526_s16 + $0xe0] sm:$0xff] %v329_v28  ;;  %332 = vst [vmem:[%s2526_s16 + $0xe8] sm:$0xff] %v331_v29  ;;  %v333_v30 = vld [vmem:[%s2521_s15 + $0x1e0] sm:$0xff]  ;;  %v335_v31 = vld [vmem:[%s2521_s15 + $0x1e8] sm:$0xff] }
  0x21   : > { %v337_v32 = vld [vmem:[%s2521_s15 + $0x200] sm:$0xff]  ;;  %334 = vst [vmem:[%s2526_s16 + $0xf0] sm:$0xff] %v333_v30  ;;  %336 = vst [vmem:[%s2526_s16 + $0xf8] sm:$0xff] %v335_v31  ;;  %v339_v33 = vld [vmem:[%s2521_s15 + $0x208] sm:$0xff] }
  0x22   : > { %338 = vst [vmem:[%s2526_s16 + $0x100] sm:$0xff] %v337_v32  ;;  %v341_v34 = vld [vmem:[%s2521_s15 + $0x220] sm:$0xff]  ;;  %v343_v35 = vld [vmem:[%s2521_s15 + $0x228] sm:$0xff]  ;;  %340 = vst [vmem:[%s2526_s16 + $0x108] sm:$0xff] %v339_v33 }
  0x23   : > { %342 = vst [vmem:[%s2526_s16 + $0x110] sm:$0xff] %v341_v34  ;;  %344 = vst [vmem:[%s2526_s16 + $0x118] sm:$0xff] %v343_v35  ;;  %v345_v36 = vld [vmem:[%s2521_s15 + $0x240] sm:$0xff]  ;;  %v347_v37 = vld [vmem:[%s2521_s15 + $0x248] sm:$0xff] }
  0x24   : > { %v349_v38 = vld [vmem:[%s2521_s15 + $0x260] sm:$0xff]  ;;  %346 = vst [vmem:[%s2526_s16 + $0x120] sm:$0xff] %v345_v36  ;;  %348 = vst [vmem:[%s2526_s16 + $0x128] sm:$0xff] %v347_v37  ;;  %v351_v39 = vld [vmem:[%s2521_s15 + $0x268] sm:$0xff] }
  0x25   : > { %350 = vst [vmem:[%s2526_s16 + $0x130] sm:$0xff] %v349_v38  ;;  %v353_v40 = vld [vmem:[%s2521_s15 + $0x280] sm:$0xff]  ;;  %v355_v41 = vld [vmem:[%s2521_s15 + $0x288] sm:$0xff]  ;;  %352 = vst [vmem:[%s2526_s16 + $0x138] sm:$0xff] %v351_v39 }
  0x26   : > { %354 = vst [vmem:[%s2526_s16 + $0x140] sm:$0xff] %v353_v40  ;;  %356 = vst [vmem:[%s2526_s16 + $0x148] sm:$0xff] %v355_v41  ;;  %v357_v42 = vld [vmem:[%s2521_s15 + $0x2a0] sm:$0xff]  ;;  %v359_v43 = vld [vmem:[%s2521_s15 + $0x2a8] sm:$0xff] }
  0x27   : > { %v361_v44 = vld [vmem:[%s2521_s15 + $0x2c0] sm:$0xff]  ;;  %358 = vst [vmem:[%s2526_s16 + $0x150] sm:$0xff] %v357_v42  ;;  %360 = vst [vmem:[%s2526_s16 + $0x158] sm:$0xff] %v359_v43  ;;  %v363_v45 = vld [vmem:[%s2521_s15 + $0x2c8] sm:$0xff] }
  0x28   : > { %362 = vst [vmem:[%s2526_s16 + $0x160] sm:$0xff] %v361_v44  ;;  %v365_v46 = vld [vmem:[%s2521_s15 + $0x2e0] sm:$0xff]  ;;  %v367_v47 = vld [vmem:[%s2521_s15 + $0x2e8] sm:$0xff]  ;;  %364 = vst [vmem:[%s2526_s16 + $0x168] sm:$0xff] %v363_v45 }
  0x29   : > { %366 = vst [vmem:[%s2526_s16 + $0x170] sm:$0xff] %v365_v46  ;;  %368 = vst [vmem:[%s2526_s16 + $0x178] sm:$0xff] %v367_v47  ;;  %v369_v48 = vld [vmem:[%s2521_s15 + $0x300] sm:$0xff]  ;;  %v371_v49 = vld [vmem:[%s2521_s15 + $0x308] sm:$0xff] }
  0x2a   : > { %v373_v50 = vld [vmem:[%s2521_s15 + $0x320] sm:$0xff]  ;;  %370 = vst [vmem:[%s2526_s16 + $0x180] sm:$0xff] %v369_v48  ;;  %372 = vst [vmem:[%s2526_s16 + $0x188] sm:$0xff] %v371_v49  ;;  %v375_v51 = vld [vmem:[%s2521_s15 + $0x328] sm:$0xff] }
  0x2b   : > { %374 = vst [vmem:[%s2526_s16 + $0x190] sm:$0xff] %v373_v50  ;;  %v377_v52 = vld [vmem:[%s2521_s15 + $0x340] sm:$0xff]  ;;  %v379_v53 = vld [vmem:[%s2521_s15 + $0x348] sm:$0xff]  ;;  %376 = vst [vmem:[%s2526_s16 + $0x198] sm:$0xff] %v375_v51 }
  0x2c   : > { %378 = vst [vmem:[%s2526_s16 + $0x1a0] sm:$0xff] %v377_v52  ;;  %380 = vst [vmem:[%s2526_s16 + $0x1a8] sm:$0xff] %v379_v53  ;;  %v381_v54 = vld [vmem:[%s2521_s15 + $0x360] sm:$0xff]  ;;  %v383_v55 = vld [vmem:[%s2521_s15 + $0x368] sm:$0xff] }
  0x2d   : > { %v385_v56 = vld [vmem:[%s2521_s15 + $0x380] sm:$0xff]  ;;  %382 = vst [vmem:[%s2526_s16 + $0x1b0] sm:$0xff] %v381_v54  ;;  %384 = vst [vmem:[%s2526_s16 + $0x1b8] sm:$0xff] %v383_v55  ;;  %v387_v57 = vld [vmem:[%s2521_s15 + $0x388] sm:$0xff] }
  0x2e   : > { %386 = vst [vmem:[%s2526_s16 + $0x1c0] sm:$0xff] %v385_v56  ;;  %v389_v58 = vld [vmem:[%s2521_s15 + $0x3a0] sm:$0xff]  ;;  %v391_v59 = vld [vmem:[%s2521_s15 + $0x3a8] sm:$0xff]  ;;  %388 = vst [vmem:[%s2526_s16 + $0x1c8] sm:$0xff] %v387_v57 }
  0x2f   : > { %390 = vst [vmem:[%s2526_s16 + $0x1d0] sm:$0xff] %v389_v58  ;;  %392 = vst [vmem:[%s2526_s16 + $0x1d8] sm:$0xff] %v391_v59  ;;  %v393_v60 = vld [vmem:[%s2521_s15 + $0x3c0] sm:$0xff]  ;;  %v395_v61 = vld [vmem:[%s2521_s15 + $0x3c8] sm:$0xff] }
  0x30   : > { %v397_v62 = vld [vmem:[%s2521_s15 + $0x3e0] sm:$0xff]  ;;  %394 = vst [vmem:[%s2526_s16 + $0x1e0] sm:$0xff] %v393_v60  ;;  %396 = vst [vmem:[%s2526_s16 + $0x1e8] sm:$0xff] %v395_v61  ;;  %v399_v63 = vld [vmem:[%s2521_s15 + $0x3e8] sm:$0xff] }
  0x31   : > { %398 = vst [vmem:[%s2526_s16 + $0x1f0] sm:$0xff] %v397_v62  ;;  %400 = vst [vmem:[%s2526_s16 + $0x1f8] sm:$0xff] %v399_v63 }
  0x32 PF: > { %p1929_p6 = scmp.ge.s32.totalorder %s2436_s28, 1  ;;  %p427_p7 = scmp.lt.s32.totalorder %s2436_s28, 3 }
  0x34   : > { %p428_p8 = pnand %p1929_p6, %p427_p7 }
  0x35   : > { %v2658_v0 = vld [vmem:[%s3040_s0] sm:$0xff] (!%p428_p8)  ;;  %v2663_v1 = vld [vmem:[%s3040_s0 + $0x8] sm:$0xff] (!%p428_p8)  ;;  %v579_v2 = vlaneseq (!%p428_p8)  ;;  %p645_p9 = scmp.eq.s32.totalorder (!%p428_p8), %s2428_s26, 0  ;;  %p495_p10 = scmp.lt.s32.totalorder (!%p428_p8), %s2428_s26, 1  ;;  %v2682_v6 = vld [vmem:[%s3040_s0 + $0x10] sm:$0xff] (!%p428_p8) }
  0x36   : > { %431 = sbr.rel (%p428_p8) target bundleno = 916 (0x394), region = 67  ;;  %v512_v3 = vadd.f32 (!%p428_p8), %v2663_v1, %v2658_v0  ;;  %v2672_v4 = vld [vmem:[%s3040_s0 + $0x20] sm:$0xff] (!%p428_p8)  ;;  %v2677_v5 = vld [vmem:[%s3040_s0 + $0x28] sm:$0xff] (!%p428_p8)  ;;  %v2691_v9 = vld [vmem:[%s3040_s0 + $0x18] sm:$0xff] (!%p428_p8)  ;;  %s434_s10 = sand.u32 (!%p428_p8), 1, %s2420_s24  }
  0x37   : > { %v2684_v7 = vshrl.u32 (!%p428_p8), %v579_v2, 7  ;;  %v518_v8 = vadd.f32 (!%p428_p8), %v2677_v5, %v2672_v4  ;;  %v2696_v10 = vld [vmem:[%s3040_s0 + $0x30] sm:$0xff] (!%p428_p8)  ;;  %v2701_v11 = vld [vmem:[%s3040_s0 + $0x38] sm:$0xff] (!%p428_p8)  ;;  %v625_v12 = vld [vmem:[%s3046_s6] sm:$0x3] (!%p428_p8)  ;;  %v515_v13 = vadd.f32 (!%p428_p8), %v2691_v9, %v2682_v6  ;;  %s1932_s24 = sshll.u32 (!%p428_p8), %s2428_s26, 6 }
  0x38   : > { %513 = vadd.xlane.f32.xlu0 (!%p428_p8), %v512_v3  ;;  %v521_v16 = vadd.f32 (!%p428_p8), %v2701_v11, %v2696_v10  ;;  %p488_p11 = scmp.lt.s32.totalorder (!%p428_p8), %s1932_s24, 127 }
  0x39   : > { %v2710_v14 = vsub.s32 (!%p428_p8), 0, %v2684_v7  ;;  %v2713_v15 = vsub.s32 (!%p428_p8), 1, %v2684_v7  ;;  %519 = vadd.xlane.f32.xlu1 (!%p428_p8), %v518_v8 }
  0x3b   : > { %v630_v17 = vrot.slane (!%p428_p8), %v625_v12, %v2710_v14  ;;  %v634_v18 = vrot.slane (!%p428_p8), %v625_v12, %v2713_v15 }
  0x3c   : > { %516 = vadd.xlane.f32.xlu0 (!%p428_p8), %v515_v13 }
  0x3d   : > { %s646_s11 = scalar_select %p645_p9, 1, 0  ;;  %v637_v20 = vadd.f32 %v630_v17, %v2658_v0  ;;  %v638_v21 = vadd.f32 %v634_v18, %v2663_v1  ;;  %v641_v22 = vadd.f32 %v630_v17, %v2672_v4  ;;  %v642_v23 = vadd.f32 %v634_v18, %v2677_v5  ;;  %522 = vadd.xlane.f32.xlu1 %v521_v16 }
  0x3e   : > { %s496_s20 = scalar_select %p495_p10, %s2428_s26, 1  ;;  %v639_v24 = vadd.f32 %v630_v17, %v2682_v6  ;;  %v640_v25 = vadd.f32 %v634_v18, %v2691_v9  ;;  %v643_v26 = vadd.f32 %v630_v17, %v2696_v10  ;;  %v644_v27 = vadd.f32 %v634_v18, %v2701_v11 }
  0x3f   : > { %s647_s21 = scvt.s32.f32 %s646_s11  ;;  %s1930_s11 = sshll.u32 %s434_s10, 9 }
  0x40   : > { %s2085_s22 = sshll.u32 %s496_s20, 6  ;;  %s2741_s12 = scalar_lea.vmem [#allocation3], %s1930_s11 }
  0x41   : > { %v648_v19 = vstv %s647_s21  ;;  %s2726_s8 = scalar_lea.vmem %s3047_s7, %s2085_s22  ;;  %v2134_v36 = vld [vmem:[%s2741_s12 + $0x4] ss:$16 sps:$4 sm:$0xff]   ;;  %v2136_v37 = vld [vmem:[%s2741_s12] ss:$16 sps:$4 sm:$0xff]   ;;  %s3055_s24 = smov (!%p488_p11, %s1932_s24), 127 }
  0x42   : > { %v649_v28 = vmul.f32 %v648_v19, %v637_v20  ;;  %v650_v29 = vmul.f32 %v648_v19, %v638_v21  ;;  %v653_v30 = vmul.f32 %v648_v19, %v641_v22  ;;  %v654_v31 = vmul.f32 %v648_v19, %v642_v23  ;;  %1075 = vmatprep.subr.bf16.mxu1 %v2134_v36  ;;  %v2137_v38 = vld [vmem:[%s2741_s12 + $0x24] ss:$16 sps:$4 sm:$0xff]   ;;  %v2139_v39 = vld [vmem:[%s2741_s12 + $0x20] ss:$16 sps:$4 sm:$0xff]   ;;  %s2084_s13 = sshll.u32 %s3055_s24, 3  ;;  %s1931_s21 = sshll.u32 %s2428_s26, 2 }
  0x43   : > { %v651_v32 = vmul.f32 %v648_v19, %v639_v24  ;;  %v652_v33 = vmul.f32 %v648_v19, %v640_v25  ;;  %v655_v34 = vmul.f32 %v648_v19, %v643_v26  ;;  %v656_v35 = vmul.f32 %v648_v19, %v644_v27  ;;  %1076 = vmatpush1.bf16.msra.mxu1 %v2136_v37  ;;  %v2140_v40 = vld [vmem:[%s2741_s12 + $0x44] ss:$16 sps:$4 sm:$0xff]   ;;  %v2142_v41 = vld [vmem:[%s2741_s12 + $0x40] ss:$16 sps:$4 sm:$0xff]   ;;  %s2820_s16 = scalar_lea.vmem %s3045_s5, %s2084_s13  ;;  %p481_p12 = scmp.lt.s32.totalorder %s1931_s21, 7 }
  0x44   : > { %657 = vst [vmem:[%s2726_s8] sm:$0xff] %v649_v28  ;;  %658 = vst [vmem:[%s2726_s8 + $0x8] sm:$0xff] %v650_v29  ;;  %1077 = vmatprep.subr.bf16.mxu1 %v2137_v38  ;;  %v2143_v42 = vld [vmem:[%s2741_s12 + $0x64] ss:$16 sps:$4 sm:$0xff]   ;;  %v2145_v43 = vld [vmem:[%s2741_s12 + $0x60] ss:$16 sps:$4 sm:$0xff]  }
  0x45   : > { %661 = vst [vmem:[%s2726_s8 + $0x20] sm:$0xff] %v653_v30  ;;  %662 = vst [vmem:[%s2726_s8 + $0x28] sm:$0xff] %v654_v31  ;;  %v2146_v44 = vld [vmem:[%s2741_s12 + $0x84] ss:$16 sps:$4 sm:$0xff]   ;;  %v2148_v45 = vld [vmem:[%s2741_s12 + $0x80] ss:$16 sps:$4 sm:$0xff]  }
  0x46   : > { %659 = vst [vmem:[%s2726_s8 + $0x10] sm:$0xff] %v651_v32  ;;  %660 = vst [vmem:[%s2726_s8 + $0x18] sm:$0xff] %v652_v33  ;;  %v2149_v46 = vld [vmem:[%s2741_s12 + $0xa4] ss:$16 sps:$4 sm:$0xff]   ;;  %v2151_v47 = vld [vmem:[%s2741_s12 + $0xa0] ss:$16 sps:$4 sm:$0xff]  }
  0x47   : > { %663 = vst [vmem:[%s2726_s8 + $0x30] sm:$0xff] %v655_v34  ;;  %664 = vst [vmem:[%s2726_s8 + $0x38] sm:$0xff] %v656_v35  ;;  %1078 = vmatpush1.bf16.msra.mxu1 %v2139_v39  ;;  %v2152_v48 = vld [vmem:[%s2741_s12 + $0xc4] ss:$16 sps:$4 sm:$0xff]   ;;  %v2154_v49 = vld [vmem:[%s2741_s12 + $0xc0] ss:$16 sps:$4 sm:$0xff]  }
  0x48   : > { %1079 = vmatprep.subr.bf16.mxu1 %v2140_v40  ;;  %v2155_v50 = vld [vmem:[%s2741_s12 + $0xe4] ss:$16 sps:$4 sm:$0xff]   ;;  %v2157_v51 = vld [vmem:[%s2741_s12 + $0xe0] ss:$16 sps:$4 sm:$0xff]   ;;  %v2184_v35 = vld [vmem:[%s2741_s12 + $0xc] ss:$16 sps:$4 sm:$0xff]  }
  0x49   : > { %v2158_v52 = vld [vmem:[%s2741_s12 + $0x104] ss:$16 sps:$4 sm:$0xff]   ;;  %v2160_v53 = vld [vmem:[%s2741_s12 + $0x100] ss:$16 sps:$4 sm:$0xff]   ;;  %s3057_s21 = smov (!%p481_p12, %s1931_s21), 7 }
  0x4a   : > { %v2161_v21 = vld [vmem:[%s2741_s12 + $0x124] ss:$16 sps:$4 sm:$0xff]   ;;  %v2163_v22 = vld [vmem:[%s2741_s12 + $0x120] ss:$16 sps:$4 sm:$0xff]   ;;  %s483_s30 = scalar_lea.vmem %s3044_s4, %s3057_s21 }
  0x4b   : > { %1080 = vmatpush1.bf16.msra.mxu1 %v2142_v41  ;;  %v2164_v23 = vld [vmem:[%s2741_s12 + $0x144] ss:$16 sps:$4 sm:$0xff]   ;;  %v2166_v24 = vld [vmem:[%s2741_s12 + $0x140] ss:$16 sps:$4 sm:$0xff]  }
  0x4c   : > { %1081 = vmatprep.subr.bf16.mxu1 %v2143_v42  ;;  %v2167_v25 = vld [vmem:[%s2741_s12 + $0x164] ss:$16 sps:$4 sm:$0xff]   ;;  %v2169_v26 = vld [vmem:[%s2741_s12 + $0x160] ss:$16 sps:$4 sm:$0xff]  }
  0x4d   : > { %v2170_v27 = vld [vmem:[%s2741_s12 + $0x184] ss:$16 sps:$4 sm:$0xff]   ;;  %v2172_v28 = vld [vmem:[%s2741_s12 + $0x180] ss:$16 sps:$4 sm:$0xff]  }
  0x4e   : > { %v2173_v29 = vld [vmem:[%s2741_s12 + $0x1a4] ss:$16 sps:$4 sm:$0xff]   ;;  %v2175_v30 = vld [vmem:[%s2741_s12 + $0x1a0] ss:$16 sps:$4 sm:$0xff]  }
  0x4f   : > { %1082 = vmatpush1.bf16.msra.mxu1 %v2145_v43  ;;  %v2176_v31 = vld [vmem:[%s2741_s12 + $0x1c4] ss:$16 sps:$4 sm:$0xff]   ;;  %v2178_v32 = vld [vmem:[%s2741_s12 + $0x1c0] ss:$16 sps:$4 sm:$0xff]  }
  0x50   : > { %1083 = vmatprep.subr.bf16.mxu1 %v2146_v44  ;;  %v2179_v33 = vld [vmem:[%s2741_s12 + $0x1e4] ss:$16 sps:$4 sm:$0xff]   ;;  %v2181_v34 = vld [vmem:[%s2741_s12 + $0x1e0] ss:$16 sps:$4 sm:$0xff]  }
  0x51   : > { %v2230_v36 = vld [vmem:[%s2820_s16 + $0x4] ss:$8 sps:$4 sm:$0xff]   ;;  %v2232_v37 = vld [vmem:[%s2820_s16] ss:$8 sps:$4 sm:$0xff]   ;;  %v2233_v38 = vld [vmem:[%s2820_s16 + $0x14] ss:$8 sps:$4 sm:$0xff]  }
  0x52   : > { %1709 = vmatprep.subr.bf16.mxu0 %v2230_v36  ;;  %v2235_v39 = vld [vmem:[%s2820_s16 + $0x10] ss:$8 sps:$4 sm:$0xff]   ;;  %v2236_v40 = vld [vmem:[%s2820_s16 + $0x24] ss:$8 sps:$4 sm:$0xff]   ;;  %v2238_v41 = vld [vmem:[%s2820_s16 + $0x20] ss:$8 sps:$4 sm:$0xff]  }
  0x53   : > { %1084 = vmatpush1.bf16.msra.mxu1 %v2148_v45  ;;  %1710 = vmatpush1.bf16.msra.mxu0 %v2232_v37  ;;  %v2239_v42 = vld [vmem:[%s2820_s16 + $0x34] ss:$8 sps:$4 sm:$0xff]   ;;  %v2241_v43 = vld [vmem:[%s2820_s16 + $0x30] ss:$8 sps:$4 sm:$0xff]   ;;  %v2242_v44 = vld [vmem:[%s2820_s16 + $0x44] ss:$8 sps:$4 sm:$0xff]  }
  0x54   : > { %1085 = vmatprep.subr.bf16.mxu1 %v2149_v46  ;;  %1711 = vmatprep.subr.bf16.mxu0 %v2233_v38  ;;  %v2244_v45 = vld [vmem:[%s2820_s16 + $0x40] ss:$8 sps:$4 sm:$0xff]   ;;  %v2245_v46 = vld [vmem:[%s2820_s16 + $0x54] ss:$8 sps:$4 sm:$0xff]  }
  0x57   : > { %1086 = vmatpush1.bf16.msra.mxu1 %v2151_v47  ;;  %1712 = vmatpush1.bf16.msra.mxu0 %v2235_v39  ;;  %v2247_v47 = vld [vmem:[%s2820_s16 + $0x50] ss:$8 sps:$4 sm:$0xff]   ;;  %v2190_v39 = vld [vmem:[%s2741_s12 + $0x4c] ss:$16 sps:$4 sm:$0xff]  }
  0x58   : > { %1087 = vmatprep.subr.bf16.mxu1 %v2152_v48  ;;  %1713 = vmatprep.subr.bf16.mxu0 %v2236_v40  ;;  %v2248_v48 = vld [vmem:[%s2820_s16 + $0x64] ss:$8 sps:$4 sm:$0xff]  }
  0x5b   : > { %1088 = vmatpush1.bf16.msra.mxu1 %v2154_v49  ;;  %1714 = vmatpush1.bf16.msra.mxu0 %v2238_v41 }
  0x5c   : > { %1089 = vmatprep.subr.bf16.mxu1 %v2155_v50  ;;  %1715 = vmatprep.subr.bf16.mxu0 %v2239_v42  ;;  %v2188_v42 = vld [vmem:[%s2741_s12 + $0x48] ss:$16 sps:$4 sm:$0xff]  }
  0x5f   : > { %1090 = vmatpush1.bf16.msra.mxu1 %v2157_v51  ;;  %1716 = vmatpush1.bf16.msra.mxu0 %v2241_v43  ;;  %v2250_v51 = vld [vmem:[%s2820_s16 + $0x60] ss:$8 sps:$4 sm:$0xff]  }
  0x60   : > { %1091 = vmatprep.subr.bf16.mxu1 %v2158_v52  ;;  %1717 = vmatprep.subr.bf16.mxu0 %v2242_v44  ;;  %v2193_v44 = vld [vmem:[%s2741_s12 + $0x6c] ss:$16 sps:$4 sm:$0xff]  }
  0x63   : > { %1092 = vmatpush1.bf16.msra.mxu1 %v2160_v53  ;;  %1718 = vmatpush1.bf16.msra.mxu0 %v2244_v45  ;;  %v2191_v45 = vld [vmem:[%s2741_s12 + $0x68] ss:$16 sps:$4 sm:$0xff]  }
  0x64   : > { %1093 = vmatprep.subr.bf16.mxu1 %v2161_v21  ;;  %1719 = vmatprep.subr.bf16.mxu0 %v2245_v46  ;;  %v2196_v46 = vld [vmem:[%s2741_s12 + $0x8c] ss:$16 sps:$4 sm:$0xff]  }
  0x67   : > { %1094 = vmatpush1.bf16.msra.mxu1 %v2163_v22  ;;  %1720 = vmatpush1.bf16.msra.mxu0 %v2247_v47  ;;  %v2194_v47 = vld [vmem:[%s2741_s12 + $0x88] ss:$16 sps:$4 sm:$0xff]  }
  0x68   : > { %1095 = vmatprep.subr.bf16.mxu1 %v2164_v23  ;;  %1721 = vmatprep.subr.bf16.mxu0 %v2248_v48  ;;  %v2199_v48 = vld [vmem:[%s2741_s12 + $0xac] ss:$16 sps:$4 sm:$0xff]  }
  0x6b   : > { %1096 = vmatpush1.bf16.msra.mxu1 %v2166_v24  ;;  %1722 = vmatpush1.bf16.msra.mxu0 %v2250_v51  ;;  %v2200_v51 = vld [vmem:[%s2741_s12 + $0xc8] ss:$16 sps:$4 sm:$0xff]  }
  0x6c   : > { %1097 = vmatprep.subr.bf16.mxu1 %v2167_v25 }
  0x6f   : > { %1098 = vmatpush1.bf16.msra.mxu1 %v2169_v26 }
  0x70   : > { %1099 = vmatprep.subr.bf16.mxu1 %v2170_v27 }
  0x73   : > { %1100 = vmatpush1.bf16.msra.mxu1 %v2172_v28 }
  0x74   : > { %1101 = vmatprep.subr.bf16.mxu1 %v2173_v29 }
  0x77   : > { %1102 = vmatpush1.bf16.msra.mxu1 %v2175_v30 }
  0x78   : > { %1103 = vmatprep.subr.bf16.mxu1 %v2176_v31 }
  0x7b   : > { %1104 = vmatpush1.bf16.msra.mxu1 %v2178_v32 }
  0x7c   : > { %1105 = vmatprep.subr.bf16.mxu1 %v2179_v33  ;;  %v2182_v33 = vld [vmem:[%s2741_s12 + $0x8] ss:$16 sps:$4 sm:$0xff]  }
  0x7f   : > { %1106 = vmatpush1.bf16.msra.mxu1 %v2181_v34 }
  0x80   : > { %1128 = vmatprep.subr.bf16.mxu1 %v2184_v35  ;;  %v2187_v35 = vld [vmem:[%s2741_s12 + $0x2c] ss:$16 sps:$4 sm:$0xff]  }
  0xc5   : > { %v514_v54 = vpop.xlane.xlu0 %513 }
  0xc6   : > { %v525_v55 = vmul.f32 0.00390625, %v514_v54  ;;  %v520_v56 = vpop.xlane.xlu1 %519 }
  0xc7   : > { %v527_v57 = vmul.f32 0.00390625, %v520_v56 }
  0xc8   : > { %v2762_v58 = vsub.f32 %v2658_v0, %v525_v55  ;;  %v2765_v59 = vsub.f32 %v2663_v1, %v525_v55 }
  0xc9   : > { %v2768_v60 = vsub.f32 %v2672_v4, %v527_v57  ;;  %v2771_v61 = vsub.f32 %v2677_v5, %v527_v57  ;;  %v517_v62 = vpop.xlane.xlu0 %516 }
  0xca   : > { %v526_v63 = vmul.f32 0.00390625, %v517_v62  ;;  %v523_v2 = vpop.xlane.xlu1 %522  ;;  %v537_v3 = vmul.f32 %v2762_v58, %v2762_v58  ;;  %v538_v8 = vmul.f32 %v2765_v59, %v2765_v59 }
  0xcb   : > { %v528_v0 = vmul.f32 0.00390625, %v523_v2  ;;  %v541_v1 = vmul.f32 %v2768_v60, %v2768_v60  ;;  %v542_v4 = vmul.f32 %v2771_v61, %v2771_v61 }
  0xcc   : > { %v2782_v12 = vsub.f32 %v2682_v6, %v526_v63  ;;  %v2785_v5 = vsub.f32 %v2691_v9, %v526_v63  ;;  %v545_v13 = vadd.f32 %v538_v8, %v537_v3  ;;  %v577_v8 = vld [vmem:[%s3041_s1] sm:$0x3] }
  0xcd   : > { %v2788_v16 = vsub.f32 %v2696_v10, %v528_v0  ;;  %v2791_v17 = vsub.f32 %v2701_v11, %v528_v0  ;;  %v551_v18 = vadd.f32 %v542_v4, %v541_v1  ;;  %v582_v1 = vrot.slane %v577_v8, %v2710_v14 }
  0xce   : > { %546 = vadd.xlane.f32.xlu0 %v545_v13  ;;  %v539_v6 = vmul.f32 %v2782_v12, %v2782_v12  ;;  %v540_v19 = vmul.f32 %v2785_v5, %v2785_v5  ;;  %v586_v4 = vrot.slane %v577_v8, %v2713_v15  ;;  %v2220_v8 = vld [vmem:[%s2741_s12 + $0x18c] ss:$16 sps:$4 sm:$0xff]  }
  0xcf   : > { %v543_v9 = vmul.f32 %v2788_v16, %v2788_v16  ;;  %v544_v10 = vmul.f32 %v2791_v17, %v2791_v17 }
  0xd0   : > { %v548_v11 = vadd.f32 %v540_v19, %v539_v6 }
  0xd1   : > { %v554_v20 = vadd.f32 %v544_v10, %v543_v9 }
  0xd2   : > { %552 = vadd.xlane.f32.xlu0 %v551_v18  ;;  %549 = vadd.xlane.f32.xlu1 %v548_v11  ;;  %v597_v18 = vld [vmem:[%s3042_s2] sm:$0x3] }
  0xd3   : > { %v602_v10 = vrot.slane %v597_v18, %v2710_v14  ;;  %v606_v11 = vrot.slane %v597_v18, %v2713_v15  ;;  %v2224_v18 = vld [vmem:[%s2741_s12 + $0x1c8] ss:$16 sps:$4 sm:$0xff]  }
  0xd6   : > { %555 = vadd.xlane.f32.xlu1 %v554_v20 }
 0x15b   : > { %v547_v49 = vpop.xlane.xlu0 %546 }
 0x15c   : > { %v557_v50 = vmul.f32 0.00390625, %v547_v49  ;;  %v2197_v49 = vld [vmem:[%s2741_s12 + $0xa8] ss:$16 sps:$4 sm:$0xff]  }
 0x15e   : > { %v561_v52 = vadd.f32 1e-05, %v557_v50  ;;  %v2202_v50 = vld [vmem:[%s2741_s12 + $0xcc] ss:$16 sps:$4 sm:$0xff]  }
 0x15f   : > { %v550_v53 = vpop.xlane.xlu1 %549  ;;  %v553_v54 = vpop.xlane.xlu0 %552 }
 0x160   : > { %2326 = vrsqrt.f32 %v561_v52  ;;  %v558_v55 = vmul.f32 0.00390625, %v550_v53  ;;  %v559_v56 = vmul.f32 0.00390625, %v553_v54  ;;  %v2205_v52 = vld [vmem:[%s2741_s12 + $0xec] ss:$16 sps:$4 sm:$0xff]   ;;  %v2203_v53 = vld [vmem:[%s2741_s12 + $0xe8] ss:$16 sps:$4 sm:$0xff]  }
 0x161   : > { %v2208_v54 = vld [vmem:[%s2741_s12 + $0x10c] ss:$16 sps:$4 sm:$0xff]  }
 0x162   : > { %v562_v57 = vadd.f32 1e-05, %v558_v55  ;;  %v563_v62 = vadd.f32 1e-05, %v559_v56  ;;  %v2206_v55 = vld [vmem:[%s2741_s12 + $0x108] ss:$16 sps:$4 sm:$0xff]  }
 0x163   : > { %v556_v63 = vpop.xlane.xlu1 %555  ;;  %v2211_v56 = vld [vmem:[%s2741_s12 + $0x12c] ss:$16 sps:$4 sm:$0xff]  }
 0x164   : > { %2328 = vrsqrt.f32 %v562_v57  ;;  %v560_v2 = vmul.f32 0.00390625, %v556_v63  ;;  %v2209_v57 = vld [vmem:[%s2741_s12 + $0x128] ss:$16 sps:$4 sm:$0xff]  }
 0x165   : > { %2330 = vrsqrt.f32 %v563_v62  ;;  %v2214_v62 = vld [vmem:[%s2741_s12 + $0x14c] ss:$16 sps:$4 sm:$0xff]   ;;  %v2212_v63 = vld [vmem:[%s2741_s12 + $0x148] ss:$16 sps:$4 sm:$0xff]  }
 0x166   : > { %v564_v3 = vadd.f32 1e-05, %v560_v2  ;;  %v2217_v2 = vld [vmem:[%s2741_s12 + $0x16c] ss:$16 sps:$4 sm:$0xff]  }
 0x168   : > { %2332 = vrsqrt.f32 %v564_v3  ;;  %v2215_v3 = vld [vmem:[%s2741_s12 + $0x168] ss:$16 sps:$4 sm:$0xff]  }
 0x16a   : > { %v2327_v0 = vpop.eup %2326 }
 0x16b   : > { %v570_v13 = vmul.f32 %v2327_v0, %v2765_v59  ;;  %v569_v6 = vmul.f32 %v2327_v0, %v2762_v58  ;;  %v2218_v0 = vld [vmem:[%s2741_s12 + $0x188] ss:$16 sps:$4 sm:$0xff]  }
 0x16d   : > { %v590_v9 = vmul.f32 %v586_v4, %v570_v13  ;;  %v589_v20 = vmul.f32 %v582_v1, %v569_v6  ;;  %v2226_v13 = vld [vmem:[%s2741_s12 + $0x1cc] ss:$16 sps:$4 sm:$0xff]  }
 0x16e   : > { %v2329_v19 = vpop.eup %2328  ;;  %v2229_v6 = vld [vmem:[%s2741_s12 + $0x1ec] ss:$16 sps:$4 sm:$0xff]  }
 0x16f   : > { %v2331_v21 = vpop.eup %2330  ;;  %v572_v22 = vmul.f32 %v2329_v19, %v2785_v5  ;;  %v571_v23 = vmul.f32 %v2329_v19, %v2782_v12  ;;  %v610_v58 = vadd.f32 %v606_v11, %v590_v9  ;;  %v609_v27 = vadd.f32 %v602_v10, %v589_v20  ;;  %v2227_v19 = vld [vmem:[%s2741_s12 + $0x1e8] ss:$16 sps:$4 sm:$0xff]   ;;  %v2251_v9 = vld [vmem:[%s2820_s16 + $0x74] ss:$8 sps:$4 sm:$0xff]  }
 0x170   : > { %v574_v59 = vmul.f32 %v2331_v21, %v2771_v61  ;;  %v573_v5 = vmul.f32 %v2331_v21, %v2768_v60  ;;  %v2185_v60 = vld [vmem:[%s2741_s12 + $0x28] ss:$16 sps:$4 sm:$0xff]   ;;  %1723 = vmatprep.subr.bf16.mxu0 %v2251_v9  ;;  %v2257_v21 = vld [vmem:[%s2820_s16 + $0x94] ss:$8 sps:$4 sm:$0xff]  }
 0x171   : > { %v592_v24 = vmul.f32 %v586_v4, %v572_v22  ;;  %v591_v25 = vmul.f32 %v582_v1, %v571_v23  ;;  %v2256_v20 = vld [vmem:[%s2820_s16 + $0x80] ss:$8 sps:$4 sm:$0xff]   ;;  %v2259_v22 = vld [vmem:[%s2820_s16 + $0x90] ss:$8 sps:$4 sm:$0xff]   ;;  %v2260_v23 = vld [vmem:[%s2820_s16 + $0xa4] ss:$8 sps:$4 sm:$0xff]  }
 0x172   : > { %v2333_v26 = vpop.eup %2332  ;;  %v594_v28 = vmul.f32 %v586_v4, %v574_v59  ;;  %v2262_v59 = vld [vmem:[%s2820_s16 + $0xa0] ss:$8 sps:$4 sm:$0xff]  }
 0x173   : > { %v612_v29 = vadd.f32 %v606_v11, %v592_v24  ;;  %v611_v30 = vadd.f32 %v602_v10, %v591_v25  ;;  %v576_v31 = vmul.f32 %v2333_v26, %v2791_v17  ;;  %v575_v32 = vmul.f32 %v2333_v26, %v2788_v16  ;;  %v2263_v24 = vld [vmem:[%s2820_s16 + $0xb4] ss:$8 sps:$4 sm:$0xff]   ;;  %v2265_v25 = vld [vmem:[%s2820_s16 + $0xb0] ss:$8 sps:$4 sm:$0xff]   ;;  %v2266_v26 = vld [vmem:[%s2820_s16 + $0xc4] ss:$8 sps:$4 sm:$0xff]  }
 0x174   : > { %v614_v37 = vadd.f32 %v606_v11, %v594_v28  ;;  %v593_v17 = vmul.f32 %v582_v1, %v573_v5  ;;  %v2271_v28 = vld [vmem:[%s2820_s16 + $0xd0] ss:$8 sps:$4 sm:$0xff]   ;;  %v2280_v5 = vld [vmem:[%s2820_s16 + $0x104] ss:$8 sps:$4 sm:$0xff]  }
 0x175   : > { %v618_v12 = vpack.c.bf16 %v612_v29, %v610_v58  ;;  %v2855_v61 = vpack.c.bf16 %v611_v30, %v609_v27  ;;  %v596_v34 = vmul.f32 %v586_v4, %v576_v31  ;;  %v595_v36 = vmul.f32 %v582_v1, %v575_v32  ;;  %v2223_v1 = vld [vmem:[%s2741_s12 + $0x1ac] ss:$16 sps:$4 sm:$0xff]   ;;  %v2221_v4 = vld [vmem:[%s2741_s12 + $0x1a8] ss:$16 sps:$4 sm:$0xff]  }
 0x176   : > { %v613_v41 = vadd.f32 %v602_v10, %v593_v17  ;;  %v2268_v58 = vld [vmem:[%s2820_s16 + $0xc0] ss:$8 sps:$4 sm:$0xff]   ;;  %v2269_v27 = vld [vmem:[%s2820_s16 + $0xd4] ss:$8 sps:$4 sm:$0xff]   ;;  %v2272_v29 = vld [vmem:[%s2820_s16 + $0xe4] ss:$8 sps:$4 sm:$0xff]  }
 0x177   : > { %1107 = vmatprep.mubr.bf16.mxu1 %v618_v12  ;;  %v616_v38 = vadd.f32 %v606_v11, %v596_v34  ;;  %v615_v40 = vadd.f32 %v602_v10, %v595_v36  ;;  %v2253_v10 = vld [vmem:[%s2820_s16 + $0x70] ss:$8 sps:$4 sm:$0xff]   ;;  %v2254_v11 = vld [vmem:[%s2820_s16 + $0x84] ss:$8 sps:$4 sm:$0xff]   ;;  %v2274_v30 = vld [vmem:[%s2820_s16 + $0xe0] ss:$8 sps:$4 sm:$0xff]  }
 0x178   : > { %1108 = vmatmul.mubr.bf16.vlgmr.msra.gmra.mrb[0].mxu1 %v2855_v61  ;;  %1724 = vmatpush1.bf16.msra.mxu0 %v2253_v10  ;;  %v2275_v31 = vld [vmem:[%s2820_s16 + $0xf4] ss:$8 sps:$4 sm:$0xff]   ;;  %v2277_v32 = vld [vmem:[%s2820_s16 + $0xf0] ss:$8 sps:$4 sm:$0xff]  }
 0x179   : > { %1129 = vmatpush1.bf16.msra.mxu1 %v2182_v33  ;;  %v2859_v16 = vpack.c.bf16 %v616_v38, %v614_v37  ;;  %v619_v43 = vpack.c.bf16 %v615_v40, %v613_v41  ;;  %1725 = vmatprep.subr.bf16.mxu0 %v2254_v11 }
 0x17a   : > { %1130 = vmatprep.subr.bf16.mxu1 %v2187_v35 }
 0x17b   : > { %1117 = vmatprep.mubr.bf16.mxu1 %v2859_v16 }
 0x17c   : > { %1726 = vmatpush1.bf16.msra.mxu0 %v2256_v20 }
 0x17d   : > { %1131 = vmatpush1.bf16.msra.mxu1 %v2185_v60  ;;  %1727 = vmatprep.subr.bf16.mxu0 %v2257_v21 }
 0x17e   : > { %1132 = vmatprep.subr.bf16.mxu1 %v2190_v39 }
 0x180   : > { %1118 = vmatmul.mubr.bf16.gmra.mrb[4].mxu1 %v619_v43  ;;  %1728 = vmatpush1.bf16.msra.mxu0 %v2259_v22 }
 0x181   : > { %1133 = vmatpush1.bf16.msra.mxu1 %v2188_v42  ;;  %1160 = vmatprep.mubr.bf16.mxu1 %v618_v12  ;;  %v2916_v12 = vld [vmem:[%s483_s30] sm:$0xf] }
 0x182   : > { %1134 = vmatprep.subr.bf16.mxu1 %v2193_v44  ;;  %1729 = vmatprep.subr.bf16.mxu0 %v2260_v23  ;;  %v738_v33 = vrot.slane %v2916_v12, %v2710_v14 }
 0x184   : > { %1730 = vmatpush1.bf16.msra.mxu0 %v2262_v59 }
 0x185   : > { %1135 = vmatpush1.bf16.msra.mxu1 %v2191_v45  ;;  %1731 = vmatprep.subr.bf16.mxu0 %v2263_v24 }
 0x186   : > { %1136 = vmatprep.subr.bf16.mxu1 %v2196_v46 }
 0x188   : > { %1732 = vmatpush1.bf16.msra.mxu0 %v2265_v25 }
 0x189   : > { %1137 = vmatpush1.bf16.msra.mxu1 %v2194_v47  ;;  %1733 = vmatprep.subr.bf16.mxu0 %v2266_v26 }
 0x18a   : > { %1138 = vmatprep.subr.bf16.mxu1 %v2199_v48 }
 0x18c   : > { %1734 = vmatpush1.bf16.msra.mxu0 %v2268_v58 }
 0x18d   : > { %1139 = vmatpush1.bf16.msra.mxu1 %v2197_v49  ;;  %1735 = vmatprep.subr.bf16.mxu0 %v2269_v27 }
 0x18e   : > { %1140 = vmatprep.subr.bf16.mxu1 %v2202_v50 }
 0x190   : > { %1736 = vmatpush1.bf16.msra.mxu0 %v2271_v28 }
 0x191   : > { %1141 = vmatpush1.bf16.msra.mxu1 %v2200_v51  ;;  %1737 = vmatprep.subr.bf16.mxu0 %v2272_v29 }
 0x192   : > { %1142 = vmatprep.subr.bf16.mxu1 %v2205_v52 }
 0x194   : > { %1738 = vmatpush1.bf16.msra.mxu0 %v2274_v30 }
 0x195   : > { %1143 = vmatpush1.bf16.msra.mxu1 %v2203_v53  ;;  %1739 = vmatprep.subr.bf16.mxu0 %v2275_v31 }
 0x196   : > { %1144 = vmatprep.subr.bf16.mxu1 %v2208_v54 }
 0x198   : > { %1740 = vmatpush1.bf16.msra.mxu0 %v2277_v32  ;;  %v2278_v32 = vld [vmem:[%s2820_s16 + $0x100] ss:$8 sps:$4 sm:$0xff]  }
 0x199   : > { %1145 = vmatpush1.bf16.msra.mxu1 %v2206_v55  ;;  %1762 = vmatprep.subr.bf16.mxu0 %v2280_v5  ;;  %v2283_v5 = vld [vmem:[%s2820_s16 + $0x114] ss:$8 sps:$4 sm:$0xff]  }
 0x19a   : > { %1146 = vmatprep.subr.bf16.mxu1 %v2211_v56 }
 0x19d   : > { %1147 = vmatpush1.bf16.msra.mxu1 %v2209_v57 }
 0x19e   : > { %1148 = vmatprep.subr.bf16.mxu1 %v2214_v62 }
 0x1a1   : > { %1149 = vmatpush1.bf16.msra.mxu1 %v2212_v63 }
 0x1a2   : > { %1150 = vmatprep.subr.bf16.mxu1 %v2217_v2 }
 0x1a5   : > { %1151 = vmatpush1.bf16.msra.mxu1 %v2215_v3 }
 0x1a6   : > { %1152 = vmatprep.subr.bf16.mxu1 %v2220_v8 }
 0x1a9   : > { %1153 = vmatpush1.bf16.msra.mxu1 %v2218_v0 }
 0x1aa   : > { %1154 = vmatprep.subr.bf16.mxu1 %v2223_v1 }
 0x1ad   : > { %1155 = vmatpush1.bf16.msra.mxu1 %v2221_v4 }
 0x1ae   : > { %1156 = vmatprep.subr.bf16.mxu1 %v2226_v13 }
 0x1b1   : > { %1157 = vmatpush1.bf16.msra.mxu1 %v2224_v18 }
 0x1b2   : > { %1158 = vmatprep.subr.bf16.mxu1 %v2229_v6 }
 0x1b5   : > { %1159 = vmatpush1.bf16.msra.mxu1 %v2227_v19 }
 0x1b8   : > { %1161 = vmatmul.mubr.bf16.vlgmr.msra.gmra.mrb[8].mxu1 %v2855_v61  ;;  %v742_v61 = vrot.slane %v2916_v12, %v2713_v15 }
 0x1b9   : > { %1170 = vmatprep.mubr.bf16.mxu1 %v2859_v16 }
 0x1c0   : > { %1171 = vmatmul.mubr.bf16.gmra.mrb[12].mxu1 %v619_v43 }
 0x24b   : > { %v1109_v34 = vpop.f32.mrb[0].mxu1 }
 0x24c   : > { %v2922_v35 = vadd.f32 %v1109_v34, %v738_v33  ;;  %v1111_v36 = vpop.f32.mrb[1].mxu1 }
 0x24d   : > { %v2924_v37 = vadd.f32 %v1111_v36, %v742_v61  ;;  %v1113_v38 = vpop.f32.mrb[2].mxu1  ;;  %v2281_v36 = vld [vmem:[%s2820_s16 + $0x110] ss:$8 sps:$4 sm:$0xff]  }
 0x24e   : > { %v2001_v17 = vmul.f32 -1.702, %v2922_v35  ;;  %v2927_v16 = vadd.f32 %v1113_v38, %v738_v33  ;;  %v1115_v60 = vpop.f32.mrb[3].mxu1 }
 0x24f   : > { %v2002_v39 = vmul.f32 -1.702, %v2924_v37  ;;  %v1116_v40 = vadd.f32 %v1115_v60, %v742_v61 }
 0x250   : > { %v1213_v41 = vmul.f32 1.442695, %v2001_v17  ;;  %v2005_v14 = vmul.f32 -1.702, %v2927_v16  ;;  %v2286_v17 = vld [vmem:[%s2820_s16 + $0x124] ss:$8 sps:$4 sm:$0xff]  }
 0x251   : > { %v1215_v42 = vmul.f32 1.442695, %v2002_v39  ;;  %v2006_v15 = vmul.f32 -1.702, %v1116_v40 }
 0x252   : > { %2334 = vpow2.f32 %v1213_v41  ;;  %v1221_v43 = vmul.f32 1.442695, %v2005_v14  ;;  %v2284_v41 = vld [vmem:[%s2820_s16 + $0x120] ss:$8 sps:$4 sm:$0xff]   ;;  %v2289_v14 = vld [vmem:[%s2820_s16 + $0x134] ss:$8 sps:$4 sm:$0xff]  }
 0x253   : > { %2336 = vpow2.f32 %v1215_v42  ;;  %v1223_v44 = vmul.f32 1.442695, %v2006_v15  ;;  %v1119_v45 = vpop.f32.mrb[4].mxu1  ;;  %v2287_v42 = vld [vmem:[%s2820_s16 + $0x130] ss:$8 sps:$4 sm:$0xff]  }
 0x254   : > { %2338 = vpow2.f32 %v1221_v43  ;;  %v2931_v46 = vadd.f32 %v1119_v45, %v738_v33  ;;  %v1121_v47 = vpop.f32.mrb[5].mxu1  ;;  %v2292_v15 = vld [vmem:[%s2820_s16 + $0x144] ss:$8 sps:$4 sm:$0xff]   ;;  %v2290_v43 = vld [vmem:[%s2820_s16 + $0x140] ss:$8 sps:$4 sm:$0xff]  }
 0x255   : > { %2340 = vpow2.f32 %v1223_v44  ;;  %v2933_v48 = vadd.f32 %v1121_v47, %v742_v61  ;;  %v1123_v49 = vpop.f32.mrb[6].mxu1  ;;  %v2295_v44 = vld [vmem:[%s2820_s16 + $0x154] ss:$8 sps:$4 sm:$0xff]   ;;  %v2293_v45 = vld [vmem:[%s2820_s16 + $0x150] ss:$8 sps:$4 sm:$0xff]   ;;  %v745_v47 = vsub.s32 2, %v2684_v7 }
 0x256   : > { %v2009_v50 = vmul.f32 -1.702, %v2931_v46  ;;  %v1124_v51 = vadd.f32 %v1123_v49, %v738_v33  ;;  %v1125_v52 = vpop.f32.mrb[7].mxu1  ;;  %v2296_v49 = vld [vmem:[%s2820_s16 + $0x160] ss:$8 sps:$4 sm:$0xff]  }
 0x257   : > { %v2010_v53 = vmul.f32 -1.702, %v2933_v48  ;;  %v1126_v54 = vadd.f32 %v1125_v52, %v742_v61 }
 0x258   : > { %v1229_v55 = vmul.f32 1.442695, %v2009_v50  ;;  %v2013_v56 = vmul.f32 -1.702, %v1124_v51  ;;  %v746_v50 = vrot.slane %v2916_v12, %v745_v47 }
 0x259   : > { %v1231_v57 = vmul.f32 1.442695, %v2010_v53  ;;  %v2014_v62 = vmul.f32 -1.702, %v1126_v54 }
 0x25a   : > { %2342 = vpow2.f32 %v1229_v55  ;;  %v1237_v63 = vmul.f32 1.442695, %v2013_v56 }
 0x25b   : > { %2344 = vpow2.f32 %v1231_v57  ;;  %v1239_v2 = vmul.f32 1.442695, %v2014_v62  ;;  %v2304_v57 = vld [vmem:[%s2820_s16 + $0x184] ss:$8 sps:$4 sm:$0xff]  }
 0x25c   : > { %v2335_v3 = vpop.eup %2334  ;;  %2346 = vpow2.f32 %v1237_v63 }
 0x25d   : > { %v2337_v8 = vpop.eup %2336  ;;  %v1245_v0 = vadd.f32 1.0, %v2335_v3  ;;  %2348 = vpow2.f32 %v1239_v2 }
 0x25e   : > { %v2339_v1 = vpop.eup %2338  ;;  %v1246_v4 = vadd.f32 1.0, %v2337_v8 }
 0x25f   : > { %v2341_v13 = vpop.eup %2340  ;;  %2350 = vrcp.f32 %v1245_v0  ;;  %v1249_v18 = vadd.f32 1.0, %v2339_v1  ;;  %v2302_v0 = vld [vmem:[%s2820_s16 + $0x180] ss:$8 sps:$4 sm:$0xff]  }
 0x260   : > { %2352 = vrcp.f32 %v1246_v4  ;;  %v1250_v6 = vadd.f32 1.0, %v2341_v13  ;;  %v2307_v13 = vld [vmem:[%s2820_s16 + $0x194] ss:$8 sps:$4 sm:$0xff]  }
 0x261   : > { %2354 = vrcp.f32 %v1249_v18 }
 0x262   : > { %2356 = vrcp.f32 %v1250_v6 }
 0x264   : > { %v2343_v19 = vpop.eup %2342 }
 0x265   : > { %v2345_v9 = vpop.eup %2344  ;;  %v1253_v10 = vadd.f32 1.0, %v2343_v19 }
 0x266   : > { %v2347_v11 = vpop.eup %2346  ;;  %v1254_v20 = vadd.f32 1.0, %v2345_v9 }
 0x267   : > { %v2349_v21 = vpop.eup %2348  ;;  %2358 = vrcp.f32 %v1253_v10  ;;  %v1257_v22 = vadd.f32 1.0, %v2347_v11  ;;  %v2305_v11 = vld [vmem:[%s2820_s16 + $0x190] ss:$8 sps:$4 sm:$0xff]  }
 0x268   : > { %2360 = vrcp.f32 %v1254_v20  ;;  %v1258_v23 = vadd.f32 1.0, %v2349_v21 }
 0x269   : > { %v2351_v59 = vpop.eup %2350  ;;  %2362 = vrcp.f32 %v1257_v22  ;;  %v2310_v22 = vld [vmem:[%s2820_s16 + $0x1a4] ss:$8 sps:$4 sm:$0xff]  }
 0x26a   : > { %v2353_v24 = vpop.eup %2352  ;;  %2364 = vrcp.f32 %v1258_v23  ;;  %v1293_v58 = vmul.f32 %v2351_v59, %v2922_v35 }
 0x26b   : > { %v2355_v25 = vpop.eup %2354  ;;  %v1294_v28 = vmul.f32 %v2353_v24, %v2924_v37 }
 0x26c   : > { %v2357_v26 = vpop.eup %2356  ;;  %v1297_v27 = vmul.f32 %v2355_v25, %v2927_v16 }
 0x26d   : > { %v1298_v29 = vmul.f32 %v2357_v26, %v1116_v40 }
 0x26e   : > { %v1309_v30 = vpack.c.bf16 %v1297_v27, %v1293_v58 }
 0x26f   : > { %v1310_v31 = vpack.c.bf16 %v1298_v29, %v1294_v28  ;;  %v2308_v28 = vld [vmem:[%s2820_s16 + $0x1a0] ss:$8 sps:$4 sm:$0xff]  }
 0x271   : > { %v2359_v33 = vpop.eup %2358  ;;  %1741 = vmatprep.mubr.bf16.mxu0 %v1310_v31  ;;  %v2313_v31 = vld [vmem:[%s2820_s16 + $0x1b4] ss:$8 sps:$4 sm:$0xff]  }
 0x272   : > { %v2361_v61 = vpop.eup %2360  ;;  %1742 = vmatmul.mubr.bf16.vlgmr.msra.gmra.mrb[0].mxu0 %v1309_v30  ;;  %v1301_v38 = vmul.f32 %v2359_v33, %v2931_v46  ;;  %v2298_v46 = vld [vmem:[%s2820_s16 + $0x164] ss:$8 sps:$4 sm:$0xff]  }
 0x273   : > { %v2363_v34 = vpop.eup %2362  ;;  %1763 = vmatpush1.bf16.msra.mxu0 %v2278_v32  ;;  %v1302_v16 = vmul.f32 %v2361_v61, %v2933_v48  ;;  %v749_v48 = vsub.s32 3, %v2684_v7 }
 0x274   : > { %v2365_v35 = vpop.eup %2364  ;;  %v1305_v37 = vmul.f32 %v2363_v34, %v1124_v51  ;;  %1764 = vmatprep.subr.bf16.mxu0 %v2283_v5  ;;  %v2301_v51 = vld [vmem:[%s2820_s16 + $0x174] ss:$8 sps:$4 sm:$0xff]   ;;  %v2311_v34 = vld [vmem:[%s2820_s16 + $0x1b0] ss:$8 sps:$4 sm:$0xff]  }
 0x275   : > { %v1306_v60 = vmul.f32 %v2365_v35, %v1126_v54  ;;  %v750_v52 = vrot.slane %v2916_v12, %v749_v48  ;;  %v2299_v54 = vld [vmem:[%s2820_s16 + $0x170] ss:$8 sps:$4 sm:$0xff]   ;;  %v2316_v35 = vld [vmem:[%s2820_s16 + $0x1c4] ss:$8 sps:$4 sm:$0xff]  }
 0x276   : > { %v1313_v39 = vpack.c.bf16 %v1305_v37, %v1301_v38 }
 0x277   : > { %1765 = vmatpush1.bf16.msra.mxu0 %v2281_v36  ;;  %v1314_v40 = vpack.c.bf16 %v1306_v60, %v1302_v16 }
 0x278   : > { %1766 = vmatprep.subr.bf16.mxu0 %v2286_v17 }
 0x279   : > { %1751 = vmatprep.mubr.bf16.mxu0 %v1314_v40  ;;  %v2314_v40 = vld [vmem:[%s2820_s16 + $0x1c0] ss:$8 sps:$4 sm:$0xff]  }
 0x27a   : > { %1752 = vmatmul.mubr.bf16.gmra.mrb[4].mxu0 %v1313_v39 }
 0x27b   : > { %1767 = vmatpush1.bf16.msra.mxu0 %v2284_v41 }
 0x27c   : > { %1768 = vmatprep.subr.bf16.mxu0 %v2289_v14  ;;  %v2319_v14 = vld [vmem:[%s2820_s16 + $0x1d4] ss:$8 sps:$4 sm:$0xff]  }
 0x27f   : > { %1769 = vmatpush1.bf16.msra.mxu0 %v2287_v42  ;;  %v2317_v42 = vld [vmem:[%s2820_s16 + $0x1d0] ss:$8 sps:$4 sm:$0xff]  }
 0x280   : > { %1770 = vmatprep.subr.bf16.mxu0 %v2292_v15 }
 0x283   : > { %1771 = vmatpush1.bf16.msra.mxu0 %v2290_v43  ;;  %v2322_v43 = vld [vmem:[%s2820_s16 + $0x1e4] ss:$8 sps:$4 sm:$0xff]  }
 0x284   : > { %1772 = vmatprep.subr.bf16.mxu0 %v2295_v44 }
 0x287   : > { %1773 = vmatpush1.bf16.msra.mxu0 %v2293_v45 }
 0x288   : > { %1774 = vmatprep.subr.bf16.mxu0 %v2298_v46 }
 0x28b   : > { %v1162_v53 = vpop.f32.mrb[8].mxu1  ;;  %1775 = vmatpush1.bf16.msra.mxu0 %v2296_v49 }
 0x28c   : > { %v2961_v55 = vadd.f32 %v1162_v53, %v746_v50  ;;  %v1164_v56 = vpop.f32.mrb[9].mxu1  ;;  %1776 = vmatprep.subr.bf16.mxu0 %v2301_v51 }
 0x28d   : > { %v2964_v62 = vadd.f32 %v1164_v56, %v750_v52  ;;  %v1166_v7 = vpop.f32.mrb[10].mxu1 }
 0x28e   : > { %v2003_v63 = vmul.f32 -1.702, %v2961_v55  ;;  %v2967_v2 = vadd.f32 %v1166_v7, %v746_v50  ;;  %v1168_v3 = vpop.f32.mrb[11].mxu1 }
 0x28f   : > { %v2004_v12 = vmul.f32 -1.702, %v2964_v62  ;;  %v2970_v8 = vadd.f32 %v1168_v3, %v750_v52  ;;  %1777 = vmatpush1.bf16.msra.mxu0 %v2299_v54 }
 0x290   : > { %v1217_v1 = vmul.f32 1.442695, %v2003_v63  ;;  %v2007_v4 = vmul.f32 -1.702, %v2967_v2  ;;  %1778 = vmatprep.subr.bf16.mxu0 %v2304_v57  ;;  %v2323_v57 = vld [vmem:[%s2820_s16 + $0x1f0] ss:$8 sps:$4 sm:$0xff]  }
 0x291   : > { %v1219_v18 = vmul.f32 1.442695, %v2004_v12  ;;  %v2008_v6 = vmul.f32 -1.702, %v2970_v8 }
 0x292   : > { %2366 = vpow2.f32 %v1217_v1  ;;  %v1225_v19 = vmul.f32 1.442695, %v2007_v4 }
 0x293   : > { %2368 = vpow2.f32 %v1219_v18  ;;  %v1227_v9 = vmul.f32 1.442695, %v2008_v6  ;;  %v1172_v10 = vpop.f32.mrb[12].mxu1  ;;  %1779 = vmatpush1.bf16.msra.mxu0 %v2302_v0 }
 0x294   : > { %2370 = vpow2.f32 %v1225_v19  ;;  %v2977_v20 = vadd.f32 %v1172_v10, %v746_v50  ;;  %v1174_v21 = vpop.f32.mrb[13].mxu1  ;;  %1780 = vmatprep.subr.bf16.mxu0 %v2307_v13 }
 0x295   : > { %2372 = vpow2.f32 %v1227_v9  ;;  %v2980_v23 = vadd.f32 %v1174_v21, %v750_v52  ;;  %v1176_v59 = vpop.f32.mrb[14].mxu1  ;;  %v1318_v21 = vld [vmem:[%s2726_s8 + $0x8] sm:$0xff] }
 0x296   : > { %v2011_v24 = vmul.f32 -1.702, %v2977_v20  ;;  %v2983_v25 = vadd.f32 %v1176_v59, %v746_v50  ;;  %v1178_v26 = vpop.f32.mrb[15].mxu1  ;;  %v2320_v50 = vld [vmem:[%s2820_s16 + $0x1e0] ss:$8 sps:$4 sm:$0xff]  }
 0x297   : > { %v2012_v58 = vmul.f32 -1.702, %v2980_v23  ;;  %v2986_v27 = vadd.f32 %v1178_v26, %v750_v52  ;;  %1781 = vmatpush1.bf16.msra.mxu0 %v2305_v11  ;;  %v2325_v52 = vld [vmem:[%s2820_s16 + $0x1f4] ss:$8 sps:$4 sm:$0xff]   ;;  %v1317_v11 = vld [vmem:[%s2726_s8] sm:$0xff] }
 0x298   : > { %v1233_v29 = vmul.f32 1.442695, %v2011_v24  ;;  %v2015_v30 = vmul.f32 -1.702, %v2983_v25  ;;  %1782 = vmatprep.subr.bf16.mxu0 %v2310_v22 }
 0x299   : > { %v1235_v32 = vmul.f32 1.442695, %v2012_v58  ;;  %v2016_v5 = vmul.f32 -1.702, %v2986_v27 }
 0x29a   : > { %2374 = vpow2.f32 %v1233_v29  ;;  %v1241_v33 = vmul.f32 1.442695, %v2015_v30  ;;  %v1321_v29 = vld [vmem:[%s2726_s8 + $0x20] sm:$0xff]  ;;  %v1322_v30 = vld [vmem:[%s2726_s8 + $0x28] sm:$0xff] }
 0x29b   : > { %2376 = vpow2.f32 %v1235_v32  ;;  %v1243_v61 = vmul.f32 1.442695, %v2016_v5  ;;  %1783 = vmatpush1.bf16.msra.mxu0 %v2308_v28  ;;  %v1323_v32 = vld [vmem:[%s2726_s8 + $0x30] sm:$0xff] }
 0x29c   : > { %v2367_v36 = vpop.eup %2366  ;;  %2378 = vpow2.f32 %v1241_v33  ;;  %1784 = vmatprep.subr.bf16.mxu0 %v2313_v31 }
 0x29d   : > { %v2369_v38 = vpop.eup %2368  ;;  %v1247_v37 = vadd.f32 1.0, %v2367_v36  ;;  %2380 = vpow2.f32 %v1243_v61  ;;  %v1324_v61 = vld [vmem:[%s2726_s8 + $0x38] sm:$0xff] }
 0x29e   : > { %v2371_v17 = vpop.eup %2370  ;;  %v1248_v16 = vadd.f32 1.0, %v2369_v38 }
 0x29f   : > { %v2373_v60 = vpop.eup %2372  ;;  %2382 = vrcp.f32 %v1247_v37  ;;  %v1251_v39 = vadd.f32 1.0, %v2371_v17  ;;  %1785 = vmatpush1.bf16.msra.mxu0 %v2311_v34 }
 0x2a0   : > { %2384 = vrcp.f32 %v1248_v16  ;;  %v1252_v41 = vadd.f32 1.0, %v2373_v60  ;;  %1786 = vmatprep.subr.bf16.mxu0 %v2316_v35 }
 0x2a1   : > { %2386 = vrcp.f32 %v1251_v39 }
 0x2a2   : > { %2388 = vrcp.f32 %v1252_v41 }
 0x2a3   : > { %1787 = vmatpush1.bf16.msra.mxu0 %v2314_v40 }
 0x2a4   : > { %v2375_v15 = vpop.eup %2374  ;;  %1788 = vmatprep.subr.bf16.mxu0 %v2319_v14 }
 0x2a5   : > { %v2377_v44 = vpop.eup %2376  ;;  %v1255_v45 = vadd.f32 1.0, %v2375_v15 }
 0x2a6   : > { %v2379_v46 = vpop.eup %2378  ;;  %v1256_v47 = vadd.f32 1.0, %v2377_v44 }
 0x2a7   : > { %v2381_v48 = vpop.eup %2380  ;;  %2390 = vrcp.f32 %v1255_v45  ;;  %v1259_v49 = vadd.f32 1.0, %v2379_v46  ;;  %1789 = vmatpush1.bf16.msra.mxu0 %v2317_v42 }
 0x2a8   : > { %2392 = vrcp.f32 %v1256_v47  ;;  %v1260_v51 = vadd.f32 1.0, %v2381_v48  ;;  %1790 = vmatprep.subr.bf16.mxu0 %v2322_v43 }
 0x2a9   : > { %v2383_v53 = vpop.eup %2382  ;;  %2394 = vrcp.f32 %v1259_v49 }
 0x2aa   : > { %v2385_v54 = vpop.eup %2384  ;;  %2396 = vrcp.f32 %v1260_v51  ;;  %v1295_v63 = vmul.f32 %v2383_v53, %v2961_v55 }
 0x2ab   : > { %v2387_v56 = vpop.eup %2386  ;;  %1791 = vmatpush1.bf16.msra.mxu0 %v2320_v50  ;;  %v1296_v12 = vmul.f32 %v2385_v54, %v2964_v62 }
 0x2ac   : > { %v2389_v7 = vpop.eup %2388  ;;  %v1299_v3 = vmul.f32 %v2387_v56, %v2967_v2  ;;  %1792 = vmatprep.subr.bf16.mxu0 %v2325_v52 }
 0x2ad   : > { %v1300_v0 = vmul.f32 %v2389_v7, %v2970_v8 }
 0x2ae   : > { %v1311_v1 = vpack.c.bf16 %v1299_v3, %v1295_v63 }
 0x2af   : > { %1793 = vmatpush1.bf16.msra.mxu0 %v2323_v57  ;;  %v1312_v4 = vpack.c.bf16 %v1300_v0, %v1296_v12 }
 0x2b1   : > { %v2391_v13 = vpop.eup %2390  ;;  %1794 = vmatprep.mubr.bf16.mxu0 %v1312_v4 }
 0x2b2   : > { %v2393_v18 = vpop.eup %2392  ;;  %1795 = vmatmul.mubr.bf16.vlgmr.msra.gmra.mrb[0].mxu0 %v1311_v1  ;;  %v1303_v2 = vmul.f32 %v2391_v13, %v2977_v20  ;;  %v1319_v20 = vld [vmem:[%s2726_s8 + $0x10] sm:$0xff] }
 0x2b3   : > { %v2395_v6 = vpop.eup %2394  ;;  %v1304_v62 = vmul.f32 %v2393_v18, %v2980_v23 }
 0x2b4   : > { %v2397_v55 = vpop.eup %2396  ;;  %v1307_v19 = vmul.f32 %v2395_v6, %v2983_v25  ;;  %v1320_v25 = vld [vmem:[%s2726_s8 + $0x18] sm:$0xff] }
 0x2b5   : > { %v1308_v8 = vmul.f32 %v2397_v55, %v2986_v27 }
 0x2b6   : > { %v1315_v9 = vpack.c.bf16 %v1307_v19, %v1303_v2 }
 0x2b7   : > { %v1316_v10 = vpack.c.bf16 %v1308_v8, %v1304_v62 }
 0x2b9   : > { %1804 = vmatprep.mubr.bf16.mxu0 %v1316_v10 }
 0x2ba   : > { %1805 = vmatmul.mubr.bf16.gmra.mrb[4].mxu0 %v1315_v9 }
 0x385   : > { %v1796_v22 = vpop.f32.mrb[0].mxu0 }
 0x386   : > { %v1815_v59 = vadd.f32 %v1796_v22, %v1317_v11  ;;  %v1798_v24 = vpop.f32.mrb[1].mxu0 }
 0x387   : > { %v1816_v23 = vadd.f32 %v1798_v24, %v1318_v21  ;;  %v1800_v26 = vpop.f32.mrb[2].mxu0 }
 0x388   : > { %1823 = vst [vmem:[%s2726_s8] sm:$0xff] %v1815_v59  ;;  %v1817_v58 = vadd.f32 %v1800_v26, %v1319_v20  ;;  %v1802_v27 = vpop.f32.mrb[3].mxu0 }
 0x389   : > { %1824 = vst [vmem:[%s2726_s8 + $0x8] sm:$0xff] %v1816_v23  ;;  %v1818_v28 = vadd.f32 %v1802_v27, %v1320_v25 }
 0x38a   : > { %1825 = vst [vmem:[%s2726_s8 + $0x10] sm:$0xff] %v1817_v58 }
 0x38b   : > { %1826 = vst [vmem:[%s2726_s8 + $0x18] sm:$0xff] %v1818_v28 }
 0x38d   : > { %v1806_v31 = vpop.f32.mrb[4].mxu0 }
 0x38e   : > { %v1819_v5 = vadd.f32 %v1806_v31, %v1321_v29  ;;  %v1808_v33 = vpop.f32.mrb[5].mxu0 }
 0x38f   : > { %v1820_v34 = vadd.f32 %v1808_v33, %v1322_v30  ;;  %v1810_v36 = vpop.f32.mrb[6].mxu0 }
 0x390   : > { %1827 = vst [vmem:[%s2726_s8 + $0x20] sm:$0xff] %v1819_v5  ;;  %v1821_v35 = vadd.f32 %v1810_v36, %v1323_v32  ;;  %v1812_v38 = vpop.f32.mrb[7].mxu0 }
 0x391   : > { %1828 = vst [vmem:[%s2726_s8 + $0x28] sm:$0xff] %v1820_v34  ;;  %v1822_v37 = vadd.f32 %v1812_v38, %v1324_v61 }
 0x392   : > { %1829 = vst [vmem:[%s2726_s8 + $0x30] sm:$0xff] %v1821_v35 }
 0x393   : > { %1830 = vst [vmem:[%s2726_s8 + $0x38] sm:$0xff] %v1822_v37 }
 0x394 PF: > { %s17_s28 = sadd.s32 1, %s2436_s28   ;;  %s3048_s24 = smov %s2424_s25 }
 0x395   : > { %p14_p13 = scmp.ge.s32.totalorder %s17_s28, 4   ;;  %s3049_s25 = smov %s2513_s9 }
 0x396   : > { %s3050_s26 = smov %s2432_s27  ;;  %s3051_s27 = smov %s3053_s29 }
 0x397   :  { %16 = sbr.rel (!%p14_p13) target bundleno = 3 (0x3), region = 116 }

// kernel: frozen_clip_t5_forward.22
= control target key start
LH: loop header
LB: loop body
LE: loop exit
PB: predicated region body
PF: predicated region fallthrough
CT: control target
= control target key end

     0   :  { %s1835_s0 = inlined_call_operand.vmem [shape: f32[2,32,256], index: 0, kind: input, shape index: {}]   ;;  %s1836_s3 = inlined_call_operand.vmem [shape: bf16[256,768], index: 3, kind: input, shape index: {}]   ;;  %s1837_s1 = inlined_call_operand.vmem [shape: f32[1,256], index: 1, kind: input, shape index: {}]   ;;  %s1838_s2 = inlined_call_operand.vmem [shape: f32[1,256], index: 2, kind: input, shape index: {}]   ;;  %s1839_s4 = inlined_call_operand.vmem [shape: f32[1,768], index: 4, kind: input, shape index: {}]   ;;  %s1840_s5 = inlined_call_operand.vmem [shape: bf16[32,768], index: 5, kind: output, shape index: {}]  }
   0x1   :  { %v24_v0 = vld [vmem:[%s1835_s0] sm:$0xff]  ;;  %v25_v1 = vld [vmem:[%s1835_s0 + $0x8] sm:$0xff]  ;;  %v26_v10 = vld [vmem:[%s1835_s0 + $0x10] sm:$0xff] }
   0x2   :  { %v32_v2 = vld [vmem:[%s1835_s0 + $0x40] sm:$0xff]  ;;  %v33_v3 = vld [vmem:[%s1835_s0 + $0x48] sm:$0xff]  ;;  %v27_v13 = vld [vmem:[%s1835_s0 + $0x18] sm:$0xff] }
   0x3   :  { %v1366_v4 = vadd.f32 %v32_v2, %v24_v0  ;;  %v28_v5 = vld [vmem:[%s1835_s0 + $0x20] sm:$0xff]  ;;  %v29_v6 = vld [vmem:[%s1835_s0 + $0x28] sm:$0xff]  ;;  %v1374_v7 = vadd.f32 %v33_v3, %v25_v1  ;;  %v34_v14 = vld [vmem:[%s1835_s0 + $0x50] sm:$0xff] }
   0x4   :  { %v36_v8 = vld [vmem:[%s1835_s0 + $0x60] sm:$0xff]  ;;  %v37_v9 = vld [vmem:[%s1835_s0 + $0x68] sm:$0xff]  ;;  %v35_v15 = vld [vmem:[%s1835_s0 + $0x58] sm:$0xff]  ;;  %v1400_v17 = vadd.f32 %v34_v14, %v26_v10 }
   0x5   :  { %v1385_v11 = vadd.f32 %v36_v8, %v28_v5  ;;  %v1387_v12 = vadd.f32 %v37_v9, %v29_v6  ;;  %v48_v16 = vadd.f32 %v1374_v7, %v1366_v4  ;;  %v1402_v18 = vadd.f32 %v35_v15, %v27_v13  ;;  %v30_v19 = vld [vmem:[%s1835_s0 + $0x30] sm:$0xff]  ;;  %v31_v20 = vld [vmem:[%s1835_s0 + $0x38] sm:$0xff]  ;;  %v1174_v29 = vld [vmem:[%s1836_s3 + $0xc] ss:$24 sps:$4 sm:$0xff]  }
   0x6   :  { %v38_v21 = vld [vmem:[%s1835_s0 + $0x70] sm:$0xff]  ;;  %v39_v23 = vld [vmem:[%s1835_s0 + $0x78] sm:$0xff]  ;;  %v1177_v31 = vld [vmem:[%s1836_s3 + $0x8] ss:$24 sps:$4 sm:$0xff]   ;;  %826 = vmatprep.subr.bf16.mxu1 %v1174_v29 }
   0x7   :  { %v54_v22 = vadd.f32 %v1387_v12, %v1385_v11  ;;  %v1418_v24 = vadd.f32 %v38_v21, %v30_v19  ;;  %49 = vadd.xlane.f32.xlu0 %v48_v16  ;;  %v51_v25 = vadd.f32 %v1402_v18, %v1400_v17  ;;  %v1422_v26 = vadd.f32 %v39_v23, %v31_v20  ;;  %v1172_v28 = vld [vmem:[%s1836_s3 + $0x4] ss:$24 sps:$4 sm:$0xff]   ;;  %v1176_v30 = vld [vmem:[%s1836_s3] ss:$24 sps:$4 sm:$0xff]   ;;  %v1178_v32 = vld [vmem:[%s1836_s3 + $0x34] ss:$24 sps:$4 sm:$0xff]  }
   0x8   :  { %773 = vmatprep.subr.bf16.mxu0 %v1172_v28  ;;  %827 = vmatpush1.bf16.msra.mxu1 %v1177_v31  ;;  %v1180_v33 = vld [vmem:[%s1836_s3 + $0x3c] ss:$24 sps:$4 sm:$0xff]   ;;  %v1182_v34 = vld [vmem:[%s1836_s3 + $0x30] ss:$24 sps:$4 sm:$0xff]   ;;  %v1186_v37 = vld [vmem:[%s1836_s3 + $0x6c] ss:$24 sps:$4 sm:$0xff]  }
   0x9   :  { %55 = vadd.xlane.f32.xlu1 %v54_v22  ;;  %v57_v27 = vadd.f32 %v1422_v26, %v1418_v24  ;;  %774 = vmatpush1.bf16.msra.mxu0 %v1176_v30  ;;  %v1183_v35 = vld [vmem:[%s1836_s3 + $0x38] ss:$24 sps:$4 sm:$0xff]   ;;  %v1184_v36 = vld [vmem:[%s1836_s3 + $0x64] ss:$24 sps:$4 sm:$0xff]   ;;  %v1189_v39 = vld [vmem:[%s1836_s3 + $0x68] ss:$24 sps:$4 sm:$0xff]  }
   0xa   :  { %775 = vmatprep.subr.bf16.mxu0 %v1178_v32  ;;  %828 = vmatprep.subr.bf16.mxu1 %v1180_v33  ;;  %v1188_v38 = vld [vmem:[%s1836_s3 + $0x60] ss:$24 sps:$4 sm:$0xff]   ;;  %v1190_v40 = vld [vmem:[%s1836_s3 + $0x94] ss:$24 sps:$4 sm:$0xff]   ;;  %v1194_v42 = vld [vmem:[%s1836_s3 + $0x90] ss:$24 sps:$4 sm:$0xff]  }
   0xb   :  { %52 = vadd.xlane.f32.xlu0 %v51_v25  ;;  %v1192_v41 = vld [vmem:[%s1836_s3 + $0x9c] ss:$24 sps:$4 sm:$0xff]   ;;  %v1195_v43 = vld [vmem:[%s1836_s3 + $0x98] ss:$24 sps:$4 sm:$0xff]   ;;  %v1198_v45 = vld [vmem:[%s1836_s3 + $0xcc] ss:$24 sps:$4 sm:$0xff]  }
   0xc   :  { %829 = vmatpush1.bf16.msra.mxu1 %v1183_v35  ;;  %v1196_v44 = vld [vmem:[%s1836_s3 + $0xc4] ss:$24 sps:$4 sm:$0xff]   ;;  %v1200_v46 = vld [vmem:[%s1836_s3 + $0xc0] ss:$24 sps:$4 sm:$0xff]   ;;  %v1202_v48 = vld [vmem:[%s1836_s3 + $0xf4] ss:$24 sps:$4 sm:$0xff]  }
   0xd   :  { %58 = vadd.xlane.f32.xlu1 %v57_v27  ;;  %776 = vmatpush1.bf16.msra.mxu0 %v1182_v34  ;;  %v1201_v47 = vld [vmem:[%s1836_s3 + $0xc8] ss:$24 sps:$4 sm:$0xff]   ;;  %v1204_v49 = vld [vmem:[%s1836_s3 + $0xfc] ss:$24 sps:$4 sm:$0xff]   ;;  %v1207_v51 = vld [vmem:[%s1836_s3 + $0xf8] ss:$24 sps:$4 sm:$0xff]  }
   0xe   :  { %777 = vmatprep.subr.bf16.mxu0 %v1184_v36  ;;  %830 = vmatprep.subr.bf16.mxu1 %v1186_v37  ;;  %v1206_v50 = vld [vmem:[%s1836_s3 + $0xf0] ss:$24 sps:$4 sm:$0xff]   ;;  %v1208_v52 = vld [vmem:[%s1836_s3 + $0x124] ss:$24 sps:$4 sm:$0xff]   ;;  %v1212_v54 = vld [vmem:[%s1836_s3 + $0x120] ss:$24 sps:$4 sm:$0xff]  }
   0xf   :  { %v1210_v53 = vld [vmem:[%s1836_s3 + $0x12c] ss:$24 sps:$4 sm:$0xff]   ;;  %v1213_v55 = vld [vmem:[%s1836_s3 + $0x128] ss:$24 sps:$4 sm:$0xff]   ;;  %v1216_v57 = vld [vmem:[%s1836_s3 + $0x15c] ss:$24 sps:$4 sm:$0xff]  }
  0x10   :  { %831 = vmatpush1.bf16.msra.mxu1 %v1189_v39  ;;  %v1214_v56 = vld [vmem:[%s1836_s3 + $0x154] ss:$24 sps:$4 sm:$0xff]   ;;  %v1218_v58 = vld [vmem:[%s1836_s3 + $0x150] ss:$24 sps:$4 sm:$0xff]   ;;  %v1220_v60 = vld [vmem:[%s1836_s3 + $0x184] ss:$24 sps:$4 sm:$0xff]  }
  0x11   :  { %778 = vmatpush1.bf16.msra.mxu0 %v1188_v38  ;;  %832 = vmatprep.subr.bf16.mxu1 %v1192_v41  ;;  %v1219_v59 = vld [vmem:[%s1836_s3 + $0x158] ss:$24 sps:$4 sm:$0xff]   ;;  %v1222_v61 = vld [vmem:[%s1836_s3 + $0x18c] ss:$24 sps:$4 sm:$0xff]   ;;  %v1225_v63 = vld [vmem:[%s1836_s3 + $0x188] ss:$24 sps:$4 sm:$0xff]  }
  0x12   :  { %779 = vmatprep.subr.bf16.mxu0 %v1190_v40  ;;  %v1224_v62 = vld [vmem:[%s1836_s3 + $0x180] ss:$24 sps:$4 sm:$0xff]   ;;  %v1226_v0 = vld [vmem:[%s1836_s3 + $0x1b4] ss:$24 sps:$4 sm:$0xff]   ;;  %v1232_v32 = vld [vmem:[%s1836_s3 + $0x1e4] ss:$24 sps:$4 sm:$0xff]  }
  0x13   :  { %v1228_v1 = vld [vmem:[%s1836_s3 + $0x1bc] ss:$24 sps:$4 sm:$0xff]   ;;  %v1231_v31 = vld [vmem:[%s1836_s3 + $0x1b8] ss:$24 sps:$4 sm:$0xff]   ;;  %v1234_v33 = vld [vmem:[%s1836_s3 + $0x1ec] ss:$24 sps:$4 sm:$0xff]  }
  0x14   :  { %833 = vmatpush1.bf16.msra.mxu1 %v1195_v43  ;;  %v1236_v34 = vld [vmem:[%s1836_s3 + $0x1e0] ss:$24 sps:$4 sm:$0xff]   ;;  %v1238_v36 = vld [vmem:[%s1836_s3 + $0x214] ss:$24 sps:$4 sm:$0xff]   ;;  %v1242_v38 = vld [vmem:[%s1836_s3 + $0x210] ss:$24 sps:$4 sm:$0xff]  }
  0x15   :  { %780 = vmatpush1.bf16.msra.mxu0 %v1194_v42  ;;  %834 = vmatprep.subr.bf16.mxu1 %v1198_v45  ;;  %v1237_v35 = vld [vmem:[%s1836_s3 + $0x1e8] ss:$24 sps:$4 sm:$0xff]   ;;  %v1240_v37 = vld [vmem:[%s1836_s3 + $0x21c] ss:$24 sps:$4 sm:$0xff]   ;;  %v1243_v39 = vld [vmem:[%s1836_s3 + $0x218] ss:$24 sps:$4 sm:$0xff]  }
  0x16   :  { %781 = vmatprep.subr.bf16.mxu0 %v1196_v44  ;;  %v1244_v40 = vld [vmem:[%s1836_s3 + $0x244] ss:$24 sps:$4 sm:$0xff]   ;;  %v1248_v42 = vld [vmem:[%s1836_s3 + $0x240] ss:$24 sps:$4 sm:$0xff]   ;;  %v1250_v44 = vld [vmem:[%s1836_s3 + $0x274] ss:$24 sps:$4 sm:$0xff]  }
  0x17   :  { %v1246_v41 = vld [vmem:[%s1836_s3 + $0x24c] ss:$24 sps:$4 sm:$0xff]   ;;  %v1249_v43 = vld [vmem:[%s1836_s3 + $0x248] ss:$24 sps:$4 sm:$0xff]   ;;  %v1252_v45 = vld [vmem:[%s1836_s3 + $0x27c] ss:$24 sps:$4 sm:$0xff]  }
  0x18   :  { %835 = vmatpush1.bf16.msra.mxu1 %v1201_v47  ;;  %v1255_v47 = vld [vmem:[%s1836_s3 + $0x278] ss:$24 sps:$4 sm:$0xff]  }
  0x19   :  { %782 = vmatpush1.bf16.msra.mxu0 %v1200_v46  ;;  %836 = vmatprep.subr.bf16.mxu1 %v1204_v49  ;;  %v1254_v46 = vld [vmem:[%s1836_s3 + $0x270] ss:$24 sps:$4 sm:$0xff]   ;;  %v1258_v49 = vld [vmem:[%s1836_s3 + $0x2ac] ss:$24 sps:$4 sm:$0xff]  }
  0x1a   :  { %783 = vmatprep.subr.bf16.mxu0 %v1202_v48  ;;  %v1256_v48 = vld [vmem:[%s1836_s3 + $0x2a4] ss:$24 sps:$4 sm:$0xff]  }
  0x1c   :  { %837 = vmatpush1.bf16.msra.mxu1 %v1207_v51  ;;  %v1261_v51 = vld [vmem:[%s1836_s3 + $0x2a8] ss:$24 sps:$4 sm:$0xff]  }
  0x1d   :  { %784 = vmatpush1.bf16.msra.mxu0 %v1206_v50  ;;  %838 = vmatprep.subr.bf16.mxu1 %v1210_v53  ;;  %v1260_v50 = vld [vmem:[%s1836_s3 + $0x2a0] ss:$24 sps:$4 sm:$0xff]   ;;  %v1264_v53 = vld [vmem:[%s1836_s3 + $0x2dc] ss:$24 sps:$4 sm:$0xff]  }
  0x1e   :  { %785 = vmatprep.subr.bf16.mxu0 %v1208_v52  ;;  %v1262_v52 = vld [vmem:[%s1836_s3 + $0x2d4] ss:$24 sps:$4 sm:$0xff]  }
  0x20   :  { %839 = vmatpush1.bf16.msra.mxu1 %v1213_v55  ;;  %v1267_v55 = vld [vmem:[%s1836_s3 + $0x2d8] ss:$24 sps:$4 sm:$0xff]  }
  0x21   :  { %786 = vmatpush1.bf16.msra.mxu0 %v1212_v54  ;;  %840 = vmatprep.subr.bf16.mxu1 %v1216_v57  ;;  %v1266_v54 = vld [vmem:[%s1836_s3 + $0x2d0] ss:$24 sps:$4 sm:$0xff]  }
  0x22   :  { %787 = vmatprep.subr.bf16.mxu0 %v1214_v56  ;;  %v1270_v56 = vld [vmem:[%s1836_s3 + $0x14] ss:$24 sps:$4 sm:$0xff]  }
  0x24   :  { %841 = vmatpush1.bf16.msra.mxu1 %v1219_v59 }
  0x25   :  { %788 = vmatpush1.bf16.msra.mxu0 %v1218_v58  ;;  %842 = vmatprep.subr.bf16.mxu1 %v1222_v61 }
  0x26   :  { %789 = vmatprep.subr.bf16.mxu0 %v1220_v60  ;;  %v115_v60 = vlaneseq }
  0x28   :  { %843 = vmatpush1.bf16.msra.mxu1 %v1225_v63 }
  0x29   :  { %790 = vmatpush1.bf16.msra.mxu0 %v1224_v62  ;;  %844 = vmatprep.subr.bf16.mxu1 %v1228_v1 }
  0x2a   :  { %791 = vmatprep.subr.bf16.mxu0 %v1226_v0 }
  0x2c   :  { %845 = vmatpush1.bf16.msra.mxu1 %v1231_v31 }
  0x2d   :  { %846 = vmatprep.subr.bf16.mxu1 %v1234_v33 }
  0x30   :  { %847 = vmatpush1.bf16.msra.mxu1 %v1237_v35 }
  0x31   :  { %848 = vmatprep.subr.bf16.mxu1 %v1240_v37 }
  0x34   :  { %849 = vmatpush1.bf16.msra.mxu1 %v1243_v39 }
  0x35   :  { %850 = vmatprep.subr.bf16.mxu1 %v1246_v41 }
  0x38   :  { %851 = vmatpush1.bf16.msra.mxu1 %v1249_v43  ;;  %v1273_v43 = vld [vmem:[%s1836_s3 + $0x44] ss:$24 sps:$4 sm:$0xff]  }
  0x39   :  { %852 = vmatprep.subr.bf16.mxu1 %v1252_v45 }
  0x3c   :  { %853 = vmatpush1.bf16.msra.mxu1 %v1255_v47  ;;  %v1276_v47 = vld [vmem:[%s1836_s3 + $0x74] ss:$24 sps:$4 sm:$0xff]  }
  0x3d   :  { %854 = vmatprep.subr.bf16.mxu1 %v1258_v49 }
  0x40   :  { %855 = vmatpush1.bf16.msra.mxu1 %v1261_v51 }
  0x41   :  { %856 = vmatprep.subr.bf16.mxu1 %v1264_v53  ;;  %v1277_v53 = vld [vmem:[%s1836_s3 + $0xa0] ss:$24 sps:$4 sm:$0xff]  }
  0x44   :  { %857 = vmatpush1.bf16.msra.mxu1 %v1267_v55  ;;  %v1280_v55 = vld [vmem:[%s1836_s3 + $0xd0] ss:$24 sps:$4 sm:$0xff]  }
  0x45   :  { %1140 = vmatprep.subr.bf16.mxu1 %v1270_v56 }
  0x94   :  { %v50_v2 = vpop.xlane.xlu0 %49 }
  0x95   :  { %v61_v3 = vmul.f32 0.00390625, %v50_v2 }
  0x96   :  { %v56_v5 = vpop.xlane.xlu1 %55 }
  0x97   :  { %v63_v6 = vmul.f32 0.00390625, %v56_v5  ;;  %v1541_v8 = vsub.f32 %v1366_v4, %v61_v3  ;;  %v1544_v9 = vsub.f32 %v1374_v7, %v61_v3  ;;  %v1661_v3 = vshrl.u32 %v115_v60, 7  ;;  %v1291_v60 = vld [vmem:[%s1836_s3 + $0x164] ss:$24 sps:$4 sm:$0xff]  }
  0x98   :  { %v53_v14 = vpop.xlane.xlu0 %52 }
  0x99   :  { %v1547_v10 = vsub.f32 %v1385_v11, %v63_v6  ;;  %v1550_v13 = vsub.f32 %v1387_v12, %v63_v6  ;;  %v62_v15 = vmul.f32 0.00390625, %v53_v14  ;;  %v73_v19 = vmul.f32 %v1541_v8, %v1541_v8 }
  0x9a   :  { %v59_v16 = vpop.xlane.xlu1 %58  ;;  %v74_v20 = vmul.f32 %v1544_v9, %v1544_v9 }
  0x9b   :  { %v64_v4 = vmul.f32 0.00390625, %v59_v16  ;;  %v77_v7 = vmul.f32 %v1547_v10, %v1547_v10  ;;  %v78_v11 = vmul.f32 %v1550_v13, %v1550_v13  ;;  %v1561_v21 = vsub.f32 %v1400_v17, %v62_v15 }
  0x9c   :  { %v1564_v12 = vsub.f32 %v1402_v18, %v62_v15  ;;  %v81_v22 = vadd.f32 %v74_v20, %v73_v19  ;;  %v1664_v15 = vsub.s32 1, %v1661_v3  ;;  %v1667_v16 = vsub.s32 0, %v1661_v3  ;;  %v113_v19 = vld [vmem:[%s1837_s1] sm:$0x3] }
  0x9d   :  { %v1567_v23 = vsub.f32 %v1418_v24, %v64_v4  ;;  %v1570_v25 = vsub.f32 %v1422_v26, %v64_v4  ;;  %v87_v27 = vadd.f32 %v78_v11, %v77_v7  ;;  %v75_v28 = vmul.f32 %v1561_v21, %v1561_v21  ;;  %v1230_v26 = vld [vmem:[%s1836_s3 + $0x1b0] ss:$24 sps:$4 sm:$0xff]  }
  0x9e   :  { %82 = vadd.xlane.f32.xlu0 %v81_v22  ;;  %v76_v29 = vmul.f32 %v1564_v12, %v1564_v12  ;;  %792 = vmatpush1.bf16.msra.mxu0 %v1230_v26  ;;  %v122_v4 = vrot.slane %v113_v19, %v1664_v15  ;;  %v118_v7 = vrot.slane %v113_v19, %v1667_v16  ;;  %v133_v22 = vld [vmem:[%s1838_s2] sm:$0x3]  ;;  %v1306_v19 = vld [vmem:[%s1836_s3 + $0x254] ss:$24 sps:$4 sm:$0xff]  }
  0x9f   :  { %v79_v17 = vmul.f32 %v1567_v23, %v1567_v23  ;;  %v80_v18 = vmul.f32 %v1570_v25, %v1570_v25  ;;  %793 = vmatprep.subr.bf16.mxu0 %v1232_v32 }
  0xa0   :  { %v84_v30 = vadd.f32 %v76_v29, %v75_v28 }
  0xa1   :  { %v90_v24 = vadd.f32 %v80_v18, %v79_v17  ;;  %v142_v17 = vrot.slane %v133_v22, %v1664_v15 }
  0xa2   :  { %88 = vadd.xlane.f32.xlu0 %v87_v27  ;;  %85 = vadd.xlane.f32.xlu1 %v84_v30  ;;  %v138_v30 = vrot.slane %v133_v22, %v1667_v16  ;;  %v1310_v22 = vld [vmem:[%s1836_s3 + $0x2b0] ss:$24 sps:$4 sm:$0xff]  }
  0xa3   :  { %794 = vmatpush1.bf16.msra.mxu0 %v1236_v34 }
  0xa4   :  { %795 = vmatprep.subr.bf16.mxu0 %v1238_v36 }
  0xa6   :  { %91 = vadd.xlane.f32.xlu1 %v90_v24 }
  0xa7   :  { %796 = vmatpush1.bf16.msra.mxu0 %v1242_v38 }
  0xa8   :  { %797 = vmatprep.subr.bf16.mxu0 %v1244_v40 }
  0xab   :  { %798 = vmatpush1.bf16.msra.mxu0 %v1248_v42 }
  0xac   :  { %799 = vmatprep.subr.bf16.mxu0 %v1250_v44 }
  0xaf   :  { %800 = vmatpush1.bf16.msra.mxu0 %v1254_v46  ;;  %v1271_v46 = vld [vmem:[%s1836_s3 + $0x40] ss:$24 sps:$4 sm:$0xff]  }
  0xb0   :  { %801 = vmatprep.subr.bf16.mxu0 %v1256_v48 }
  0xb3   :  { %802 = vmatpush1.bf16.msra.mxu0 %v1260_v50  ;;  %v1274_v50 = vld [vmem:[%s1836_s3 + $0x70] ss:$24 sps:$4 sm:$0xff]  }
  0xb4   :  { %803 = vmatprep.subr.bf16.mxu0 %v1262_v52  ;;  %v1279_v52 = vld [vmem:[%s1836_s3 + $0xa4] ss:$24 sps:$4 sm:$0xff]  }
  0xb7   :  { %804 = vmatpush1.bf16.msra.mxu0 %v1266_v54  ;;  %v1282_v54 = vld [vmem:[%s1836_s3 + $0xd4] ss:$24 sps:$4 sm:$0xff]  }
  0xb8   :  { %879 = vmatprep.subr.bf16.mxu0 %v1270_v56  ;;  %v1285_v56 = vld [vmem:[%s1836_s3 + $0x104] ss:$24 sps:$4 sm:$0xff]  }
 0x12b   :  { %v83_v57 = vpop.xlane.xlu0 %82 }
 0x12c   :  { %v93_v58 = vmul.f32 0.00390625, %v83_v57  ;;  %v1283_v57 = vld [vmem:[%s1836_s3 + $0x100] ss:$24 sps:$4 sm:$0xff]  }
 0x12e   :  { %v97_v59 = vadd.f32 1e-05, %v93_v58  ;;  %v1288_v58 = vld [vmem:[%s1836_s3 + $0x134] ss:$24 sps:$4 sm:$0xff]  }
 0x12f   :  { %v86_v61 = vpop.xlane.xlu1 %85  ;;  %v89_v62 = vpop.xlane.xlu0 %88 }
 0x130   :  { %1316 = vrsqrt.f32 %v97_v59  ;;  %v94_v63 = vmul.f32 0.00390625, %v86_v61  ;;  %v95_v0 = vmul.f32 0.00390625, %v89_v62  ;;  %v1286_v59 = vld [vmem:[%s1836_s3 + $0x130] ss:$24 sps:$4 sm:$0xff]   ;;  %v1289_v61 = vld [vmem:[%s1836_s3 + $0x160] ss:$24 sps:$4 sm:$0xff]  }
 0x131   :  { %v1294_v62 = vld [vmem:[%s1836_s3 + $0x194] ss:$24 sps:$4 sm:$0xff]  }
 0x132   :  { %v98_v1 = vadd.f32 1e-05, %v94_v63  ;;  %v99_v2 = vadd.f32 1e-05, %v95_v0  ;;  %v1292_v63 = vld [vmem:[%s1836_s3 + $0x190] ss:$24 sps:$4 sm:$0xff]  }
 0x133   :  { %v92_v5 = vpop.xlane.xlu1 %91  ;;  %v1297_v0 = vld [vmem:[%s1836_s3 + $0x1c4] ss:$24 sps:$4 sm:$0xff]  }
 0x134   :  { %1318 = vrsqrt.f32 %v98_v1  ;;  %v96_v6 = vmul.f32 0.00390625, %v92_v5  ;;  %v1295_v1 = vld [vmem:[%s1836_s3 + $0x1c0] ss:$24 sps:$4 sm:$0xff]   ;;  %v1298_v5 = vld [vmem:[%s1836_s3 + $0x1f0] ss:$24 sps:$4 sm:$0xff]  }
 0x135   :  { %1320 = vrsqrt.f32 %v99_v2  ;;  %v1300_v2 = vld [vmem:[%s1836_s3 + $0x1f4] ss:$24 sps:$4 sm:$0xff]  }
 0x136   :  { %v100_v14 = vadd.f32 1e-05, %v96_v6  ;;  %v1303_v6 = vld [vmem:[%s1836_s3 + $0x224] ss:$24 sps:$4 sm:$0xff]  }
 0x138   :  { %1322 = vrsqrt.f32 %v100_v14  ;;  %v1301_v14 = vld [vmem:[%s1836_s3 + $0x220] ss:$24 sps:$4 sm:$0xff]  }
 0x13a   :  { %v1317_v20 = vpop.eup %1316 }
 0x13b   :  { %v106_v11 = vmul.f32 %v1317_v20, %v1544_v9  ;;  %v105_v27 = vmul.f32 %v1317_v20, %v1541_v8  ;;  %v1304_v20 = vld [vmem:[%s1836_s3 + $0x250] ss:$24 sps:$4 sm:$0xff]  }
 0x13d   :  { %v126_v29 = vmul.f32 %v122_v4, %v106_v11  ;;  %v125_v18 = vmul.f32 %v118_v7, %v105_v27  ;;  %v1312_v11 = vld [vmem:[%s1836_s3 + $0x2b4] ss:$24 sps:$4 sm:$0xff]   ;;  %v1315_v27 = vld [vmem:[%s1836_s3 + $0x2e4] ss:$24 sps:$4 sm:$0xff]  }
 0x13e   :  { %v1319_v28 = vpop.eup %1318 }
 0x13f   :  { %v1321_v24 = vpop.eup %1320  ;;  %v108_v26 = vmul.f32 %v1319_v28, %v1564_v12  ;;  %v107_v31 = vmul.f32 %v1319_v28, %v1561_v21  ;;  %v146_v35 = vadd.f32 %v142_v17, %v126_v29  ;;  %v145_v36 = vadd.f32 %v138_v30, %v125_v18  ;;  %v1268_v21 = vld [vmem:[%s1836_s3 + $0x10] ss:$24 sps:$4 sm:$0xff]   ;;  %v1313_v28 = vld [vmem:[%s1836_s3 + $0x2e0] ss:$24 sps:$4 sm:$0xff]  }
 0x140   :  { %v110_v9 = vmul.f32 %v1321_v24, %v1550_v13  ;;  %v109_v41 = vmul.f32 %v1321_v24, %v1547_v10  ;;  %v273_v29 = vsub.s32 2, %v1661_v3  ;;  %v277_v18 = vsub.s32 3, %v1661_v3 }
 0x141   :  { %v128_v32 = vmul.f32 %v122_v4, %v108_v26  ;;  %v127_v33 = vmul.f32 %v118_v7, %v107_v31 }
 0x142   :  { %v1323_v34 = vpop.eup %1322  ;;  %v130_v8 = vmul.f32 %v122_v4, %v110_v9  ;;  %v129_v10 = vmul.f32 %v118_v7, %v109_v41 }
 0x143   :  { %v148_v37 = vadd.f32 %v142_v17, %v128_v32  ;;  %v147_v38 = vadd.f32 %v138_v30, %v127_v33  ;;  %v112_v39 = vmul.f32 %v1323_v34, %v1570_v25  ;;  %v111_v40 = vmul.f32 %v1323_v34, %v1567_v23 }
 0x144   :  { %v150_v25 = vadd.f32 %v142_v17, %v130_v8  ;;  %v149_v49 = vadd.f32 %v138_v30, %v129_v10 }
 0x145   :  { %v154_v42 = vpack.c.bf16 %v148_v37, %v146_v35  ;;  %v1690_v13 = vpack.c.bf16 %v147_v38, %v145_v36  ;;  %v132_v12 = vmul.f32 %v122_v4, %v112_v39  ;;  %v131_v44 = vmul.f32 %v118_v7, %v111_v40  ;;  %v1309_v4 = vld [vmem:[%s1836_s3 + $0x284] ss:$24 sps:$4 sm:$0xff]   ;;  %v1307_v7 = vld [vmem:[%s1836_s3 + $0x280] ss:$24 sps:$4 sm:$0xff]  }
 0x147   :  { %805 = vmatprep.mubr.bf16.mxu0 %v154_v42  ;;  %858 = vmatprep.mubr.bf16.mxu1 %v154_v42  ;;  %v152_v45 = vadd.f32 %v142_v17, %v132_v12  ;;  %v151_v48 = vadd.f32 %v138_v30, %v131_v44  ;;  %v261_v17 = vld [vmem:[%s1839_s4] sm:$0x3f] }
 0x148   :  { %806 = vmatmul.mubr.bf16.vlgmr.msra.gmra.mrb[0].mxu0 %v1690_v13  ;;  %859 = vmatmul.mubr.bf16.vlgmr.msra.gmra.mrb[0].mxu1 %v1690_v13  ;;  %v266_v30 = vrot.slane %v261_v17, %v1667_v16  ;;  %v274_v24 = vrot.slane %v261_v17, %v273_v29  ;;  %v270_v26 = vrot.slane %v261_v17, %v1664_v15 }
 0x149   :  { %880 = vmatpush1.bf16.msra.mxu0 %v1268_v21  ;;  %1156 = vmatpush1.bf16.msra.mxu1 %v1268_v21  ;;  %v156_v23 = vpack.c.bf16 %v152_v45, %v150_v25  ;;  %v1706_v51 = vpack.c.bf16 %v151_v48, %v149_v49  ;;  %v278_v31 = vrot.slane %v261_v17, %v277_v18 }
 0x14a   :  { %881 = vmatprep.subr.bf16.mxu0 %v1273_v43  ;;  %1141 = vmatprep.subr.bf16.mxu1 %v1273_v43 }
 0x14b   :  { %815 = vmatprep.mubr.bf16.mxu0 %v156_v23  ;;  %868 = vmatprep.mubr.bf16.mxu1 %v156_v23 }
 0x14d   :  { %882 = vmatpush1.bf16.msra.mxu0 %v1271_v46  ;;  %1157 = vmatpush1.bf16.msra.mxu1 %v1271_v46 }
 0x14e   :  { %883 = vmatprep.subr.bf16.mxu0 %v1276_v47  ;;  %1142 = vmatprep.subr.bf16.mxu1 %v1276_v47 }
 0x150   :  { %816 = vmatmul.mubr.bf16.gmra.mrb[4].mxu0 %v1706_v51  ;;  %869 = vmatmul.mubr.bf16.gmra.mrb[4].mxu1 %v1706_v51 }
 0x151   :  { %884 = vmatpush1.bf16.msra.mxu0 %v1274_v50  ;;  %1158 = vmatpush1.bf16.msra.mxu1 %v1274_v50 }
 0x152   :  { %911 = vmatprep.mubr.bf16.mxu0 %v154_v42  ;;  %921 = vmatprep.mubr.bf16.mxu1 %v156_v23 }
 0x153   :  { %885 = vmatprep.subr.bf16.mxu0 %v1279_v52  ;;  %1143 = vmatprep.subr.bf16.mxu1 %v1279_v52 }
 0x155   :  { %886 = vmatpush1.bf16.msra.mxu0 %v1277_v53  ;;  %1159 = vmatpush1.bf16.msra.mxu1 %v1277_v53 }
 0x156   :  { %887 = vmatprep.subr.bf16.mxu0 %v1282_v54  ;;  %1144 = vmatprep.subr.bf16.mxu1 %v1282_v54 }
 0x159   :  { %888 = vmatpush1.bf16.msra.mxu0 %v1280_v55  ;;  %1160 = vmatpush1.bf16.msra.mxu1 %v1280_v55 }
 0x15a   :  { %889 = vmatprep.subr.bf16.mxu0 %v1285_v56  ;;  %1145 = vmatprep.subr.bf16.mxu1 %v1285_v56 }
 0x15d   :  { %890 = vmatpush1.bf16.msra.mxu0 %v1283_v57  ;;  %1161 = vmatpush1.bf16.msra.mxu1 %v1283_v57 }
 0x15e   :  { %891 = vmatprep.subr.bf16.mxu0 %v1288_v58  ;;  %1146 = vmatprep.subr.bf16.mxu1 %v1288_v58 }
 0x161   :  { %892 = vmatpush1.bf16.msra.mxu0 %v1286_v59  ;;  %1162 = vmatpush1.bf16.msra.mxu1 %v1286_v59 }
 0x162   :  { %893 = vmatprep.subr.bf16.mxu0 %v1291_v60  ;;  %1147 = vmatprep.subr.bf16.mxu1 %v1291_v60 }
 0x165   :  { %894 = vmatpush1.bf16.msra.mxu0 %v1289_v61  ;;  %1163 = vmatpush1.bf16.msra.mxu1 %v1289_v61 }
 0x166   :  { %895 = vmatprep.subr.bf16.mxu0 %v1294_v62  ;;  %1148 = vmatprep.subr.bf16.mxu1 %v1294_v62  ;;  %v281_v62 = vsub.s32 4, %v1661_v3 }
 0x169   :  { %896 = vmatpush1.bf16.msra.mxu0 %v1292_v63  ;;  %1164 = vmatpush1.bf16.msra.mxu1 %v1292_v63  ;;  %v285_v63 = vsub.s32 5, %v1661_v3 }
 0x16a   :  { %897 = vmatprep.subr.bf16.mxu0 %v1297_v0  ;;  %1149 = vmatprep.subr.bf16.mxu1 %v1297_v0  ;;  %v282_v0 = vrot.slane %v261_v17, %v281_v62 }
 0x16d   :  { %898 = vmatpush1.bf16.msra.mxu0 %v1295_v1  ;;  %1165 = vmatpush1.bf16.msra.mxu1 %v1295_v1  ;;  %v286_v1 = vrot.slane %v261_v17, %v285_v63 }
 0x16e   :  { %899 = vmatprep.subr.bf16.mxu0 %v1300_v2  ;;  %1150 = vmatprep.subr.bf16.mxu1 %v1300_v2 }
 0x171   :  { %900 = vmatpush1.bf16.msra.mxu0 %v1298_v5  ;;  %1166 = vmatpush1.bf16.msra.mxu1 %v1298_v5 }
 0x172   :  { %901 = vmatprep.subr.bf16.mxu0 %v1303_v6  ;;  %1151 = vmatprep.subr.bf16.mxu1 %v1303_v6 }
 0x175   :  { %902 = vmatpush1.bf16.msra.mxu0 %v1301_v14  ;;  %1167 = vmatpush1.bf16.msra.mxu1 %v1301_v14 }
 0x176   :  { %903 = vmatprep.subr.bf16.mxu0 %v1306_v19  ;;  %1152 = vmatprep.subr.bf16.mxu1 %v1306_v19 }
 0x179   :  { %904 = vmatpush1.bf16.msra.mxu0 %v1304_v20  ;;  %1168 = vmatpush1.bf16.msra.mxu1 %v1304_v20 }
 0x17a   :  { %905 = vmatprep.subr.bf16.mxu0 %v1309_v4  ;;  %1153 = vmatprep.subr.bf16.mxu1 %v1309_v4 }
 0x17d   :  { %906 = vmatpush1.bf16.msra.mxu0 %v1307_v7  ;;  %1169 = vmatpush1.bf16.msra.mxu1 %v1307_v7 }
 0x17e   :  { %907 = vmatprep.subr.bf16.mxu0 %v1312_v11  ;;  %1154 = vmatprep.subr.bf16.mxu1 %v1312_v11 }
 0x181   :  { %908 = vmatpush1.bf16.msra.mxu0 %v1310_v22  ;;  %1170 = vmatpush1.bf16.msra.mxu1 %v1310_v22 }
 0x182   :  { %909 = vmatprep.subr.bf16.mxu0 %v1315_v27  ;;  %1155 = vmatprep.subr.bf16.mxu1 %v1315_v27 }
 0x185   :  { %910 = vmatpush1.bf16.msra.mxu0 %v1313_v28  ;;  %1171 = vmatpush1.bf16.msra.mxu1 %v1313_v28 }
 0x188   :  { %912 = vmatmul.mubr.bf16.vlgmr.msra.gmra.mrb[8].mxu0 %v1690_v13  ;;  %922 = vmatmul.mubr.bf16.vlgmr.msra.gmra.mrb[8].mxu1 %v1706_v51 }
 0x21b   :  { %v807_v9 = vpop.f32.mrb[0].mxu0  ;;  %v860_v32 = vpop.f32.mrb[0].mxu1 }
 0x21c   :  { %v808_v33 = vadd.f32 %v807_v9, %v266_v30  ;;  %v861_v34 = vadd.f32 %v860_v32, %v274_v24  ;;  %v809_v35 = vpop.f32.mrb[1].mxu0  ;;  %v862_v36 = vpop.f32.mrb[1].mxu1 }
 0x21d   :  { %v810_v8 = vadd.f32 %v809_v35, %v270_v26  ;;  %v863_v37 = vadd.f32 %v862_v36, %v278_v31  ;;  %v811_v38 = vpop.f32.mrb[2].mxu0  ;;  %v864_v39 = vpop.f32.mrb[2].mxu1 }
 0x21e   :  { %v812_v40 = vadd.f32 %v811_v38, %v266_v30  ;;  %v865_v41 = vadd.f32 %v864_v39, %v274_v24  ;;  %v813_v42 = vpop.f32.mrb[3].mxu0  ;;  %v866_v21 = vpop.f32.mrb[3].mxu1 }
 0x21f   :  { %v1128_v13 = vpack.c.bf16 %v810_v8, %v808_v33  ;;  %v1129_v16 = vpack.c.bf16 %v863_v37, %v861_v34  ;;  %v814_v12 = vadd.f32 %v813_v42, %v270_v26  ;;  %v867_v43 = vadd.f32 %v866_v21, %v278_v31 }
 0x221   :  { %1004 = vst [vmem:[%s1840_s5] sm:$0xff] %v1128_v13  ;;  %1005 = vst [vmem:[%s1840_s5 + $0x8] sm:$0xff] %v1129_v16  ;;  %v1131_v15 = vpack.c.bf16 %v814_v12, %v812_v40  ;;  %v1132_v44 = vpack.c.bf16 %v867_v43, %v865_v41 }
 0x223   :  { %1007 = vst [vmem:[%s1840_s5 + $0x18] sm:$0xff] %v1131_v15  ;;  %1008 = vst [vmem:[%s1840_s5 + $0x20] sm:$0xff] %v1132_v44  ;;  %v817_v25 = vpop.f32.mrb[4].mxu0  ;;  %v870_v45 = vpop.f32.mrb[4].mxu1 }
 0x224   :  { %v818_v10 = vadd.f32 %v817_v25, %v266_v30  ;;  %v871_v23 = vadd.f32 %v870_v45, %v274_v24  ;;  %v819_v46 = vpop.f32.mrb[5].mxu0  ;;  %v872_v47 = vpop.f32.mrb[5].mxu1 }
 0x225   :  { %v820_v48 = vadd.f32 %v819_v46, %v270_v26  ;;  %v873_v49 = vadd.f32 %v872_v47, %v278_v31  ;;  %v821_v50 = vpop.f32.mrb[6].mxu0  ;;  %v874_v51 = vpop.f32.mrb[6].mxu1 }
 0x226   :  { %v822_v52 = vadd.f32 %v821_v50, %v266_v30  ;;  %v875_v53 = vadd.f32 %v874_v51, %v274_v24  ;;  %v823_v54 = vpop.f32.mrb[7].mxu0  ;;  %v876_v55 = vpop.f32.mrb[7].mxu1 }
 0x227   :  { %v1134_v56 = vpack.c.bf16 %v820_v48, %v818_v10  ;;  %v1135_v57 = vpack.c.bf16 %v873_v49, %v871_v23  ;;  %v824_v58 = vadd.f32 %v823_v54, %v270_v26  ;;  %v877_v59 = vadd.f32 %v876_v55, %v278_v31 }
 0x229   :  { %1010 = vst [vmem:[%s1840_s5 + $0x30] sm:$0xff] %v1134_v56  ;;  %1011 = vst [vmem:[%s1840_s5 + $0x38] sm:$0xff] %v1135_v57  ;;  %v1137_v60 = vpack.c.bf16 %v824_v58, %v822_v52  ;;  %v1138_v61 = vpack.c.bf16 %v877_v59, %v875_v53 }
 0x22b   :  { %1013 = vst [vmem:[%s1840_s5 + $0x48] sm:$0xff] %v1137_v60  ;;  %1014 = vst [vmem:[%s1840_s5 + $0x50] sm:$0xff] %v1138_v61 }
 0x25b   :  { %v913_v2 = vpop.f32.mrb[8].mxu0  ;;  %v923_v5 = vpop.f32.mrb[8].mxu1 }
 0x25c   :  { %v914_v6 = vadd.f32 %v913_v2, %v282_v0  ;;  %v924_v14 = vadd.f32 %v923_v5, %v282_v0  ;;  %v915_v19 = vpop.f32.mrb[9].mxu0  ;;  %v925_v20 = vpop.f32.mrb[9].mxu1 }
 0x25d   :  { %v916_v4 = vadd.f32 %v915_v19, %v286_v1  ;;  %v926_v7 = vadd.f32 %v925_v20, %v286_v1  ;;  %v917_v11 = vpop.f32.mrb[10].mxu0  ;;  %v927_v22 = vpop.f32.mrb[10].mxu1 }
 0x25e   :  { %v918_v27 = vadd.f32 %v917_v11, %v282_v0  ;;  %v928_v28 = vadd.f32 %v927_v22, %v282_v0  ;;  %v919_v29 = vpop.f32.mrb[11].mxu0  ;;  %v929_v18 = vpop.f32.mrb[11].mxu1 }
 0x25f   :  { %v1130_v30 = vpack.c.bf16 %v916_v4, %v914_v6  ;;  %v1136_v24 = vpack.c.bf16 %v926_v7, %v924_v14  ;;  %v920_v26 = vadd.f32 %v919_v29, %v286_v1  ;;  %v930_v3 = vadd.f32 %v929_v18, %v286_v1 }
 0x261   :  { %1006 = vst [vmem:[%s1840_s5 + $0x10] sm:$0xff] %v1130_v30  ;;  %1012 = vst [vmem:[%s1840_s5 + $0x40] sm:$0xff] %v1136_v24  ;;  %v1133_v17 = vpack.c.bf16 %v920_v26, %v918_v27  ;;  %v1139_v31 = vpack.c.bf16 %v930_v3, %v928_v28 }
 0x263   :  { %1009 = vst [vmem:[%s1840_s5 + $0x28] sm:$0xff] %v1133_v17  ;;  %1015 = vst [vmem:[%s1840_s5 + $0x58] sm:$0xff] %v1139_v31 }

</bundles_post_ra>
